<compile_context>
chip_gen: v5e
topology: v5e:2x2
jax: 0.10.0
libtpu: 0.0.40
codegen_flags: <defaults>
</compile_context>

<pallas_src>
import functools

import jax
import jax.numpy as jnp
from jax.experimental import pallas as pl
from jax.experimental.pallas import tpu as pltpu

BLOCKS = (1, 1, 1, 1)    # ResNet-152: (3, 8, 36, 3)
BASE_WIDTH = 16          # ResNet-152: 64
EXPANSION = 4            # bottleneck expansion
LANES = 128              # persistent channel padding (lane-dense outputs)


def _pad_ch(c):
    return ((c + LANES - 1) // LANES) * LANES


def _cparams(grid_rank):
    return pltpu.CompilerParams(
        dimension_semantics=("parallel",) * grid_rank,
        vmem_limit_bytes=32 * 1024 * 1024,   # safe everywhere; raise on v6e
    )


def _pick_tm(m):
    """Largest row tile <= 512 that divides M (multiple of 8), else whole M."""
    for tm in (512, 256, 128, 64, 32, 16, 8):
        if m % tm == 0:
            return tm
    return m


# ----------------------------------------------------------------------------
# Static architecture description (Python ints only -> no tracer leaks)
# ----------------------------------------------------------------------------
def _make_arch():
    stem = dict(kh=7, kw=7, cin=3, cout=BASE_WIDTH, stride=2, pad=3)
    stages = []
    cin = BASE_WIDTH
    for s, nblocks in enumerate(BLOCKS):
        width = BASE_WIDTH * (2 ** s)
        stage = []
        for b in range(nblocks):
            stride = (1 if s == 0 else 2) if b == 0 else 1
            stage.append(dict(cin=cin, width=width, stride=stride,
                              down=(stride != 1 or cin != width * EXPANSION)))
            cin = width * EXPANSION
        stages.append(tuple(stage))
    return dict(stem=stem, stages=tuple(stages), feat_dim=cin)


ARCH = _make_arch()


# ----------------------------------------------------------------------------
# Pallas kernels
# ----------------------------------------------------------------------------
def _matmul_bn_kernel(*refs, relu, has_res):
    """(TM, K) x (K, Cout) on the MXU (bf16 in, f32 acc) + folded-BN
    scale/bias epilogue (+ fused residual add) (+ ReLU)."""
    if has_res:
        x_ref, w_ref, s_ref, b_ref, res_ref, o_ref = refs
    else:
        x_ref, w_ref, s_ref, b_ref, o_ref = refs
    out = jnp.dot(x_ref[...], w_ref[...], preferred_element_type=jnp.float32)
    out = out * s_ref[...] + b_ref[...]
    if has_res:
        out = out + res_ref[...].astype(jnp.float32)
    if relu:
        out = jnp.maximum(out, 0.0)
    o_ref[...] = out.astype(o_ref.dtype)


def _conv_bn_rows_kernel(x_ref, w_ref, s_ref, b_ref, o_ref, acc_ref, *,
                         kh, stride, Ho, Wo, Hq, relu):
    """General 3x3 conv: horizontal taps are pre-folded into K by the wrapper;
    the kh vertical taps are accumulated here into an f32 VMEM scratch
    (acc_ref[...] += dot -> MRB accumulate on v7x).  Input arrives as flat
    (stride*Hq*Wo, K) rows so every tap slice is a contiguous, sublane-aligned
    2-D row slice.  One grid step == one image."""
    rows = Ho * Wo
    for i in range(kh):
        r0 = ((i % stride) * Hq + i // stride) * Wo
        xt = x_ref[r0:r0 + rows, :]
        contrib = jnp.dot(xt, w_ref[i], preferred_element_type=jnp.float32)
        if i == 0:
            acc_ref[...] = contrib
        else:
            acc_ref[...] += contrib
    out = acc_ref[...] * s_ref[...] + b_ref[...]
    if relu:
        out = jnp.maximum(out, 0.0)
    o_ref[...] = out.astype(o_ref.dtype)


def _maxpool_kernel(x_ref, o_ref, *, taps, Ho, Wo, Hq):
    """3x3/s2 max pool as a chain of maximums over shifted slices (pure VPU)."""
    out = None
    for (ph, qi, qj) in taps:
        r0 = ph * Hq + qi
        v = x_ref[r0:r0 + Ho, qj:qj + Wo, :]
        out = v if out is None else jnp.maximum(out, v)
    o_ref[...] = out


def _avgpool_kernel(x_ref, o_ref):
    """Global average pool for one image: (H*W, C) -> (1, C) in f32."""
    o_ref[...] = jnp.mean(x_ref[...].astype(jnp.float32), axis=0, keepdims=True)


# ----------------------------------------------------------------------------
# XLA-side layout helpers (cheap copies only; no padded-channel im2col blowup)
# ----------------------------------------------------------------------------
def _im2col(x, kh, kw, stride, pad, Ho, Wo):
    """Full im2col on UNPADDED channels: (B,H,W,c) -> (B, Ho*Wo, kh*kw*c)."""
    B = x.shape[0]
    c = x.shape[-1]
    if pad:
        x = jnp.pad(x, ((0, 0), (pad, pad), (pad, pad), (0, 0)))
    cols = [x[:, i:i + stride * Ho:stride, j:j + stride * Wo:stride, :]
            .reshape(B, Ho * Wo, c)
            for i in range(kh) for j in range(kw)]
    return jnp.concatenate(cols, axis=-1)


def _rows_decompose(x, kh, kw, stride, pad, Ho, Wo):
    """Horizontal im2col (kw taps folded into channels) + vertical phase split
    so each vertical conv tap is a contiguous block of rows.
    Returns ((B, stride*Hq, Wo, kw*c), Hq)."""
    B = x.shape[0]
    if pad:
        x = jnp.pad(x, ((0, 0), (pad, pad), (pad, pad), (0, 0)))
    cols = [x[:, :, j:j + stride * Wo:stride, :] for j in range(kw)]
    xh = jnp.concatenate(cols, axis=-1)                # (B, Hp, Wo, kw*c)
    Hq = Ho + (kh - 1) // stride
    need = stride * Hq
    Hp = xh.shape[1]
    if need > Hp:
        xh = jnp.pad(xh, ((0, 0), (0, need - Hp), (0, 0), (0, 0)))
    xh = xh[:, :need]
    xh = xh.reshape(B, Hq, stride, Wo, xh.shape[-1]).transpose(0, 2, 1, 3, 4)
    return xh.reshape(B, stride * Hq, Wo, xh.shape[-1]), Hq


def _phase_decompose(x, stride, pad, k, Ho, Wo):
    """Spatially pad and split into stride**2 phase images (maxpool helper)."""
    B, H, W, C = x.shape
    if pad:
        x = jnp.pad(x, ((0, 0), (pad, pad), (pad, pad), (0, 0)))
    if stride == 1:
        return x, x.shape[1], x.shape[2], 1
    qmax = (k - 1) // stride
    Hq, Wq = Ho + qmax, Wo + qmax
    Hneed, Wneed = stride * Hq, stride * Wq
    Hp, Wp = x.shape[1], x.shape[2]
    if Hneed > Hp or Wneed > Wp:
        x = jnp.pad(x, ((0, 0), (0, max(0, Hneed - Hp)),
                        (0, max(0, Wneed - Wp)), (0, 0)))
    x = x[:, :Hneed, :Wneed, :]
    x = x.reshape(B, Hq, stride, Wq, stride, C).transpose(0, 2, 4, 1, 3, 5)
    x = x.reshape(B, stride * stride * Hq, Wq, C)
    return x, Hq, Wq, stride * stride


def _make_taps(k, stride):
    return tuple(((i % stride) * stride + (j % stride), i // stride, j // stride)
                 for i in range(k) for j in range(k))


# ----------------------------------------------------------------------------
# Layer wrappers
# ----------------------------------------------------------------------------
def _flat_conv_bn(x_in, wt, sp, bp, res, *, relu):
    """x_in: (B, M, K) bf16, wt: (K, Cout) bf16, sp/bp: (1, Cout) f32,
    res: (B, M, Cout) bf16 or None -> (B, M, Cout) bf16."""
    B, M, K = x_in.shape
    Cout = wt.shape[-1]
    TM = _pick_tm(M)
    has_res = res is not None
    in_specs = [pl.BlockSpec((None, TM, K), lambda b, m: (b, m, 0)),
                pl.BlockSpec((K, Cout), lambda b, m: (0, 0)),
                pl.BlockSpec((1, Cout), lambda b, m: (0, 0)),
                pl.BlockSpec((1, Cout), lambda b, m: (0, 0))]
    args = [x_in, wt, sp, bp]
    if has_res:
        in_specs.append(pl.BlockSpec((None, TM, Cout), lambda b, m: (b, m, 0)))
        args.append(res)
    return pl.pallas_call(
        functools.partial(_matmul_bn_kernel, relu=relu, has_res=has_res),
        out_shape=jax.ShapeDtypeStruct((B, M, Cout), jnp.bfloat16),
        grid=(B, M // TM),
        in_specs=in_specs,
        out_specs=pl.BlockSpec((None, TM, Cout), lambda b, m: (b, m, 0)),
        compiler_params=_cparams(2),
    )(*args)


def conv2d_bn(x, w, scale, bias, *, cin, stride, pad, relu, residual=None):
    """Conv2d (no bias) + folded inference BN (+ ReLU) (+ fused residual add).

    x: (B, H, W, Cx) bf16 activation; the real channels are x[..., :cin] and
       any padded lanes are exactly zero.
    w: (kh, kw, cin, Cout_p) bf16 (real Cin, lane-padded Cout).
    scale/bias: (Cout_p,) f32, zero in padded lanes.
    Returns (B, Ho, Wo, Cout_p) bf16 with zero padded lanes."""
    B, H, W, Cx = x.shape
    kh, kw, _, Cout = w.shape
    Ho = (H + 2 * pad - kh) // stride + 1
    Wo = (W + 2 * pad - kw) // stride + 1
    M = Ho * Wo
    sp = scale.reshape(1, Cout)
    bp = bias.reshape(1, Cout)
    res = None if residual is None else residual.reshape(B, M, Cout)

    if kh == 1 and kw == 1:
        # 1x1 conv: plain matmul over the already lane-padded channels.
        xs = x[:, ::stride, ::stride, :] if stride > 1 else x
        x_in = xs.reshape(B, M, Cx)
        wt = jnp.zeros((Cx, Cout), w.dtype).at[:cin].set(w.reshape(cin, Cout))
        out = _flat_conv_bn(x_in, wt, sp, bp, res, relu=relu)
        return out.reshape(B, Ho, Wo, Cout)

    K_real = kh * kw * cin
    K_full = _pad_ch(K_real)
    K_rows = _pad_ch(kw * cin)

    if Wo % 8 != 0 or K_full <= 2 * K_rows:
        # Small-K / small-Wo layers (the 7x7 stem, early 3x3s, tiny late
        # layers): full im2col on UNPADDED channels, K padded once to a lane
        # multiple (stem: 49*3 = 147 -> 256) and a single MXU matmul.
        cols = _im2col(x[..., :cin], kh, kw, stride, pad, Ho, Wo)
        x_in = jnp.pad(cols, ((0, 0), (0, 0), (0, K_full - K_real)))
        wt = jnp.zeros((K_full, Cout), w.dtype).at[:K_real].set(
            w.reshape(K_real, Cout))
        out = _flat_conv_bn(x_in, wt, sp, bp, res, relu=relu)
        return out.reshape(B, Ho, Wo, Cout)

    # General 3x3 path: kw horizontal taps folded into K (K >= 256 at real
    # ResNet widths), kh vertical taps accumulated in-kernel (f32 scratch).
    assert residual is None
    xh, Hq = _rows_decompose(x[..., :cin], kh, kw, stride, pad, Ho, Wo)
    xh = jnp.pad(xh, ((0, 0), (0, 0), (0, 0), (0, K_rows - kw * cin)))
    x_in = xh.reshape(B, stride * Hq * Wo, K_rows)
    wt = jnp.zeros((kh, K_rows, Cout), w.dtype).at[:, :kw * cin].set(
        w.reshape(kh, kw * cin, Cout))
    out = pl.pallas_call(
        functools.partial(_conv_bn_rows_kernel, kh=kh, stride=stride,
                          Ho=Ho, Wo=Wo, Hq=Hq, relu=relu),
        out_shape=jax.ShapeDtypeStruct((B, M, Cout), jnp.bfloat16),
        grid=(B,),
        in_specs=[pl.BlockSpec((None, stride * Hq * Wo, K_rows),
                               lambda b: (b, 0, 0)),
                  pl.BlockSpec((kh, K_rows, Cout), lambda b: (0, 0, 0)),
                  pl.BlockSpec((1, Cout), lambda b: (0, 0)),
                  pl.BlockSpec((1, Cout), lambda b: (0, 0))],
        out_specs=pl.BlockSpec((None, M, Cout), lambda b: (b, 0, 0)),
        scratch_shapes=[pltpu.VMEM((M, Cout), jnp.float32)],
        compiler_params=_cparams(1),
    )(x_in, wt, sp, bp)
    return out.reshape(B, Ho, Wo, Cout)


def maxpool_3x3_s2(x):
    """3x3/s2/pad1 max pool.  Input is post-ReLU (>= 0) with zero padded
    lanes, so zero-valued spatial padding is exact (PyTorch pads with -inf)."""
    B, H, W, C = x.shape
    k, s, pad = 3, 2, 1
    Ho = (H + 2 * pad - k) // s + 1
    Wo = (W + 2 * pad - k) // s + 1
    xp, Hq, Wq, P = _phase_decompose(x, s, pad, k, Ho, Wo)
    taps = _make_taps(k, s)
    return pl.pallas_call(
        functools.partial(_maxpool_kernel, taps=taps, Ho=Ho, Wo=Wo, Hq=Hq),
        out_shape=jax.ShapeDtypeStruct((B, Ho, Wo, C), x.dtype),
        grid=(B,),
        in_specs=[pl.BlockSpec((None, P * Hq, Wq, C), lambda b: (b, 0, 0, 0))],
        out_specs=pl.BlockSpec((None, Ho, Wo, C), lambda b: (b, 0, 0, 0)),
        compiler_params=_cparams(1),
    )(xp)


def global_avgpool(x):
    B, H, W, C = x.shape
    xf = x.reshape(B, H * W, C)
    out = pl.pallas_call(
        _avgpool_kernel,
        out_shape=jax.ShapeDtypeStruct((B, 1, C), jnp.float32),
        grid=(B,),
        in_specs=[pl.BlockSpec((None, H * W, C), lambda b: (b, 0, 0))],
        out_specs=pl.BlockSpec((None, 1, C), lambda b: (b, 0, 0)),
        compiler_params=_cparams(1),
    )(xf)
    return out.reshape(B, C)


# ----------------------------------------------------------------------------
# Deterministic synthetic parameters (real Cin, lane-padded Cout, bf16 weights)
# ----------------------------------------------------------------------------
class ParamGen:
    def __init__(self, key):
        self.key = key

    def next(self):
        self.key, sub = jax.random.split(self.key)
        return sub


def make_conv_bn(pg, kh, kw, cin, cout, eps=1e-5):
    cout_p = _pad_ch(cout)
    w = 0.05 * jax.random.normal(pg.next(), (kh, kw, cin, cout), jnp.float32)
    gamma = 1.0 + 0.1 * jax.random.normal(pg.next(), (cout,), jnp.float32)
    beta = 0.1 * jax.random.normal(pg.next(), (cout,), jnp.float32)
    mean = 0.1 * jax.random.normal(pg.next(), (cout,), jnp.float32)
    var = jax.random.uniform(pg.next(), (cout,), jnp.float32, 0.5, 1.5)
    scale = gamma * jax.lax.rsqrt(var + eps)   # inference BN folded into matmul
    bias = beta - mean * scale
    # Zero pad-lane weights/scale/bias keep padded output lanes exactly zero
    # through conv, ReLU, residual adds and pooling.
    wp = (jnp.zeros((kh, kw, cin, cout_p), jnp.float32)
          .at[:, :, :, :cout].set(w).astype(jnp.bfloat16))
    sp = jnp.zeros((cout_p,), jnp.float32).at[:cout].set(scale)
    bp = jnp.zeros((cout_p,), jnp.float32).at[:cout].set(bias)
    return {"w": wp, "scale": sp, "bias": bp}


def build_encoder_params(key):
    pg = ParamGen(key)
    st = ARCH["stem"]
    params = {"stem": make_conv_bn(pg, st["kh"], st["kw"], st["cin"], st["cout"]),
              "stages": []}
    for stage_cfg in ARCH["stages"]:
        stage = []
        for cfg in stage_cfg:
            cin, width = cfg["cin"], cfg["width"]
            p = {"conv1": make_conv_bn(pg, 1, 1, cin, width),
                 "conv2": make_conv_bn(pg, 3, 3, width, width),
                 "conv3": make_conv_bn(pg, 1, 1, width, width * EXPANSION)}
            if cfg["down"]:
                p["down"] = make_conv_bn(pg, 1, 1, cin, width * EXPANSION)
            stage.append(p)
        params["stages"].append(stage)
    return params


# ----------------------------------------------------------------------------
# Forward pass (mirrors EncoderCNN.forward: resnet backbone -> flatten)
# ----------------------------------------------------------------------------
def bottleneck_forward(x, p, cfg):
    cin, width, stride = cfg["cin"], cfg["width"], cfg["stride"]
    out = conv2d_bn(x, p["conv1"]["w"], p["conv1"]["scale"], p["conv1"]["bias"],
                    cin=cin, stride=1, pad=0, relu=True)
    out = conv2d_bn(out, p["conv2"]["w"], p["conv2"]["scale"], p["conv2"]["bias"],
                    cin=width, stride=stride, pad=1, relu=True)
    if cfg["down"]:
        identity = conv2d_bn(x, p["down"]["w"], p["down"]["scale"],
                             p["down"]["bias"], cin=cin, stride=stride,
                             pad=0, relu=False)
    else:
        identity = x
    # conv3 + BN + residual add + ReLU fused into one kernel epilogue.
    return conv2d_bn(out, p["conv3"]["w"], p["conv3"]["scale"],
                     p["conv3"]["bias"], cin=width, stride=1, pad=0,
                     relu=True, residual=identity)


def encoder_cnn_forward(images_nchw, params):
    """images: (B, 3, H, W) f32 NCHW -> features: (B, 512*BASE_WIDTH/16)."""
    x = jnp.transpose(images_nchw, (0, 2, 3, 1)).astype(jnp.bfloat16)  # NHWC
    st_cfg, st_p = ARCH["stem"], params["stem"]
    x = conv2d_bn(x, st_p["w"], st_p["scale"], st_p["bias"],
                  cin=st_cfg["cin"], stride=st_cfg["stride"],
                  pad=st_cfg["pad"], relu=True)
    x = maxpool_3x3_s2(x)
    for stage_cfg, stage_p in zip(ARCH["stages"], params["stages"]):
        for cfg, p in zip(stage_cfg, stage_p):
            x = bottleneck_forward(x, p, cfg)
    feats = global_avgpool(x)    # == AdaptiveAvgPool2d((1,1)) + reshape(B, -1)
    return feats[:, :ARCH["feat_dim"]]


if __name__ == "__main__":
    key = jax.random.PRNGKey(0)
    pkey, xkey = jax.random.split(key)
    params = build_encoder_params(pkey)
    images = jax.random.normal(xkey, (2, 3, 64, 64), jnp.float32)  # NCHW input

    fwd = jax.jit(encoder_cnn_forward)
    feats = jax.block_until_ready(fwd(images, params))

    assert feats.shape == (2, ARCH["feat_dim"]), feats.shape
    assert feats.dtype == jnp.float32
    assert bool(jnp.all(jnp.isfinite(feats)))
    print("KERNEL_OK")
</pallas_src>

<mosaic_0001>
module attributes {stable_mosaic.version = 11 : i64} {
  func.func @_matmul_bn_kernel(%arg0: i32, %arg1: i32, %arg2: memref<1x512x256xbf16, #tpu.memory_space<vmem>>, %arg3: memref<256x128xbf16, #tpu.memory_space<vmem>>, %arg4: memref<1x128xf32, #tpu.memory_space<vmem>>, %arg5: memref<1x128xf32, #tpu.memory_space<vmem>>, %arg6: memref<1x512x128xbf16, #tpu.memory_space<vmem>>) attributes {dimension_semantics = [#tpu.dimension_semantics<parallel>, #tpu.dimension_semantics<parallel>], iteration_bounds = array<i64: 2, 2>, scalar_prefetch = 0 : i64, scratch_operands = 0 : i64, tpu.core_type = #tpu.core_type<tc>, window_params = [{transform_indices = @transform_0, window_bounds = array<i64: 1, 512, 256>}, {pipeline_mode = #tpu.pipeline_mode<synchronous>, transform_indices = @transform_1, window_bounds = array<i64: 256, 128>}, {pipeline_mode = #tpu.pipeline_mode<synchronous>, transform_indices = @transform_2, window_bounds = array<i64: 1, 128>}, {pipeline_mode = #tpu.pipeline_mode<synchronous>, transform_indices = @transform_3, window_bounds = array<i64: 1, 128>}, {transform_indices = @transform_4, window_bounds = array<i64: 1, 512, 128>}]} {
    %c0 = arith.constant 0 : index
    %c0_0 = arith.constant 0 : index
    %c0_1 = arith.constant 0 : index
    %0 = vector.load %arg2[%c0, %c0_0, %c0_1] : memref<1x512x256xbf16, #tpu.memory_space<vmem>>, vector<1x512x256xbf16>
    %1 = vector.shape_cast %0 : vector<1x512x256xbf16> to vector<512x256xbf16>
    %c0_2 = arith.constant 0 : index
    %c0_3 = arith.constant 0 : index
    %2 = vector.load %arg3[%c0_2, %c0_3] : memref<256x128xbf16, #tpu.memory_space<vmem>>, vector<256x128xbf16>
    %cst = arith.constant dense<0.000000e+00> : vector<512x128xf32>
    %3 = tpu.matmul %1, %2, %cst {dimension_numbers = #tpu.dot_dimension_numbers<[1], [0], [0], [1], [0, 0, 1, 1], [], []>} : vector<512x256xbf16>, vector<256x128xbf16>, vector<512x128xf32> -> vector<512x128xf32>
    %c0_4 = arith.constant 0 : index
    %c0_5 = arith.constant 0 : index
    %4 = vector.load %arg4[%c0_4, %c0_5] : memref<1x128xf32, #tpu.memory_space<vmem>>, vector<1x128xf32>
    %5 = vector.broadcast %4 : vector<1x128xf32> to vector<512x128xf32>
    %6 = arith.mulf %3, %5 : vector<512x128xf32>
    %c0_6 = arith.constant 0 : index
    %c0_7 = arith.constant 0 : index
    %7 = vector.load %arg5[%c0_6, %c0_7] : memref<1x128xf32, #tpu.memory_space<vmem>>, vector<1x128xf32>
    %8 = vector.broadcast %7 : vector<1x128xf32> to vector<512x128xf32>
    %9 = arith.addf %6, %8 : vector<512x128xf32>
    %cst_8 = arith.constant 0.000000e+00 : f32
    %10 = vector.broadcast %cst_8 : f32 to vector<512x128xf32>
    %11 = arith.maximumf %9, %10 : vector<512x128xf32>
    %12 = arith.truncf %11 : vector<512x128xf32> to vector<512x128xbf16>
    %c0_9 = arith.constant 0 : index
    %c0_10 = arith.constant 0 : index
    %c0_11 = arith.constant 0 : index
    %13 = vector.load %arg6[%c0_9, %c0_10, %c0_11] : memref<1x512x128xbf16, #tpu.memory_space<vmem>>, vector<1x512x128xbf16>
    %14 = vector.shape_cast %13 : vector<1x512x128xbf16> to vector<512x128xbf16>
    %15 = vector.shape_cast %12 : vector<512x128xbf16> to vector<1x512x128xbf16>
    tpu.vector_store %arg6[%c0_9, %c0_10, %c0_11], %15 {strides = array<i32>} : memref<1x512x128xbf16, #tpu.memory_space<vmem>>, vector<1x512x128xbf16>,
    return
  }
  func.func @transform_0(%arg0: i32, %arg1: i32) -> (i32, i32, i32) {
    %c0_i32 = arith.constant 0 : i32
    %c0_i32_0 = arith.constant 0 : i32
    return %arg0, %arg1, %c0_i32 : i32, i32, i32
  }
  func.func @transform_1(%arg0: i32, %arg1: i32) -> (i32, i32) {
    %c0_i32 = arith.constant 0 : i32
    %c0_i32_0 = arith.constant 0 : i32
    %c0_i32_1 = arith.constant 0 : i32
    return %c0_i32, %c0_i32_0 : i32, i32
  }
  func.func @transform_2(%arg0: i32, %arg1: i32) -> (i32, i32) {
    %c0_i32 = arith.constant 0 : i32
    %c0_i32_0 = arith.constant 0 : i32
    %c0_i32_1 = arith.constant 0 : i32
    return %c0_i32, %c0_i32_0 : i32, i32
  }
  func.func @transform_3(%arg0: i32, %arg1: i32) -> (i32, i32) {
    %c0_i32 = arith.constant 0 : i32
    %c0_i32_0 = arith.constant 0 : i32
    %c0_i32_1 = arith.constant 0 : i32
    return %c0_i32, %c0_i32_0 : i32, i32
  }
  func.func @transform_4(%arg0: i32, %arg1: i32) -> (i32, i32, i32) {
    %c0_i32 = arith.constant 0 : i32
    %c0_i32_0 = arith.constant 0 : i32
    return %arg0, %arg1, %c0_i32 : i32, i32, i32
  }
}

module attributes {stable_mosaic.version = 11 : i64} {
  func.func @_maxpool_kernel(%arg0: i32, %arg1: memref<1x68x17x128xbf16, #tpu.memory_space<vmem>>, %arg2: memref<1x16x16x128xbf16, #tpu.memory_space<vmem>>) attributes {dimension_semantics = [#tpu.dimension_semantics<parallel>], iteration_bounds = array<i64: 2>, scalar_prefetch = 0 : i64, scratch_operands = 0 : i64, tpu.core_type = #tpu.core_type<tc>, window_params = [{transform_indices = @transform_0, window_bounds = array<i64: 1, 68, 17, 128>}, {transform_indices = @transform_1, window_bounds = array<i64: 1, 16, 16, 128>}]} {
    %c0 = arith.constant 0 : index
    %c0_0 = arith.constant 0 : index
    %c0_1 = arith.constant 0 : index
    %c0_2 = arith.constant 0 : index
    %0 = vector.load %arg1[%c0, %c0_0, %c0_1, %c0_2] : memref<1x68x17x128xbf16, #tpu.memory_space<vmem>>, vector<1x16x16x128xbf16>
    %1 = vector.shape_cast %0 : vector<1x16x16x128xbf16> to vector<16x16x128xbf16>
    %c0_3 = arith.constant 0 : index
    %c17 = arith.constant 17 : index
    %c0_4 = arith.constant 0 : index
    %c0_5 = arith.constant 0 : index
    %2 = vector.load %arg1[%c0_3, %c17, %c0_4, %c0_5] : memref<1x68x17x128xbf16, #tpu.memory_space<vmem>>, vector<1x16x16x128xbf16>
    %3 = vector.shape_cast %2 : vector<1x16x16x128xbf16> to vector<16x16x128xbf16>
    %4 = arith.maximumf %1, %3 : vector<16x16x128xbf16>
    %c0_6 = arith.constant 0 : index
    %c0_7 = arith.constant 0 : index
    %c1 = arith.constant 1 : index
    %c0_8 = arith.constant 0 : index
    %5 = vector.load %arg1[%c0_6, %c0_7, %c1, %c0_8] : memref<1x68x17x128xbf16, #tpu.memory_space<vmem>>, vector<1x16x16x128xbf16>
    %6 = vector.shape_cast %5 : vector<1x16x16x128xbf16> to vector<16x16x128xbf16>
    %7 = arith.maximumf %4, %6 : vector<16x16x128xbf16>
    %c0_9 = arith.constant 0 : index
    %c34 = arith.constant 34 : index
    %c0_10 = arith.constant 0 : index
    %c0_11 = arith.constant 0 : index
    %8 = vector.load %arg1[%c0_9, %c34, %c0_10, %c0_11] : memref<1x68x17x128xbf16, #tpu.memory_space<vmem>>, vector<1x16x16x128xbf16>
    %9 = vector.shape_cast %8 : vector<1x16x16x128xbf16> to vector<16x16x128xbf16>
    %10 = arith.maximumf %7, %9 : vector<16x16x128xbf16>
    %c0_12 = arith.constant 0 : index
    %c51 = arith.constant 51 : index
    %c0_13 = arith.constant 0 : index
    %c0_14 = arith.constant 0 : index
    %11 = vector.load %arg1[%c0_12, %c51, %c0_13, %c0_14] : memref<1x68x17x128xbf16, #tpu.memory_space<vmem>>, vector<1x16x16x128xbf16>
    %12 = vector.shape_cast %11 : vector<1x16x16x128xbf16> to vector<16x16x128xbf16>
    %13 = arith.maximumf %10, %12 : vector<16x16x128xbf16>
    %c0_15 = arith.constant 0 : index
    %c34_16 = arith.constant 34 : index
    %c1_17 = arith.constant 1 : index
    %c0_18 = arith.constant 0 : index
    %14 = vector.load %arg1[%c0_15, %c34_16, %c1_17, %c0_18] : memref<1x68x17x128xbf16, #tpu.memory_space<vmem>>, vector<1x16x16x128xbf16>
    %15 = vector.shape_cast %14 : vector<1x16x16x128xbf16> to vector<16x16x128xbf16>
    %16 = arith.maximumf %13, %15 : vector<16x16x128xbf16>
    %c0_19 = arith.constant 0 : index
    %c1_20 = arith.constant 1 : index
    %c0_21 = arith.constant 0 : index
    %c0_22 = arith.constant 0 : index
    %17 = vector.load %arg1[%c0_19, %c1_20, %c0_21, %c0_22] : memref<1x68x17x128xbf16, #tpu.memory_space<vmem>>, vector<1x16x16x128xbf16>
    %18 = vector.shape_cast %17 : vector<1x16x16x128xbf16> to vector<16x16x128xbf16>
    %19 = arith.maximumf %16, %18 : vector<16x16x128xbf16>
    %c0_23 = arith.constant 0 : index
    %c18 = arith.constant 18 : index
    %c0_24 = arith.constant 0 : index
    %c0_25 = arith.constant 0 : index
    %20 = vector.load %arg1[%c0_23, %c18, %c0_24, %c0_25] : memref<1x68x17x128xbf16, #tpu.memory_space<vmem>>, vector<1x16x16x128xbf16>
    %21 = vector.shape_cast %20 : vector<1x16x16x128xbf16> to vector<16x16x128xbf16>
    %22 = arith.maximumf %19, %21 : vector<16x16x128xbf16>
    %c0_26 = arith.constant 0 : index
    %c1_27 = arith.constant 1 : index
    %c1_28 = arith.constant 1 : index
    %c0_29 = arith.constant 0 : index
    %23 = vector.load %arg1[%c0_26, %c1_27, %c1_28, %c0_29] : memref<1x68x17x128xbf16, #tpu.memory_space<vmem>>, vector<1x16x16x128xbf16>
    %24 = vector.shape_cast %23 : vector<1x16x16x128xbf16> to vector<16x16x128xbf16>
    %25 = arith.maximumf %22, %24 : vector<16x16x128xbf16>
    %c0_30 = arith.constant 0 : index
    %c0_31 = arith.constant 0 : index
    %c0_32 = arith.constant 0 : index
    %c0_33 = arith.constant 0 : index
    %26 = vector.load %arg2[%c0_30, %c0_31, %c0_32, %c0_33] : memref<1x16x16x128xbf16, #tpu.memory_space<vmem>>, vector<1x16x16x128xbf16>
    %27 = vector.shape_cast %26 : vector<1x16x16x128xbf16> to vector<16x16x128xbf16>
    %28 = vector.shape_cast %25 : vector<16x16x128xbf16> to vector<1x16x16x128xbf16>
    tpu.vector_store %arg2[%c0_30, %c0_31, %c0_32, %c0_33], %28 {strides = array<i32>} : memref<1x16x16x128xbf16, #tpu.memory_space<vmem>>, vector<1x16x16x128xbf16>,
    return
  }
  func.func @transform_0(%arg0: i32) -> (i32, i32, i32, i32) {
    %c0_i32 = arith.constant 0 : i32
    %c0_i32_0 = arith.constant 0 : i32
    %c0_i32_1 = arith.constant 0 : i32
    %c0_i32_2 = arith.constant 0 : i32
    return %arg0, %c0_i32, %c0_i32_0, %c0_i32_1 : i32, i32, i32, i32
  }
  func.func @transform_1(%arg0: i32) -> (i32, i32, i32, i32) {
    %c0_i32 = arith.constant 0 : i32
    %c0_i32_0 = arith.constant 0 : i32
    %c0_i32_1 = arith.constant 0 : i32
    %c0_i32_2 = arith.constant 0 : i32
    return %arg0, %c0_i32, %c0_i32_0, %c0_i32_1 : i32, i32, i32, i32
  }
}

module attributes {stable_mosaic.version = 11 : i64} {
  func.func @_matmul_bn_kernel(%arg0: i32, %arg1: i32, %arg2: memref<1x256x128xbf16, #tpu.memory_space<vmem>>, %arg3: memref<128x128xbf16, #tpu.memory_space<vmem>>, %arg4: memref<1x128xf32, #tpu.memory_space<vmem>>, %arg5: memref<1x128xf32, #tpu.memory_space<vmem>>, %arg6: memref<1x256x128xbf16, #tpu.memory_space<vmem>>) attributes {dimension_semantics = [#tpu.dimension_semantics<parallel>, #tpu.dimension_semantics<parallel>], iteration_bounds = array<i64: 2, 1>, scalar_prefetch = 0 : i64, scratch_operands = 0 : i64, tpu.core_type = #tpu.core_type<tc>, window_params = [{transform_indices = @transform_0, window_bounds = array<i64: 1, 256, 128>}, {pipeline_mode = #tpu.pipeline_mode<synchronous>, transform_indices = @transform_1, window_bounds = array<i64: 128, 128>}, {pipeline_mode = #tpu.pipeline_mode<synchronous>, transform_indices = @transform_2, window_bounds = array<i64: 1, 128>}, {pipeline_mode = #tpu.pipeline_mode<synchronous>, transform_indices = @transform_3, window_bounds = array<i64: 1, 128>}, {transform_indices = @transform_4, window_bounds = array<i64: 1, 256, 128>}]} {
    %c0 = arith.constant 0 : index
    %c0_0 = arith.constant 0 : index
    %c0_1 = arith.constant 0 : index
    %0 = vector.load %arg2[%c0, %c0_0, %c0_1] : memref<1x256x128xbf16, #tpu.memory_space<vmem>>, vector<1x256x128xbf16>
    %1 = vector.shape_cast %0 : vector<1x256x128xbf16> to vector<256x128xbf16>
    %c0_2 = arith.constant 0 : index
    %c0_3 = arith.constant 0 : index
    %2 = vector.load %arg3[%c0_2, %c0_3] : memref<128x128xbf16, #tpu.memory_space<vmem>>, vector<128x128xbf16>
    %cst = arith.constant dense<0.000000e+00> : vector<256x128xf32>
    %3 = tpu.matmul %1, %2, %cst {dimension_numbers = #tpu.dot_dimension_numbers<[1], [0], [0], [1], [0, 0, 1, 1], [], []>} : vector<256x128xbf16>, vector<128x128xbf16>, vector<256x128xf32> -> vector<256x128xf32>
    %c0_4 = arith.constant 0 : index
    %c0_5 = arith.constant 0 : index
    %4 = vector.load %arg4[%c0_4, %c0_5] : memref<1x128xf32, #tpu.memory_space<vmem>>, vector<1x128xf32>
    %5 = vector.broadcast %4 : vector<1x128xf32> to vector<256x128xf32>
    %6 = arith.mulf %3, %5 : vector<256x128xf32>
    %c0_6 = arith.constant 0 : index
    %c0_7 = arith.constant 0 : index
    %7 = vector.load %arg5[%c0_6, %c0_7] : memref<1x128xf32, #tpu.memory_space<vmem>>, vector<1x128xf32>
    %8 = vector.broadcast %7 : vector<1x128xf32> to vector<256x128xf32>
    %9 = arith.addf %6, %8 : vector<256x128xf32>
    %cst_8 = arith.constant 0.000000e+00 : f32
    %10 = vector.broadcast %cst_8 : f32 to vector<256x128xf32>
    %11 = arith.maximumf %9, %10 : vector<256x128xf32>
    %12 = arith.truncf %11 : vector<256x128xf32> to vector<256x128xbf16>
    %c0_9 = arith.constant 0 : index
    %c0_10 = arith.constant 0 : index
    %c0_11 = arith.constant 0 : index
    %13 = vector.load %arg6[%c0_9, %c0_10, %c0_11] : memref<1x256x128xbf16, #tpu.memory_space<vmem>>, vector<1x256x128xbf16>
    %14 = vector.shape_cast %13 : vector<1x256x128xbf16> to vector<256x128xbf16>
    %15 = vector.shape_cast %12 : vector<256x128xbf16> to vector<1x256x128xbf16>
    tpu.vector_store %arg6[%c0_9, %c0_10, %c0_11], %15 {strides = array<i32>} : memref<1x256x128xbf16, #tpu.memory_space<vmem>>, vector<1x256x128xbf16>,
    return
  }
  func.func @transform_0(%arg0: i32, %arg1: i32) -> (i32, i32, i32) {
    %c0_i32 = arith.constant 0 : i32
    %c0_i32_0 = arith.constant 0 : i32
    return %arg0, %arg1, %c0_i32 : i32, i32, i32
  }
  func.func @transform_1(%arg0: i32, %arg1: i32) -> (i32, i32) {
    %c0_i32 = arith.constant 0 : i32
    %c0_i32_0 = arith.constant 0 : i32
    %c0_i32_1 = arith.constant 0 : i32
    return %c0_i32, %c0_i32_0 : i32, i32
  }
  func.func @transform_2(%arg0: i32, %arg1: i32) -> (i32, i32) {
    %c0_i32 = arith.constant 0 : i32
    %c0_i32_0 = arith.constant 0 : i32
    %c0_i32_1 = arith.constant 0 : i32
    return %c0_i32, %c0_i32_0 : i32, i32
  }
  func.func @transform_3(%arg0: i32, %arg1: i32) -> (i32, i32) {
    %c0_i32 = arith.constant 0 : i32
    %c0_i32_0 = arith.constant 0 : i32
    %c0_i32_1 = arith.constant 0 : i32
    return %c0_i32, %c0_i32_0 : i32, i32
  }
  func.func @transform_4(%arg0: i32, %arg1: i32) -> (i32, i32, i32) {
    %c0_i32 = arith.constant 0 : i32
    %c0_i32_0 = arith.constant 0 : i32
    return %arg0, %arg1, %c0_i32 : i32, i32, i32
  }
}

module attributes {stable_mosaic.version = 11 : i64} {
  func.func @_matmul_bn_kernel(%arg0: i32, %arg1: i32, %arg2: memref<1x256x256xbf16, #tpu.memory_space<vmem>>, %arg3: memref<256x128xbf16, #tpu.memory_space<vmem>>, %arg4: memref<1x128xf32, #tpu.memory_space<vmem>>, %arg5: memref<1x128xf32, #tpu.memory_space<vmem>>, %arg6: memref<1x256x128xbf16, #tpu.memory_space<vmem>>) attributes {dimension_semantics = [#tpu.dimension_semantics<parallel>, #tpu.dimension_semantics<parallel>], iteration_bounds = array<i64: 2, 1>, scalar_prefetch = 0 : i64, scratch_operands = 0 : i64, tpu.core_type = #tpu.core_type<tc>, window_params = [{transform_indices = @transform_0, window_bounds = array<i64: 1, 256, 256>}, {pipeline_mode = #tpu.pipeline_mode<synchronous>, transform_indices = @transform_1, window_bounds = array<i64: 256, 128>}, {pipeline_mode = #tpu.pipeline_mode<synchronous>, transform_indices = @transform_2, window_bounds = array<i64: 1, 128>}, {pipeline_mode = #tpu.pipeline_mode<synchronous>, transform_indices = @transform_3, window_bounds = array<i64: 1, 128>}, {transform_indices = @transform_4, window_bounds = array<i64: 1, 256, 128>}]} {
    %c0 = arith.constant 0 : index
    %c0_0 = arith.constant 0 : index
    %c0_1 = arith.constant 0 : index
    %0 = vector.load %arg2[%c0, %c0_0, %c0_1] : memref<1x256x256xbf16, #tpu.memory_space<vmem>>, vector<1x256x256xbf16>
    %1 = vector.shape_cast %0 : vector<1x256x256xbf16> to vector<256x256xbf16>
    %c0_2 = arith.constant 0 : index
    %c0_3 = arith.constant 0 : index
    %2 = vector.load %arg3[%c0_2, %c0_3] : memref<256x128xbf16, #tpu.memory_space<vmem>>, vector<256x128xbf16>
    %cst = arith.constant dense<0.000000e+00> : vector<256x128xf32>
    %3 = tpu.matmul %1, %2, %cst {dimension_numbers = #tpu.dot_dimension_numbers<[1], [0], [0], [1], [0, 0, 1, 1], [], []>} : vector<256x256xbf16>, vector<256x128xbf16>, vector<256x128xf32> -> vector<256x128xf32>
    %c0_4 = arith.constant 0 : index
    %c0_5 = arith.constant 0 : index
    %4 = vector.load %arg4[%c0_4, %c0_5] : memref<1x128xf32, #tpu.memory_space<vmem>>, vector<1x128xf32>
    %5 = vector.broadcast %4 : vector<1x128xf32> to vector<256x128xf32>
    %6 = arith.mulf %3, %5 : vector<256x128xf32>
    %c0_6 = arith.constant 0 : index
    %c0_7 = arith.constant 0 : index
    %7 = vector.load %arg5[%c0_6, %c0_7] : memref<1x128xf32, #tpu.memory_space<vmem>>, vector<1x128xf32>
    %8 = vector.broadcast %7 : vector<1x128xf32> to vector<256x128xf32>
    %9 = arith.addf %6, %8 : vector<256x128xf32>
    %cst_8 = arith.constant 0.000000e+00 : f32
    %10 = vector.broadcast %cst_8 : f32 to vector<256x128xf32>
    %11 = arith.maximumf %9, %10 : vector<256x128xf32>
    %12 = arith.truncf %11 : vector<256x128xf32> to vector<256x128xbf16>
    %c0_9 = arith.constant 0 : index
    %c0_10 = arith.constant 0 : index
    %c0_11 = arith.constant 0 : index
    %13 = vector.load %arg6[%c0_9, %c0_10, %c0_11] : memref<1x256x128xbf16, #tpu.memory_space<vmem>>, vector<1x256x128xbf16>
    %14 = vector.shape_cast %13 : vector<1x256x128xbf16> to vector<256x128xbf16>
    %15 = vector.shape_cast %12 : vector<256x128xbf16> to vector<1x256x128xbf16>
    tpu.vector_store %arg6[%c0_9, %c0_10, %c0_11], %15 {strides = array<i32>} : memref<1x256x128xbf16, #tpu.memory_space<vmem>>, vector<1x256x128xbf16>,
    return
  }
  func.func @transform_0(%arg0: i32, %arg1: i32) -> (i32, i32, i32) {
    %c0_i32 = arith.constant 0 : i32
    %c0_i32_0 = arith.constant 0 : i32
    return %arg0, %arg1, %c0_i32 : i32, i32, i32
  }
  func.func @transform_1(%arg0: i32, %arg1: i32) -> (i32, i32) {
    %c0_i32 = arith.constant 0 : i32
    %c0_i32_0 = arith.constant 0 : i32
    %c0_i32_1 = arith.constant 0 : i32
    return %c0_i32, %c0_i32_0 : i32, i32
  }
  func.func @transform_2(%arg0: i32, %arg1: i32) -> (i32, i32) {
    %c0_i32 = arith.constant 0 : i32
    %c0_i32_0 = arith.constant 0 : i32
    %c0_i32_1 = arith.constant 0 : i32
    return %c0_i32, %c0_i32_0 : i32, i32
  }
  func.func @transform_3(%arg0: i32, %arg1: i32) -> (i32, i32) {
    %c0_i32 = arith.constant 0 : i32
    %c0_i32_0 = arith.constant 0 : i32
    %c0_i32_1 = arith.constant 0 : i32
    return %c0_i32, %c0_i32_0 : i32, i32
  }
  func.func @transform_4(%arg0: i32, %arg1: i32) -> (i32, i32, i32) {
    %c0_i32 = arith.constant 0 : i32
    %c0_i32_0 = arith.constant 0 : i32
    return %arg0, %arg1, %c0_i32 : i32, i32, i32
  }
}

module attributes {stable_mosaic.version = 11 : i64} {
  func.func @_matmul_bn_kernel(%arg0: i32, %arg1: i32, %arg2: memref<1x256x128xbf16, #tpu.memory_space<vmem>>, %arg3: memref<128x128xbf16, #tpu.memory_space<vmem>>, %arg4: memref<1x128xf32, #tpu.memory_space<vmem>>, %arg5: memref<1x128xf32, #tpu.memory_space<vmem>>, %arg6: memref<1x256x128xbf16, #tpu.memory_space<vmem>>) attributes {dimension_semantics = [#tpu.dimension_semantics<parallel>, #tpu.dimension_semantics<parallel>], iteration_bounds = array<i64: 2, 1>, scalar_prefetch = 0 : i64, scratch_operands = 0 : i64, tpu.core_type = #tpu.core_type<tc>, window_params = [{transform_indices = @transform_0, window_bounds = array<i64: 1, 256, 128>}, {pipeline_mode = #tpu.pipeline_mode<synchronous>, transform_indices = @transform_1, window_bounds = array<i64: 128, 128>}, {pipeline_mode = #tpu.pipeline_mode<synchronous>, transform_indices = @transform_2, window_bounds = array<i64: 1, 128>}, {pipeline_mode = #tpu.pipeline_mode<synchronous>, transform_indices = @transform_3, window_bounds = array<i64: 1, 128>}, {transform_indices = @transform_4, window_bounds = array<i64: 1, 256, 128>}]} {
    %c0 = arith.constant 0 : index
    %c0_0 = arith.constant 0 : index
    %c0_1 = arith.constant 0 : index
    %0 = vector.load %arg2[%c0, %c0_0, %c0_1] : memref<1x256x128xbf16, #tpu.memory_space<vmem>>, vector<1x256x128xbf16>
    %1 = vector.shape_cast %0 : vector<1x256x128xbf16> to vector<256x128xbf16>
    %c0_2 = arith.constant 0 : index
    %c0_3 = arith.constant 0 : index
    %2 = vector.load %arg3[%c0_2, %c0_3] : memref<128x128xbf16, #tpu.memory_space<vmem>>, vector<128x128xbf16>
    %cst = arith.constant dense<0.000000e+00> : vector<256x128xf32>
    %3 = tpu.matmul %1, %2, %cst {dimension_numbers = #tpu.dot_dimension_numbers<[1], [0], [0], [1], [0, 0, 1, 1], [], []>} : vector<256x128xbf16>, vector<128x128xbf16>, vector<256x128xf32> -> vector<256x128xf32>
    %c0_4 = arith.constant 0 : index
    %c0_5 = arith.constant 0 : index
    %4 = vector.load %arg4[%c0_4, %c0_5] : memref<1x128xf32, #tpu.memory_space<vmem>>, vector<1x128xf32>
    %5 = vector.broadcast %4 : vector<1x128xf32> to vector<256x128xf32>
    %6 = arith.mulf %3, %5 : vector<256x128xf32>
    %c0_6 = arith.constant 0 : index
    %c0_7 = arith.constant 0 : index
    %7 = vector.load %arg5[%c0_6, %c0_7] : memref<1x128xf32, #tpu.memory_space<vmem>>, vector<1x128xf32>
    %8 = vector.broadcast %7 : vector<1x128xf32> to vector<256x128xf32>
    %9 = arith.addf %6, %8 : vector<256x128xf32>
    %10 = arith.truncf %9 : vector<256x128xf32> to vector<256x128xbf16>
    %c0_8 = arith.constant 0 : index
    %c0_9 = arith.constant 0 : index
    %c0_10 = arith.constant 0 : index
    %11 = vector.load %arg6[%c0_8, %c0_9, %c0_10] : memref<1x256x128xbf16, #tpu.memory_space<vmem>>, vector<1x256x128xbf16>
    %12 = vector.shape_cast %11 : vector<1x256x128xbf16> to vector<256x128xbf16>
    %13 = vector.shape_cast %10 : vector<256x128xbf16> to vector<1x256x128xbf16>
    tpu.vector_store %arg6[%c0_8, %c0_9, %c0_10], %13 {strides = array<i32>} : memref<1x256x128xbf16, #tpu.memory_space<vmem>>, vector<1x256x128xbf16>,
    return
  }
  func.func @transform_0(%arg0: i32, %arg1: i32) -> (i32, i32, i32) {
    %c0_i32 = arith.constant 0 : i32
    %c0_i32_0 = arith.constant 0 : i32
    return %arg0, %arg1, %c0_i32 : i32, i32, i32
  }
  func.func @transform_1(%arg0: i32, %arg1: i32) -> (i32, i32) {
    %c0_i32 = arith.constant 0 : i32
    %c0_i32_0 = arith.constant 0 : i32
    %c0_i32_1 = arith.constant 0 : i32
    return %c0_i32, %c0_i32_0 : i32, i32
  }
  func.func @transform_2(%arg0: i32, %arg1: i32) -> (i32, i32) {
    %c0_i32 = arith.constant 0 : i32
    %c0_i32_0 = arith.constant 0 : i32
    %c0_i32_1 = arith.constant 0 : i32
    return %c0_i32, %c0_i32_0 : i32, i32
  }
  func.func @transform_3(%arg0: i32, %arg1: i32) -> (i32, i32) {
    %c0_i32 = arith.constant 0 : i32
    %c0_i32_0 = arith.constant 0 : i32
    %c0_i32_1 = arith.constant 0 : i32
    return %c0_i32, %c0_i32_0 : i32, i32
  }
  func.func @transform_4(%arg0: i32, %arg1: i32) -> (i32, i32, i32) {
    %c0_i32 = arith.constant 0 : i32
    %c0_i32_0 = arith.constant 0 : i32
    return %arg0, %arg1, %c0_i32 : i32, i32, i32
  }
}

module attributes {stable_mosaic.version = 11 : i64} {
  func.func @_matmul_bn_kernel(%arg0: i32, %arg1: i32, %arg2: memref<1x256x128xbf16, #tpu.memory_space<vmem>>, %arg3: memref<128x128xbf16, #tpu.memory_space<vmem>>, %arg4: memref<1x128xf32, #tpu.memory_space<vmem>>, %arg5: memref<1x128xf32, #tpu.memory_space<vmem>>, %arg6: memref<1x256x128xbf16, #tpu.memory_space<vmem>>, %arg7: memref<1x256x128xbf16, #tpu.memory_space<vmem>>) attributes {dimension_semantics = [#tpu.dimension_semantics<parallel>, #tpu.dimension_semantics<parallel>], iteration_bounds = array<i64: 2, 1>, scalar_prefetch = 0 : i64, scratch_operands = 0 : i64, tpu.core_type = #tpu.core_type<tc>, window_params = [{transform_indices = @transform_0, window_bounds = array<i64: 1, 256, 128>}, {pipeline_mode = #tpu.pipeline_mode<synchronous>, transform_indices = @transform_1, window_bounds = array<i64: 128, 128>}, {pipeline_mode = #tpu.pipeline_mode<synchronous>, transform_indices = @transform_2, window_bounds = array<i64: 1, 128>}, {pipeline_mode = #tpu.pipeline_mode<synchronous>, transform_indices = @transform_3, window_bounds = array<i64: 1, 128>}, {transform_indices = @transform_4, window_bounds = array<i64: 1, 256, 128>}, {transform_indices = @transform_5, window_bounds = array<i64: 1, 256, 128>}]} {
    %c0 = arith.constant 0 : index
    %c0_0 = arith.constant 0 : index
    %c0_1 = arith.constant 0 : index
    %0 = vector.load %arg2[%c0, %c0_0, %c0_1] : memref<1x256x128xbf16, #tpu.memory_space<vmem>>, vector<1x256x128xbf16>
    %1 = vector.shape_cast %0 : vector<1x256x128xbf16> to vector<256x128xbf16>
    %c0_2 = arith.constant 0 : index
    %c0_3 = arith.constant 0 : index
    %2 = vector.load %arg3[%c0_2, %c0_3] : memref<128x128xbf16, #tpu.memory_space<vmem>>, vector<128x128xbf16>
    %cst = arith.constant dense<0.000000e+00> : vector<256x128xf32>
    %3 = tpu.matmul %1, %2, %cst {dimension_numbers = #tpu.dot_dimension_numbers<[1], [0], [0], [1], [0, 0, 1, 1], [], []>} : vector<256x128xbf16>, vector<128x128xbf16>, vector<256x128xf32> -> vector<256x128xf32>
    %c0_4 = arith.constant 0 : index
    %c0_5 = arith.constant 0 : index
    %4 = vector.load %arg4[%c0_4, %c0_5] : memref<1x128xf32, #tpu.memory_space<vmem>>, vector<1x128xf32>
    %5 = vector.broadcast %4 : vector<1x128xf32> to vector<256x128xf32>
    %6 = arith.mulf %3, %5 : vector<256x128xf32>
    %c0_6 = arith.constant 0 : index
    %c0_7 = arith.constant 0 : index
    %7 = vector.load %arg5[%c0_6, %c0_7] : memref<1x128xf32, #tpu.memory_space<vmem>>, vector<1x128xf32>
    %8 = vector.broadcast %7 : vector<1x128xf32> to vector<256x128xf32>
    %9 = arith.addf %6, %8 : vector<256x128xf32>
    %c0_8 = arith.constant 0 : index
    %c0_9 = arith.constant 0 : index
    %c0_10 = arith.constant 0 : index
    %10 = vector.load %arg6[%c0_8, %c0_9, %c0_10] : memref<1x256x128xbf16, #tpu.memory_space<vmem>>, vector<1x256x128xbf16>
    %11 = vector.shape_cast %10 : vector<1x256x128xbf16> to vector<256x128xbf16>
    %12 = arith.extf %11 : vector<256x128xbf16> to vector<256x128xf32>
    %13 = arith.addf %9, %12 : vector<256x128xf32>
    %cst_11 = arith.constant 0.000000e+00 : f32
    %14 = vector.broadcast %cst_11 : f32 to vector<256x128xf32>
    %15 = arith.maximumf %13, %14 : vector<256x128xf32>
    %16 = arith.truncf %15 : vector<256x128xf32> to vector<256x128xbf16>
    %c0_12 = arith.constant 0 : index
    %c0_13 = arith.constant 0 : index
    %c0_14 = arith.constant 0 : index
    %17 = vector.load %arg7[%c0_12, %c0_13, %c0_14] : memref<1x256x128xbf16, #tpu.memory_space<vmem>>, vector<1x256x128xbf16>
    %18 = vector.shape_cast %17 : vector<1x256x128xbf16> to vector<256x128xbf16>
    %19 = vector.shape_cast %16 : vector<256x128xbf16> to vector<1x256x128xbf16>
    tpu.vector_store %arg7[%c0_12, %c0_13, %c0_14], %19 {strides = array<i32>} : memref<1x256x128xbf16, #tpu.memory_space<vmem>>, vector<1x256x128xbf16>,
    return
  }
  func.func @transform_0(%arg0: i32, %arg1: i32) -> (i32, i32, i32) {
    %c0_i32 = arith.constant 0 : i32
    %c0_i32_0 = arith.constant 0 : i32
    return %arg0, %arg1, %c0_i32 : i32, i32, i32
  }
  func.func @transform_1(%arg0: i32, %arg1: i32) -> (i32, i32) {
    %c0_i32 = arith.constant 0 : i32
    %c0_i32_0 = arith.constant 0 : i32
    %c0_i32_1 = arith.constant 0 : i32
    return %c0_i32, %c0_i32_0 : i32, i32
  }
  func.func @transform_2(%arg0: i32, %arg1: i32) -> (i32, i32) {
    %c0_i32 = arith.constant 0 : i32
    %c0_i32_0 = arith.constant 0 : i32
    %c0_i32_1 = arith.constant 0 : i32
    return %c0_i32, %c0_i32_0 : i32, i32
  }
  func.func @transform_3(%arg0: i32, %arg1: i32) -> (i32, i32) {
    %c0_i32 = arith.constant 0 : i32
    %c0_i32_0 = arith.constant 0 : i32
    %c0_i32_1 = arith.constant 0 : i32
    return %c0_i32, %c0_i32_0 : i32, i32
  }
  func.func @transform_4(%arg0: i32, %arg1: i32) -> (i32, i32, i32) {
    %c0_i32 = arith.constant 0 : i32
    %c0_i32_0 = arith.constant 0 : i32
    return %arg0, %arg1, %c0_i32 : i32, i32, i32
  }
  func.func @transform_5(%arg0: i32, %arg1: i32) -> (i32, i32, i32) {
    %c0_i32 = arith.constant 0 : i32
    %c0_i32_0 = arith.constant 0 : i32
    return %arg0, %arg1, %c0_i32 : i32, i32, i32
  }
}

module attributes {stable_mosaic.version = 11 : i64} {
  func.func @_conv_bn_rows_kernel(%arg0: i32, %arg1: memref<1x144x128xbf16, #tpu.memory_space<vmem>>, %arg2: memref<3x128x128xbf16, #tpu.memory_space<vmem>>, %arg3: memref<1x128xf32, #tpu.memory_space<vmem>>, %arg4: memref<1x128xf32, #tpu.memory_space<vmem>>, %arg5: memref<1x64x128xbf16, #tpu.memory_space<vmem>>, %arg6: memref<64x128xf32, #tpu.memory_space<vmem>>) attributes {dimension_semantics = [#tpu.dimension_semantics<parallel>], iteration_bounds = array<i64: 2>, scalar_prefetch = 0 : i64, scratch_operands = 1 : i64, tpu.core_type = #tpu.core_type<tc>, window_params = [{transform_indices = @transform_0, window_bounds = array<i64: 1, 144, 128>}, {pipeline_mode = #tpu.pipeline_mode<synchronous>, transform_indices = @transform_1, window_bounds = array<i64: 3, 128, 128>}, {pipeline_mode = #tpu.pipeline_mode<synchronous>, transform_indices = @transform_2, window_bounds = array<i64: 1, 128>}, {pipeline_mode = #tpu.pipeline_mode<synchronous>, transform_indices = @transform_3, window_bounds = array<i64: 1, 128>}, {transform_indices = @transform_4, window_bounds = array<i64: 1, 64, 128>}]} {
    %c0 = arith.constant 0 : index
    %c0_0 = arith.constant 0 : index
    %c0_1 = arith.constant 0 : index
    %0 = vector.load %arg1[%c0, %c0_0, %c0_1] : memref<1x144x128xbf16, #tpu.memory_space<vmem>>, vector<1x64x128xbf16>
    %1 = vector.shape_cast %0 : vector<1x64x128xbf16> to vector<64x128xbf16>
    %c0_2 = arith.constant 0 : index
    %c0_3 = arith.constant 0 : index
    %c0_4 = arith.constant 0 : index
    %2 = vector.load %arg2[%c0_2, %c0_3, %c0_4] : memref<3x128x128xbf16, #tpu.memory_space<vmem>>, vector<1x128x128xbf16>
    %3 = vector.shape_cast %2 : vector<1x128x128xbf16> to vector<128x128xbf16>
    %cst = arith.constant dense<0.000000e+00> : vector<64x128xf32>
    %4 = tpu.matmul %1, %3, %cst {dimension_numbers = #tpu.dot_dimension_numbers<[1], [0], [0], [1], [0, 0, 1, 1], [], []>} : vector<64x128xbf16>, vector<128x128xbf16>, vector<64x128xf32> -> vector<64x128xf32>
    %c0_5 = arith.constant 0 : index
    %c0_6 = arith.constant 0 : index
    %5 = vector.load %arg6[%c0_5, %c0_6] : memref<64x128xf32, #tpu.memory_space<vmem>>, vector<64x128xf32>
    tpu.vector_store %arg6[%c0_5, %c0_6], %4 {strides = array<i32>} : memref<64x128xf32, #tpu.memory_space<vmem>>, vector<64x128xf32>,
    %c0_7 = arith.constant 0 : index
    %c72 = arith.constant 72 : index
    %c0_8 = arith.constant 0 : index
    %6 = vector.load %arg1[%c0_7, %c72, %c0_8] : memref<1x144x128xbf16, #tpu.memory_space<vmem>>, vector<1x64x128xbf16>
    %7 = vector.shape_cast %6 : vector<1x64x128xbf16> to vector<64x128xbf16>
    %c1 = arith.constant 1 : index
    %c0_9 = arith.constant 0 : index
    %c0_10 = arith.constant 0 : index
    %8 = vector.load %arg2[%c1, %c0_9, %c0_10] : memref<3x128x128xbf16, #tpu.memory_space<vmem>>, vector<1x128x128xbf16>
    %9 = vector.shape_cast %8 : vector<1x128x128xbf16> to vector<128x128xbf16>
    %cst_11 = arith.constant dense<0.000000e+00> : vector<64x128xf32>
    %10 = tpu.matmul %7, %9, %cst_11 {dimension_numbers = #tpu.dot_dimension_numbers<[1], [0], [0], [1], [0, 0, 1, 1], [], []>} : vector<64x128xbf16>, vector<128x128xbf16>, vector<64x128xf32> -> vector<64x128xf32>
    %c0_12 = arith.constant 0 : index
    %c0_13 = arith.constant 0 : index
    %11 = vector.load %arg6[%c0_12, %c0_13] : memref<64x128xf32, #tpu.memory_space<vmem>>, vector<64x128xf32>
    %12 = arith.addf %11, %10 : vector<64x128xf32>
    %c0_14 = arith.constant 0 : index
    %c0_15 = arith.constant 0 : index
    %13 = vector.load %arg6[%c0_14, %c0_15] : memref<64x128xf32, #tpu.memory_space<vmem>>, vector<64x128xf32>
    tpu.vector_store %arg6[%c0_14, %c0_15], %12 {strides = array<i32>} : memref<64x128xf32, #tpu.memory_space<vmem>>, vector<64x128xf32>,
    %c0_16 = arith.constant 0 : index
    %c8 = arith.constant 8 : index
    %c0_17 = arith.constant 0 : index
    %14 = vector.load %arg1[%c0_16, %c8, %c0_17] : memref<1x144x128xbf16, #tpu.memory_space<vmem>>, vector<1x64x128xbf16>
    %15 = vector.shape_cast %14 : vector<1x64x128xbf16> to vector<64x128xbf16>
    %c2 = arith.constant 2 : index
    %c0_18 = arith.constant 0 : index
    %c0_19 = arith.constant 0 : index
    %16 = vector.load %arg2[%c2, %c0_18, %c0_19] : memref<3x128x128xbf16, #tpu.memory_space<vmem>>, vector<1x128x128xbf16>
    %17 = vector.shape_cast %16 : vector<1x128x128xbf16> to vector<128x128xbf16>
    %cst_20 = arith.constant dense<0.000000e+00> : vector<64x128xf32>
    %18 = tpu.matmul %15, %17, %cst_20 {dimension_numbers = #tpu.dot_dimension_numbers<[1], [0], [0], [1], [0, 0, 1, 1], [], []>} : vector<64x128xbf16>, vector<128x128xbf16>, vector<64x128xf32> -> vector<64x128xf32>
    %c0_21 = arith.constant 0 : index
    %c0_22 = arith.constant 0 : index
    %19 = vector.load %arg6[%c0_21, %c0_22] : memref<64x128xf32, #tpu.memory_space<vmem>>, vector<64x128xf32>
    %20 = arith.addf %19, %18 : vector<64x128xf32>
    %c0_23 = arith.constant 0 : index
    %c0_24 = arith.constant 0 : index
    %21 = vector.load %arg6[%c0_23, %c0_24] : memref<64x128xf32, #tpu.memory_space<vmem>>, vector<64x128xf32>
    tpu.vector_store %arg6[%c0_23, %c0_24], %20 {strides = array<i32>} : memref<64x128xf32, #tpu.memory_space<vmem>>, vector<64x128xf32>,
    %c0_25 = arith.constant 0 : index
    %c0_26 = arith.constant 0 : index
    %22 = vector.load %arg6[%c0_25, %c0_26] : memref<64x128xf32, #tpu.memory_space<vmem>>, vector<64x128xf32>
    %c0_27 = arith.constant 0 : index
    %c0_28 = arith.constant 0 : index
    %23 = vector.load %arg3[%c0_27, %c0_28] : memref<1x128xf32, #tpu.memory_space<vmem>>, vector<1x128xf32>
    %24 = vector.broadcast %23 : vector<1x128xf32> to vector<64x128xf32>
    %25 = arith.mulf %22, %24 : vector<64x128xf32>
    %c0_29 = arith.constant 0 : index
    %c0_30 = arith.constant 0 : index
    %26 = vector.load %arg4[%c0_29, %c0_30] : memref<1x128xf32, #tpu.memory_space<vmem>>, vector<1x128xf32>
    %27 = vector.broadcast %26 : vector<1x128xf32> to vector<64x128xf32>
    %28 = arith.addf %25, %27 : vector<64x128xf32>
    %cst_31 = arith.constant 0.000000e+00 : f32
    %29 = vector.broadcast %cst_31 : f32 to vector<64x128xf32>
    %30 = arith.maximumf %28, %29 : vector<64x128xf32>
    %31 = arith.truncf %30 : vector<64x128xf32> to vector<64x128xbf16>
    %c0_32 = arith.constant 0 : index
    %c0_33 = arith.constant 0 : index
    %c0_34 = arith.constant 0 : index
    %32 = vector.load %arg5[%c0_32, %c0_33, %c0_34] : memref<1x64x128xbf16, #tpu.memory_space<vmem>>, vector<1x64x128xbf16>
    %33 = vector.shape_cast %32 : vector<1x64x128xbf16> to vector<64x128xbf16>
    %34 = vector.shape_cast %31 : vector<64x128xbf16> to vector<1x64x128xbf16>
    tpu.vector_store %arg5[%c0_32, %c0_33, %c0_34], %34 {strides = array<i32>} : memref<1x64x128xbf16, #tpu.memory_space<vmem>>, vector<1x64x128xbf16>,
    return
  }
  func.func @transform_0(%arg0: i32) -> (i32, i32, i32) {
    %c0_i32 = arith.constant 0 : i32
    %c0_i32_0 = arith.constant 0 : i32
    %c0_i32_1 = arith.constant 0 : i32
    return %arg0, %c0_i32, %c0_i32_0 : i32, i32, i32
  }
  func.func @transform_1(%arg0: i32) -> (i32, i32, i32) {
    %c0_i32 = arith.constant 0 : i32
    %c0_i32_0 = arith.constant 0 : i32
    %c0_i32_1 = arith.constant 0 : i32
    %c0_i32_2 = arith.constant 0 : i32
    return %c0_i32, %c0_i32_0, %c0_i32_1 : i32, i32, i32
  }
  func.func @transform_2(%arg0: i32) -> (i32, i32) {
    %c0_i32 = arith.constant 0 : i32
    %c0_i32_0 = arith.constant 0 : i32
    %c0_i32_1 = arith.constant 0 : i32
    return %c0_i32, %c0_i32_0 : i32, i32
  }
  func.func @transform_3(%arg0: i32) -> (i32, i32) {
    %c0_i32 = arith.constant 0 : i32
    %c0_i32_0 = arith.constant 0 : i32
    %c0_i32_1 = arith.constant 0 : i32
    return %c0_i32, %c0_i32_0 : i32, i32
  }
  func.func @transform_4(%arg0: i32) -> (i32, i32, i32) {
    %c0_i32 = arith.constant 0 : i32
    %c0_i32_0 = arith.constant 0 : i32
    %c0_i32_1 = arith.constant 0 : i32
    return %arg0, %c0_i32, %c0_i32_0 : i32, i32, i32
  }
}

module attributes {stable_mosaic.version = 11 : i64} {
  func.func @_matmul_bn_kernel(%arg0: i32, %arg1: i32, %arg2: memref<1x64x128xbf16, #tpu.memory_space<vmem>>, %arg3: memref<128x128xbf16, #tpu.memory_space<vmem>>, %arg4: memref<1x128xf32, #tpu.memory_space<vmem>>, %arg5: memref<1x128xf32, #tpu.memory_space<vmem>>, %arg6: memref<1x64x128xbf16, #tpu.memory_space<vmem>>) attributes {dimension_semantics = [#tpu.dimension_semantics<parallel>, #tpu.dimension_semantics<parallel>], iteration_bounds = array<i64: 2, 1>, scalar_prefetch = 0 : i64, scratch_operands = 0 : i64, tpu.core_type = #tpu.core_type<tc>, window_params = [{transform_indices = @transform_0, window_bounds = array<i64: 1, 64, 128>}, {pipeline_mode = #tpu.pipeline_mode<synchronous>, transform_indices = @transform_1, window_bounds = array<i64: 128, 128>}, {pipeline_mode = #tpu.pipeline_mode<synchronous>, transform_indices = @transform_2, window_bounds = array<i64: 1, 128>}, {pipeline_mode = #tpu.pipeline_mode<synchronous>, transform_indices = @transform_3, window_bounds = array<i64: 1, 128>}, {transform_indices = @transform_4, window_bounds = array<i64: 1, 64, 128>}]} {
    %c0 = arith.constant 0 : index
    %c0_0 = arith.constant 0 : index
    %c0_1 = arith.constant 0 : index
    %0 = vector.load %arg2[%c0, %c0_0, %c0_1] : memref<1x64x128xbf16, #tpu.memory_space<vmem>>, vector<1x64x128xbf16>
    %1 = vector.shape_cast %0 : vector<1x64x128xbf16> to vector<64x128xbf16>
    %c0_2 = arith.constant 0 : index
    %c0_3 = arith.constant 0 : index
    %2 = vector.load %arg3[%c0_2, %c0_3] : memref<128x128xbf16, #tpu.memory_space<vmem>>, vector<128x128xbf16>
    %cst = arith.constant dense<0.000000e+00> : vector<64x128xf32>
    %3 = tpu.matmul %1, %2, %cst {dimension_numbers = #tpu.dot_dimension_numbers<[1], [0], [0], [1], [0, 0, 1, 1], [], []>} : vector<64x128xbf16>, vector<128x128xbf16>, vector<64x128xf32> -> vector<64x128xf32>
    %c0_4 = arith.constant 0 : index
    %c0_5 = arith.constant 0 : index
    %4 = vector.load %arg4[%c0_4, %c0_5] : memref<1x128xf32, #tpu.memory_space<vmem>>, vector<1x128xf32>
    %5 = vector.broadcast %4 : vector<1x128xf32> to vector<64x128xf32>
    %6 = arith.mulf %3, %5 : vector<64x128xf32>
    %c0_6 = arith.constant 0 : index
    %c0_7 = arith.constant 0 : index
    %7 = vector.load %arg5[%c0_6, %c0_7] : memref<1x128xf32, #tpu.memory_space<vmem>>, vector<1x128xf32>
    %8 = vector.broadcast %7 : vector<1x128xf32> to vector<64x128xf32>
    %9 = arith.addf %6, %8 : vector<64x128xf32>
    %10 = arith.truncf %9 : vector<64x128xf32> to vector<64x128xbf16>
    %c0_8 = arith.constant 0 : index
    %c0_9 = arith.constant 0 : index
    %c0_10 = arith.constant 0 : index
    %11 = vector.load %arg6[%c0_8, %c0_9, %c0_10] : memref<1x64x128xbf16, #tpu.memory_space<vmem>>, vector<1x64x128xbf16>
    %12 = vector.shape_cast %11 : vector<1x64x128xbf16> to vector<64x128xbf16>
    %13 = vector.shape_cast %10 : vector<64x128xbf16> to vector<1x64x128xbf16>
    tpu.vector_store %arg6[%c0_8, %c0_9, %c0_10], %13 {strides = array<i32>} : memref<1x64x128xbf16, #tpu.memory_space<vmem>>, vector<1x64x128xbf16>,
    return
  }
  func.func @transform_0(%arg0: i32, %arg1: i32) -> (i32, i32, i32) {
    %c0_i32 = arith.constant 0 : i32
    %c0_i32_0 = arith.constant 0 : i32
    return %arg0, %arg1, %c0_i32 : i32, i32, i32
  }
  func.func @transform_1(%arg0: i32, %arg1: i32) -> (i32, i32) {
    %c0_i32 = arith.constant 0 : i32
    %c0_i32_0 = arith.constant 0 : i32
    %c0_i32_1 = arith.constant 0 : i32
    return %c0_i32, %c0_i32_0 : i32, i32
  }
  func.func @transform_2(%arg0: i32, %arg1: i32) -> (i32, i32) {
    %c0_i32 = arith.constant 0 : i32
    %c0_i32_0 = arith.constant 0 : i32
    %c0_i32_1 = arith.constant 0 : i32
    return %c0_i32, %c0_i32_0 : i32, i32
  }
  func.func @transform_3(%arg0: i32, %arg1: i32) -> (i32, i32) {
    %c0_i32 = arith.constant 0 : i32
    %c0_i32_0 = arith.constant 0 : i32
    %c0_i32_1 = arith.constant 0 : i32
    return %c0_i32, %c0_i32_0 : i32, i32
  }
  func.func @transform_4(%arg0: i32, %arg1: i32) -> (i32, i32, i32) {
    %c0_i32 = arith.constant 0 : i32
    %c0_i32_0 = arith.constant 0 : i32
    return %arg0, %arg1, %c0_i32 : i32, i32, i32
  }
}

module attributes {stable_mosaic.version = 11 : i64} {
  func.func @_matmul_bn_kernel(%arg0: i32, %arg1: i32, %arg2: memref<1x64x128xbf16, #tpu.memory_space<vmem>>, %arg3: memref<128x128xbf16, #tpu.memory_space<vmem>>, %arg4: memref<1x128xf32, #tpu.memory_space<vmem>>, %arg5: memref<1x128xf32, #tpu.memory_space<vmem>>, %arg6: memref<1x64x128xbf16, #tpu.memory_space<vmem>>) attributes {dimension_semantics = [#tpu.dimension_semantics<parallel>, #tpu.dimension_semantics<parallel>], iteration_bounds = array<i64: 2, 1>, scalar_prefetch = 0 : i64, scratch_operands = 0 : i64, tpu.core_type = #tpu.core_type<tc>, window_params = [{transform_indices = @transform_0, window_bounds = array<i64: 1, 64, 128>}, {pipeline_mode = #tpu.pipeline_mode<synchronous>, transform_indices = @transform_1, window_bounds = array<i64: 128, 128>}, {pipeline_mode = #tpu.pipeline_mode<synchronous>, transform_indices = @transform_2, window_bounds = array<i64: 1, 128>}, {pipeline_mode = #tpu.pipeline_mode<synchronous>, transform_indices = @transform_3, window_bounds = array<i64: 1, 128>}, {transform_indices = @transform_4, window_bounds = array<i64: 1, 64, 128>}]} {
    %c0 = arith.constant 0 : index
    %c0_0 = arith.constant 0 : index
    %c0_1 = arith.constant 0 : index
    %0 = vector.load %arg2[%c0, %c0_0, %c0_1] : memref<1x64x128xbf16, #tpu.memory_space<vmem>>, vector<1x64x128xbf16>
    %1 = vector.shape_cast %0 : vector<1x64x128xbf16> to vector<64x128xbf16>
    %c0_2 = arith.constant 0 : index
    %c0_3 = arith.constant 0 : index
    %2 = vector.load %arg3[%c0_2, %c0_3] : memref<128x128xbf16, #tpu.memory_space<vmem>>, vector<128x128xbf16>
    %cst = arith.constant dense<0.000000e+00> : vector<64x128xf32>
    %3 = tpu.matmul %1, %2, %cst {dimension_numbers = #tpu.dot_dimension_numbers<[1], [0], [0], [1], [0, 0, 1, 1], [], []>} : vector<64x128xbf16>, vector<128x128xbf16>, vector<64x128xf32> -> vector<64x128xf32>
    %c0_4 = arith.constant 0 : index
    %c0_5 = arith.constant 0 : index
    %4 = vector.load %arg4[%c0_4, %c0_5] : memref<1x128xf32, #tpu.memory_space<vmem>>, vector<1x128xf32>
    %5 = vector.broadcast %4 : vector<1x128xf32> to vector<64x128xf32>
    %6 = arith.mulf %3, %5 : vector<64x128xf32>
    %c0_6 = arith.constant 0 : index
    %c0_7 = arith.constant 0 : index
    %7 = vector.load %arg5[%c0_6, %c0_7] : memref<1x128xf32, #tpu.memory_space<vmem>>, vector<1x128xf32>
    %8 = vector.broadcast %7 : vector<1x128xf32> to vector<64x128xf32>
    %9 = arith.addf %6, %8 : vector<64x128xf32>
    %cst_8 = arith.constant 0.000000e+00 : f32
    %10 = vector.broadcast %cst_8 : f32 to vector<64x128xf32>
    %11 = arith.maximumf %9, %10 : vector<64x128xf32>
    %12 = arith.truncf %11 : vector<64x128xf32> to vector<64x128xbf16>
    %c0_9 = arith.constant 0 : index
    %c0_10 = arith.constant 0 : index
    %c0_11 = arith.constant 0 : index
    %13 = vector.load %arg6[%c0_9, %c0_10, %c0_11] : memref<1x64x128xbf16, #tpu.memory_space<vmem>>, vector<1x64x128xbf16>
    %14 = vector.shape_cast %13 : vector<1x64x128xbf16> to vector<64x128xbf16>
    %15 = vector.shape_cast %12 : vector<64x128xbf16> to vector<1x64x128xbf16>
    tpu.vector_store %arg6[%c0_9, %c0_10, %c0_11], %15 {strides = array<i32>} : memref<1x64x128xbf16, #tpu.memory_space<vmem>>, vector<1x64x128xbf16>,
    return
  }
  func.func @transform_0(%arg0: i32, %arg1: i32) -> (i32, i32, i32) {
    %c0_i32 = arith.constant 0 : i32
    %c0_i32_0 = arith.constant 0 : i32
    return %arg0, %arg1, %c0_i32 : i32, i32, i32
  }
  func.func @transform_1(%arg0: i32, %arg1: i32) -> (i32, i32) {
    %c0_i32 = arith.constant 0 : i32
    %c0_i32_0 = arith.constant 0 : i32
    %c0_i32_1 = arith.constant 0 : i32
    return %c0_i32, %c0_i32_0 : i32, i32
  }
  func.func @transform_2(%arg0: i32, %arg1: i32) -> (i32, i32) {
    %c0_i32 = arith.constant 0 : i32
    %c0_i32_0 = arith.constant 0 : i32
    %c0_i32_1 = arith.constant 0 : i32
    return %c0_i32, %c0_i32_0 : i32, i32
  }
  func.func @transform_3(%arg0: i32, %arg1: i32) -> (i32, i32) {
    %c0_i32 = arith.constant 0 : i32
    %c0_i32_0 = arith.constant 0 : i32
    %c0_i32_1 = arith.constant 0 : i32
    return %c0_i32, %c0_i32_0 : i32, i32
  }
  func.func @transform_4(%arg0: i32, %arg1: i32) -> (i32, i32, i32) {
    %c0_i32 = arith.constant 0 : i32
    %c0_i32_0 = arith.constant 0 : i32
    return %arg0, %arg1, %c0_i32 : i32, i32, i32
  }
}

module attributes {stable_mosaic.version = 11 : i64} {
  func.func @_matmul_bn_kernel(%arg0: i32, %arg1: i32, %arg2: memref<1x64x128xbf16, #tpu.memory_space<vmem>>, %arg3: memref<128x128xbf16, #tpu.memory_space<vmem>>, %arg4: memref<1x128xf32, #tpu.memory_space<vmem>>, %arg5: memref<1x128xf32, #tpu.memory_space<vmem>>, %arg6: memref<1x64x128xbf16, #tpu.memory_space<vmem>>, %arg7: memref<1x64x128xbf16, #tpu.memory_space<vmem>>) attributes {dimension_semantics = [#tpu.dimension_semantics<parallel>, #tpu.dimension_semantics<parallel>], iteration_bounds = array<i64: 2, 1>, scalar_prefetch = 0 : i64, scratch_operands = 0 : i64, tpu.core_type = #tpu.core_type<tc>, window_params = [{transform_indices = @transform_0, window_bounds = array<i64: 1, 64, 128>}, {pipeline_mode = #tpu.pipeline_mode<synchronous>, transform_indices = @transform_1, window_bounds = array<i64: 128, 128>}, {pipeline_mode = #tpu.pipeline_mode<synchronous>, transform_indices = @transform_2, window_bounds = array<i64: 1, 128>}, {pipeline_mode = #tpu.pipeline_mode<synchronous>, transform_indices = @transform_3, window_bounds = array<i64: 1, 128>}, {transform_indices = @transform_4, window_bounds = array<i64: 1, 64, 128>}, {transform_indices = @transform_5, window_bounds = array<i64: 1, 64, 128>}]} {
    %c0 = arith.constant 0 : index
    %c0_0 = arith.constant 0 : index
    %c0_1 = arith.constant 0 : index
    %0 = vector.load %arg2[%c0, %c0_0, %c0_1] : memref<1x64x128xbf16, #tpu.memory_space<vmem>>, vector<1x64x128xbf16>
    %1 = vector.shape_cast %0 : vector<1x64x128xbf16> to vector<64x128xbf16>
    %c0_2 = arith.constant 0 : index
    %c0_3 = arith.constant 0 : index
    %2 = vector.load %arg3[%c0_2, %c0_3] : memref<128x128xbf16, #tpu.memory_space<vmem>>, vector<128x128xbf16>
    %cst = arith.constant dense<0.000000e+00> : vector<64x128xf32>
    %3 = tpu.matmul %1, %2, %cst {dimension_numbers = #tpu.dot_dimension_numbers<[1], [0], [0], [1], [0, 0, 1, 1], [], []>} : vector<64x128xbf16>, vector<128x128xbf16>, vector<64x128xf32> -> vector<64x128xf32>
    %c0_4 = arith.constant 0 : index
    %c0_5 = arith.constant 0 : index
    %4 = vector.load %arg4[%c0_4, %c0_5] : memref<1x128xf32, #tpu.memory_space<vmem>>, vector<1x128xf32>
    %5 = vector.broadcast %4 : vector<1x128xf32> to vector<64x128xf32>
    %6 = arith.mulf %3, %5 : vector<64x128xf32>
    %c0_6 = arith.constant 0 : index
    %c0_7 = arith.constant 0 : index
    %7 = vector.load %arg5[%c0_6, %c0_7] : memref<1x128xf32, #tpu.memory_space<vmem>>, vector<1x128xf32>
    %8 = vector.broadcast %7 : vector<1x128xf32> to vector<64x128xf32>
    %9 = arith.addf %6, %8 : vector<64x128xf32>
    %c0_8 = arith.constant 0 : index
    %c0_9 = arith.constant 0 : index
    %c0_10 = arith.constant 0 : index
    %10 = vector.load %arg6[%c0_8, %c0_9, %c0_10] : memref<1x64x128xbf16, #tpu.memory_space<vmem>>, vector<1x64x128xbf16>
    %11 = vector.shape_cast %10 : vector<1x64x128xbf16> to vector<64x128xbf16>
    %12 = arith.extf %11 : vector<64x128xbf16> to vector<64x128xf32>
    %13 = arith.addf %9, %12 : vector<64x128xf32>
    %cst_11 = arith.constant 0.000000e+00 : f32
    %14 = vector.broadcast %cst_11 : f32 to vector<64x128xf32>
    %15 = arith.maximumf %13, %14 : vector<64x128xf32>
    %16 = arith.truncf %15 : vector<64x128xf32> to vector<64x128xbf16>
    %c0_12 = arith.constant 0 : index
    %c0_13 = arith.constant 0 : index
    %c0_14 = arith.constant 0 : index
    %17 = vector.load %arg7[%c0_12, %c0_13, %c0_14] : memref<1x64x128xbf16, #tpu.memory_space<vmem>>, vector<1x64x128xbf16>
    %18 = vector.shape_cast %17 : vector<1x64x128xbf16> to vector<64x128xbf16>
    %19 = vector.shape_cast %16 : vector<64x128xbf16> to vector<1x64x128xbf16>
    tpu.vector_store %arg7[%c0_12, %c0_13, %c0_14], %19 {strides = array<i32>} : memref<1x64x128xbf16, #tpu.memory_space<vmem>>, vector<1x64x128xbf16>,
    return
  }
  func.func @transform_0(%arg0: i32, %arg1: i32) -> (i32, i32, i32) {
    %c0_i32 = arith.constant 0 : i32
    %c0_i32_0 = arith.constant 0 : i32
    return %arg0, %arg1, %c0_i32 : i32, i32, i32
  }
  func.func @transform_1(%arg0: i32, %arg1: i32) -> (i32, i32) {
    %c0_i32 = arith.constant 0 : i32
    %c0_i32_0 = arith.constant 0 : i32
    %c0_i32_1 = arith.constant 0 : i32
    return %c0_i32, %c0_i32_0 : i32, i32
  }
  func.func @transform_2(%arg0: i32, %arg1: i32) -> (i32, i32) {
    %c0_i32 = arith.constant 0 : i32
    %c0_i32_0 = arith.constant 0 : i32
    %c0_i32_1 = arith.constant 0 : i32
    return %c0_i32, %c0_i32_0 : i32, i32
  }
  func.func @transform_3(%arg0: i32, %arg1: i32) -> (i32, i32) {
    %c0_i32 = arith.constant 0 : i32
    %c0_i32_0 = arith.constant 0 : i32
    %c0_i32_1 = arith.constant 0 : i32
    return %c0_i32, %c0_i32_0 : i32, i32
  }
  func.func @transform_4(%arg0: i32, %arg1: i32) -> (i32, i32, i32) {
    %c0_i32 = arith.constant 0 : i32
    %c0_i32_0 = arith.constant 0 : i32
    return %arg0, %arg1, %c0_i32 : i32, i32, i32
  }
  func.func @transform_5(%arg0: i32, %arg1: i32) -> (i32, i32, i32) {
    %c0_i32 = arith.constant 0 : i32
    %c0_i32_0 = arith.constant 0 : i32
    return %arg0, %arg1, %c0_i32 : i32, i32, i32
  }
}

module attributes {stable_mosaic.version = 11 : i64} {
  func.func @_matmul_bn_kernel(%arg0: i32, %arg1: i32, %arg2: memref<1x16x640xbf16, #tpu.memory_space<vmem>>, %arg3: memref<640x128xbf16, #tpu.memory_space<vmem>>, %arg4: memref<1x128xf32, #tpu.memory_space<vmem>>, %arg5: memref<1x128xf32, #tpu.memory_space<vmem>>, %arg6: memref<1x16x128xbf16, #tpu.memory_space<vmem>>) attributes {dimension_semantics = [#tpu.dimension_semantics<parallel>, #tpu.dimension_semantics<parallel>], iteration_bounds = array<i64: 2, 1>, scalar_prefetch = 0 : i64, scratch_operands = 0 : i64, tpu.core_type = #tpu.core_type<tc>, window_params = [{transform_indices = @transform_0, window_bounds = array<i64: 1, 16, 640>}, {pipeline_mode = #tpu.pipeline_mode<synchronous>, transform_indices = @transform_1, window_bounds = array<i64: 640, 128>}, {pipeline_mode = #tpu.pipeline_mode<synchronous>, transform_indices = @transform_2, window_bounds = array<i64: 1, 128>}, {pipeline_mode = #tpu.pipeline_mode<synchronous>, transform_indices = @transform_3, window_bounds = array<i64: 1, 128>}, {transform_indices = @transform_4, window_bounds = array<i64: 1, 16, 128>}]} {
    %c0 = arith.constant 0 : index
    %c0_0 = arith.constant 0 : index
    %c0_1 = arith.constant 0 : index
    %0 = vector.load %arg2[%c0, %c0_0, %c0_1] : memref<1x16x640xbf16, #tpu.memory_space<vmem>>, vector<1x16x640xbf16>
    %1 = vector.shape_cast %0 : vector<1x16x640xbf16> to vector<16x640xbf16>
    %c0_2 = arith.constant 0 : index
    %c0_3 = arith.constant 0 : index
    %2 = vector.load %arg3[%c0_2, %c0_3] : memref<640x128xbf16, #tpu.memory_space<vmem>>, vector<640x128xbf16>
    %cst = arith.constant dense<0.000000e+00> : vector<16x128xf32>
    %3 = tpu.matmul %1, %2, %cst {dimension_numbers = #tpu.dot_dimension_numbers<[1], [0], [0], [1], [0, 0, 1, 1], [], []>} : vector<16x640xbf16>, vector<640x128xbf16>, vector<16x128xf32> -> vector<16x128xf32>
    %c0_4 = arith.constant 0 : index
    %c0_5 = arith.constant 0 : index
    %4 = vector.load %arg4[%c0_4, %c0_5] : memref<1x128xf32, #tpu.memory_space<vmem>>, vector<1x128xf32>
    %5 = vector.broadcast %4 : vector<1x128xf32> to vector<16x128xf32>
    %6 = arith.mulf %3, %5 : vector<16x128xf32>
    %c0_6 = arith.constant 0 : index
    %c0_7 = arith.constant 0 : index
    %7 = vector.load %arg5[%c0_6, %c0_7] : memref<1x128xf32, #tpu.memory_space<vmem>>, vector<1x128xf32>
    %8 = vector.broadcast %7 : vector<1x128xf32> to vector<16x128xf32>
    %9 = arith.addf %6, %8 : vector<16x128xf32>
    %cst_8 = arith.constant 0.000000e+00 : f32
    %10 = vector.broadcast %cst_8 : f32 to vector<16x128xf32>
    %11 = arith.maximumf %9, %10 : vector<16x128xf32>
    %12 = arith.truncf %11 : vector<16x128xf32> to vector<16x128xbf16>
    %c0_9 = arith.constant 0 : index
    %c0_10 = arith.constant 0 : index
    %c0_11 = arith.constant 0 : index
    %13 = vector.load %arg6[%c0_9, %c0_10, %c0_11] : memref<1x16x128xbf16, #tpu.memory_space<vmem>>, vector<1x16x128xbf16>
    %14 = vector.shape_cast %13 : vector<1x16x128xbf16> to vector<16x128xbf16>
    %15 = vector.shape_cast %12 : vector<16x128xbf16> to vector<1x16x128xbf16>
    tpu.vector_store %arg6[%c0_9, %c0_10, %c0_11], %15 {strides = array<i32>} : memref<1x16x128xbf16, #tpu.memory_space<vmem>>, vector<1x16x128xbf16>,
    return
  }
  func.func @transform_0(%arg0: i32, %arg1: i32) -> (i32, i32, i32) {
    %c0_i32 = arith.constant 0 : i32
    %c0_i32_0 = arith.constant 0 : i32
    return %arg0, %arg1, %c0_i32 : i32, i32, i32
  }
  func.func @transform_1(%arg0: i32, %arg1: i32) -> (i32, i32) {
    %c0_i32 = arith.constant 0 : i32
    %c0_i32_0 = arith.constant 0 : i32
    %c0_i32_1 = arith.constant 0 : i32
    return %c0_i32, %c0_i32_0 : i32, i32
  }
  func.func @transform_2(%arg0: i32, %arg1: i32) -> (i32, i32) {
    %c0_i32 = arith.constant 0 : i32
    %c0_i32_0 = arith.constant 0 : i32
    %c0_i32_1 = arith.constant 0 : i32
    return %c0_i32, %c0_i32_0 : i32, i32
  }
  func.func @transform_3(%arg0: i32, %arg1: i32) -> (i32, i32) {
    %c0_i32 = arith.constant 0 : i32
    %c0_i32_0 = arith.constant 0 : i32
    %c0_i32_1 = arith.constant 0 : i32
    return %c0_i32, %c0_i32_0 : i32, i32
  }
  func.func @transform_4(%arg0: i32, %arg1: i32) -> (i32, i32, i32) {
    %c0_i32 = arith.constant 0 : i32
    %c0_i32_0 = arith.constant 0 : i32
    return %arg0, %arg1, %c0_i32 : i32, i32, i32
  }
}

module attributes {stable_mosaic.version = 11 : i64} {
  func.func @_matmul_bn_kernel(%arg0: i32, %arg1: i32, %arg2: memref<1x16x128xbf16, #tpu.memory_space<vmem>>, %arg3: memref<128x256xbf16, #tpu.memory_space<vmem>>, %arg4: memref<1x256xf32, #tpu.memory_space<vmem>>, %arg5: memref<1x256xf32, #tpu.memory_space<vmem>>, %arg6: memref<1x16x256xbf16, #tpu.memory_space<vmem>>, %arg7: memref<1x16x256xbf16, #tpu.memory_space<vmem>>) attributes {dimension_semantics = [#tpu.dimension_semantics<parallel>, #tpu.dimension_semantics<parallel>], iteration_bounds = array<i64: 2, 1>, scalar_prefetch = 0 : i64, scratch_operands = 0 : i64, tpu.core_type = #tpu.core_type<tc>, window_params = [{transform_indices = @transform_0, window_bounds = array<i64: 1, 16, 128>}, {pipeline_mode = #tpu.pipeline_mode<synchronous>, transform_indices = @transform_1, window_bounds = array<i64: 128, 256>}, {pipeline_mode = #tpu.pipeline_mode<synchronous>, transform_indices = @transform_2, window_bounds = array<i64: 1, 256>}, {pipeline_mode = #tpu.pipeline_mode<synchronous>, transform_indices = @transform_3, window_bounds = array<i64: 1, 256>}, {transform_indices = @transform_4, window_bounds = array<i64: 1, 16, 256>}, {transform_indices = @transform_5, window_bounds = array<i64: 1, 16, 256>}]} {
    %c0 = arith.constant 0 : index
    %c0_0 = arith.constant 0 : index
    %c0_1 = arith.constant 0 : index
    %0 = vector.load %arg2[%c0, %c0_0, %c0_1] : memref<1x16x128xbf16, #tpu.memory_space<vmem>>, vector<1x16x128xbf16>
    %1 = vector.shape_cast %0 : vector<1x16x128xbf16> to vector<16x128xbf16>
    %c0_2 = arith.constant 0 : index
    %c0_3 = arith.constant 0 : index
    %2 = vector.load %arg3[%c0_2, %c0_3] : memref<128x256xbf16, #tpu.memory_space<vmem>>, vector<128x256xbf16>
    %cst = arith.constant dense<0.000000e+00> : vector<16x256xf32>
    %3 = tpu.matmul %1, %2, %cst {dimension_numbers = #tpu.dot_dimension_numbers<[1], [0], [0], [1], [0, 0, 1, 1], [], []>} : vector<16x128xbf16>, vector<128x256xbf16>, vector<16x256xf32> -> vector<16x256xf32>
    %c0_4 = arith.constant 0 : index
    %c0_5 = arith.constant 0 : index
    %4 = vector.load %arg4[%c0_4, %c0_5] : memref<1x256xf32, #tpu.memory_space<vmem>>, vector<1x256xf32>
    %5 = vector.broadcast %4 : vector<1x256xf32> to vector<16x256xf32>
    %6 = arith.mulf %3, %5 : vector<16x256xf32>
    %c0_6 = arith.constant 0 : index
    %c0_7 = arith.constant 0 : index
    %7 = vector.load %arg5[%c0_6, %c0_7] : memref<1x256xf32, #tpu.memory_space<vmem>>, vector<1x256xf32>
    %8 = vector.broadcast %7 : vector<1x256xf32> to vector<16x256xf32>
    %9 = arith.addf %6, %8 : vector<16x256xf32>
    %c0_8 = arith.constant 0 : index
    %c0_9 = arith.constant 0 : index
    %c0_10 = arith.constant 0 : index
    %10 = vector.load %arg6[%c0_8, %c0_9, %c0_10] : memref<1x16x256xbf16, #tpu.memory_space<vmem>>, vector<1x16x256xbf16>
    %11 = vector.shape_cast %10 : vector<1x16x256xbf16> to vector<16x256xbf16>
    %12 = arith.extf %11 : vector<16x256xbf16> to vector<16x256xf32>
    %13 = arith.addf %9, %12 : vector<16x256xf32>
    %cst_11 = arith.constant 0.000000e+00 : f32
    %14 = vector.broadcast %cst_11 : f32 to vector<16x256xf32>
    %15 = arith.maximumf %13, %14 : vector<16x256xf32>
    %16 = arith.truncf %15 : vector<16x256xf32> to vector<16x256xbf16>
    %c0_12 = arith.constant 0 : index
    %c0_13 = arith.constant 0 : index
    %c0_14 = arith.constant 0 : index
    %17 = vector.load %arg7[%c0_12, %c0_13, %c0_14] : memref<1x16x256xbf16, #tpu.memory_space<vmem>>, vector<1x16x256xbf16>
    %18 = vector.shape_cast %17 : vector<1x16x256xbf16> to vector<16x256xbf16>
    %19 = vector.shape_cast %16 : vector<16x256xbf16> to vector<1x16x256xbf16>
    tpu.vector_store %arg7[%c0_12, %c0_13, %c0_14], %19 {strides = array<i32>} : memref<1x16x256xbf16, #tpu.memory_space<vmem>>, vector<1x16x256xbf16>,
    return
  }
  func.func @transform_0(%arg0: i32, %arg1: i32) -> (i32, i32, i32) {
    %c0_i32 = arith.constant 0 : i32
    %c0_i32_0 = arith.constant 0 : i32
    return %arg0, %arg1, %c0_i32 : i32, i32, i32
  }
  func.func @transform_1(%arg0: i32, %arg1: i32) -> (i32, i32) {
    %c0_i32 = arith.constant 0 : i32
    %c0_i32_0 = arith.constant 0 : i32
    %c0_i32_1 = arith.constant 0 : i32
    return %c0_i32, %c0_i32_0 : i32, i32
  }
  func.func @transform_2(%arg0: i32, %arg1: i32) -> (i32, i32) {
    %c0_i32 = arith.constant 0 : i32
    %c0_i32_0 = arith.constant 0 : i32
    %c0_i32_1 = arith.constant 0 : i32
    return %c0_i32, %c0_i32_0 : i32, i32
  }
  func.func @transform_3(%arg0: i32, %arg1: i32) -> (i32, i32) {
    %c0_i32 = arith.constant 0 : i32
    %c0_i32_0 = arith.constant 0 : i32
    %c0_i32_1 = arith.constant 0 : i32
    return %c0_i32, %c0_i32_0 : i32, i32
  }
  func.func @transform_4(%arg0: i32, %arg1: i32) -> (i32, i32, i32) {
    %c0_i32 = arith.constant 0 : i32
    %c0_i32_0 = arith.constant 0 : i32
    return %arg0, %arg1, %c0_i32 : i32, i32, i32
  }
  func.func @transform_5(%arg0: i32, %arg1: i32) -> (i32, i32, i32) {
    %c0_i32 = arith.constant 0 : i32
    %c0_i32_0 = arith.constant 0 : i32
    return %arg0, %arg1, %c0_i32 : i32, i32, i32
  }
}

module attributes {stable_mosaic.version = 11 : i64} {
  func.func @_matmul_bn_kernel(%arg0: i32, %arg1: i32, %arg2: memref<1x16x256xbf16, #tpu.memory_space<vmem>>, %arg3: memref<256x128xbf16, #tpu.memory_space<vmem>>, %arg4: memref<1x128xf32, #tpu.memory_space<vmem>>, %arg5: memref<1x128xf32, #tpu.memory_space<vmem>>, %arg6: memref<1x16x128xbf16, #tpu.memory_space<vmem>>) attributes {dimension_semantics = [#tpu.dimension_semantics<parallel>, #tpu.dimension_semantics<parallel>], iteration_bounds = array<i64: 2, 1>, scalar_prefetch = 0 : i64, scratch_operands = 0 : i64, tpu.core_type = #tpu.core_type<tc>, window_params = [{transform_indices = @transform_0, window_bounds = array<i64: 1, 16, 256>}, {pipeline_mode = #tpu.pipeline_mode<synchronous>, transform_indices = @transform_1, window_bounds = array<i64: 256, 128>}, {pipeline_mode = #tpu.pipeline_mode<synchronous>, transform_indices = @transform_2, window_bounds = array<i64: 1, 128>}, {pipeline_mode = #tpu.pipeline_mode<synchronous>, transform_indices = @transform_3, window_bounds = array<i64: 1, 128>}, {transform_indices = @transform_4, window_bounds = array<i64: 1, 16, 128>}]} {
    %c0 = arith.constant 0 : index
    %c0_0 = arith.constant 0 : index
    %c0_1 = arith.constant 0 : index
    %0 = vector.load %arg2[%c0, %c0_0, %c0_1] : memref<1x16x256xbf16, #tpu.memory_space<vmem>>, vector<1x16x256xbf16>
    %1 = vector.shape_cast %0 : vector<1x16x256xbf16> to vector<16x256xbf16>
    %c0_2 = arith.constant 0 : index
    %c0_3 = arith.constant 0 : index
    %2 = vector.load %arg3[%c0_2, %c0_3] : memref<256x128xbf16, #tpu.memory_space<vmem>>, vector<256x128xbf16>
    %cst = arith.constant dense<0.000000e+00> : vector<16x128xf32>
    %3 = tpu.matmul %1, %2, %cst {dimension_numbers = #tpu.dot_dimension_numbers<[1], [0], [0], [1], [0, 0, 1, 1], [], []>} : vector<16x256xbf16>, vector<256x128xbf16>, vector<16x128xf32> -> vector<16x128xf32>
    %c0_4 = arith.constant 0 : index
    %c0_5 = arith.constant 0 : index
    %4 = vector.load %arg4[%c0_4, %c0_5] : memref<1x128xf32, #tpu.memory_space<vmem>>, vector<1x128xf32>
    %5 = vector.broadcast %4 : vector<1x128xf32> to vector<16x128xf32>
    %6 = arith.mulf %3, %5 : vector<16x128xf32>
    %c0_6 = arith.constant 0 : index
    %c0_7 = arith.constant 0 : index
    %7 = vector.load %arg5[%c0_6, %c0_7] : memref<1x128xf32, #tpu.memory_space<vmem>>, vector<1x128xf32>
    %8 = vector.broadcast %7 : vector<1x128xf32> to vector<16x128xf32>
    %9 = arith.addf %6, %8 : vector<16x128xf32>
    %cst_8 = arith.constant 0.000000e+00 : f32
    %10 = vector.broadcast %cst_8 : f32 to vector<16x128xf32>
    %11 = arith.maximumf %9, %10 : vector<16x128xf32>
    %12 = arith.truncf %11 : vector<16x128xf32> to vector<16x128xbf16>
    %c0_9 = arith.constant 0 : index
    %c0_10 = arith.constant 0 : index
    %c0_11 = arith.constant 0 : index
    %13 = vector.load %arg6[%c0_9, %c0_10, %c0_11] : memref<1x16x128xbf16, #tpu.memory_space<vmem>>, vector<1x16x128xbf16>
    %14 = vector.shape_cast %13 : vector<1x16x128xbf16> to vector<16x128xbf16>
    %15 = vector.shape_cast %12 : vector<16x128xbf16> to vector<1x16x128xbf16>
    tpu.vector_store %arg6[%c0_9, %c0_10, %c0_11], %15 {strides = array<i32>} : memref<1x16x128xbf16, #tpu.memory_space<vmem>>, vector<1x16x128xbf16>,
    return
  }
  func.func @transform_0(%arg0: i32, %arg1: i32) -> (i32, i32, i32) {
    %c0_i32 = arith.constant 0 : i32
    %c0_i32_0 = arith.constant 0 : i32
    return %arg0, %arg1, %c0_i32 : i32, i32, i32
  }
  func.func @transform_1(%arg0: i32, %arg1: i32) -> (i32, i32) {
    %c0_i32 = arith.constant 0 : i32
    %c0_i32_0 = arith.constant 0 : i32
    %c0_i32_1 = arith.constant 0 : i32
    return %c0_i32, %c0_i32_0 : i32, i32
  }
  func.func @transform_2(%arg0: i32, %arg1: i32) -> (i32, i32) {
    %c0_i32 = arith.constant 0 : i32
    %c0_i32_0 = arith.constant 0 : i32
    %c0_i32_1 = arith.constant 0 : i32
    return %c0_i32, %c0_i32_0 : i32, i32
  }
  func.func @transform_3(%arg0: i32, %arg1: i32) -> (i32, i32) {
    %c0_i32 = arith.constant 0 : i32
    %c0_i32_0 = arith.constant 0 : i32
    %c0_i32_1 = arith.constant 0 : i32
    return %c0_i32, %c0_i32_0 : i32, i32
  }
  func.func @transform_4(%arg0: i32, %arg1: i32) -> (i32, i32, i32) {
    %c0_i32 = arith.constant 0 : i32
    %c0_i32_0 = arith.constant 0 : i32
    return %arg0, %arg1, %c0_i32 : i32, i32, i32
  }
}

module attributes {stable_mosaic.version = 11 : i64} {
  func.func @_matmul_bn_kernel(%arg0: i32, %arg1: i32, %arg2: memref<1x16x128xbf16, #tpu.memory_space<vmem>>, %arg3: memref<128x256xbf16, #tpu.memory_space<vmem>>, %arg4: memref<1x256xf32, #tpu.memory_space<vmem>>, %arg5: memref<1x256xf32, #tpu.memory_space<vmem>>, %arg6: memref<1x16x256xbf16, #tpu.memory_space<vmem>>) attributes {dimension_semantics = [#tpu.dimension_semantics<parallel>, #tpu.dimension_semantics<parallel>], iteration_bounds = array<i64: 2, 1>, scalar_prefetch = 0 : i64, scratch_operands = 0 : i64, tpu.core_type = #tpu.core_type<tc>, window_params = [{transform_indices = @transform_0, window_bounds = array<i64: 1, 16, 128>}, {pipeline_mode = #tpu.pipeline_mode<synchronous>, transform_indices = @transform_1, window_bounds = array<i64: 128, 256>}, {pipeline_mode = #tpu.pipeline_mode<synchronous>, transform_indices = @transform_2, window_bounds = array<i64: 1, 256>}, {pipeline_mode = #tpu.pipeline_mode<synchronous>, transform_indices = @transform_3, window_bounds = array<i64: 1, 256>}, {transform_indices = @transform_4, window_bounds = array<i64: 1, 16, 256>}]} {
    %c0 = arith.constant 0 : index
    %c0_0 = arith.constant 0 : index
    %c0_1 = arith.constant 0 : index
    %0 = vector.load %arg2[%c0, %c0_0, %c0_1] : memref<1x16x128xbf16, #tpu.memory_space<vmem>>, vector<1x16x128xbf16>
    %1 = vector.shape_cast %0 : vector<1x16x128xbf16> to vector<16x128xbf16>
    %c0_2 = arith.constant 0 : index
    %c0_3 = arith.constant 0 : index
    %2 = vector.load %arg3[%c0_2, %c0_3] : memref<128x256xbf16, #tpu.memory_space<vmem>>, vector<128x256xbf16>
    %cst = arith.constant dense<0.000000e+00> : vector<16x256xf32>
    %3 = tpu.matmul %1, %2, %cst {dimension_numbers = #tpu.dot_dimension_numbers<[1], [0], [0], [1], [0, 0, 1, 1], [], []>} : vector<16x128xbf16>, vector<128x256xbf16>, vector<16x256xf32> -> vector<16x256xf32>
    %c0_4 = arith.constant 0 : index
    %c0_5 = arith.constant 0 : index
    %4 = vector.load %arg4[%c0_4, %c0_5] : memref<1x256xf32, #tpu.memory_space<vmem>>, vector<1x256xf32>
    %5 = vector.broadcast %4 : vector<1x256xf32> to vector<16x256xf32>
    %6 = arith.mulf %3, %5 : vector<16x256xf32>
    %c0_6 = arith.constant 0 : index
    %c0_7 = arith.constant 0 : index
    %7 = vector.load %arg5[%c0_6, %c0_7] : memref<1x256xf32, #tpu.memory_space<vmem>>, vector<1x256xf32>
    %8 = vector.broadcast %7 : vector<1x256xf32> to vector<16x256xf32>
    %9 = arith.addf %6, %8 : vector<16x256xf32>
    %10 = arith.truncf %9 : vector<16x256xf32> to vector<16x256xbf16>
    %c0_8 = arith.constant 0 : index
    %c0_9 = arith.constant 0 : index
    %c0_10 = arith.constant 0 : index
    %11 = vector.load %arg6[%c0_8, %c0_9, %c0_10] : memref<1x16x256xbf16, #tpu.memory_space<vmem>>, vector<1x16x256xbf16>
    %12 = vector.shape_cast %11 : vector<1x16x256xbf16> to vector<16x256xbf16>
    %13 = vector.shape_cast %10 : vector<16x256xbf16> to vector<1x16x256xbf16>
    tpu.vector_store %arg6[%c0_8, %c0_9, %c0_10], %13 {strides = array<i32>} : memref<1x16x256xbf16, #tpu.memory_space<vmem>>, vector<1x16x256xbf16>,
    return
  }
  func.func @transform_0(%arg0: i32, %arg1: i32) -> (i32, i32, i32) {
    %c0_i32 = arith.constant 0 : i32
    %c0_i32_0 = arith.constant 0 : i32
    return %arg0, %arg1, %c0_i32 : i32, i32, i32
  }
  func.func @transform_1(%arg0: i32, %arg1: i32) -> (i32, i32) {
    %c0_i32 = arith.constant 0 : i32
    %c0_i32_0 = arith.constant 0 : i32
    %c0_i32_1 = arith.constant 0 : i32
    return %c0_i32, %c0_i32_0 : i32, i32
  }
  func.func @transform_2(%arg0: i32, %arg1: i32) -> (i32, i32) {
    %c0_i32 = arith.constant 0 : i32
    %c0_i32_0 = arith.constant 0 : i32
    %c0_i32_1 = arith.constant 0 : i32
    return %c0_i32, %c0_i32_0 : i32, i32
  }
  func.func @transform_3(%arg0: i32, %arg1: i32) -> (i32, i32) {
    %c0_i32 = arith.constant 0 : i32
    %c0_i32_0 = arith.constant 0 : i32
    %c0_i32_1 = arith.constant 0 : i32
    return %c0_i32, %c0_i32_0 : i32, i32
  }
  func.func @transform_4(%arg0: i32, %arg1: i32) -> (i32, i32, i32) {
    %c0_i32 = arith.constant 0 : i32
    %c0_i32_0 = arith.constant 0 : i32
    return %arg0, %arg1, %c0_i32 : i32, i32, i32
  }
}

module attributes {stable_mosaic.version = 11 : i64} {
  func.func @_matmul_bn_kernel(%arg0: i32, %arg1: i32, %arg2: memref<1x4x128xbf16, #tpu.memory_space<vmem>>, %arg3: memref<128x512xbf16, #tpu.memory_space<vmem>>, %arg4: memref<1x512xf32, #tpu.memory_space<vmem>>, %arg5: memref<1x512xf32, #tpu.memory_space<vmem>>, %arg6: memref<1x4x512xbf16, #tpu.memory_space<vmem>>, %arg7: memref<1x4x512xbf16, #tpu.memory_space<vmem>>) attributes {dimension_semantics = [#tpu.dimension_semantics<parallel>, #tpu.dimension_semantics<parallel>], iteration_bounds = array<i64: 2, 1>, scalar_prefetch = 0 : i64, scratch_operands = 0 : i64, tpu.core_type = #tpu.core_type<tc>, window_params = [{transform_indices = @transform_0, window_bounds = array<i64: 1, 4, 128>}, {pipeline_mode = #tpu.pipeline_mode<synchronous>, transform_indices = @transform_1, window_bounds = array<i64: 128, 512>}, {pipeline_mode = #tpu.pipeline_mode<synchronous>, transform_indices = @transform_2, window_bounds = array<i64: 1, 512>}, {pipeline_mode = #tpu.pipeline_mode<synchronous>, transform_indices = @transform_3, window_bounds = array<i64: 1, 512>}, {transform_indices = @transform_4, window_bounds = array<i64: 1, 4, 512>}, {transform_indices = @transform_5, window_bounds = array<i64: 1, 4, 512>}]} {
    %c0 = arith.constant 0 : index
    %c0_0 = arith.constant 0 : index
    %c0_1 = arith.constant 0 : index
    %0 = vector.load %arg2[%c0, %c0_0, %c0_1] : memref<1x4x128xbf16, #tpu.memory_space<vmem>>, vector<1x4x128xbf16>
    %1 = vector.shape_cast %0 : vector<1x4x128xbf16> to vector<4x128xbf16>
    %c0_2 = arith.constant 0 : index
    %c0_3 = arith.constant 0 : index
    %2 = vector.load %arg3[%c0_2, %c0_3] : memref<128x512xbf16, #tpu.memory_space<vmem>>, vector<128x512xbf16>
    %cst = arith.constant dense<0.000000e+00> : vector<4x512xf32>
    %3 = tpu.matmul %1, %2, %cst {dimension_numbers = #tpu.dot_dimension_numbers<[1], [0], [0], [1], [0, 0, 1, 1], [], []>} : vector<4x128xbf16>, vector<128x512xbf16>, vector<4x512xf32> -> vector<4x512xf32>
    %c0_4 = arith.constant 0 : index
    %c0_5 = arith.constant 0 : index
    %4 = vector.load %arg4[%c0_4, %c0_5] : memref<1x512xf32, #tpu.memory_space<vmem>>, vector<1x512xf32>
    %5 = vector.broadcast %4 : vector<1x512xf32> to vector<4x512xf32>
    %6 = arith.mulf %3, %5 : vector<4x512xf32>
    %c0_6 = arith.constant 0 : index
    %c0_7 = arith.constant 0 : index
    %7 = vector.load %arg5[%c0_6, %c0_7] : memref<1x512xf32, #tpu.memory_space<vmem>>, vector<1x512xf32>
    %8 = vector.broadcast %7 : vector<1x512xf32> to vector<4x512xf32>
    %9 = arith.addf %6, %8 : vector<4x512xf32>
    %c0_8 = arith.constant 0 : index
    %c0_9 = arith.constant 0 : index
    %c0_10 = arith.constant 0 : index
    %10 = vector.load %arg6[%c0_8, %c0_9, %c0_10] : memref<1x4x512xbf16, #tpu.memory_space<vmem>>, vector<1x4x512xbf16>
    %11 = vector.shape_cast %10 : vector<1x4x512xbf16> to vector<4x512xbf16>
    %12 = arith.extf %11 : vector<4x512xbf16> to vector<4x512xf32>
    %13 = arith.addf %9, %12 : vector<4x512xf32>
    %cst_11 = arith.constant 0.000000e+00 : f32
    %14 = vector.broadcast %cst_11 : f32 to vector<4x512xf32>
    %15 = arith.maximumf %13, %14 : vector<4x512xf32>
    %16 = arith.truncf %15 : vector<4x512xf32> to vector<4x512xbf16>
    %c0_12 = arith.constant 0 : index
    %c0_13 = arith.constant 0 : index
    %c0_14 = arith.constant 0 : index
    %17 = vector.load %arg7[%c0_12, %c0_13, %c0_14] : memref<1x4x512xbf16, #tpu.memory_space<vmem>>, vector<1x4x512xbf16>
    %18 = vector.shape_cast %17 : vector<1x4x512xbf16> to vector<4x512xbf16>
    %19 = vector.shape_cast %16 : vector<4x512xbf16> to vector<1x4x512xbf16>
    tpu.vector_store %arg7[%c0_12, %c0_13, %c0_14], %19 {strides = array<i32>} : memref<1x4x512xbf16, #tpu.memory_space<vmem>>, vector<1x4x512xbf16>,
    return
  }
  func.func @transform_0(%arg0: i32, %arg1: i32) -> (i32, i32, i32) {
    %c0_i32 = arith.constant 0 : i32
    %c0_i32_0 = arith.constant 0 : i32
    return %arg0, %arg1, %c0_i32 : i32, i32, i32
  }
  func.func @transform_1(%arg0: i32, %arg1: i32) -> (i32, i32) {
    %c0_i32 = arith.constant 0 : i32
    %c0_i32_0 = arith.constant 0 : i32
    %c0_i32_1 = arith.constant 0 : i32
    return %c0_i32, %c0_i32_0 : i32, i32
  }
  func.func @transform_2(%arg0: i32, %arg1: i32) -> (i32, i32) {
    %c0_i32 = arith.constant 0 : i32
    %c0_i32_0 = arith.constant 0 : i32
    %c0_i32_1 = arith.constant 0 : i32
    return %c0_i32, %c0_i32_0 : i32, i32
  }
  func.func @transform_3(%arg0: i32, %arg1: i32) -> (i32, i32) {
    %c0_i32 = arith.constant 0 : i32
    %c0_i32_0 = arith.constant 0 : i32
    %c0_i32_1 = arith.constant 0 : i32
    return %c0_i32, %c0_i32_0 : i32, i32
  }
  func.func @transform_4(%arg0: i32, %arg1: i32) -> (i32, i32, i32) {
    %c0_i32 = arith.constant 0 : i32
    %c0_i32_0 = arith.constant 0 : i32
    return %arg0, %arg1, %c0_i32 : i32, i32, i32
  }
  func.func @transform_5(%arg0: i32, %arg1: i32) -> (i32, i32, i32) {
    %c0_i32 = arith.constant 0 : i32
    %c0_i32_0 = arith.constant 0 : i32
    return %arg0, %arg1, %c0_i32 : i32, i32, i32
  }
}

module attributes {stable_mosaic.version = 11 : i64} {
  func.func @_matmul_bn_kernel(%arg0: i32, %arg1: i32, %arg2: memref<1x4x1152xbf16, #tpu.memory_space<vmem>>, %arg3: memref<1152x128xbf16, #tpu.memory_space<vmem>>, %arg4: memref<1x128xf32, #tpu.memory_space<vmem>>, %arg5: memref<1x128xf32, #tpu.memory_space<vmem>>, %arg6: memref<1x4x128xbf16, #tpu.memory_space<vmem>>) attributes {dimension_semantics = [#tpu.dimension_semantics<parallel>, #tpu.dimension_semantics<parallel>], iteration_bounds = array<i64: 2, 1>, scalar_prefetch = 0 : i64, scratch_operands = 0 : i64, tpu.core_type = #tpu.core_type<tc>, window_params = [{transform_indices = @transform_0, window_bounds = array<i64: 1, 4, 1152>}, {pipeline_mode = #tpu.pipeline_mode<synchronous>, transform_indices = @transform_1, window_bounds = array<i64: 1152, 128>}, {pipeline_mode = #tpu.pipeline_mode<synchronous>, transform_indices = @transform_2, window_bounds = array<i64: 1, 128>}, {pipeline_mode = #tpu.pipeline_mode<synchronous>, transform_indices = @transform_3, window_bounds = array<i64: 1, 128>}, {transform_indices = @transform_4, window_bounds = array<i64: 1, 4, 128>}]} {
    %c0 = arith.constant 0 : index
    %c0_0 = arith.constant 0 : index
    %c0_1 = arith.constant 0 : index
    %0 = vector.load %arg2[%c0, %c0_0, %c0_1] : memref<1x4x1152xbf16, #tpu.memory_space<vmem>>, vector<1x4x1152xbf16>
    %1 = vector.shape_cast %0 : vector<1x4x1152xbf16> to vector<4x1152xbf16>
    %c0_2 = arith.constant 0 : index
    %c0_3 = arith.constant 0 : index
    %2 = vector.load %arg3[%c0_2, %c0_3] : memref<1152x128xbf16, #tpu.memory_space<vmem>>, vector<1152x128xbf16>
    %cst = arith.constant dense<0.000000e+00> : vector<4x128xf32>
    %3 = tpu.matmul %1, %2, %cst {dimension_numbers = #tpu.dot_dimension_numbers<[1], [0], [0], [1], [0, 0, 1, 1], [], []>} : vector<4x1152xbf16>, vector<1152x128xbf16>, vector<4x128xf32> -> vector<4x128xf32>
    %c0_4 = arith.constant 0 : index
    %c0_5 = arith.constant 0 : index
    %4 = vector.load %arg4[%c0_4, %c0_5] : memref<1x128xf32, #tpu.memory_space<vmem>>, vector<1x128xf32>
    %5 = vector.broadcast %4 : vector<1x128xf32> to vector<4x128xf32>
    %6 = arith.mulf %3, %5 : vector<4x128xf32>
    %c0_6 = arith.constant 0 : index
    %c0_7 = arith.constant 0 : index
    %7 = vector.load %arg5[%c0_6, %c0_7] : memref<1x128xf32, #tpu.memory_space<vmem>>, vector<1x128xf32>
    %8 = vector.broadcast %7 : vector<1x128xf32> to vector<4x128xf32>
    %9 = arith.addf %6, %8 : vector<4x128xf32>
    %cst_8 = arith.constant 0.000000e+00 : f32
    %10 = vector.broadcast %cst_8 : f32 to vector<4x128xf32>
    %11 = arith.maximumf %9, %10 : vector<4x128xf32>
    %12 = arith.truncf %11 : vector<4x128xf32> to vector<4x128xbf16>
    %c0_9 = arith.constant 0 : index
    %c0_10 = arith.constant 0 : index
    %c0_11 = arith.constant 0 : index
    %13 = vector.load %arg6[%c0_9, %c0_10, %c0_11] : memref<1x4x128xbf16, #tpu.memory_space<vmem>>, vector<1x4x128xbf16>
    %14 = vector.shape_cast %13 : vector<1x4x128xbf16> to vector<4x128xbf16>
    %15 = vector.shape_cast %12 : vector<4x128xbf16> to vector<1x4x128xbf16>
    tpu.vector_store %arg6[%c0_9, %c0_10, %c0_11], %15 {strides = array<i32>} : memref<1x4x128xbf16, #tpu.memory_space<vmem>>, vector<1x4x128xbf16>,
    return
  }
  func.func @transform_0(%arg0: i32, %arg1: i32) -> (i32, i32, i32) {
    %c0_i32 = arith.constant 0 : i32
    %c0_i32_0 = arith.constant 0 : i32
    return %arg0, %arg1, %c0_i32 : i32, i32, i32
  }
  func.func @transform_1(%arg0: i32, %arg1: i32) -> (i32, i32) {
    %c0_i32 = arith.constant 0 : i32
    %c0_i32_0 = arith.constant 0 : i32
    %c0_i32_1 = arith.constant 0 : i32
    return %c0_i32, %c0_i32_0 : i32, i32
  }
  func.func @transform_2(%arg0: i32, %arg1: i32) -> (i32, i32) {
    %c0_i32 = arith.constant 0 : i32
    %c0_i32_0 = arith.constant 0 : i32
    %c0_i32_1 = arith.constant 0 : i32
    return %c0_i32, %c0_i32_0 : i32, i32
  }
  func.func @transform_3(%arg0: i32, %arg1: i32) -> (i32, i32) {
    %c0_i32 = arith.constant 0 : i32
    %c0_i32_0 = arith.constant 0 : i32
    %c0_i32_1 = arith.constant 0 : i32
    return %c0_i32, %c0_i32_0 : i32, i32
  }
  func.func @transform_4(%arg0: i32, %arg1: i32) -> (i32, i32, i32) {
    %c0_i32 = arith.constant 0 : i32
    %c0_i32_0 = arith.constant 0 : i32
    return %arg0, %arg1, %c0_i32 : i32, i32, i32
  }
}

module attributes {stable_mosaic.version = 11 : i64} {
  func.func @_matmul_bn_kernel(%arg0: i32, %arg1: i32, %arg2: memref<1x4x256xbf16, #tpu.memory_space<vmem>>, %arg3: memref<256x512xbf16, #tpu.memory_space<vmem>>, %arg4: memref<1x512xf32, #tpu.memory_space<vmem>>, %arg5: memref<1x512xf32, #tpu.memory_space<vmem>>, %arg6: memref<1x4x512xbf16, #tpu.memory_space<vmem>>) attributes {dimension_semantics = [#tpu.dimension_semantics<parallel>, #tpu.dimension_semantics<parallel>], iteration_bounds = array<i64: 2, 1>, scalar_prefetch = 0 : i64, scratch_operands = 0 : i64, tpu.core_type = #tpu.core_type<tc>, window_params = [{transform_indices = @transform_0, window_bounds = array<i64: 1, 4, 256>}, {pipeline_mode = #tpu.pipeline_mode<synchronous>, transform_indices = @transform_1, window_bounds = array<i64: 256, 512>}, {pipeline_mode = #tpu.pipeline_mode<synchronous>, transform_indices = @transform_2, window_bounds = array<i64: 1, 512>}, {pipeline_mode = #tpu.pipeline_mode<synchronous>, transform_indices = @transform_3, window_bounds = array<i64: 1, 512>}, {transform_indices = @transform_4, window_bounds = array<i64: 1, 4, 512>}]} {
    %c0 = arith.constant 0 : index
    %c0_0 = arith.constant 0 : index
    %c0_1 = arith.constant 0 : index
    %0 = vector.load %arg2[%c0, %c0_0, %c0_1] : memref<1x4x256xbf16, #tpu.memory_space<vmem>>, vector<1x4x256xbf16>
    %1 = vector.shape_cast %0 : vector<1x4x256xbf16> to vector<4x256xbf16>
    %c0_2 = arith.constant 0 : index
    %c0_3 = arith.constant 0 : index
    %2 = vector.load %arg3[%c0_2, %c0_3] : memref<256x512xbf16, #tpu.memory_space<vmem>>, vector<256x512xbf16>
    %cst = arith.constant dense<0.000000e+00> : vector<4x512xf32>
    %3 = tpu.matmul %1, %2, %cst {dimension_numbers = #tpu.dot_dimension_numbers<[1], [0], [0], [1], [0, 0, 1, 1], [], []>} : vector<4x256xbf16>, vector<256x512xbf16>, vector<4x512xf32> -> vector<4x512xf32>
    %c0_4 = arith.constant 0 : index
    %c0_5 = arith.constant 0 : index
    %4 = vector.load %arg4[%c0_4, %c0_5] : memref<1x512xf32, #tpu.memory_space<vmem>>, vector<1x512xf32>
    %5 = vector.broadcast %4 : vector<1x512xf32> to vector<4x512xf32>
    %6 = arith.mulf %3, %5 : vector<4x512xf32>
    %c0_6 = arith.constant 0 : index
    %c0_7 = arith.constant 0 : index
    %7 = vector.load %arg5[%c0_6, %c0_7] : memref<1x512xf32, #tpu.memory_space<vmem>>, vector<1x512xf32>
    %8 = vector.broadcast %7 : vector<1x512xf32> to vector<4x512xf32>
    %9 = arith.addf %6, %8 : vector<4x512xf32>
    %10 = arith.truncf %9 : vector<4x512xf32> to vector<4x512xbf16>
    %c0_8 = arith.constant 0 : index
    %c0_9 = arith.constant 0 : index
    %c0_10 = arith.constant 0 : index
    %11 = vector.load %arg6[%c0_8, %c0_9, %c0_10] : memref<1x4x512xbf16, #tpu.memory_space<vmem>>, vector<1x4x512xbf16>
    %12 = vector.shape_cast %11 : vector<1x4x512xbf16> to vector<4x512xbf16>
    %13 = vector.shape_cast %10 : vector<4x512xbf16> to vector<1x4x512xbf16>
    tpu.vector_store %arg6[%c0_8, %c0_9, %c0_10], %13 {strides = array<i32>} : memref<1x4x512xbf16, #tpu.memory_space<vmem>>, vector<1x4x512xbf16>,
    return
  }
  func.func @transform_0(%arg0: i32, %arg1: i32) -> (i32, i32, i32) {
    %c0_i32 = arith.constant 0 : i32
    %c0_i32_0 = arith.constant 0 : i32
    return %arg0, %arg1, %c0_i32 : i32, i32, i32
  }
  func.func @transform_1(%arg0: i32, %arg1: i32) -> (i32, i32) {
    %c0_i32 = arith.constant 0 : i32
    %c0_i32_0 = arith.constant 0 : i32
    %c0_i32_1 = arith.constant 0 : i32
    return %c0_i32, %c0_i32_0 : i32, i32
  }
  func.func @transform_2(%arg0: i32, %arg1: i32) -> (i32, i32) {
    %c0_i32 = arith.constant 0 : i32
    %c0_i32_0 = arith.constant 0 : i32
    %c0_i32_1 = arith.constant 0 : i32
    return %c0_i32, %c0_i32_0 : i32, i32
  }
  func.func @transform_3(%arg0: i32, %arg1: i32) -> (i32, i32) {
    %c0_i32 = arith.constant 0 : i32
    %c0_i32_0 = arith.constant 0 : i32
    %c0_i32_1 = arith.constant 0 : i32
    return %c0_i32, %c0_i32_0 : i32, i32
  }
  func.func @transform_4(%arg0: i32, %arg1: i32) -> (i32, i32, i32) {
    %c0_i32 = arith.constant 0 : i32
    %c0_i32_0 = arith.constant 0 : i32
    return %arg0, %arg1, %c0_i32 : i32, i32, i32
  }
}

module attributes {stable_mosaic.version = 11 : i64} {
  func.func @_avgpool_kernel(%arg0: i32, %arg1: memref<1x4x512xbf16, #tpu.memory_space<vmem>>, %arg2: memref<1x1x512xf32, #tpu.memory_space<vmem>>) attributes {dimension_semantics = [#tpu.dimension_semantics<parallel>], iteration_bounds = array<i64: 2>, scalar_prefetch = 0 : i64, scratch_operands = 0 : i64, tpu.core_type = #tpu.core_type<tc>, window_params = [{transform_indices = @transform_0, window_bounds = array<i64: 1, 4, 512>}, {transform_indices = @transform_1, window_bounds = array<i64: 1, 1, 512>}]} {
    %c0 = arith.constant 0 : index
    %c0_0 = arith.constant 0 : index
    %c0_1 = arith.constant 0 : index
    %0 = vector.load %arg1[%c0, %c0_0, %c0_1] : memref<1x4x512xbf16, #tpu.memory_space<vmem>>, vector<1x4x512xbf16>
    %1 = vector.shape_cast %0 : vector<1x4x512xbf16> to vector<4x512xbf16>
    %2 = arith.extf %1 : vector<4x512xbf16> to vector<4x512xf32>
    %cst = arith.constant dense<0.000000e+00> : vector<512xf32>
    %3 = vector.multi_reduction <add>, %2, %cst [0] : vector<4x512xf32> to vector<512xf32>
    %4 = vector.shape_cast %3 : vector<512xf32> to vector<1x512xf32>
    %cst_2 = arith.constant 4.000000e+00 : f32
    %5 = vector.broadcast %cst_2 : f32 to vector<1x512xf32>
    %6 = arith.divf %4, %5 : vector<1x512xf32>
    %c0_3 = arith.constant 0 : index
    %c0_4 = arith.constant 0 : index
    %c0_5 = arith.constant 0 : index
    %7 = vector.load %arg2[%c0_3, %c0_4, %c0_5] : memref<1x1x512xf32, #tpu.memory_space<vmem>>, vector<1x1x512xf32>
    %8 = vector.shape_cast %7 : vector<1x1x512xf32> to vector<1x512xf32>
    %9 = vector.shape_cast %6 : vector<1x512xf32> to vector<1x1x512xf32>
    tpu.vector_store %arg2[%c0_3, %c0_4, %c0_5], %9 {strides = array<i32>} : memref<1x1x512xf32, #tpu.memory_space<vmem>>, vector<1x1x512xf32>,
    return
  }
  func.func @transform_0(%arg0: i32) -> (i32, i32, i32) {
    %c0_i32 = arith.constant 0 : i32
    %c0_i32_0 = arith.constant 0 : i32
    %c0_i32_1 = arith.constant 0 : i32
    return %arg0, %c0_i32, %c0_i32_0 : i32, i32, i32
  }
  func.func @transform_1(%arg0: i32) -> (i32, i32, i32) {
    %c0_i32 = arith.constant 0 : i32
    %c0_i32_0 = arith.constant 0 : i32
    %c0_i32_1 = arith.constant 0 : i32
    return %arg0, %c0_i32, %c0_i32_0 : i32, i32, i32
  }
}

</mosaic_0001>

<bundles_post_ra>
// kernel: encoder_cnn_forward.19
= control target key start
LH: loop header
LB: loop body
LE: loop exit
PB: predicated region body
PF: predicated region fallthrough
CT: control target
= control target key end

     0   :  { %s2241_s15 = smov 0   ;;  %s2243_s16 = smov 0   ;;  %s2652_s0 = inlined_call_operand.vmem [shape: bf16[2,1024,256], index: 0, kind: input, shape index: {}]   ;;  %s2653_s1 = inlined_call_operand.vmem [shape: bf16[256,128], index: 1, kind: input, shape index: {}]   ;;  %s2654_s2 = inlined_call_operand.vmem [shape: f32[1,128], index: 2, kind: input, shape index: {}]   ;;  %s2655_s3 = inlined_call_operand.vmem [shape: f32[1,128], index: 3, kind: input, shape index: {}]   ;;  %s2656_s4 = inlined_call_operand.vmem [shape: bf16[2,1024,128], index: 4, kind: output, shape index: {}]  }
   0x1   :  { %s2245_s17 = smov 0   ;;  %s2247_s18 = smov 0  }
   0x2   :  { %s2249_s19 = smov 0  }
   0x3 LB: > { %s23_s20 = sadd.s32 1, %s2206_s17  ;;  %s26_s21 = sadd.s32 1, %s2210_s18  ;;  %s2214_s19 = sphi %s2249_s19, %s14_s19   ;;  %s2210_s18 = sphi %s2247_s18, %s2660_s18   ;;  %s2206_s17 = sphi %s2245_s17, %s2659_s17   ;;  %s2202_s16 = sphi %s2243_s16, %s2658_s16   ;;  %s2198_s15 = sphi %s2241_s15, %s2657_s15  }
   0x4   : > { %p24_p0 = scmp.ge.s32.totalorder %s23_s20, 2  ;;  %p1515_p1 = scmp.ge.s32.totalorder %s2214_s19, 1 }
   0x5   : > { %p184_p2 = scmp.lt.s32.totalorder %s2214_s19, 5 }
   0x6   : > { %s2662_s20 = smov (%p24_p0, %s23_s20), 0  ;;  %s2664_s21 = smov (!%p24_p0, %s26_s21), %s2210_s18 }
   0x7   : > { %p185_p3 = pnand %p1515_p1, %p184_p2  ;;  %p28_p4 = scmp.ge.s32.totalorder %s2664_s21, 2 }
   0x8   : > { %s1516_s28 = sshll.u32 (!%p185_p3), %s2198_s15, 6  ;;  %p220_p5 = scmp.lt.s32.totalorder (!%p185_p3), %s2202_s16, 1 }
   0x9   : > { %s2666_s21 = smov (%p28_p4, %s2664_s21), 0  ;;  %188 = sbr.rel (%p185_p3) target bundleno = 438 (0x1b6), region = 36 }
   0xa   : > { %p222_p6 = scmp.lt.s32.totalorder (!%p185_p3), %s1516_s28, 127 }
   0xe   : > { %v1916_v0 = vld [vmem:[%s2653_s1 + $0x38] sm:$0xff]  ;;  %v1915_v2 = vld [vmem:[%s2653_s1 + $0x30] sm:$0xff]  ;;  %v1914_v4 = vld [vmem:[%s2653_s1 + $0x28] sm:$0xff]  ;;  %s2668_s16 = smov (!%p220_p5, %s2202_s16), 1  ;;  %s2670_s28 = smov (!%p222_p6, %s1516_s28), 127 }
   0xf   : > { %v1924_v1 = vld [vmem:[%s2653_s1 + $0x78] sm:$0xff]  ;;  %752 = vmatpush.bf16.msra.mxu0 %v1916_v0  ;;  %2116 = vmatpush.bf16.msra.mxu2 %v1916_v0  ;;  %v1923_v3 = vld [vmem:[%s2653_s1 + $0x70] sm:$0xff]  ;;  %v1922_v5 = vld [vmem:[%s2653_s1 + $0x68] sm:$0xff]  ;;  %s1517_s13 = sshll.u32 %s2670_s28, 1  ;;  %s1518_s14 = sshll.u32 %s2668_s16, 8 }
  0x10   : > { %921 = vmatpush.bf16.msra.mxu1 %v1924_v1  ;;  %2124 = vmatpush.bf16.msra.mxu3 %v1924_v1  ;;  %v1913_v6 = vld [vmem:[%s2653_s1 + $0x20] sm:$0xff]  ;;  %v1912_v8 = vld [vmem:[%s2653_s1 + $0x18] sm:$0xff]  ;;  %s226_s25 = sadd.s32 %s1518_s14, %s1517_s13  ;;  %v1911_v10 = vld [vmem:[%s2653_s1 + $0x10] sm:$0xff]  ;;  %s1521_s23 = sshll.u32 %s2668_s16, 7 }
  0x11   : > { %v1921_v7 = vld [vmem:[%s2653_s1 + $0x60] sm:$0xff]  ;;  %v1920_v9 = vld [vmem:[%s2653_s1 + $0x58] sm:$0xff]  ;;  %v1919_v11 = vld [vmem:[%s2653_s1 + $0x50] sm:$0xff]  ;;  %s1519_s5 = sshll.u32 %s226_s25, 2  ;;  %s2355_s24 = sadd.s32 %s1521_s23, %s2670_s28 }
  0x12   : > { %v1910_v12 = vld [vmem:[%s2653_s1 + $0x8] sm:$0xff]  ;;  %s2326_s10 = scalar_lea.vmem %s2652_s0, %s1519_s5  ;;  %v1909_v14 = vld [vmem:[%s2653_s1] sm:$0xff]  ;;  %s1522_s27 = sshll.u32 %s2355_s24, 2 }
  0x13   : > { %753 = vmatpush.bf16.msra.mxu0 %v1915_v2  ;;  %2117 = vmatpush.bf16.msra.mxu2 %v1915_v2  ;;  %v1918_v13 = vld [vmem:[%s2653_s1 + $0x48] sm:$0xff]  ;;  %v1917_v15 = vld [vmem:[%s2653_s1 + $0x40] sm:$0xff]  ;;  %v1533_v28 = vld [vmem:[%s2326_s10 + $0x10] sm:$0xf]  ;;  %s2440_s5 = scalar_lea.vmem %s2656_s4, %s1522_s27 }
  0x14   : > { %922 = vmatpush.bf16.msra.mxu1 %v1923_v3  ;;  %2125 = vmatpush.bf16.msra.mxu3 %v1923_v3  ;;  %v1525_v16 = vld [vmem:[%s2326_s10] sm:$0xf]  ;;  %v1846_v17 = vld [vmem:[%s2326_s10 + $0x4] sm:$0xf0]  ;;  %v1845_v20 = vld [vmem:[%s2326_s10 + $0x4] sm:$0xf] }
  0x15   : > { %v1653_v18 = vld [vmem:[%s2326_s10 + $0x100] sm:$0xf]  ;;  %v1878_v19 = vld [vmem:[%s2326_s10 + $0x104] sm:$0xf0]  ;;  %v1527_v21 = vld [vmem:[%s2326_s10 + $0x8] sm:$0xf0]  ;;  %v1526_v24 = vor.u32 %v1846_v17, %v1525_v16 }
  0x16   : > { %v1877_v22 = vld [vmem:[%s2326_s10 + $0x104] sm:$0xf]  ;;  %v1655_v23 = vld [vmem:[%s2326_s10 + $0x108] sm:$0xf0]  ;;  %v1654_v25 = vor.u32 %v1878_v19, %v1653_v18  ;;  %v1530_v26 = vor.u32 %v1845_v20, %v1527_v21  ;;  %v1848_v29 = vld [vmem:[%s2326_s10 + $0x14] sm:$0xf0] }
  0x17   : > { %754 = vmatpush.bf16.msra.mxu0 %v1914_v4  ;;  %2118 = vmatpush.bf16.msra.mxu2 %v1914_v4  ;;  %v1658_v27 = vor.u32 %v1877_v22, %v1655_v23  ;;  %v1661_v30 = vld [vmem:[%s2326_s10 + $0x110] sm:$0xf]  ;;  %v1880_v31 = vld [vmem:[%s2326_s10 + $0x114] sm:$0xf0]  ;;  %v1847_v32 = vld [vmem:[%s2326_s10 + $0x14] sm:$0xf]  ;;  %v1534_v36 = vor.u32 %v1848_v29, %v1533_v28 }
  0x18   : > { %923 = vmatpush.bf16.msra.mxu1 %v1922_v5  ;;  %2126 = vmatpush.bf16.msra.mxu3 %v1922_v5  ;;  %v1535_v33 = vld [vmem:[%s2326_s10 + $0x18] sm:$0xf0]  ;;  %v1879_v34 = vld [vmem:[%s2326_s10 + $0x114] sm:$0xf]  ;;  %v1662_v37 = vor.u32 %v1880_v31, %v1661_v30  ;;  %v1541_v40 = vld [vmem:[%s2326_s10 + $0x20] sm:$0xf] }
  0x19   : > { %v1663_v35 = vld [vmem:[%s2326_s10 + $0x118] sm:$0xf0]  ;;  %v1538_v38 = vor.u32 %v1847_v32, %v1535_v33  ;;  %v1850_v41 = vld [vmem:[%s2326_s10 + $0x24] sm:$0xf0]  ;;  %v1669_v42 = vld [vmem:[%s2326_s10 + $0x120] sm:$0xf] }
  0x1a   : > { %v1666_v39 = vor.u32 %v1879_v34, %v1663_v35  ;;  %v1882_v43 = vld [vmem:[%s2326_s10 + $0x124] sm:$0xf0]  ;;  %v1849_v44 = vld [vmem:[%s2326_s10 + $0x24] sm:$0xf]  ;;  %v1543_v45 = vld [vmem:[%s2326_s10 + $0x28] sm:$0xf0]  ;;  %v1542_v48 = vor.u32 %v1850_v41, %v1541_v40 }
  0x1b   : > { %755 = vmatpush.bf16.msra.mxu0 %v1913_v6  ;;  %2119 = vmatpush.bf16.msra.mxu2 %v1913_v6  ;;  %v1881_v46 = vld [vmem:[%s2326_s10 + $0x124] sm:$0xf]  ;;  %v1671_v47 = vld [vmem:[%s2326_s10 + $0x128] sm:$0xf0]  ;;  %v1670_v49 = vor.u32 %v1882_v43, %v1669_v42  ;;  %v1546_v50 = vor.u32 %v1849_v44, %v1543_v45  ;;  %v1549_v52 = vld [vmem:[%s2326_s10 + $0x30] sm:$0xf] }
  0x1c   : > { %924 = vmatpush.bf16.msra.mxu1 %v1921_v7  ;;  %2127 = vmatpush.bf16.msra.mxu3 %v1921_v7  ;;  %v1674_v51 = vor.u32 %v1881_v46, %v1671_v47  ;;  %v1852_v53 = vld [vmem:[%s2326_s10 + $0x34] sm:$0xf0]  ;;  %v1677_v54 = vld [vmem:[%s2326_s10 + $0x130] sm:$0xf]  ;;  %v1851_v56 = vld [vmem:[%s2326_s10 + $0x34] sm:$0xf] }
  0x1d   : > { %v1884_v55 = vld [vmem:[%s2326_s10 + $0x134] sm:$0xf0]  ;;  %v1551_v57 = vld [vmem:[%s2326_s10 + $0x38] sm:$0xf0]  ;;  %v1883_v58 = vld [vmem:[%s2326_s10 + $0x134] sm:$0xf]  ;;  %v1550_v60 = vor.u32 %v1852_v53, %v1549_v52 }
  0x1e   : > { %v1679_v59 = vld [vmem:[%s2326_s10 + $0x138] sm:$0xf0]  ;;  %v1678_v61 = vor.u32 %v1884_v55, %v1677_v54  ;;  %v1554_v62 = vor.u32 %v1851_v56, %v1551_v57  ;;  %v1557_v0 = vld [vmem:[%s2326_s10 + $0x40] sm:$0xf]  ;;  %v1854_v1 = vld [vmem:[%s2326_s10 + $0x44] sm:$0xf0] }
  0x1f   : > { %756 = vmatpush.bf16.msra.mxu0 %v1912_v8  ;;  %2120 = vmatpush.bf16.msra.mxu2 %v1912_v8  ;;  %v1682_v63 = vor.u32 %v1883_v58, %v1679_v59  ;;  %v1685_v2 = vld [vmem:[%s2326_s10 + $0x140] sm:$0xf]  ;;  %v1886_v3 = vld [vmem:[%s2326_s10 + $0x144] sm:$0xf0]  ;;  %v1853_v4 = vld [vmem:[%s2326_s10 + $0x44] sm:$0xf]  ;;  %v1558_v8 = vor.u32 %v1854_v1, %v1557_v0 }
  0x20   : > { %925 = vmatpush.bf16.msra.mxu1 %v1920_v9  ;;  %2128 = vmatpush.bf16.msra.mxu3 %v1920_v9  ;;  %v1559_v5 = vld [vmem:[%s2326_s10 + $0x48] sm:$0xf0]  ;;  %v1885_v6 = vld [vmem:[%s2326_s10 + $0x144] sm:$0xf]  ;;  %v1686_v9 = vor.u32 %v1886_v3, %v1685_v2  ;;  %v1855_v16 = vld [vmem:[%s2326_s10 + $0x54] sm:$0xf] }
  0x21   : > { %v1687_v7 = vld [vmem:[%s2326_s10 + $0x148] sm:$0xf0]  ;;  %v1567_v17 = vld [vmem:[%s2326_s10 + $0x58] sm:$0xf0]  ;;  %v1887_v18 = vld [vmem:[%s2326_s10 + $0x154] sm:$0xf] }
  0x22   : > { %v1695_v19 = vld [vmem:[%s2326_s10 + $0x158] sm:$0xf0]  ;;  %v1570_v22 = vor.u32 %v1855_v16, %v1567_v17  ;;  %v1857_v28 = vld [vmem:[%s2326_s10 + $0x64] sm:$0xf]  ;;  %v1575_v29 = vld [vmem:[%s2326_s10 + $0x68] sm:$0xf0] }
  0x23   : > { %757 = vmatpush.bf16.msra.mxu0 %v1911_v10  ;;  %2121 = vmatpush.bf16.msra.mxu2 %v1911_v10  ;;  %v1562_v10 = vor.u32 %v1853_v4, %v1559_v5  ;;  %v1698_v23 = vor.u32 %v1887_v18, %v1695_v19  ;;  %v1889_v30 = vld [vmem:[%s2326_s10 + $0x164] sm:$0xf]  ;;  %v1703_v31 = vld [vmem:[%s2326_s10 + $0x168] sm:$0xf0]  ;;  %v1578_v34 = vor.u32 %v1857_v28, %v1575_v29  ;;  %v1859_v40 = vld [vmem:[%s2326_s10 + $0x74] sm:$0xf] }
  0x24   : > { %926 = vmatpush.bf16.msra.mxu1 %v1919_v11  ;;  %2129 = vmatpush.bf16.msra.mxu3 %v1919_v11  ;;  %v1690_v11 = vor.u32 %v1885_v6, %v1687_v7  ;;  %v1706_v35 = vor.u32 %v1889_v30, %v1703_v31  ;;  %v1583_v41 = vld [vmem:[%s2326_s10 + $0x78] sm:$0xf0]  ;;  %v1891_v42 = vld [vmem:[%s2326_s10 + $0x174] sm:$0xf]  ;;  %v1861_v52 = vld [vmem:[%s2326_s10 + $0x84] sm:$0xf] }
  0x25   : > { %v1711_v43 = vld [vmem:[%s2326_s10 + $0x178] sm:$0xf0]  ;;  %v1586_v46 = vor.u32 %v1859_v40, %v1583_v41  ;;  %v1591_v53 = vld [vmem:[%s2326_s10 + $0x88] sm:$0xf0]  ;;  %v1893_v54 = vld [vmem:[%s2326_s10 + $0x184] sm:$0xf] }
  0x26   : > { %v1714_v47 = vor.u32 %v1891_v42, %v1711_v43  ;;  %v1719_v55 = vld [vmem:[%s2326_s10 + $0x188] sm:$0xf0]  ;;  %v1594_v59 = vor.u32 %v1861_v52, %v1591_v53  ;;  %v2422_v3 = vld [vmem:[%s2655_s3] ss:$0 sm:$0xff]  ;;  %v1895_v16 = vld [vmem:[%s2326_s10 + $0x194] sm:$0xf] }
  0x27   : > { %758 = vmatpush.bf16.msra.mxu0 %v1910_v12  ;;  %2122 = vmatpush.bf16.msra.mxu2 %v1910_v12  ;;  %v1565_v12 = vld [vmem:[%s2326_s10 + $0x50] sm:$0xf]  ;;  %v1727_v17 = vld [vmem:[%s2326_s10 + $0x198] sm:$0xf0]  ;;  %v1865_v52 = vld [vmem:[%s2326_s10 + $0xa4] sm:$0xf] }
  0x28   : > { %927 = vmatpush.bf16.msra.mxu1 %v1918_v13  ;;  %2130 = vmatpush.bf16.msra.mxu3 %v1918_v13  ;;  %v1856_v13 = vld [vmem:[%s2326_s10 + $0x54] sm:$0xf0]  ;;  %v1730_v29 = vor.u32 %v1895_v16, %v1727_v17  ;;  %v1607_v53 = vld [vmem:[%s2326_s10 + $0xa8] sm:$0xf0] }
  0x29   : > { %v1566_v20 = vor.u32 %v1856_v13, %v1565_v12  ;;  %v1896_v13 = vld [vmem:[%s2326_s10 + $0x194] sm:$0xf0] }
  0x2b   : > { %759 = vmatpush.bf16.msra.mxu0 %v1909_v14  ;;  %2123 = vmatpush.bf16.msra.mxu2 %v1909_v14  ;;  %v1693_v14 = vld [vmem:[%s2326_s10 + $0x150] sm:$0xf] }
  0x2c   : > { %928 = vmatpush.bf16.msra.mxu1 %v1917_v15  ;;  %2131 = vmatpush.bf16.msra.mxu3 %v1917_v15  ;;  %v1888_v15 = vld [vmem:[%s2326_s10 + $0x154] sm:$0xf0] }
  0x2d   : > { %v1694_v21 = vor.u32 %v1888_v15, %v1693_v14  ;;  %v1863_v14 = vld [vmem:[%s2326_s10 + $0x94] sm:$0xf]  ;;  %v1599_v15 = vld [vmem:[%s2326_s10 + $0x98] sm:$0xf0] }
  0x2e   : > { %760 = vmatmul.bf16.vlgmr.msra.gmra.mxu0 %v1526_v24  ;;  %840 = vmatmul.bf16.vlgmr.msra.gmra.mxu2 %v1654_v25  ;;  %v1573_v24 = vld [vmem:[%s2326_s10 + $0x60] sm:$0xf]  ;;  %v1858_v25 = vld [vmem:[%s2326_s10 + $0x64] sm:$0xf0] }
  0x2f   : > { %929 = vmatmul.bf16.vlgmr.msra.gmra.mxu1 %v1530_v26  ;;  %1009 = vmatmul.bf16.vlgmr.msra.gmra.mxu3 %v1658_v27  ;;  %v1701_v26 = vld [vmem:[%s2326_s10 + $0x160] sm:$0xf]  ;;  %v1890_v27 = vld [vmem:[%s2326_s10 + $0x164] sm:$0xf0]  ;;  %v1574_v32 = vor.u32 %v1858_v25, %v1573_v24  ;;  %v1602_v24 = vor.u32 %v1863_v14, %v1599_v15 }
  0x30   : > { %v1702_v33 = vor.u32 %v1890_v27, %v1701_v26 }
  0x3e   : > { %765 = vmatmul.bf16.gmra.mxu0 %v1534_v36  ;;  %845 = vmatmul.bf16.gmra.mxu2 %v1662_v37  ;;  %v1581_v36 = vld [vmem:[%s2326_s10 + $0x70] sm:$0xf]  ;;  %v1860_v37 = vld [vmem:[%s2326_s10 + $0x74] sm:$0xf0] }
  0x3f   : > { %934 = vmatmul.bf16.gmra.mxu1 %v1538_v38  ;;  %1014 = vmatmul.bf16.gmra.mxu3 %v1666_v39  ;;  %v1709_v38 = vld [vmem:[%s2326_s10 + $0x170] sm:$0xf]  ;;  %v1892_v39 = vld [vmem:[%s2326_s10 + $0x174] sm:$0xf0]  ;;  %v1582_v44 = vor.u32 %v1860_v37, %v1581_v36 }
  0x40   : > { %v1710_v45 = vor.u32 %v1892_v39, %v1709_v38 }
  0x4e   : > { %770 = vmatmul.bf16.gmra.mxu0 %v1542_v48  ;;  %850 = vmatmul.bf16.gmra.mxu2 %v1670_v49  ;;  %v1589_v48 = vld [vmem:[%s2326_s10 + $0x80] sm:$0xf]  ;;  %v1862_v49 = vld [vmem:[%s2326_s10 + $0x84] sm:$0xf0] }
  0x4f   : > { %939 = vmatmul.bf16.gmra.mxu1 %v1546_v50  ;;  %1019 = vmatmul.bf16.gmra.mxu3 %v1674_v51  ;;  %v1717_v50 = vld [vmem:[%s2326_s10 + $0x180] sm:$0xf]  ;;  %v1894_v51 = vld [vmem:[%s2326_s10 + $0x184] sm:$0xf0]  ;;  %v1590_v56 = vor.u32 %v1862_v49, %v1589_v48 }
  0x50   : > { %v1718_v57 = vor.u32 %v1894_v51, %v1717_v50  ;;  %v1733_v48 = vld [vmem:[%s2326_s10 + $0x1a0] sm:$0xf]  ;;  %v1898_v51 = vld [vmem:[%s2326_s10 + $0x1a4] sm:$0xf0] }
  0x5e   : > { %775 = vmatmul.bf16.gmra.mxu0 %v1550_v60  ;;  %855 = vmatmul.bf16.gmra.mxu2 %v1678_v61  ;;  %v1722_v60 = vor.u32 %v1893_v54, %v1719_v55  ;;  %v1897_v54 = vld [vmem:[%s2326_s10 + $0x1a4] sm:$0xf]  ;;  %v1735_v55 = vld [vmem:[%s2326_s10 + $0x1a8] sm:$0xf0] }
  0x5f   : > { %944 = vmatmul.bf16.gmra.mxu1 %v1554_v62  ;;  %1024 = vmatmul.bf16.gmra.mxu3 %v1682_v63  ;;  %v2416_v63 = vld [vmem:[%s2654_s2] ss:$0 sm:$0xff] }
  0x6e   : > { %780 = vmatmul.bf16.gmra.mxu0 %v1558_v8  ;;  %860 = vmatmul.bf16.gmra.mxu2 %v1686_v9  ;;  %v1597_v8 = vld [vmem:[%s2326_s10 + $0x90] sm:$0xf]  ;;  %v1864_v9 = vld [vmem:[%s2326_s10 + $0x94] sm:$0xf0] }
  0x6f   : > { %949 = vmatmul.bf16.gmra.mxu1 %v1562_v10  ;;  %1029 = vmatmul.bf16.gmra.mxu3 %v1690_v11  ;;  %v1725_v10 = vld [vmem:[%s2326_s10 + $0x190] sm:$0xf] }
  0x7e   : > { %785 = vmatmul.bf16.gmra.mxu0 %v1566_v20  ;;  %865 = vmatmul.bf16.gmra.mxu2 %v1694_v21 }
  0x7f   : > { %954 = vmatmul.bf16.gmra.mxu1 %v1570_v22  ;;  %1034 = vmatmul.bf16.gmra.mxu3 %v1698_v23  ;;  %v1598_v22 = vor.u32 %v1864_v9, %v1597_v8  ;;  %v1726_v23 = vor.u32 %v1896_v13, %v1725_v10 }
  0x8e   : > { %790 = vmatmul.bf16.gmra.mxu0 %v1574_v32  ;;  %870 = vmatmul.bf16.gmra.mxu2 %v1702_v33 }
  0x8f   : > { %959 = vmatmul.bf16.gmra.mxu1 %v1578_v34  ;;  %1039 = vmatmul.bf16.gmra.mxu3 %v1706_v35 }
  0x9e   : > { %795 = vmatmul.bf16.gmra.mxu0 %v1582_v44  ;;  %875 = vmatmul.bf16.gmra.mxu2 %v1710_v45 }
  0x9f   : > { %964 = vmatmul.bf16.gmra.mxu1 %v1586_v46  ;;  %1044 = vmatmul.bf16.gmra.mxu3 %v1714_v47  ;;  %v1605_v46 = vld [vmem:[%s2326_s10 + $0xa0] sm:$0xf]  ;;  %v1866_v47 = vld [vmem:[%s2326_s10 + $0xa4] sm:$0xf0] }
  0xab   : > { %v761_v58 = vpop.f32.mrf.mxu0 }
  0xac   : > { %v930_v61 = vpop.f32.mrf.mxu1 }
  0xad   : > { %v931_v62 = vadd.f32 %v930_v61, %v761_v58  ;;  %v1734_v61 = vor.u32 %v1898_v51, %v1733_v48 }
  0xae   : > { %800 = vmatmul.bf16.gmra.mxu0 %v1590_v56  ;;  %880 = vmatmul.bf16.gmra.mxu2 %v1718_v57 }
  0xaf   : > { %969 = vmatmul.bf16.gmra.mxu1 %v1594_v59  ;;  %1049 = vmatmul.bf16.gmra.mxu3 %v1722_v60  ;;  %v1094_v2 = vmul.f32 %v2416_v63, %v931_v62  ;;  %v1606_v60 = vor.u32 %v1866_v47, %v1605_v46  ;;  %v1610_v62 = vor.u32 %v1865_v52, %v1607_v53 }
  0xb1   : > { %v841_v0 = vpop.f32.mrf.mxu2  ;;  %v1162_v11 = vadd.f32 %v2422_v3, %v1094_v2 }
  0xb2   : > { %v1010_v1 = vpop.f32.mrf.mxu3 }
  0xb3   : > { %v763_v4 = vpop.f32.mrf.mxu0  ;;  %v1011_v6 = vadd.f32 %v1010_v1, %v841_v0  ;;  %v1226_v25 = vmax.f32 %v1162_v11, 0.0 }
  0xb4   : > { %v932_v5 = vpop.f32.mrf.mxu1 }
  0xb5   : > { %v933_v7 = vadd.f32 %v932_v5, %v763_v4  ;;  %v1126_v18 = vmul.f32 %v2416_v63, %v1011_v6  ;;  %v1738_v5 = vor.u32 %v1897_v54, %v1735_v55 }
  0xb7   : > { %v1095_v12 = vmul.f32 %v2416_v63, %v933_v7  ;;  %v1194_v31 = vadd.f32 %v2422_v3, %v1126_v18 }
  0xb9   : > { %v1163_v19 = vadd.f32 %v2422_v3, %v1095_v12  ;;  %v843_v20 = vpop.f32.mrf.mxu2  ;;  %v1258_v36 = vmax.f32 %v1194_v31, 0.0  ;;  %v1743_v31 = vld [vmem:[%s2326_s10 + $0x1b8] sm:$0xf0] }
  0xba   : > { %v1012_v21 = vpop.f32.mrf.mxu3 }
  0xbb   : > { %v1227_v26 = vmax.f32 %v1163_v19, 0.0  ;;  %v1013_v27 = vadd.f32 %v1012_v21, %v843_v20  ;;  %v766_v28 = vpop.f32.mrf.mxu0 }
  0xbc   : > { %v935_v30 = vpop.f32.mrf.mxu1 }
  0xbd   : > { %v1928_v32 = vpack.c.bf16 %v1227_v26, %v1226_v25  ;;  %v1127_v33 = vmul.f32 %v2416_v63, %v1013_v27  ;;  %v936_v35 = vadd.f32 %v935_v30, %v766_v28  ;;  %v1900_v27 = vld [vmem:[%s2326_s10 + $0x1b4] sm:$0xf0]  ;;  %v1867_v28 = vld [vmem:[%s2326_s10 + $0xb4] sm:$0xf] }
  0xbe   : > { %805 = vmatmul.bf16.gmra.mxu0 %v1598_v22  ;;  %885 = vmatmul.bf16.gmra.mxu2 %v1726_v23  ;;  %v1613_v22 = vld [vmem:[%s2326_s10 + $0xb0] sm:$0xf]  ;;  %v1868_v23 = vld [vmem:[%s2326_s10 + $0xb4] sm:$0xf0]  ;;  %v1899_v30 = vld [vmem:[%s2326_s10 + $0x1b4] sm:$0xf] }
  0xbf   : > { %1929 = vst [vmem:[%s2440_s5] sm:$0xff] %v1928_v32   ;;  %v1195_v34 = vadd.f32 %v2422_v3, %v1127_v33  ;;  %974 = vmatmul.bf16.gmra.mxu1 %v1602_v24  ;;  %1054 = vmatmul.bf16.gmra.mxu3 %v1730_v29  ;;  %v1096_v41 = vmul.f32 %v2416_v63, %v936_v35  ;;  %v1741_v24 = vld [vmem:[%s2326_s10 + $0x1b0] sm:$0xf]  ;;  %v1615_v29 = vld [vmem:[%s2326_s10 + $0xb8] sm:$0xf0] }
  0xc1   : > { %v1259_v37 = vmax.f32 %v1195_v34, 0.0  ;;  %v846_v38 = vpop.f32.mrf.mxu2  ;;  %v1164_v49 = vadd.f32 %v2422_v3, %v1096_v41 }
  0xc2   : > { %v1015_v39 = vpop.f32.mrf.mxu3 }
  0xc3   : > { %v2008_v40 = vpack.c.bf16 %v1259_v37, %v1258_v36  ;;  %v768_v42 = vpop.f32.mrf.mxu0  ;;  %v1016_v44 = vadd.f32 %v1015_v39, %v846_v38  ;;  %v1228_v0 = vmax.f32 %v1164_v49, 0.0  ;;  %v1614_v36 = vor.u32 %v1868_v23, %v1613_v22 }
  0xc4   : > { %v937_v43 = vpop.f32.mrf.mxu1  ;;  %v1742_v37 = vor.u32 %v1900_v27, %v1741_v24  ;;  %v1618_v38 = vor.u32 %v1867_v28, %v1615_v29 }
  0xc5   : > { %2100 = vst [vmem:[%s2440_s5 + $0x80] sm:$0xff] %v2008_v40   ;;  %v938_v45 = vadd.f32 %v937_v43, %v768_v42  ;;  %v1128_v56 = vmul.f32 %v2416_v63, %v1016_v44  ;;  %v1746_v43 = vor.u32 %v1899_v30, %v1743_v31 }
  0xc7   : > { %v1097_v50 = vmul.f32 %v2416_v63, %v938_v45  ;;  %v1196_v7 = vadd.f32 %v2422_v3, %v1128_v56 }
  0xc9   : > { %v1165_v57 = vadd.f32 %v2422_v3, %v1097_v50  ;;  %v848_v58 = vpop.f32.mrf.mxu2  ;;  %v1260_v12 = vmax.f32 %v1196_v7, 0.0  ;;  %v1751_v7 = vld [vmem:[%s2326_s10 + $0x1c8] sm:$0xf0] }
  0xca   : > { %v1017_v59 = vpop.f32.mrf.mxu3 }
  0xcb   : > { %v1229_v1 = vmax.f32 %v1165_v57, 0.0  ;;  %v1018_v2 = vadd.f32 %v1017_v59, %v848_v58  ;;  %v771_v4 = vpop.f32.mrf.mxu0 }
  0xcc   : > { %v940_v6 = vpop.f32.mrf.mxu1 }
  0xcd   : > { %v1933_v8 = vpack.c.bf16 %v1229_v1, %v1228_v0  ;;  %v1129_v9 = vmul.f32 %v2416_v63, %v1018_v2  ;;  %v941_v11 = vadd.f32 %v940_v6, %v771_v4  ;;  %v1902_v2 = vld [vmem:[%s2326_s10 + $0x1c4] sm:$0xf0]  ;;  %v1869_v4 = vld [vmem:[%s2326_s10 + $0xc4] sm:$0xf] }
  0xce   : > { %810 = vmatmul.bf16.gmra.mxu0 %v1606_v60  ;;  %890 = vmatmul.bf16.gmra.mxu2 %v1734_v61  ;;  %v1621_v60 = vld [vmem:[%s2326_s10 + $0xc0] sm:$0xf]  ;;  %v1870_v61 = vld [vmem:[%s2326_s10 + $0xc4] sm:$0xf0]  ;;  %v1901_v6 = vld [vmem:[%s2326_s10 + $0x1c4] sm:$0xf] }
  0xcf   : > { %2085 = vst [vmem:[%s2440_s5 + $0x8] sm:$0xff] %v1933_v8   ;;  %v1197_v10 = vadd.f32 %v2422_v3, %v1129_v9  ;;  %979 = vmatmul.bf16.gmra.mxu1 %v1610_v62  ;;  %1059 = vmatmul.bf16.gmra.mxu3 %v1738_v5  ;;  %v1098_v17 = vmul.f32 %v2416_v63, %v941_v11  ;;  %v1749_v62 = vld [vmem:[%s2326_s10 + $0x1c0] sm:$0xf]  ;;  %v1623_v5 = vld [vmem:[%s2326_s10 + $0xc8] sm:$0xf0] }
  0xd1   : > { %v1261_v13 = vmax.f32 %v1197_v10, 0.0  ;;  %v851_v14 = vpop.f32.mrf.mxu2  ;;  %v1166_v25 = vadd.f32 %v2422_v3, %v1098_v17 }
  0xd2   : > { %v1020_v15 = vpop.f32.mrf.mxu3 }
  0xd3   : > { %v2013_v16 = vpack.c.bf16 %v1261_v13, %v1260_v12  ;;  %v773_v18 = vpop.f32.mrf.mxu0  ;;  %v1021_v20 = vadd.f32 %v1020_v15, %v851_v14  ;;  %v1230_v39 = vmax.f32 %v1166_v25, 0.0  ;;  %v1622_v12 = vor.u32 %v1870_v61, %v1621_v60 }
  0xd4   : > { %v942_v19 = vpop.f32.mrf.mxu1  ;;  %v1750_v13 = vor.u32 %v1902_v2, %v1749_v62  ;;  %v1626_v14 = vor.u32 %v1869_v4, %v1623_v5 }
  0xd5   : > { %2101 = vst [vmem:[%s2440_s5 + $0x88] sm:$0xff] %v2013_v16   ;;  %v943_v21 = vadd.f32 %v942_v19, %v773_v18  ;;  %v1130_v32 = vmul.f32 %v2416_v63, %v1021_v20  ;;  %v1754_v19 = vor.u32 %v1901_v6, %v1751_v7 }
  0xd7   : > { %v1099_v26 = vmul.f32 %v2416_v63, %v943_v21  ;;  %v1198_v45 = vadd.f32 %v2422_v3, %v1130_v32 }
  0xd9   : > { %v1167_v33 = vadd.f32 %v2422_v3, %v1099_v26  ;;  %v853_v34 = vpop.f32.mrf.mxu2  ;;  %v1262_v50 = vmax.f32 %v1198_v45, 0.0  ;;  %v1759_v45 = vld [vmem:[%s2326_s10 + $0x1d8] sm:$0xf0] }
  0xda   : > { %v1022_v35 = vpop.f32.mrf.mxu3 }
  0xdb   : > { %v1231_v40 = vmax.f32 %v1167_v33, 0.0  ;;  %v1023_v41 = vadd.f32 %v1022_v35, %v853_v34  ;;  %v776_v42 = vpop.f32.mrf.mxu0 }
  0xdc   : > { %v945_v44 = vpop.f32.mrf.mxu1 }
  0xdd   : > { %v1938_v46 = vpack.c.bf16 %v1231_v40, %v1230_v39  ;;  %v1131_v47 = vmul.f32 %v2416_v63, %v1023_v41  ;;  %v946_v49 = vadd.f32 %v945_v44, %v776_v42  ;;  %v1904_v41 = vld [vmem:[%s2326_s10 + $0x1d4] sm:$0xf0]  ;;  %v1871_v42 = vld [vmem:[%s2326_s10 + $0xd4] sm:$0xf] }
  0xde   : > { %815 = vmatmul.bf16.gmra.mxu0 %v1614_v36  ;;  %895 = vmatmul.bf16.gmra.mxu2 %v1742_v37  ;;  %v1629_v36 = vld [vmem:[%s2326_s10 + $0xd0] sm:$0xf]  ;;  %v1872_v37 = vld [vmem:[%s2326_s10 + $0xd4] sm:$0xf0]  ;;  %v1903_v44 = vld [vmem:[%s2326_s10 + $0x1d4] sm:$0xf] }
  0xdf   : > { %2086 = vst [vmem:[%s2440_s5 + $0x10] sm:$0xff] %v1938_v46   ;;  %v1199_v48 = vadd.f32 %v2422_v3, %v1131_v47  ;;  %984 = vmatmul.bf16.gmra.mxu1 %v1618_v38  ;;  %1064 = vmatmul.bf16.gmra.mxu3 %v1746_v43  ;;  %v1100_v55 = vmul.f32 %v2416_v63, %v946_v49  ;;  %v1757_v38 = vld [vmem:[%s2326_s10 + $0x1d0] sm:$0xf]  ;;  %v1631_v43 = vld [vmem:[%s2326_s10 + $0xd8] sm:$0xf0] }
  0xe1   : > { %v1263_v51 = vmax.f32 %v1199_v48, 0.0  ;;  %v856_v52 = vpop.f32.mrf.mxu2  ;;  %v1168_v0 = vadd.f32 %v2422_v3, %v1100_v55 }
  0xe2   : > { %v1025_v53 = vpop.f32.mrf.mxu3 }
  0xe3   : > { %v2018_v54 = vpack.c.bf16 %v1263_v51, %v1262_v50  ;;  %v778_v56 = vpop.f32.mrf.mxu0  ;;  %v1026_v58 = vadd.f32 %v1025_v53, %v856_v52  ;;  %v1232_v15 = vmax.f32 %v1168_v0, 0.0  ;;  %v1630_v50 = vor.u32 %v1872_v37, %v1629_v36 }
  0xe4   : > { %v947_v57 = vpop.f32.mrf.mxu1  ;;  %v1758_v51 = vor.u32 %v1904_v41, %v1757_v38  ;;  %v1634_v52 = vor.u32 %v1871_v42, %v1631_v43 }
  0xe5   : > { %2102 = vst [vmem:[%s2440_s5 + $0x90] sm:$0xff] %v2018_v54   ;;  %v948_v59 = vadd.f32 %v947_v57, %v778_v56  ;;  %v1132_v8 = vmul.f32 %v2416_v63, %v1026_v58  ;;  %v1762_v57 = vor.u32 %v1903_v44, %v1759_v45 }
  0xe7   : > { %v1101_v1 = vmul.f32 %v2416_v63, %v948_v59  ;;  %v1200_v21 = vadd.f32 %v2422_v3, %v1132_v8 }
  0xe9   : > { %v1169_v9 = vadd.f32 %v2422_v3, %v1101_v1  ;;  %v858_v10 = vpop.f32.mrf.mxu2  ;;  %v1264_v26 = vmax.f32 %v1200_v21, 0.0  ;;  %v1767_v21 = vld [vmem:[%s2326_s10 + $0x1e8] sm:$0xf0] }
  0xea   : > { %v1027_v11 = vpop.f32.mrf.mxu3 }
  0xeb   : > { %v1233_v16 = vmax.f32 %v1169_v9, 0.0  ;;  %v1028_v17 = vadd.f32 %v1027_v11, %v858_v10  ;;  %v781_v18 = vpop.f32.mrf.mxu0 }
  0xec   : > { %v950_v20 = vpop.f32.mrf.mxu1 }
  0xed   : > { %v1943_v22 = vpack.c.bf16 %v1233_v16, %v1232_v15  ;;  %v1133_v23 = vmul.f32 %v2416_v63, %v1028_v17  ;;  %v951_v25 = vadd.f32 %v950_v20, %v781_v18  ;;  %v1906_v17 = vld [vmem:[%s2326_s10 + $0x1e4] sm:$0xf0]  ;;  %v1873_v18 = vld [vmem:[%s2326_s10 + $0xe4] sm:$0xf] }
  0xee   : > { %820 = vmatmul.bf16.gmra.mxu0 %v1622_v12  ;;  %900 = vmatmul.bf16.gmra.mxu2 %v1750_v13  ;;  %v1637_v12 = vld [vmem:[%s2326_s10 + $0xe0] sm:$0xf]  ;;  %v1874_v13 = vld [vmem:[%s2326_s10 + $0xe4] sm:$0xf0]  ;;  %v1905_v20 = vld [vmem:[%s2326_s10 + $0x1e4] sm:$0xf] }
  0xef   : > { %2087 = vst [vmem:[%s2440_s5 + $0x18] sm:$0xff] %v1943_v22   ;;  %v1201_v24 = vadd.f32 %v2422_v3, %v1133_v23  ;;  %989 = vmatmul.bf16.gmra.mxu1 %v1626_v14  ;;  %1069 = vmatmul.bf16.gmra.mxu3 %v1754_v19  ;;  %v1102_v31 = vmul.f32 %v2416_v63, %v951_v25  ;;  %v1765_v14 = vld [vmem:[%s2326_s10 + $0x1e0] sm:$0xf]  ;;  %v1639_v19 = vld [vmem:[%s2326_s10 + $0xe8] sm:$0xf0] }
  0xf1   : > { %v1265_v27 = vmax.f32 %v1201_v24, 0.0  ;;  %v861_v28 = vpop.f32.mrf.mxu2  ;;  %v1170_v39 = vadd.f32 %v2422_v3, %v1102_v31 }
  0xf2   : > { %v1030_v29 = vpop.f32.mrf.mxu3 }
  0xf3   : > { %v2023_v30 = vpack.c.bf16 %v1265_v27, %v1264_v26  ;;  %v783_v32 = vpop.f32.mrf.mxu0  ;;  %v1031_v34 = vadd.f32 %v1030_v29, %v861_v28  ;;  %v1234_v53 = vmax.f32 %v1170_v39, 0.0  ;;  %v1638_v26 = vor.u32 %v1874_v13, %v1637_v12 }
  0xf4   : > { %v952_v33 = vpop.f32.mrf.mxu1  ;;  %v1766_v27 = vor.u32 %v1906_v17, %v1765_v14  ;;  %v1642_v28 = vor.u32 %v1873_v18, %v1639_v19 }
  0xf5   : > { %2103 = vst [vmem:[%s2440_s5 + $0x98] sm:$0xff] %v2023_v30   ;;  %v953_v35 = vadd.f32 %v952_v33, %v783_v32  ;;  %v1134_v46 = vmul.f32 %v2416_v63, %v1031_v34  ;;  %v1770_v33 = vor.u32 %v1905_v20, %v1767_v21 }
  0xf7   : > { %v1103_v40 = vmul.f32 %v2416_v63, %v953_v35  ;;  %v1202_v59 = vadd.f32 %v2422_v3, %v1134_v46 }
  0xf9   : > { %v1171_v47 = vadd.f32 %v2422_v3, %v1103_v40  ;;  %v863_v48 = vpop.f32.mrf.mxu2  ;;  %v1266_v1 = vmax.f32 %v1202_v59, 0.0  ;;  %v1775_v59 = vld [vmem:[%s2326_s10 + $0x1f8] sm:$0xf0] }
  0xfa   : > { %v1032_v49 = vpop.f32.mrf.mxu3 }
  0xfb   : > { %v1235_v54 = vmax.f32 %v1171_v47, 0.0  ;;  %v1033_v55 = vadd.f32 %v1032_v49, %v863_v48  ;;  %v786_v56 = vpop.f32.mrf.mxu0 }
  0xfc   : > { %v955_v58 = vpop.f32.mrf.mxu1 }
  0xfd   : > { %v1948_v60 = vpack.c.bf16 %v1235_v54, %v1234_v53  ;;  %v1135_v61 = vmul.f32 %v2416_v63, %v1033_v55  ;;  %v956_v0 = vadd.f32 %v955_v58, %v786_v56  ;;  %v1908_v55 = vld [vmem:[%s2326_s10 + $0x1f4] sm:$0xf0]  ;;  %v1875_v56 = vld [vmem:[%s2326_s10 + $0xf4] sm:$0xf] }
  0xfe   : > { %825 = vmatmul.bf16.gmra.mxu0 %v1630_v50  ;;  %905 = vmatmul.bf16.gmra.mxu2 %v1758_v51  ;;  %v1645_v50 = vld [vmem:[%s2326_s10 + $0xf0] sm:$0xf]  ;;  %v1876_v51 = vld [vmem:[%s2326_s10 + $0xf4] sm:$0xf0]  ;;  %v1907_v58 = vld [vmem:[%s2326_s10 + $0x1f4] sm:$0xf] }
  0xff   : > { %2088 = vst [vmem:[%s2440_s5 + $0x20] sm:$0xff] %v1948_v60   ;;  %v1203_v62 = vadd.f32 %v2422_v3, %v1135_v61  ;;  %994 = vmatmul.bf16.gmra.mxu1 %v1634_v52  ;;  %1074 = vmatmul.bf16.gmra.mxu3 %v1762_v57  ;;  %v1104_v7 = vmul.f32 %v2416_v63, %v956_v0  ;;  %v1773_v52 = vld [vmem:[%s2326_s10 + $0x1f0] sm:$0xf]  ;;  %v1647_v57 = vld [vmem:[%s2326_s10 + $0xf8] sm:$0xf0] }
 0x101   : > { %v1267_v2 = vmax.f32 %v1203_v62, 0.0  ;;  %v866_v4 = vpop.f32.mrf.mxu2  ;;  %v1172_v15 = vadd.f32 %v2422_v3, %v1104_v7 }
 0x102   : > { %v1035_v5 = vpop.f32.mrf.mxu3 }
 0x103   : > { %v2028_v6 = vpack.c.bf16 %v1267_v2, %v1266_v1  ;;  %v788_v8 = vpop.f32.mrf.mxu0  ;;  %v1036_v10 = vadd.f32 %v1035_v5, %v866_v4  ;;  %v1236_v29 = vmax.f32 %v1172_v15, 0.0  ;;  %v1646_v1 = vor.u32 %v1876_v51, %v1645_v50 }
 0x104   : > { %v957_v9 = vpop.f32.mrf.mxu1  ;;  %v1774_v2 = vor.u32 %v1908_v55, %v1773_v52  ;;  %v1650_v4 = vor.u32 %v1875_v56, %v1647_v57 }
 0x105   : > { %2104 = vst [vmem:[%s2440_s5 + $0xa0] sm:$0xff] %v2028_v6   ;;  %v958_v11 = vadd.f32 %v957_v9, %v788_v8  ;;  %v1136_v22 = vmul.f32 %v2416_v63, %v1036_v10  ;;  %v1778_v9 = vor.u32 %v1907_v58, %v1775_v59 }
 0x107   : > { %v1105_v16 = vmul.f32 %v2416_v63, %v958_v11  ;;  %v1204_v35 = vadd.f32 %v2422_v3, %v1136_v22 }
 0x109   : > { %v1173_v23 = vadd.f32 %v2422_v3, %v1105_v16  ;;  %v868_v24 = vpop.f32.mrf.mxu2  ;;  %v1268_v40 = vmax.f32 %v1204_v35, 0.0 }
 0x10a   : > { %v1037_v25 = vpop.f32.mrf.mxu3 }
 0x10b   : > { %v1237_v30 = vmax.f32 %v1173_v23, 0.0  ;;  %v1038_v31 = vadd.f32 %v1037_v25, %v868_v24  ;;  %v791_v32 = vpop.f32.mrf.mxu0 }
 0x10c   : > { %v960_v34 = vpop.f32.mrf.mxu1 }
 0x10d   : > { %v1953_v36 = vpack.c.bf16 %v1237_v30, %v1236_v29  ;;  %v1137_v37 = vmul.f32 %v2416_v63, %v1038_v31  ;;  %v961_v39 = vadd.f32 %v960_v34, %v791_v32 }
 0x10e   : > { %830 = vmatmul.bf16.gmra.mxu0 %v1638_v26  ;;  %910 = vmatmul.bf16.gmra.mxu2 %v1766_v27 }
 0x10f   : > { %2089 = vst [vmem:[%s2440_s5 + $0x28] sm:$0xff] %v1953_v36   ;;  %v1205_v38 = vadd.f32 %v2422_v3, %v1137_v37  ;;  %999 = vmatmul.bf16.gmra.mxu1 %v1642_v28  ;;  %1079 = vmatmul.bf16.gmra.mxu3 %v1770_v33  ;;  %v1106_v45 = vmul.f32 %v2416_v63, %v961_v39 }
 0x111   : > { %v1269_v41 = vmax.f32 %v1205_v38, 0.0  ;;  %v871_v42 = vpop.f32.mrf.mxu2  ;;  %v1174_v53 = vadd.f32 %v2422_v3, %v1106_v45 }
 0x112   : > { %v1040_v43 = vpop.f32.mrf.mxu3 }
 0x113   : > { %v2033_v44 = vpack.c.bf16 %v1269_v41, %v1268_v40  ;;  %v793_v46 = vpop.f32.mrf.mxu0  ;;  %v1041_v48 = vadd.f32 %v1040_v43, %v871_v42  ;;  %v1238_v5 = vmax.f32 %v1174_v53, 0.0 }
 0x114   : > { %v962_v47 = vpop.f32.mrf.mxu1 }
 0x115   : > { %2105 = vst [vmem:[%s2440_s5 + $0xa8] sm:$0xff] %v2033_v44   ;;  %v963_v49 = vadd.f32 %v962_v47, %v793_v46  ;;  %v1138_v60 = vmul.f32 %v2416_v63, %v1041_v48 }
 0x117   : > { %v1107_v54 = vmul.f32 %v2416_v63, %v963_v49  ;;  %v1206_v11 = vadd.f32 %v2422_v3, %v1138_v60 }
 0x119   : > { %v1175_v61 = vadd.f32 %v2422_v3, %v1107_v54  ;;  %v873_v62 = vpop.f32.mrf.mxu2  ;;  %v1270_v16 = vmax.f32 %v1206_v11, 0.0 }
 0x11a   : > { %v1042_v0 = vpop.f32.mrf.mxu3 }
 0x11b   : > { %v1239_v6 = vmax.f32 %v1175_v61, 0.0  ;;  %v1043_v7 = vadd.f32 %v1042_v0, %v873_v62  ;;  %v796_v8 = vpop.f32.mrf.mxu0 }
 0x11c   : > { %v965_v10 = vpop.f32.mrf.mxu1 }
 0x11d   : > { %v1958_v12 = vpack.c.bf16 %v1239_v6, %v1238_v5  ;;  %v1139_v13 = vmul.f32 %v2416_v63, %v1043_v7  ;;  %v966_v15 = vadd.f32 %v965_v10, %v796_v8 }
 0x11e   : > { %835 = vmatmul.bf16.gmra.mxu0 %v1646_v1  ;;  %915 = vmatmul.bf16.gmra.mxu2 %v1774_v2 }
 0x11f   : > { %2090 = vst [vmem:[%s2440_s5 + $0x30] sm:$0xff] %v1958_v12   ;;  %v1207_v14 = vadd.f32 %v2422_v3, %v1139_v13  ;;  %1004 = vmatmul.bf16.gmra.mxu1 %v1650_v4  ;;  %1084 = vmatmul.bf16.gmra.mxu3 %v1778_v9  ;;  %v1108_v21 = vmul.f32 %v2416_v63, %v966_v15 }
 0x121   : > { %v1271_v17 = vmax.f32 %v1207_v14, 0.0  ;;  %v876_v18 = vpop.f32.mrf.mxu2  ;;  %v1176_v26 = vadd.f32 %v2422_v3, %v1108_v21 }
 0x122   : > { %v1045_v19 = vpop.f32.mrf.mxu3 }
 0x123   : > { %v2038_v20 = vpack.c.bf16 %v1271_v17, %v1270_v16  ;;  %v798_v22 = vpop.f32.mrf.mxu0  ;;  %v1046_v24 = vadd.f32 %v1045_v19, %v876_v18  ;;  %v1240_v32 = vmax.f32 %v1176_v26, 0.0 }
 0x124   : > { %v967_v23 = vpop.f32.mrf.mxu1 }
 0x125   : > { %2106 = vst [vmem:[%s2440_s5 + $0xb0] sm:$0xff] %v2038_v20   ;;  %v968_v25 = vadd.f32 %v967_v23, %v798_v22  ;;  %v1140_v28 = vmul.f32 %v2416_v63, %v1046_v24 }
 0x127   : > { %v1109_v27 = vmul.f32 %v2416_v63, %v968_v25  ;;  %v1208_v37 = vadd.f32 %v2422_v3, %v1140_v28 }
 0x129   : > { %v1177_v29 = vadd.f32 %v2422_v3, %v1109_v27  ;;  %v878_v30 = vpop.f32.mrf.mxu2  ;;  %v1272_v42 = vmax.f32 %v1208_v37, 0.0 }
 0x12a   : > { %v1047_v31 = vpop.f32.mrf.mxu3 }
 0x12b   : > { %v1241_v33 = vmax.f32 %v1177_v29, 0.0  ;;  %v1048_v34 = vadd.f32 %v1047_v31, %v878_v30  ;;  %v801_v35 = vpop.f32.mrf.mxu0 }
 0x12c   : > { %v970_v36 = vpop.f32.mrf.mxu1 }
 0x12d   : > { %v1963_v38 = vpack.c.bf16 %v1241_v33, %v1240_v32  ;;  %v1141_v39 = vmul.f32 %v2416_v63, %v1048_v34  ;;  %v971_v41 = vadd.f32 %v970_v36, %v801_v35 }
 0x12f   : > { %2091 = vst [vmem:[%s2440_s5 + $0x38] sm:$0xff] %v1963_v38   ;;  %v1209_v40 = vadd.f32 %v2422_v3, %v1141_v39  ;;  %v1110_v47 = vmul.f32 %v2416_v63, %v971_v41 }
 0x131   : > { %v1273_v43 = vmax.f32 %v1209_v40, 0.0  ;;  %v881_v44 = vpop.f32.mrf.mxu2  ;;  %v1178_v52 = vadd.f32 %v2422_v3, %v1110_v47 }
 0x132   : > { %v1050_v45 = vpop.f32.mrf.mxu3 }
 0x133   : > { %v2043_v46 = vpack.c.bf16 %v1273_v43, %v1272_v42  ;;  %v803_v48 = vpop.f32.mrf.mxu0  ;;  %v1051_v50 = vadd.f32 %v1050_v45, %v881_v44  ;;  %v1242_v58 = vmax.f32 %v1178_v52, 0.0 }
 0x134   : > { %v972_v49 = vpop.f32.mrf.mxu1 }
 0x135   : > { %2107 = vst [vmem:[%s2440_s5 + $0xb8] sm:$0xff] %v2043_v46   ;;  %v973_v51 = vadd.f32 %v972_v49, %v803_v48  ;;  %v1142_v54 = vmul.f32 %v2416_v63, %v1051_v50 }
 0x137   : > { %v1111_v53 = vmul.f32 %v2416_v63, %v973_v51  ;;  %v1210_v0 = vadd.f32 %v2422_v3, %v1142_v54 }
 0x139   : > { %v1179_v55 = vadd.f32 %v2422_v3, %v1111_v53  ;;  %v883_v56 = vpop.f32.mrf.mxu2  ;;  %v1274_v6 = vmax.f32 %v1210_v0, 0.0 }
 0x13a   : > { %v1052_v57 = vpop.f32.mrf.mxu3 }
 0x13b   : > { %v1243_v59 = vmax.f32 %v1179_v55, 0.0  ;;  %v1053_v60 = vadd.f32 %v1052_v57, %v883_v56  ;;  %v806_v61 = vpop.f32.mrf.mxu0 }
 0x13c   : > { %v975_v62 = vpop.f32.mrf.mxu1 }
 0x13d   : > { %v1968_v1 = vpack.c.bf16 %v1243_v59, %v1242_v58  ;;  %v1143_v2 = vmul.f32 %v2416_v63, %v1053_v60  ;;  %v976_v5 = vadd.f32 %v975_v62, %v806_v61 }
 0x13f   : > { %2092 = vst [vmem:[%s2440_s5 + $0x40] sm:$0xff] %v1968_v1   ;;  %v1211_v4 = vadd.f32 %v2422_v3, %v1143_v2  ;;  %v1112_v11 = vmul.f32 %v2416_v63, %v976_v5 }
 0x141   : > { %v1275_v7 = vmax.f32 %v1211_v4, 0.0  ;;  %v886_v8 = vpop.f32.mrf.mxu2  ;;  %v1180_v16 = vadd.f32 %v2422_v3, %v1112_v11 }
 0x142   : > { %v1055_v9 = vpop.f32.mrf.mxu3 }
 0x143   : > { %v2048_v10 = vpack.c.bf16 %v1275_v7, %v1274_v6  ;;  %v808_v12 = vpop.f32.mrf.mxu0  ;;  %v1056_v14 = vadd.f32 %v1055_v9, %v886_v8  ;;  %v1244_v22 = vmax.f32 %v1180_v16, 0.0 }
 0x144   : > { %v977_v13 = vpop.f32.mrf.mxu1 }
 0x145   : > { %2108 = vst [vmem:[%s2440_s5 + $0xc0] sm:$0xff] %v2048_v10   ;;  %v978_v15 = vadd.f32 %v977_v13, %v808_v12  ;;  %v1144_v18 = vmul.f32 %v2416_v63, %v1056_v14 }
 0x147   : > { %v1113_v17 = vmul.f32 %v2416_v63, %v978_v15  ;;  %v1212_v27 = vadd.f32 %v2422_v3, %v1144_v18 }
 0x149   : > { %v1181_v19 = vadd.f32 %v2422_v3, %v1113_v17  ;;  %v888_v20 = vpop.f32.mrf.mxu2  ;;  %v1276_v32 = vmax.f32 %v1212_v27, 0.0 }
 0x14a   : > { %v1057_v21 = vpop.f32.mrf.mxu3 }
 0x14b   : > { %v1245_v23 = vmax.f32 %v1181_v19, 0.0  ;;  %v1058_v24 = vadd.f32 %v1057_v21, %v888_v20  ;;  %v811_v25 = vpop.f32.mrf.mxu0 }
 0x14c   : > { %v980_v26 = vpop.f32.mrf.mxu1 }
 0x14d   : > { %v1973_v28 = vpack.c.bf16 %v1245_v23, %v1244_v22  ;;  %v1145_v29 = vmul.f32 %v2416_v63, %v1058_v24  ;;  %v981_v31 = vadd.f32 %v980_v26, %v811_v25 }
 0x14f   : > { %2093 = vst [vmem:[%s2440_s5 + $0x48] sm:$0xff] %v1973_v28   ;;  %v1213_v30 = vadd.f32 %v2422_v3, %v1145_v29  ;;  %v1114_v37 = vmul.f32 %v2416_v63, %v981_v31 }
 0x151   : > { %v1277_v33 = vmax.f32 %v1213_v30, 0.0  ;;  %v891_v34 = vpop.f32.mrf.mxu2  ;;  %v1182_v42 = vadd.f32 %v2422_v3, %v1114_v37 }
 0x152   : > { %v1060_v35 = vpop.f32.mrf.mxu3 }
 0x153   : > { %v2053_v36 = vpack.c.bf16 %v1277_v33, %v1276_v32  ;;  %v813_v38 = vpop.f32.mrf.mxu0  ;;  %v1061_v40 = vadd.f32 %v1060_v35, %v891_v34  ;;  %v1246_v48 = vmax.f32 %v1182_v42, 0.0 }
 0x154   : > { %v982_v39 = vpop.f32.mrf.mxu1 }
 0x155   : > { %2109 = vst [vmem:[%s2440_s5 + $0xc8] sm:$0xff] %v2053_v36   ;;  %v983_v41 = vadd.f32 %v982_v39, %v813_v38  ;;  %v1146_v44 = vmul.f32 %v2416_v63, %v1061_v40 }
 0x157   : > { %v1115_v43 = vmul.f32 %v2416_v63, %v983_v41  ;;  %v1214_v53 = vadd.f32 %v2422_v3, %v1146_v44 }
 0x159   : > { %v1183_v45 = vadd.f32 %v2422_v3, %v1115_v43  ;;  %v893_v46 = vpop.f32.mrf.mxu2  ;;  %v1278_v58 = vmax.f32 %v1214_v53, 0.0 }
 0x15a   : > { %v1062_v47 = vpop.f32.mrf.mxu3 }
 0x15b   : > { %v1247_v49 = vmax.f32 %v1183_v45, 0.0  ;;  %v1063_v50 = vadd.f32 %v1062_v47, %v893_v46  ;;  %v816_v51 = vpop.f32.mrf.mxu0 }
 0x15c   : > { %v985_v52 = vpop.f32.mrf.mxu1 }
 0x15d   : > { %v1978_v54 = vpack.c.bf16 %v1247_v49, %v1246_v48  ;;  %v1147_v55 = vmul.f32 %v2416_v63, %v1063_v50  ;;  %v986_v57 = vadd.f32 %v985_v52, %v816_v51 }
 0x15f   : > { %2094 = vst [vmem:[%s2440_s5 + $0x50] sm:$0xff] %v1978_v54   ;;  %v1215_v56 = vadd.f32 %v2422_v3, %v1147_v55  ;;  %v1116_v0 = vmul.f32 %v2416_v63, %v986_v57 }
 0x161   : > { %v1279_v59 = vmax.f32 %v1215_v56, 0.0  ;;  %v896_v60 = vpop.f32.mrf.mxu2  ;;  %v1184_v6 = vadd.f32 %v2422_v3, %v1116_v0 }
 0x162   : > { %v1065_v61 = vpop.f32.mrf.mxu3 }
 0x163   : > { %v2058_v62 = vpack.c.bf16 %v1279_v59, %v1278_v58  ;;  %v818_v1 = vpop.f32.mrf.mxu0  ;;  %v1066_v4 = vadd.f32 %v1065_v61, %v896_v60  ;;  %v1248_v12 = vmax.f32 %v1184_v6, 0.0 }
 0x164   : > { %v987_v2 = vpop.f32.mrf.mxu1 }
 0x165   : > { %2110 = vst [vmem:[%s2440_s5 + $0xd0] sm:$0xff] %v2058_v62   ;;  %v988_v5 = vadd.f32 %v987_v2, %v818_v1  ;;  %v1148_v8 = vmul.f32 %v2416_v63, %v1066_v4 }
 0x167   : > { %v1117_v7 = vmul.f32 %v2416_v63, %v988_v5  ;;  %v1216_v17 = vadd.f32 %v2422_v3, %v1148_v8 }
 0x169   : > { %v1185_v9 = vadd.f32 %v2422_v3, %v1117_v7  ;;  %v898_v10 = vpop.f32.mrf.mxu2  ;;  %v1280_v22 = vmax.f32 %v1216_v17, 0.0 }
 0x16a   : > { %v1067_v11 = vpop.f32.mrf.mxu3 }
 0x16b   : > { %v1249_v13 = vmax.f32 %v1185_v9, 0.0  ;;  %v1068_v14 = vadd.f32 %v1067_v11, %v898_v10  ;;  %v821_v15 = vpop.f32.mrf.mxu0 }
 0x16c   : > { %v990_v16 = vpop.f32.mrf.mxu1 }
 0x16d   : > { %v1983_v18 = vpack.c.bf16 %v1249_v13, %v1248_v12  ;;  %v1149_v19 = vmul.f32 %v2416_v63, %v1068_v14  ;;  %v991_v21 = vadd.f32 %v990_v16, %v821_v15 }
 0x16f   : > { %2095 = vst [vmem:[%s2440_s5 + $0x58] sm:$0xff] %v1983_v18   ;;  %v1217_v20 = vadd.f32 %v2422_v3, %v1149_v19  ;;  %v1118_v27 = vmul.f32 %v2416_v63, %v991_v21 }
 0x171   : > { %v1281_v23 = vmax.f32 %v1217_v20, 0.0  ;;  %v901_v24 = vpop.f32.mrf.mxu2  ;;  %v1186_v32 = vadd.f32 %v2422_v3, %v1118_v27 }
 0x172   : > { %v1070_v25 = vpop.f32.mrf.mxu3 }
 0x173   : > { %v2063_v26 = vpack.c.bf16 %v1281_v23, %v1280_v22  ;;  %v823_v28 = vpop.f32.mrf.mxu0  ;;  %v1071_v30 = vadd.f32 %v1070_v25, %v901_v24  ;;  %v1250_v38 = vmax.f32 %v1186_v32, 0.0  ;;  %v2174_v23 = vld [vmem:[%s2654_s2] ss:$0 sm:$0xff] }
 0x174   : > { %v992_v29 = vpop.f32.mrf.mxu1 }
 0x175   : > { %2111 = vst [vmem:[%s2440_s5 + $0xd8] sm:$0xff] %v2063_v26   ;;  %v993_v31 = vadd.f32 %v992_v29, %v823_v28  ;;  %v1150_v34 = vmul.f32 %v2416_v63, %v1071_v30  ;;  %v2175_v26 = vld [vmem:[%s2655_s3] ss:$0 sm:$0xff] }
 0x177   : > { %v1119_v33 = vmul.f32 %v2416_v63, %v993_v31  ;;  %v1218_v43 = vadd.f32 %v2422_v3, %v1150_v34 }
 0x179   : > { %v1187_v35 = vadd.f32 %v2422_v3, %v1119_v33  ;;  %v903_v36 = vpop.f32.mrf.mxu2  ;;  %v1282_v48 = vmax.f32 %v1218_v43, 0.0 }
 0x17a   : > { %v1072_v37 = vpop.f32.mrf.mxu3 }
 0x17b   : > { %v1251_v39 = vmax.f32 %v1187_v35, 0.0  ;;  %v1073_v40 = vadd.f32 %v1072_v37, %v903_v36  ;;  %v826_v41 = vpop.f32.mrf.mxu0 }
 0x17c   : > { %v995_v42 = vpop.f32.mrf.mxu1 }
 0x17d   : > { %v1988_v44 = vpack.c.bf16 %v1251_v39, %v1250_v38  ;;  %v1151_v45 = vmul.f32 %v2416_v63, %v1073_v40  ;;  %v996_v47 = vadd.f32 %v995_v42, %v826_v41 }
 0x17f   : > { %2096 = vst [vmem:[%s2440_s5 + $0x60] sm:$0xff] %v1988_v44   ;;  %v1219_v46 = vadd.f32 %v2422_v3, %v1151_v45  ;;  %v1120_v53 = vmul.f32 %v2416_v63, %v996_v47 }
 0x181   : > { %v1283_v49 = vmax.f32 %v1219_v46, 0.0  ;;  %v906_v50 = vpop.f32.mrf.mxu2  ;;  %v1188_v58 = vadd.f32 %v2422_v3, %v1120_v53 }
 0x182   : > { %v1075_v51 = vpop.f32.mrf.mxu3 }
 0x183   : > { %v2068_v52 = vpack.c.bf16 %v1283_v49, %v1282_v48  ;;  %v828_v54 = vpop.f32.mrf.mxu0  ;;  %v1076_v56 = vadd.f32 %v1075_v51, %v906_v50  ;;  %v1252_v1 = vmax.f32 %v1188_v58, 0.0 }
 0x184   : > { %v997_v55 = vpop.f32.mrf.mxu1 }
 0x185   : > { %2112 = vst [vmem:[%s2440_s5 + $0xe0] sm:$0xff] %v2068_v52   ;;  %v998_v57 = vadd.f32 %v997_v55, %v828_v54  ;;  %v1152_v60 = vmul.f32 %v2416_v63, %v1076_v56 }
 0x187   : > { %v1121_v59 = vmul.f32 %v2416_v63, %v998_v57  ;;  %v1220_v7 = vadd.f32 %v2422_v3, %v1152_v60 }
 0x189   : > { %v1189_v61 = vadd.f32 %v2422_v3, %v1121_v59  ;;  %v908_v62 = vpop.f32.mrf.mxu2  ;;  %v1284_v12 = vmax.f32 %v1220_v7, 0.0 }
 0x18a   : > { %v1077_v0 = vpop.f32.mrf.mxu3 }
 0x18b   : > { %v1253_v2 = vmax.f32 %v1189_v61, 0.0  ;;  %v1078_v4 = vadd.f32 %v1077_v0, %v908_v62  ;;  %v831_v5 = vpop.f32.mrf.mxu0 }
 0x18c   : > { %v1000_v6 = vpop.f32.mrf.mxu1 }
 0x18d   : > { %v1993_v8 = vpack.c.bf16 %v1253_v2, %v1252_v1  ;;  %v1153_v9 = vmul.f32 %v2416_v63, %v1078_v4  ;;  %v1001_v11 = vadd.f32 %v1000_v6, %v831_v5 }
 0x18f   : > { %2097 = vst [vmem:[%s2440_s5 + $0x68] sm:$0xff] %v1993_v8   ;;  %v1221_v10 = vadd.f32 %v2422_v3, %v1153_v9  ;;  %v1122_v17 = vmul.f32 %v2416_v63, %v1001_v11 }
 0x191   : > { %v1285_v13 = vmax.f32 %v1221_v10, 0.0  ;;  %v911_v14 = vpop.f32.mrf.mxu2  ;;  %v1190_v22 = vadd.f32 %v2422_v3, %v1122_v17 }
 0x192   : > { %v1080_v15 = vpop.f32.mrf.mxu3 }
 0x193   : > { %v2073_v16 = vpack.c.bf16 %v1285_v13, %v1284_v12  ;;  %v833_v18 = vpop.f32.mrf.mxu0  ;;  %v1081_v20 = vadd.f32 %v1080_v15, %v911_v14  ;;  %v1254_v29 = vmax.f32 %v1190_v22, 0.0 }
 0x194   : > { %v1002_v19 = vpop.f32.mrf.mxu1 }
 0x195   : > { %2113 = vst [vmem:[%s2440_s5 + $0xe8] sm:$0xff] %v2073_v16   ;;  %v1003_v21 = vadd.f32 %v1002_v19, %v833_v18  ;;  %v1154_v25 = vmul.f32 %v2174_v23, %v1081_v20 }
 0x197   : > { %v1123_v24 = vmul.f32 %v2174_v23, %v1003_v21  ;;  %v1222_v33 = vadd.f32 %v2175_v26, %v1154_v25 }
 0x199   : > { %v1191_v27 = vadd.f32 %v2175_v26, %v1123_v24  ;;  %v913_v63 = vpop.f32.mrf.mxu2  ;;  %v1286_v38 = vmax.f32 %v1222_v33, 0.0 }
 0x19a   : > { %v1082_v28 = vpop.f32.mrf.mxu3 }
 0x19b   : > { %v1255_v30 = vmax.f32 %v1191_v27, 0.0  ;;  %v1083_v31 = vadd.f32 %v1082_v28, %v913_v63  ;;  %v836_v32 = vpop.f32.mrf.mxu0 }
 0x19c   : > { %v1005_v3 = vpop.f32.mrf.mxu1 }
 0x19d   : > { %v1998_v34 = vpack.c.bf16 %v1255_v30, %v1254_v29  ;;  %v1155_v35 = vmul.f32 %v2174_v23, %v1083_v31  ;;  %v1006_v37 = vadd.f32 %v1005_v3, %v836_v32 }
 0x19f   : > { %2098 = vst [vmem:[%s2440_s5 + $0x70] sm:$0xff] %v1998_v34   ;;  %v1223_v36 = vadd.f32 %v2175_v26, %v1155_v35  ;;  %v1124_v43 = vmul.f32 %v2174_v23, %v1006_v37 }
 0x1a1   : > { %v1287_v39 = vmax.f32 %v1223_v36, 0.0  ;;  %v916_v40 = vpop.f32.mrf.mxu2  ;;  %v1192_v48 = vadd.f32 %v2175_v26, %v1124_v43 }
 0x1a2   : > { %v1085_v41 = vpop.f32.mrf.mxu3 }
 0x1a3   : > { %v2078_v42 = vpack.c.bf16 %v1287_v39, %v1286_v38  ;;  %v838_v44 = vpop.f32.mrf.mxu0  ;;  %v1086_v46 = vadd.f32 %v1085_v41, %v916_v40  ;;  %v1256_v54 = vmax.f32 %v1192_v48, 0.0 }
 0x1a4   : > { %v1007_v45 = vpop.f32.mrf.mxu1 }
 0x1a5   : > { %2114 = vst [vmem:[%s2440_s5 + $0xf0] sm:$0xff] %v2078_v42   ;;  %v1008_v47 = vadd.f32 %v1007_v45, %v838_v44  ;;  %v1156_v50 = vmul.f32 %v2174_v23, %v1086_v46 }
 0x1a7   : > { %v1125_v49 = vmul.f32 %v2174_v23, %v1008_v47  ;;  %v1224_v57 = vadd.f32 %v2175_v26, %v1156_v50 }
 0x1a9   : > { %v1193_v51 = vadd.f32 %v2175_v26, %v1125_v49  ;;  %v918_v52 = vpop.f32.mrf.mxu2  ;;  %v1288_v61 = vmax.f32 %v1224_v57, 0.0 }
 0x1aa   : > { %v1087_v53 = vpop.f32.mrf.mxu3 }
 0x1ab   : > { %v1257_v55 = vmax.f32 %v1193_v51, 0.0  ;;  %v1088_v56 = vadd.f32 %v1087_v53, %v918_v52 }
 0x1ad   : > { %v2003_v58 = vpack.c.bf16 %v1257_v55, %v1256_v54  ;;  %v1157_v59 = vmul.f32 %v2174_v23, %v1088_v56 }
 0x1af   : > { %2099 = vst [vmem:[%s2440_s5 + $0x78] sm:$0xff] %v2003_v58   ;;  %v1225_v60 = vadd.f32 %v2175_v26, %v1157_v59 }
 0x1b1   : > { %v1289_v62 = vmax.f32 %v1225_v60, 0.0 }
 0x1b3   : > { %v2083_v0 = vpack.c.bf16 %v1289_v62, %v1288_v61 }
 0x1b5   : > { %2115 = vst [vmem:[%s2440_s5 + $0xf8] sm:$0xff] %v2083_v0  }
 0x1b6 PF: > { %s14_s19 = sadd.s32 1, %s2214_s19   ;;  %s2657_s15 = smov %s2206_s17 }
 0x1b7   : > { %p11_p7 = scmp.ge.s32.totalorder %s14_s19, 6   ;;  %s2658_s16 = smov %s2210_s18 }
 0x1b8   : > { %s2659_s17 = smov %s2662_s20  ;;  %s2660_s18 = smov %s2666_s21 }
 0x1b9   :  { %13 = sbr.rel (!%p11_p7) target bundleno = 3 (0x3), region = 66 }

// kernel: encoder_cnn_forward.21
= control target key start
LH: loop header
LB: loop body
LE: loop exit
PB: predicated region body
PF: predicated region fallthrough
CT: control target
= control target key end

     0   :  { %s1100_s15 = smov 0   ;;  %s1102_s16 = smov 0   ;;  %s1278_s0 = inlined_call_operand.vmem [shape: bf16[2,256,128], index: 0, kind: input, shape index: {}]   ;;  %s1279_s1 = inlined_call_operand.vmem [shape: bf16[128,128], index: 1, kind: input, shape index: {}]   ;;  %s1280_s2 = inlined_call_operand.vmem [shape: f32[1,128], index: 2, kind: input, shape index: {}]   ;;  %s1281_s3 = inlined_call_operand.vmem [shape: f32[1,128], index: 3, kind: input, shape index: {}]   ;;  %s1282_s4 = inlined_call_operand.vmem [shape: bf16[2,256,128], index: 4, kind: output, shape index: {}]  }
   0x1   :  { %s1104_s17 = smov 0  }
   0x2 LB: > { %s26_s18 = sadd.s32 1, %s1069_s16  ;;  %p777_p0 = scmp.ge.s32.totalorder %s1073_s17, 1  ;;  %s1073_s17 = sphi %s1104_s17, %s14_s17   ;;  %s1069_s16 = sphi %s1102_s16, %s1284_s16   ;;  %s1065_s15 = sphi %s1100_s15, %s1283_s15  }
   0x3   : > { %p28_p1 = scmp.ge.s32.totalorder %s26_s18, 2  ;;  %p183_p2 = scmp.lt.s32.totalorder %s1073_s17, 3 }
   0x5   : > { %s1286_s18 = smov (%p28_p1, %s26_s18), 0  ;;  %p184_p3 = pnand %p777_p0, %p183_p2 }
   0x6   : > { %p218_p4 = scmp.lt.s32.totalorder (!%p184_p3), %s1065_s15, 1 }
   0x7   : > { %187 = sbr.rel (%p184_p3) target bundleno = 243 (0xf3), region = 36 }
   0xc   : > { %v905_v0 = vld [vmem:[%s1279_s1 + $0x38] sm:$0xff]  ;;  %v904_v1 = vld [vmem:[%s1279_s1 + $0x30] sm:$0xff]  ;;  %v903_v2 = vld [vmem:[%s1279_s1 + $0x28] sm:$0xff]  ;;  %s1288_s15 = smov (!%p218_p4, %s1065_s15), 1 }
   0xd   : > { %429 = vmatpush.bf16.msra.mxu0 %v905_v0  ;;  %1001 = vmatpush.bf16.msra.mxu1 %v905_v0  ;;  %v902_v3 = vld [vmem:[%s1279_s1 + $0x20] sm:$0xff]  ;;  %v901_v4 = vld [vmem:[%s1279_s1 + $0x18] sm:$0xff]  ;;  %v900_v5 = vld [vmem:[%s1279_s1 + $0x10] sm:$0xff]  ;;  %s880_s7 = sshll.u32 %s1288_s15, 7 }
   0xe   : > { %1002 = vmatpush.bf16.msra.mxu2 %v905_v0  ;;  %1003 = vmatpush.bf16.msra.mxu3 %v905_v0  ;;  %v899_v6 = vld [vmem:[%s1279_s1 + $0x8] sm:$0xff]  ;;  %v898_v7 = vld [vmem:[%s1279_s1] sm:$0xff]  ;;  %s1154_s12 = scalar_lea.vmem %s1278_s0, %s880_s7  ;;  %s1197_s23 = scalar_lea.vmem %s1282_s4, %s880_s7 }
   0xf   : > { %v882_v8 = vld [vmem:[%s1154_s12] sm:$0xff]  ;;  %v883_v12 = vld [vmem:[%s1154_s12 + $0x8] sm:$0xff]  ;;  %v884_v16 = vld [vmem:[%s1154_s12 + $0x10] sm:$0xff] }
  0x10   : > { %v886_v9 = vld [vmem:[%s1154_s12 + $0x20] sm:$0xff]  ;;  %v887_v13 = vld [vmem:[%s1154_s12 + $0x28] sm:$0xff]  ;;  %v888_v17 = vld [vmem:[%s1154_s12 + $0x30] sm:$0xff] }
  0x11   : > { %430 = vmatpush.bf16.msra.mxu0 %v904_v1  ;;  %1004 = vmatpush.bf16.msra.mxu1 %v904_v1  ;;  %v890_v10 = vld [vmem:[%s1154_s12 + $0x40] sm:$0xff]  ;;  %v891_v14 = vld [vmem:[%s1154_s12 + $0x48] sm:$0xff]  ;;  %v892_v18 = vld [vmem:[%s1154_s12 + $0x50] sm:$0xff] }
  0x12   : > { %1005 = vmatpush.bf16.msra.mxu2 %v904_v1  ;;  %1006 = vmatpush.bf16.msra.mxu3 %v904_v1  ;;  %v894_v11 = vld [vmem:[%s1154_s12 + $0x60] sm:$0xff]  ;;  %v895_v15 = vld [vmem:[%s1154_s12 + $0x68] sm:$0xff]  ;;  %v896_v19 = vld [vmem:[%s1154_s12 + $0x70] sm:$0xff] }
  0x13   : > { %v885_v20 = vld [vmem:[%s1154_s12 + $0x18] sm:$0xff]  ;;  %v1175_v26 = vld [vmem:[%s1280_s2] ss:$0 sm:$0xff] }
  0x14   : > { %v889_v21 = vld [vmem:[%s1154_s12 + $0x38] sm:$0xff]  ;;  %v1181_v28 = vld [vmem:[%s1281_s3] ss:$0 sm:$0xff] }
  0x15   : > { %431 = vmatpush.bf16.msra.mxu0 %v903_v2  ;;  %1007 = vmatpush.bf16.msra.mxu1 %v903_v2  ;;  %v893_v22 = vld [vmem:[%s1154_s12 + $0x58] sm:$0xff] }
  0x16   : > { %1008 = vmatpush.bf16.msra.mxu2 %v903_v2  ;;  %1009 = vmatpush.bf16.msra.mxu3 %v903_v2  ;;  %v897_v23 = vld [vmem:[%s1154_s12 + $0x78] sm:$0xff] }
  0x19   : > { %432 = vmatpush.bf16.msra.mxu0 %v902_v3  ;;  %1010 = vmatpush.bf16.msra.mxu1 %v902_v3 }
  0x1a   : > { %1011 = vmatpush.bf16.msra.mxu2 %v902_v3  ;;  %1012 = vmatpush.bf16.msra.mxu3 %v902_v3 }
  0x1d   : > { %433 = vmatpush.bf16.msra.mxu0 %v901_v4  ;;  %1013 = vmatpush.bf16.msra.mxu1 %v901_v4 }
  0x1e   : > { %1014 = vmatpush.bf16.msra.mxu2 %v901_v4  ;;  %1015 = vmatpush.bf16.msra.mxu3 %v901_v4 }
  0x21   : > { %434 = vmatpush.bf16.msra.mxu0 %v900_v5  ;;  %1016 = vmatpush.bf16.msra.mxu1 %v900_v5 }
  0x22   : > { %1017 = vmatpush.bf16.msra.mxu2 %v900_v5  ;;  %1018 = vmatpush.bf16.msra.mxu3 %v900_v5 }
  0x25   : > { %435 = vmatpush.bf16.msra.mxu0 %v899_v6  ;;  %1019 = vmatpush.bf16.msra.mxu1 %v899_v6 }
  0x26   : > { %1020 = vmatpush.bf16.msra.mxu2 %v899_v6  ;;  %1021 = vmatpush.bf16.msra.mxu3 %v899_v6 }
  0x29   : > { %436 = vmatpush.bf16.msra.mxu0 %v898_v7  ;;  %1022 = vmatpush.bf16.msra.mxu1 %v898_v7 }
  0x2a   : > { %1023 = vmatpush.bf16.msra.mxu2 %v898_v7  ;;  %1024 = vmatpush.bf16.msra.mxu3 %v898_v7 }
  0x2c   : > { %437 = vmatmul.bf16.vlgmr.msra.gmra.mxu0 %v882_v8  ;;  %457 = vmatmul.bf16.vlgmr.msra.gmra.mxu1 %v886_v9 }
  0x2d   : > { %477 = vmatmul.bf16.vlgmr.msra.gmra.mxu2 %v890_v10  ;;  %497 = vmatmul.bf16.vlgmr.msra.gmra.mxu3 %v894_v11 }
  0x3c   : > { %442 = vmatmul.bf16.gmra.mxu0 %v883_v12  ;;  %462 = vmatmul.bf16.gmra.mxu1 %v887_v13 }
  0x3d   : > { %482 = vmatmul.bf16.gmra.mxu2 %v891_v14  ;;  %502 = vmatmul.bf16.gmra.mxu3 %v895_v15 }
  0x4c   : > { %447 = vmatmul.bf16.gmra.mxu0 %v884_v16  ;;  %467 = vmatmul.bf16.gmra.mxu1 %v888_v17 }
  0x4d   : > { %487 = vmatmul.bf16.gmra.mxu2 %v892_v18  ;;  %507 = vmatmul.bf16.gmra.mxu3 %v896_v19 }
  0x5c   : > { %452 = vmatmul.bf16.gmra.mxu0 %v885_v20  ;;  %472 = vmatmul.bf16.gmra.mxu1 %v889_v21 }
  0x5d   : > { %492 = vmatmul.bf16.gmra.mxu2 %v893_v22  ;;  %512 = vmatmul.bf16.gmra.mxu3 %v897_v23 }
  0xa9   : > { %v438_v24 = vpop.f32.mrf.mxu0  ;;  %v458_v25 = vpop.f32.mrf.mxu1 }
  0xaa   : > { %v522_v27 = vmul.f32 %v1175_v26, %v438_v24  ;;  %v530_v29 = vmul.f32 %v1175_v26, %v458_v25 }
  0xac   : > { %v558_v34 = vadd.f32 %v1181_v28, %v522_v27  ;;  %v566_v35 = vadd.f32 %v1181_v28, %v530_v29 }
  0xae   : > { %v590_v42 = vmax.f32 %v558_v34, 0.0  ;;  %v598_v43 = vmax.f32 %v566_v35, 0.0 }
  0xb0   : > { %v478_v30 = vpop.f32.mrf.mxu2  ;;  %v498_v31 = vpop.f32.mrf.mxu3 }
  0xb1   : > { %v440_v32 = vpop.f32.mrf.mxu0  ;;  %v460_v33 = vpop.f32.mrf.mxu1  ;;  %v538_v40 = vmul.f32 %v1175_v26, %v478_v30  ;;  %v546_v41 = vmul.f32 %v1175_v26, %v498_v31 }
  0xb2   : > { %v523_v36 = vmul.f32 %v1175_v26, %v440_v32  ;;  %v531_v37 = vmul.f32 %v1175_v26, %v460_v33 }
  0xb3   : > { %v574_v50 = vadd.f32 %v1181_v28, %v538_v40  ;;  %v582_v51 = vadd.f32 %v1181_v28, %v546_v41 }
  0xb4   : > { %v559_v38 = vadd.f32 %v1181_v28, %v523_v36  ;;  %v567_v39 = vadd.f32 %v1181_v28, %v531_v37 }
  0xb5   : > { %v606_v58 = vmax.f32 %v574_v50, 0.0  ;;  %v614_v59 = vmax.f32 %v582_v51, 0.0 }
  0xb6   : > { %v591_v44 = vmax.f32 %v559_v38, 0.0  ;;  %v599_v45 = vmax.f32 %v567_v39, 0.0 }
  0xb8   : > { %v909_v46 = vpack.c.bf16 %v591_v44, %v590_v42  ;;  %v929_v47 = vpack.c.bf16 %v599_v45, %v598_v43  ;;  %v480_v48 = vpop.f32.mrf.mxu2  ;;  %v500_v49 = vpop.f32.mrf.mxu3 }
  0xb9   : > { %v539_v52 = vmul.f32 %v1175_v26, %v480_v48  ;;  %v547_v53 = vmul.f32 %v1175_v26, %v500_v49  ;;  %v443_v54 = vpop.f32.mrf.mxu0  ;;  %v463_v55 = vpop.f32.mrf.mxu1 }
  0xba   : > { %910 = vst [vmem:[%s1197_s23] sm:$0xff] %v909_v46   ;;  %v524_v62 = vmul.f32 %v1175_v26, %v443_v54  ;;  %v532_v63 = vmul.f32 %v1175_v26, %v463_v55 }
  0xbb   : > { %989 = vst [vmem:[%s1197_s23 + $0x20] sm:$0xff] %v929_v47   ;;  %v575_v56 = vadd.f32 %v1181_v28, %v539_v52  ;;  %v583_v57 = vadd.f32 %v1181_v28, %v547_v53 }
  0xbc   : > { %v560_v6 = vadd.f32 %v1181_v28, %v524_v62  ;;  %v568_v7 = vadd.f32 %v1181_v28, %v532_v63 }
  0xbd   : > { %v607_v60 = vmax.f32 %v575_v56, 0.0  ;;  %v615_v61 = vmax.f32 %v583_v57, 0.0 }
  0xbe   : > { %v592_v14 = vmax.f32 %v560_v6, 0.0  ;;  %v600_v15 = vmax.f32 %v568_v7, 0.0 }
  0xbf   : > { %v949_v0 = vpack.c.bf16 %v607_v60, %v606_v58  ;;  %v969_v1 = vpack.c.bf16 %v615_v61, %v614_v59 }
  0xc0   : > { %v483_v2 = vpop.f32.mrf.mxu2  ;;  %v503_v3 = vpop.f32.mrf.mxu3 }
  0xc1   : > { %993 = vst [vmem:[%s1197_s23 + $0x40] sm:$0xff] %v949_v0   ;;  %v445_v4 = vpop.f32.mrf.mxu0  ;;  %v465_v5 = vpop.f32.mrf.mxu1  ;;  %v540_v12 = vmul.f32 %v1175_v26, %v483_v2  ;;  %v548_v13 = vmul.f32 %v1175_v26, %v503_v3 }
  0xc2   : > { %997 = vst [vmem:[%s1197_s23 + $0x60] sm:$0xff] %v969_v1   ;;  %v525_v8 = vmul.f32 %v1175_v26, %v445_v4  ;;  %v533_v9 = vmul.f32 %v1175_v26, %v465_v5 }
  0xc3   : > { %v576_v22 = vadd.f32 %v1181_v28, %v540_v12  ;;  %v584_v23 = vadd.f32 %v1181_v28, %v548_v13 }
  0xc4   : > { %v561_v10 = vadd.f32 %v1181_v28, %v525_v8  ;;  %v569_v11 = vadd.f32 %v1181_v28, %v533_v9 }
  0xc5   : > { %v608_v32 = vmax.f32 %v576_v22, 0.0  ;;  %v616_v33 = vmax.f32 %v584_v23, 0.0 }
  0xc6   : > { %v593_v16 = vmax.f32 %v561_v10, 0.0  ;;  %v601_v17 = vmax.f32 %v569_v11, 0.0 }
  0xc8   : > { %v914_v18 = vpack.c.bf16 %v593_v16, %v592_v14  ;;  %v934_v19 = vpack.c.bf16 %v601_v17, %v600_v15  ;;  %v485_v20 = vpop.f32.mrf.mxu2  ;;  %v505_v21 = vpop.f32.mrf.mxu3 }
  0xc9   : > { %v541_v24 = vmul.f32 %v1175_v26, %v485_v20  ;;  %v549_v25 = vmul.f32 %v1175_v26, %v505_v21  ;;  %v448_v27 = vpop.f32.mrf.mxu0  ;;  %v468_v29 = vpop.f32.mrf.mxu1 }
  0xca   : > { %986 = vst [vmem:[%s1197_s23 + $0x8] sm:$0xff] %v914_v18   ;;  %v526_v36 = vmul.f32 %v1175_v26, %v448_v27  ;;  %v534_v37 = vmul.f32 %v1175_v26, %v468_v29 }
  0xcb   : > { %990 = vst [vmem:[%s1197_s23 + $0x28] sm:$0xff] %v934_v19   ;;  %v577_v30 = vadd.f32 %v1181_v28, %v541_v24  ;;  %v585_v31 = vadd.f32 %v1181_v28, %v549_v25 }
  0xcc   : > { %v562_v44 = vadd.f32 %v1181_v28, %v526_v36  ;;  %v570_v45 = vadd.f32 %v1181_v28, %v534_v37 }
  0xcd   : > { %v609_v34 = vmax.f32 %v577_v30, 0.0  ;;  %v617_v35 = vmax.f32 %v585_v31, 0.0 }
  0xce   : > { %v594_v52 = vmax.f32 %v562_v44, 0.0  ;;  %v602_v53 = vmax.f32 %v570_v45, 0.0 }
  0xcf   : > { %v954_v38 = vpack.c.bf16 %v609_v34, %v608_v32  ;;  %v974_v39 = vpack.c.bf16 %v617_v35, %v616_v33 }
  0xd0   : > { %v488_v40 = vpop.f32.mrf.mxu2  ;;  %v508_v41 = vpop.f32.mrf.mxu3 }
  0xd1   : > { %994 = vst [vmem:[%s1197_s23 + $0x48] sm:$0xff] %v954_v38   ;;  %v450_v42 = vpop.f32.mrf.mxu0  ;;  %v470_v43 = vpop.f32.mrf.mxu1  ;;  %v542_v50 = vmul.f32 %v1175_v26, %v488_v40  ;;  %v550_v51 = vmul.f32 %v1175_v26, %v508_v41 }
  0xd2   : > { %998 = vst [vmem:[%s1197_s23 + $0x68] sm:$0xff] %v974_v39   ;;  %v527_v46 = vmul.f32 %v1175_v26, %v450_v42  ;;  %v535_v47 = vmul.f32 %v1175_v26, %v470_v43 }
  0xd3   : > { %v578_v60 = vadd.f32 %v1181_v28, %v542_v50  ;;  %v586_v61 = vadd.f32 %v1181_v28, %v550_v51 }
  0xd4   : > { %v563_v48 = vadd.f32 %v1181_v28, %v527_v46  ;;  %v571_v49 = vadd.f32 %v1181_v28, %v535_v47 }
  0xd5   : > { %v610_v4 = vmax.f32 %v578_v60, 0.0  ;;  %v618_v5 = vmax.f32 %v586_v61, 0.0 }
  0xd6   : > { %v595_v54 = vmax.f32 %v563_v48, 0.0  ;;  %v603_v55 = vmax.f32 %v571_v49, 0.0 }
  0xd8   : > { %v919_v56 = vpack.c.bf16 %v595_v54, %v594_v52  ;;  %v939_v57 = vpack.c.bf16 %v603_v55, %v602_v53  ;;  %v490_v58 = vpop.f32.mrf.mxu2  ;;  %v510_v59 = vpop.f32.mrf.mxu3 }
  0xd9   : > { %v543_v62 = vmul.f32 %v1175_v26, %v490_v58  ;;  %v551_v63 = vmul.f32 %v1175_v26, %v510_v59  ;;  %v453_v0 = vpop.f32.mrf.mxu0  ;;  %v473_v1 = vpop.f32.mrf.mxu1 }
  0xda   : > { %987 = vst [vmem:[%s1197_s23 + $0x10] sm:$0xff] %v919_v56   ;;  %v528_v8 = vmul.f32 %v1175_v26, %v453_v0  ;;  %v536_v9 = vmul.f32 %v1175_v26, %v473_v1 }
  0xdb   : > { %991 = vst [vmem:[%s1197_s23 + $0x30] sm:$0xff] %v939_v57   ;;  %v579_v2 = vadd.f32 %v1181_v28, %v543_v62  ;;  %v587_v3 = vadd.f32 %v1181_v28, %v551_v63 }
  0xdc   : > { %v564_v16 = vadd.f32 %v1181_v28, %v528_v8  ;;  %v572_v17 = vadd.f32 %v1181_v28, %v536_v9 }
  0xdd   : > { %v611_v6 = vmax.f32 %v579_v2, 0.0  ;;  %v619_v7 = vmax.f32 %v587_v3, 0.0 }
  0xde   : > { %v596_v24 = vmax.f32 %v564_v16, 0.0  ;;  %v604_v25 = vmax.f32 %v572_v17, 0.0 }
  0xdf   : > { %v959_v10 = vpack.c.bf16 %v611_v6, %v610_v4  ;;  %v979_v11 = vpack.c.bf16 %v619_v7, %v618_v5 }
  0xe0   : > { %v493_v12 = vpop.f32.mrf.mxu2  ;;  %v513_v13 = vpop.f32.mrf.mxu3 }
  0xe1   : > { %995 = vst [vmem:[%s1197_s23 + $0x50] sm:$0xff] %v959_v10   ;;  %v455_v14 = vpop.f32.mrf.mxu0  ;;  %v475_v15 = vpop.f32.mrf.mxu1  ;;  %v544_v22 = vmul.f32 %v1175_v26, %v493_v12  ;;  %v552_v23 = vmul.f32 %v1175_v26, %v513_v13 }
  0xe2   : > { %999 = vst [vmem:[%s1197_s23 + $0x70] sm:$0xff] %v979_v11   ;;  %v529_v18 = vmul.f32 %v1175_v26, %v455_v14  ;;  %v537_v19 = vmul.f32 %v1175_v26, %v475_v15 }
  0xe3   : > { %v580_v34 = vadd.f32 %v1181_v28, %v544_v22  ;;  %v588_v35 = vadd.f32 %v1181_v28, %v552_v23 }
  0xe4   : > { %v565_v20 = vadd.f32 %v1181_v28, %v529_v18  ;;  %v573_v21 = vadd.f32 %v1181_v28, %v537_v19 }
  0xe5   : > { %v612_v40 = vmax.f32 %v580_v34, 0.0  ;;  %v620_v41 = vmax.f32 %v588_v35, 0.0 }
  0xe6   : > { %v597_v27 = vmax.f32 %v565_v20, 0.0  ;;  %v605_v29 = vmax.f32 %v573_v21, 0.0 }
  0xe8   : > { %v924_v30 = vpack.c.bf16 %v597_v27, %v596_v24  ;;  %v944_v31 = vpack.c.bf16 %v605_v29, %v604_v25  ;;  %v495_v32 = vpop.f32.mrf.mxu2  ;;  %v515_v33 = vpop.f32.mrf.mxu3 }
  0xe9   : > { %v545_v36 = vmul.f32 %v1175_v26, %v495_v32  ;;  %v553_v37 = vmul.f32 %v1175_v26, %v515_v33 }
  0xea   : > { %988 = vst [vmem:[%s1197_s23 + $0x18] sm:$0xff] %v924_v30  }
  0xeb   : > { %992 = vst [vmem:[%s1197_s23 + $0x38] sm:$0xff] %v944_v31   ;;  %v581_v38 = vadd.f32 %v1181_v28, %v545_v36  ;;  %v589_v39 = vadd.f32 %v1181_v28, %v553_v37 }
  0xed   : > { %v613_v42 = vmax.f32 %v581_v38, 0.0  ;;  %v621_v43 = vmax.f32 %v589_v39, 0.0 }
  0xef   : > { %v964_v44 = vpack.c.bf16 %v613_v42, %v612_v40  ;;  %v984_v45 = vpack.c.bf16 %v621_v43, %v620_v41 }
  0xf1   : > { %996 = vst [vmem:[%s1197_s23 + $0x58] sm:$0xff] %v964_v44  }
  0xf2   : > { %1000 = vst [vmem:[%s1197_s23 + $0x78] sm:$0xff] %v984_v45  }
  0xf3 PF: > { %s14_s17 = sadd.s32 1, %s1073_s17   ;;  %s1283_s15 = smov %s1069_s16 }
  0xf4   : > { %p11_p5 = scmp.ge.s32.totalorder %s14_s17, 4   ;;  %s1284_s16 = smov %s1286_s18 }
  0xf6   :  { %13 = sbr.rel (!%p11_p5) target bundleno = 2 (0x2), region = 66 }

// kernel: encoder_cnn_forward.20
= control target key start
LH: loop header
LB: loop body
LE: loop exit
PB: predicated region body
PF: predicated region fallthrough
CT: control target
= control target key end

     0   :  { %s2470_s6 = smov 0   ;;  %s2733_s0 = inlined_call_operand.vmem [shape: bf16[2,68,17,128], index: 0, kind: input, shape index: {}]   ;;  %s2734_s1 = inlined_call_operand.vmem [shape: bf16[2,16,16,128], index: 1, kind: output, shape index: {}]  }
   0x1 LB: > { %s1906_s7 = sadd.s32 4294967295, %s2458_s6   ;;  %p1910_p0 = scmp.ge.s32.totalorder %s2458_s6, 1  ;;  %s2458_s6 = sphi %s2470_s6, %s11_s6  }
   0x2   : > { %p87_p1 = scmp.lt.s32.totalorder %s2458_s6, 3 }
   0x4   : > { %p88_p2 = pnand %p1910_p0, %p87_p1 }
   0x5   : > { %p107_p3 = scmp.lt.s32.totalorder (!%p88_p2), %s1906_s7, 1 }
   0x6   : > { %91 = sbr.rel (%p88_p2) target bundleno = 201 (0xc9), region = 24 }
   0xb   : > { %s2736_s7 = smov (!%p107_p3, %s1906_s7), 1  ;;  %vm422_vm0 = vcmask 1046528  }
   0xc   : > { %s2443_s8 = smul.u32 816, %s2736_s7  ;;  %s2108_s12 = sshll.u32 %s2736_s7, 7 }
   0xd   : > { %s2523_s15 = scalar_lea.vmem %s2734_s1, %s2108_s12 }
   0xe   : > { %s2484_s11 = scalar_lea.vmem %s2733_s0, %s2443_s8 }
   0xf   : > { %v2110_v0 = vld [vmem:[%s2484_s11] sm:$0xff]   ;;  %v1914_v1 = vld [vmem:[%s2484_s11 + $0xcc] sm:$0xff]   ;;  %v310_v2 = vld [vmem:[%s2484_s11 + $0x8] sm:$0x1] }
  0x10   : > { %v2111_v3 = vunpack.c.l.bf16 %v2110_v0  ;;  %v2112_v4 = vunpack.c.h.bf16 %v2110_v0  ;;  %v214_v5 = vunpack.c.l.bf16 %v1914_v1  ;;  %v215_v6 = vunpack.c.h.bf16 %v1914_v1  ;;  %v2396_v7 = vld [vmem:[%s2484_s11 + $0x198] sm:$0xff]   ;;  %v1978_v8 = vld [vmem:[%s2484_s11 + $0x264] sm:$0xff]   ;;  %v2010_v9 = vld [vmem:[%s2484_s11 + $0x1a0] sm:$0x1] }
  0x11   : > { %v358_v10 = vunpack.c.l.bf16 %v310_v2  ;;  %v2175_v11 = vunpack.c.l.bf16 %v2396_v7  ;;  %v2176_v12 = vunpack.c.h.bf16 %v2396_v7  ;;  %v825_v13 = vunpack.c.l.bf16 %v1978_v8  ;;  %v2026_v14 = vld [vmem:[%s2484_s11 + $0xc] sm:$0xff]   ;;  %v2494_v19 = vld [vmem:[%s2484_s11 + $0xd8] sm:$0xff]   ;;  %v2090_v24 = vld [vmem:[%s2484_s11 + $0x14] sm:$0x1] }
  0x12   : > { %v246_v15 = vmax.f32 %v2111_v3, %v214_v5  ;;  %v247_v16 = vmax.f32 %v2112_v4, %v215_v6  ;;  %v423_v17 = vrot.slane %v2111_v3, 1  ;;  %v424_v18 = vrot.slane %v2112_v4, 1  ;;  %v119_v33 = vld [vmem:[%s2484_s11 + $0xc] sm:$0xff]   ;;  %v311_v38 = vld [vmem:[%s2484_s11 + $0x14] sm:$0x1]  ;;  %v1948_v39 = vld [vmem:[%s2484_s11 + $0x1a4] sm:$0xff]  }
  0x13   : > { %v426_v20 = vrot.slane %v358_v10, 1  ;;  %v826_v21 = vunpack.c.h.bf16 %v1978_v8  ;;  %v969_v22 = vunpack.c.l.bf16 %v2010_v9  ;;  %v1033_v23 = vrot.slane %v2175_v11, 1  ;;  %v2404_v52 = vld [vmem:[%s2484_s11 + $0x270] sm:$0xff]   ;;  %v2011_v57 = vld [vmem:[%s2484_s11 + $0x1ac] sm:$0x1]  ;;  %v2412_v2 = vld [vmem:[%s2484_s11 + $0x18] sm:$0xff]  }
  0x14   : > { %v425_v25 = vsel %vm422_vm0, %v423_v17, %v424_v18  ;;  %v1034_v26 = vrot.slane %v2176_v12, 1  ;;  %v1274_v27 = vunpack.c.l.bf16 %v2026_v14  ;;  %v1275_v28 = vunpack.c.h.bf16 %v2026_v14 }
  0x15   : > { %v427_v29 = vsel %vm422_vm0, %v424_v18, %v426_v20  ;;  %v535_v30 = vmax.f32 %v246_v15, %v425_v25  ;;  %v1036_v31 = vrot.slane %v969_v22, 1  ;;  %v2271_v32 = vunpack.c.l.bf16 %v2494_v19  ;;  %v2091_v20 = vld [vmem:[%s2484_s11 + $0x20] sm:$0x1] }
  0x16   : > { %v536_v34 = vmax.f32 %v247_v16, %v427_v29  ;;  %v1035_v35 = vsel %vm422_vm0, %v1033_v23, %v1034_v26  ;;  %v2272_v36 = vunpack.c.h.bf16 %v2494_v19  ;;  %v1579_v37 = vunpack.c.l.bf16 %v2090_v24 }
  0x17   : > { %v696_v40 = vmax.f32 %v535_v30, %v2175_v11  ;;  %v1037_v41 = vsel %vm422_vm0, %v1034_v26, %v1036_v31  ;;  %v1643_v42 = vrot.slane %v1274_v27, 1  ;;  %v1644_v43 = vrot.slane %v1275_v28, 1  ;;  %v2060_v11 = vld [vmem:[%s2484_s11 + $0xe4] sm:$0xff]   ;;  %v312_v30 = vld [vmem:[%s2484_s11 + $0x20] sm:$0x1] }
  0x18   : > { %v697_v44 = vmax.f32 %v536_v34, %v2176_v12  ;;  %v1646_v45 = vrot.slane %v1579_v37, 1  ;;  %v184_v46 = vunpack.c.l.bf16 %v119_v33  ;;  %v185_v47 = vunpack.c.h.bf16 %v119_v33 }
  0x19   : > { %v857_v48 = vmax.f32 %v696_v40, %v825_v13  ;;  %v1645_v49 = vsel %vm422_vm0, %v1643_v42, %v1644_v43  ;;  %v359_v50 = vunpack.c.l.bf16 %v311_v38  ;;  %v666_v51 = vunpack.c.l.bf16 %v1948_v39 }
  0x1a   : > { %v858_v53 = vmax.f32 %v697_v44, %v826_v21  ;;  %v1647_v54 = vsel %vm422_vm0, %v1644_v43, %v1646_v45  ;;  %v248_v55 = vmax.f32 %v184_v46, %v2271_v32  ;;  %v249_v56 = vmax.f32 %v185_v47, %v2272_v36  ;;  %v1918_v21 = vld [vmem:[%s2484_s11 + $0xe4] sm:$0xff]   ;;  %v1982_v44 = vld [vmem:[%s2484_s11 + $0x27c] sm:$0xff]  }
  0x1b   : > { %v1145_v58 = vmax.f32 %v857_v48, %v1035_v35  ;;  %v428_v59 = vrot.slane %v184_v46, 1  ;;  %v429_v60 = vrot.slane %v185_v47, 1  ;;  %v431_v61 = vrot.slane %v359_v50, 1  ;;  %v2397_v35 = vld [vmem:[%s2484_s11 + $0x1b0] sm:$0xff]  }
  0x1c   : > { %v1146_v62 = vmax.f32 %v858_v53, %v1037_v41  ;;  %v667_v63 = vunpack.c.h.bf16 %v1948_v39  ;;  %v2207_v0 = vunpack.c.l.bf16 %v2404_v52  ;;  %v2208_v1 = vunpack.c.h.bf16 %v2404_v52 }
  0x1d   : > { %v1306_v3 = vmax.f32 %v1145_v58, %v1274_v27  ;;  %v430_v4 = vsel %vm422_vm0, %v428_v59, %v429_v60  ;;  %v432_v5 = vsel %vm422_vm0, %v429_v60, %v431_v61  ;;  %v970_v6 = vunpack.c.l.bf16 %v2011_v57  ;;  %v2030_v58 = vld [vmem:[%s2484_s11 + $0x24] sm:$0xff]  }
  0x1e   : > { %v1307_v7 = vmax.f32 %v1146_v62, %v1275_v28  ;;  %v537_v8 = vmax.f32 %v248_v55, %v430_v4  ;;  %v538_v9 = vmax.f32 %v249_v56, %v432_v5  ;;  %v1038_v10 = vrot.slane %v666_v51, 1  ;;  %v2092_v4 = vld [vmem:[%s2484_s11 + $0x2c] sm:$0x1] }
  0x1f   : > { %v1467_v12 = vmax.f32 %v1306_v3, %v2271_v32  ;;  %v1039_v13 = vrot.slane %v667_v63, 1  ;;  %v1041_v14 = vrot.slane %v970_v6, 1  ;;  %v2239_v15 = vunpack.c.l.bf16 %v2412_v2 }
  0x20   : > { %v1468_v16 = vmax.f32 %v1307_v7, %v2272_v36  ;;  %v698_v17 = vmax.f32 %v537_v8, %v666_v51  ;;  %v699_v18 = vmax.f32 %v538_v9, %v667_v63  ;;  %v2240_v19 = vunpack.c.h.bf16 %v2412_v2  ;;  %v2421_v63 = vld [vmem:[%s2484_s11 + $0xf0] sm:$0xff]   ;;  %v123_v9 = vld [vmem:[%s2484_s11 + $0x24] sm:$0xff]  }
  0x21   : > { %v1755_v22 = vmax.f32 %v1467_v12, %v1645_v49  ;;  %v1040_v23 = vsel %vm422_vm0, %v1038_v10, %v1039_v13  ;;  %v1042_v24 = vsel %vm422_vm0, %v1039_v13, %v1041_v14  ;;  %v1437_v25 = vunpack.c.l.bf16 %v2060_v11  ;;  %v2012_v49 = vld [vmem:[%s2484_s11 + $0x1b8] sm:$0x1]  ;;  %v313_v14 = vld [vmem:[%s2484_s11 + $0x2c] sm:$0x1] }
  0x22   : > { %v1756_v26 = vmax.f32 %v1468_v16, %v1647_v54  ;;  %v859_v27 = vmax.f32 %v698_v17, %v2207_v0  ;;  %v860_v28 = vmax.f32 %v699_v18, %v2208_v1  ;;  %v1438_v29 = vunpack.c.h.bf16 %v2060_v11 }
  0x23   : > { %v1580_v31 = vunpack.c.l.bf16 %v2091_v20  ;;  %v1648_v32 = vrot.slane %v2239_v15, 1  ;;  %v1649_v33 = vrot.slane %v2240_v19, 1  ;;  %v218_v34 = vunpack.c.l.bf16 %v1918_v21 }
  0x24   : > { %v2304_v36 = vpack.c.bf16 %v1756_v26, %v1755_v22  ;;  %v1147_v37 = vmax.f32 %v859_v27, %v1040_v23  ;;  %v1148_v38 = vmax.f32 %v860_v28, %v1042_v24  ;;  %v219_v39 = vunpack.c.h.bf16 %v1918_v21  ;;  %v1952_v27 = vld [vmem:[%s2484_s11 + $0x1bc] sm:$0xff]  }
  0x25   : > { %v1650_v40 = vsel %vm422_vm0, %v1648_v32, %v1649_v33  ;;  %v1651_v41 = vrot.slane %v1580_v31, 1  ;;  %v250_v42 = vmax.f32 %v2239_v15, %v218_v34  ;;  %v360_v43 = vunpack.c.l.bf16 %v312_v30  ;;  %v2405_v32 = vld [vmem:[%s2484_s11 + $0x288] sm:$0xff]  }
  0x26   : > { %2305 = vst [vmem:[%s2523_s15] sm:$0xff] %v2304_v36   ;;  %v1308_v45 = vmax.f32 %v1147_v37, %v2239_v15  ;;  %v1309_v46 = vmax.f32 %v1148_v38, %v2240_v19  ;;  %v251_v47 = vmax.f32 %v2240_v19, %v219_v39  ;;  %v2179_v48 = vunpack.c.l.bf16 %v2397_v35  ;;  %v2013_v37 = vld [vmem:[%s2484_s11 + $0x1c4] sm:$0x1] }
  0x27   : > { %v1652_v50 = vsel %vm422_vm0, %v1649_v33, %v1651_v41  ;;  %v436_v51 = vrot.slane %v360_v43, 1  ;;  %v539_v52 = vmax.f32 %v250_v42, %v1650_v40  ;;  %v2180_v53 = vunpack.c.h.bf16 %v2397_v35  ;;  %v2413_v42 = vld [vmem:[%s2484_s11 + $0x30] sm:$0xff]  }
  0x28   : > { %v1469_v54 = vmax.f32 %v1308_v45, %v1437_v25  ;;  %v1470_v55 = vmax.f32 %v1309_v46, %v1438_v29  ;;  %v829_v56 = vunpack.c.l.bf16 %v1982_v44  ;;  %v830_v57 = vunpack.c.h.bf16 %v1982_v44 }
  0x29   : > { %v437_v59 = vsel %vm422_vm0, %v1649_v33, %v436_v51  ;;  %v700_v60 = vmax.f32 %v539_v52, %v2179_v48  ;;  %v971_v61 = vunpack.c.l.bf16 %v2012_v49  ;;  %v1043_v62 = vrot.slane %v2179_v48, 1  ;;  %v2064_v51 = vld [vmem:[%s2484_s11 + $0xfc] sm:$0xff]  }
  0x2a   : > { %v1757_v0 = vmax.f32 %v1469_v54, %v1650_v40  ;;  %v1758_v1 = vmax.f32 %v1470_v55, %v1652_v50  ;;  %v540_v2 = vmax.f32 %v251_v47, %v437_v59  ;;  %v1044_v3 = vrot.slane %v2180_v53, 1 }
  0x2b   : > { %v861_v5 = vmax.f32 %v700_v60, %v829_v56  ;;  %v1046_v6 = vrot.slane %v971_v61, 1  ;;  %v1278_v7 = vunpack.c.l.bf16 %v2030_v58  ;;  %v1279_v8 = vunpack.c.h.bf16 %v2030_v58  ;;  %v2093_v56 = vld [vmem:[%s2484_s11 + $0x38] sm:$0x1]  ;;  %v1922_v61 = vld [vmem:[%s2484_s11 + $0xfc] sm:$0xff]  }
  0x2c   : > { %v2309_v10 = vpack.c.bf16 %v1758_v1, %v1757_v0  ;;  %v701_v11 = vmax.f32 %v540_v2, %v2180_v53  ;;  %v1045_v12 = vsel %vm422_vm0, %v1043_v62, %v1044_v3  ;;  %v2275_v13 = vunpack.c.l.bf16 %v2421_v63  ;;  %v314_v2 = vld [vmem:[%s2484_s11 + $0x38] sm:$0x1] }
  0x2d   : > { %v1047_v15 = vsel %vm422_vm0, %v1044_v3, %v1046_v6  ;;  %v1149_v16 = vmax.f32 %v861_v5, %v1045_v12  ;;  %v2276_v17 = vunpack.c.h.bf16 %v2421_v63  ;;  %v1581_v18 = vunpack.c.l.bf16 %v2092_v4 }
  0x2e   : > { %2428 = vst [vmem:[%s2523_s15 + $0x8] sm:$0xff] %v2309_v10   ;;  %v862_v19 = vmax.f32 %v701_v11, %v830_v57  ;;  %v1653_v20 = vrot.slane %v1278_v7, 1  ;;  %v1654_v21 = vrot.slane %v1279_v8, 1  ;;  %v188_v22 = vunpack.c.l.bf16 %v123_v9 }
  0x2f   : > { %v1310_v23 = vmax.f32 %v1149_v16, %v1278_v7  ;;  %v1656_v24 = vrot.slane %v1581_v18, 1  ;;  %v189_v25 = vunpack.c.h.bf16 %v123_v9  ;;  %v361_v26 = vunpack.c.l.bf16 %v313_v14  ;;  %v2398_v7 = vld [vmem:[%s2484_s11 + $0x1c8] sm:$0xff]   ;;  %v1986_v16 = vld [vmem:[%s2484_s11 + $0x294] sm:$0xff]  }
  0x30   : > { %v1150_v28 = vmax.f32 %v862_v19, %v1047_v15  ;;  %v1655_v29 = vsel %vm422_vm0, %v1653_v20, %v1654_v21  ;;  %v252_v30 = vmax.f32 %v188_v22, %v2275_v13  ;;  %v438_v31 = vrot.slane %v188_v22, 1 }
  0x31   : > { %v1471_v33 = vmax.f32 %v1310_v23, %v2275_v13  ;;  %v1657_v34 = vsel %vm422_vm0, %v1654_v21, %v1656_v24  ;;  %v253_v35 = vmax.f32 %v189_v25, %v2276_v17  ;;  %v439_v36 = vrot.slane %v189_v25, 1  ;;  %v2014_v21 = vld [vmem:[%s2484_s11 + $0x1d0] sm:$0x1] }
  0x32   : > { %v1311_v38 = vmax.f32 %v1150_v28, %v1279_v8  ;;  %v441_v39 = vrot.slane %v361_v26, 1  ;;  %v670_v40 = vunpack.c.l.bf16 %v1952_v27  ;;  %v671_v41 = vunpack.c.h.bf16 %v1952_v27 }
  0x33   : > { %v1759_v43 = vmax.f32 %v1471_v33, %v1655_v29  ;;  %v440_v44 = vsel %vm422_vm0, %v438_v31, %v439_v36  ;;  %v2211_v45 = vunpack.c.l.bf16 %v2405_v32  ;;  %v2212_v46 = vunpack.c.h.bf16 %v2405_v32 }
  0x34   : > { %v1472_v47 = vmax.f32 %v1311_v38, %v2276_v17  ;;  %v442_v48 = vsel %vm422_vm0, %v439_v36, %v441_v39  ;;  %v541_v49 = vmax.f32 %v252_v30, %v440_v44  ;;  %v972_v50 = vunpack.c.l.bf16 %v2013_v37  ;;  %v2034_v30 = vld [vmem:[%s2484_s11 + $0x3c] sm:$0xff]   ;;  %v2422_v39 = vld [vmem:[%s2484_s11 + $0x108] sm:$0xff]   ;;  %v2094_v44 = vld [vmem:[%s2484_s11 + $0x44] sm:$0x1] }
  0x35   : > { %v542_v52 = vmax.f32 %v253_v35, %v442_v48  ;;  %v1048_v53 = vrot.slane %v670_v40, 1  ;;  %v1049_v54 = vrot.slane %v671_v41, 1  ;;  %v2243_v55 = vunpack.c.l.bf16 %v2413_v42 }
  0x36   : > { %v1760_v57 = vmax.f32 %v1472_v47, %v1657_v34  ;;  %v702_v58 = vmax.f32 %v541_v49, %v670_v40  ;;  %v1051_v59 = vrot.slane %v972_v50, 1  ;;  %v2244_v60 = vunpack.c.h.bf16 %v2413_v42  ;;  %v127_v49 = vld [vmem:[%s2484_s11 + $0x3c] sm:$0xff]  }
  0x37   : > { %v703_v62 = vmax.f32 %v542_v52, %v671_v41  ;;  %v1050_v63 = vsel %vm422_vm0, %v1048_v53, %v1049_v54  ;;  %v1441_v0 = vunpack.c.l.bf16 %v2064_v51  ;;  %v1442_v1 = vunpack.c.h.bf16 %v2064_v51 }
  0x38   : > { %v2314_v3 = vpack.c.bf16 %v1760_v57, %v1759_v43  ;;  %v863_v4 = vmax.f32 %v702_v58, %v2211_v45  ;;  %v1052_v5 = vsel %vm422_vm0, %v1049_v54, %v1051_v59  ;;  %v1582_v6 = vunpack.c.l.bf16 %v2093_v56  ;;  %v315_v54 = vld [vmem:[%s2484_s11 + $0x44] sm:$0x1] }
  0x39   : > { %v864_v8 = vmax.f32 %v703_v62, %v2212_v46  ;;  %v1658_v9 = vrot.slane %v2243_v55, 1  ;;  %v1659_v10 = vrot.slane %v2244_v60, 1  ;;  %v222_v11 = vunpack.c.l.bf16 %v1922_v61 }
  0x3a   : > { %2429 = vst [vmem:[%s2523_s15 + $0x10] sm:$0xff] %v2314_v3   ;;  %v1151_v12 = vmax.f32 %v863_v4, %v1050_v63  ;;  %v1661_v13 = vrot.slane %v1582_v6, 1  ;;  %v223_v14 = vunpack.c.h.bf16 %v1922_v61  ;;  %v362_v15 = vunpack.c.l.bf16 %v314_v2  ;;  %v1956_v3 = vld [vmem:[%s2484_s11 + $0x1d4] sm:$0xff]   ;;  %v2406_v4 = vld [vmem:[%s2484_s11 + $0x2a0] sm:$0xff]  }
  0x3b   : > { %v1152_v17 = vmax.f32 %v864_v8, %v1052_v5  ;;  %v1660_v18 = vsel %vm422_vm0, %v1658_v9, %v1659_v10  ;;  %v254_v19 = vmax.f32 %v2243_v55, %v222_v11  ;;  %v2183_v20 = vunpack.c.l.bf16 %v2398_v7 }
  0x3c   : > { %v1312_v22 = vmax.f32 %v1151_v12, %v2243_v55  ;;  %v1662_v23 = vsel %vm422_vm0, %v1659_v10, %v1661_v13  ;;  %v255_v24 = vmax.f32 %v2244_v60, %v223_v14  ;;  %v446_v25 = vrot.slane %v362_v15, 1  ;;  %v2015_v13 = vld [vmem:[%s2484_s11 + $0x1dc] sm:$0x1] }
  0x3d   : > { %v1313_v26 = vmax.f32 %v1152_v17, %v2244_v60  ;;  %v543_v27 = vmax.f32 %v254_v19, %v1660_v18  ;;  %v2184_v28 = vunpack.c.h.bf16 %v2398_v7  ;;  %v833_v29 = vunpack.c.l.bf16 %v1986_v16 }
  0x3e   : > { %v1473_v31 = vmax.f32 %v1312_v22, %v1441_v0  ;;  %v447_v32 = vsel %vm422_vm0, %v1659_v10, %v446_v25  ;;  %v834_v33 = vunpack.c.h.bf16 %v1986_v16  ;;  %v973_v34 = vunpack.c.l.bf16 %v2014_v21 }
  0x3f   : > { %v1474_v35 = vmax.f32 %v1313_v26, %v1442_v1  ;;  %v544_v36 = vmax.f32 %v255_v24, %v447_v32  ;;  %v704_v37 = vmax.f32 %v543_v27, %v2183_v20  ;;  %v1053_v38 = vrot.slane %v2183_v20, 1  ;;  %v2095_v32 = vld [vmem:[%s2484_s11 + $0x50] sm:$0x1] }
  0x40   : > { %v1761_v40 = vmax.f32 %v1473_v31, %v1660_v18  ;;  %v1054_v41 = vrot.slane %v2184_v28, 1  ;;  %v1056_v42 = vrot.slane %v973_v34, 1  ;;  %v1282_v43 = vunpack.c.l.bf16 %v2034_v30  ;;  %v2414_v18 = vld [vmem:[%s2484_s11 + $0x48] sm:$0xff]  }
  0x41   : > { %v1762_v45 = vmax.f32 %v1474_v35, %v1662_v23  ;;  %v705_v46 = vmax.f32 %v544_v36, %v2184_v28  ;;  %v865_v47 = vmax.f32 %v704_v37, %v833_v29  ;;  %v1283_v48 = vunpack.c.h.bf16 %v2034_v30  ;;  %v2068_v23 = vld [vmem:[%s2484_s11 + $0x114] sm:$0xff]  }
  0x42   : > { %v1055_v50 = vsel %vm422_vm0, %v1053_v38, %v1054_v41  ;;  %v1057_v51 = vsel %vm422_vm0, %v1054_v41, %v1056_v42  ;;  %v2279_v52 = vunpack.c.l.bf16 %v2422_v39  ;;  %v2280_v53 = vunpack.c.h.bf16 %v2422_v39  ;;  %v1926_v37 = vld [vmem:[%s2484_s11 + $0x114] sm:$0xff]   ;;  %v316_v42 = vld [vmem:[%s2484_s11 + $0x50] sm:$0x1] }
  0x43   : > { %v2319_v55 = vpack.c.bf16 %v1762_v45, %v1761_v40  ;;  %v866_v56 = vmax.f32 %v705_v46, %v834_v33  ;;  %v1153_v57 = vmax.f32 %v865_v47, %v1055_v50  ;;  %v1583_v58 = vunpack.c.l.bf16 %v2094_v44 }
  0x44   : > { %v1663_v59 = vrot.slane %v1282_v43, 1  ;;  %v1664_v60 = vrot.slane %v1283_v48, 1  ;;  %v192_v61 = vunpack.c.l.bf16 %v127_v49  ;;  %v193_v62 = vunpack.c.h.bf16 %v127_v49 }
  0x45   : > { %2430 = vst [vmem:[%s2523_s15 + $0x18] sm:$0xff] %v2319_v55   ;;  %v1154_v63 = vmax.f32 %v866_v56, %v1057_v51  ;;  %v1314_v0 = vmax.f32 %v1153_v57, %v1282_v43  ;;  %v1666_v1 = vrot.slane %v1583_v58, 1  ;;  %v363_v2 = vunpack.c.l.bf16 %v315_v54  ;;  %v2399_v43 = vld [vmem:[%s2484_s11 + $0x1e0] sm:$0xff]   ;;  %v1990_v56 = vld [vmem:[%s2484_s11 + $0x2ac] sm:$0xff]  }
  0x46   : > { %v1665_v5 = vsel %vm422_vm0, %v1663_v59, %v1664_v60  ;;  %v256_v6 = vmax.f32 %v192_v61, %v2279_v52  ;;  %v257_v7 = vmax.f32 %v193_v62, %v2280_v53  ;;  %v448_v8 = vrot.slane %v192_v61, 1  ;;  %v2016_v61 = vld [vmem:[%s2484_s11 + $0x1e8] sm:$0x1] }
  0x47   : > { %v1315_v9 = vmax.f32 %v1154_v63, %v1283_v48  ;;  %v1475_v10 = vmax.f32 %v1314_v0, %v2279_v52  ;;  %v1667_v11 = vsel %vm422_vm0, %v1664_v60, %v1666_v1  ;;  %v449_v12 = vrot.slane %v193_v62, 1 }
  0x48   : > { %v451_v14 = vrot.slane %v363_v2, 1  ;;  %v674_v15 = vunpack.c.l.bf16 %v1956_v3  ;;  %v675_v16 = vunpack.c.h.bf16 %v1956_v3  ;;  %v2215_v17 = vunpack.c.l.bf16 %v2406_v4 }
  0x49   : > { %v1476_v19 = vmax.f32 %v1315_v9, %v2280_v53  ;;  %v1763_v20 = vmax.f32 %v1475_v10, %v1665_v5  ;;  %v450_v21 = vsel %vm422_vm0, %v448_v8, %v449_v12  ;;  %v2216_v22 = vunpack.c.h.bf16 %v2406_v4 }
  0x4a   : > { %v452_v24 = vsel %vm422_vm0, %v449_v12, %v451_v14  ;;  %v545_v25 = vmax.f32 %v256_v6, %v450_v21  ;;  %v974_v26 = vunpack.c.l.bf16 %v2015_v13  ;;  %v1058_v27 = vrot.slane %v674_v15, 1  ;;  %v2038_v6 = vld [vmem:[%s2484_s11 + $0x54] sm:$0xff]  }
  0x4b   : > { %v1764_v28 = vmax.f32 %v1476_v19, %v1667_v11  ;;  %v546_v29 = vmax.f32 %v257_v7, %v452_v24  ;;  %v1059_v30 = vrot.slane %v675_v16, 1  ;;  %v2247_v31 = vunpack.c.l.bf16 %v2414_v18 }
  0x4c   : > { %v706_v33 = vmax.f32 %v545_v25, %v674_v15  ;;  %v1061_v34 = vrot.slane %v974_v26, 1  ;;  %v2248_v35 = vunpack.c.h.bf16 %v2414_v18  ;;  %v1445_v36 = vunpack.c.l.bf16 %v2068_v23  ;;  %v2423_v15 = vld [vmem:[%s2484_s11 + $0x120] sm:$0xff]   ;;  %v131_v25 = vld [vmem:[%s2484_s11 + $0x54] sm:$0xff]  }
  0x4d   : > { %v2324_v38 = vpack.c.bf16 %v1764_v28, %v1763_v20  ;;  %v707_v39 = vmax.f32 %v546_v29, %v675_v16  ;;  %v1060_v40 = vsel %vm422_vm0, %v1058_v27, %v1059_v30  ;;  %v1446_v41 = vunpack.c.h.bf16 %v2068_v23  ;;  %v2096_v16 = vld [vmem:[%s2484_s11 + $0x5c] sm:$0x1] }
  0x4e   : > { %v867_v44 = vmax.f32 %v706_v33, %v2215_v17  ;;  %v1062_v45 = vsel %vm422_vm0, %v1059_v30, %v1061_v34  ;;  %v1584_v46 = vunpack.c.l.bf16 %v2095_v32  ;;  %v1668_v47 = vrot.slane %v2247_v31, 1  ;;  %v317_v30 = vld [vmem:[%s2484_s11 + $0x5c] sm:$0x1] }
  0x4f   : > { %2431 = vst [vmem:[%s2523_s15 + $0x20] sm:$0xff] %v2324_v38   ;;  %v868_v48 = vmax.f32 %v707_v39, %v2216_v22  ;;  %v1669_v49 = vrot.slane %v2248_v35, 1  ;;  %v226_v50 = vunpack.c.l.bf16 %v1926_v37  ;;  %v227_v51 = vunpack.c.h.bf16 %v1926_v37 }
  0x50   : > { %v1155_v52 = vmax.f32 %v867_v44, %v1060_v40  ;;  %v1671_v53 = vrot.slane %v1584_v46, 1  ;;  %v364_v54 = vunpack.c.l.bf16 %v316_v42  ;;  %v2187_v55 = vunpack.c.l.bf16 %v2399_v43  ;;  %v2407_v44 = vld [vmem:[%s2484_s11 + $0x2b8] sm:$0xff]  }
  0x51   : > { %v1156_v57 = vmax.f32 %v868_v48, %v1062_v45  ;;  %v1670_v58 = vsel %vm422_vm0, %v1668_v47, %v1669_v49  ;;  %v258_v59 = vmax.f32 %v2247_v31, %v226_v50  ;;  %v259_v60 = vmax.f32 %v2248_v35, %v227_v51 }
  0x52   : > { %v1316_v62 = vmax.f32 %v1155_v52, %v2247_v31  ;;  %v1672_v63 = vsel %vm422_vm0, %v1669_v49, %v1671_v53  ;;  %v456_v0 = vrot.slane %v364_v54, 1  ;;  %v2188_v1 = vunpack.c.h.bf16 %v2399_v43  ;;  %v1960_v31 = vld [vmem:[%s2484_s11 + $0x1ec] sm:$0xff]  }
  0x53   : > { %v1317_v2 = vmax.f32 %v1156_v57, %v2248_v35  ;;  %v547_v3 = vmax.f32 %v258_v59, %v1670_v58  ;;  %v837_v4 = vunpack.c.l.bf16 %v1990_v56  ;;  %v838_v5 = vunpack.c.h.bf16 %v1990_v56 }
  0x54   : > { %v1477_v7 = vmax.f32 %v1316_v62, %v1445_v36  ;;  %v457_v8 = vsel %vm422_vm0, %v1669_v49, %v456_v0  ;;  %v975_v9 = vunpack.c.l.bf16 %v2016_v61  ;;  %v1063_v10 = vrot.slane %v2187_v55, 1  ;;  %v2017_v49 = vld [vmem:[%s2484_s11 + $0x1f4] sm:$0x1] }
  0x55   : > { %v1478_v11 = vmax.f32 %v1317_v2, %v1446_v41  ;;  %v548_v12 = vmax.f32 %v259_v60, %v457_v8  ;;  %v708_v13 = vmax.f32 %v547_v3, %v2187_v55  ;;  %v1064_v14 = vrot.slane %v2188_v1, 1  ;;  %v2097_v8 = vld [vmem:[%s2484_s11 + $0x68] sm:$0x1] }
  0x56   : > { %v1765_v17 = vmax.f32 %v1477_v7, %v1670_v58  ;;  %v1066_v18 = vrot.slane %v975_v9, 1  ;;  %v1286_v19 = vunpack.c.l.bf16 %v2038_v6  ;;  %v1287_v20 = vunpack.c.h.bf16 %v2038_v6  ;;  %v2415_v58 = vld [vmem:[%s2484_s11 + $0x60] sm:$0xff]  }
  0x57   : > { %v1766_v21 = vmax.f32 %v1478_v11, %v1672_v63  ;;  %v709_v22 = vmax.f32 %v548_v12, %v2188_v1  ;;  %v869_v23 = vmax.f32 %v708_v13, %v837_v4  ;;  %v1065_v24 = vsel %vm422_vm0, %v1063_v10, %v1064_v14  ;;  %v2072_v63 = vld [vmem:[%s2484_s11 + $0x12c] sm:$0xff]  }
  0x58   : > { %v1067_v26 = vsel %vm422_vm0, %v1064_v14, %v1066_v18  ;;  %v2283_v27 = vunpack.c.l.bf16 %v2423_v15  ;;  %v2284_v28 = vunpack.c.h.bf16 %v2423_v15  ;;  %v1585_v29 = vunpack.c.l.bf16 %v2096_v16  ;;  %v1930_v13 = vld [vmem:[%s2484_s11 + $0x12c] sm:$0xff]   ;;  %v318_v14 = vld [vmem:[%s2484_s11 + $0x68] sm:$0x1] }
  0x59   : > { %v2329_v32 = vpack.c.bf16 %v1766_v21, %v1765_v17  ;;  %v870_v33 = vmax.f32 %v709_v22, %v838_v5  ;;  %v1157_v34 = vmax.f32 %v869_v23, %v1065_v24  ;;  %v1673_v35 = vrot.slane %v1286_v19, 1 }
  0x5a   : > { %v1674_v36 = vrot.slane %v1287_v20, 1  ;;  %v1676_v37 = vrot.slane %v1585_v29, 1  ;;  %v196_v38 = vunpack.c.l.bf16 %v131_v25  ;;  %v197_v39 = vunpack.c.h.bf16 %v131_v25 }
  0x5b   : > { %2432 = vst [vmem:[%s2523_s15 + $0x28] sm:$0xff] %v2329_v32   ;;  %v1158_v40 = vmax.f32 %v870_v33, %v1067_v26  ;;  %v1318_v41 = vmax.f32 %v1157_v34, %v1286_v19  ;;  %v365_v42 = vunpack.c.l.bf16 %v317_v30  ;;  %v678_v43 = vunpack.c.l.bf16 %v1960_v31  ;;  %v2400_v19 = vld [vmem:[%s2484_s11 + $0x1f8] sm:$0xff]  }
  0x5c   : > { %v1675_v45 = vsel %vm422_vm0, %v1673_v35, %v1674_v36  ;;  %v1677_v46 = vsel %vm422_vm0, %v1674_v36, %v1676_v37  ;;  %v260_v47 = vmax.f32 %v196_v38, %v2283_v27  ;;  %v261_v48 = vmax.f32 %v197_v39, %v2284_v28  ;;  %v2018_v37 = vld [vmem:[%s2484_s11 + $0x200] sm:$0x1] }
  0x5d   : > { %v1319_v50 = vmax.f32 %v1158_v40, %v1287_v20  ;;  %v1479_v51 = vmax.f32 %v1318_v41, %v2283_v27  ;;  %v458_v52 = vrot.slane %v196_v38, 1  ;;  %v459_v53 = vrot.slane %v197_v39, 1 }
  0x5e   : > { %v461_v54 = vrot.slane %v365_v42, 1  ;;  %v679_v55 = vunpack.c.h.bf16 %v1960_v31  ;;  %v2219_v56 = vunpack.c.l.bf16 %v2407_v44  ;;  %v2220_v57 = vunpack.c.h.bf16 %v2407_v44  ;;  %v2042_v42 = vld [vmem:[%s2484_s11 + $0x6c] sm:$0xff]  }
  0x5f   : > { %v1480_v59 = vmax.f32 %v1319_v50, %v2284_v28  ;;  %v1767_v60 = vmax.f32 %v1479_v51, %v1675_v45  ;;  %v460_v61 = vsel %vm422_vm0, %v458_v52, %v459_v53  ;;  %v976_v62 = vunpack.c.l.bf16 %v2017_v49  ;;  %v1994_v28 = vld [vmem:[%s2484_s11 + $0x2c4] sm:$0xff]   ;;  %v2424_v51 = vld [vmem:[%s2484_s11 + $0x138] sm:$0xff]  }
  0x60   : > { %v462_v0 = vsel %vm422_vm0, %v459_v53, %v461_v54  ;;  %v549_v1 = vmax.f32 %v260_v47, %v460_v61  ;;  %v1068_v2 = vrot.slane %v678_v43, 1  ;;  %v1069_v3 = vrot.slane %v679_v55, 1 }
  0x61   : > { %v1768_v4 = vmax.f32 %v1480_v59, %v1677_v46  ;;  %v550_v5 = vmax.f32 %v261_v48, %v462_v0  ;;  %v1071_v6 = vrot.slane %v976_v62, 1  ;;  %v2251_v7 = vunpack.c.l.bf16 %v2415_v58 }
  0x62   : > { %v710_v9 = vmax.f32 %v549_v1, %v678_v43  ;;  %v1070_v10 = vsel %vm422_vm0, %v1068_v2, %v1069_v3  ;;  %v2252_v11 = vunpack.c.h.bf16 %v2415_v58  ;;  %v1449_v12 = vunpack.c.l.bf16 %v2072_v63  ;;  %v135_v1 = vld [vmem:[%s2484_s11 + $0x6c] sm:$0xff]  }
  0x63   : > { %v2334_v15 = vpack.c.bf16 %v1768_v4, %v1767_v60  ;;  %v711_v16 = vmax.f32 %v550_v5, %v679_v55  ;;  %v1072_v17 = vsel %vm422_vm0, %v1069_v3, %v1071_v6  ;;  %v1450_v18 = vunpack.c.h.bf16 %v2072_v63  ;;  %v319_v6 = vld [vmem:[%s2484_s11 + $0x74] sm:$0x1] }
  0x64   : > { %v871_v20 = vmax.f32 %v710_v9, %v2219_v56  ;;  %v1586_v21 = vunpack.c.l.bf16 %v2097_v8  ;;  %v1678_v22 = vrot.slane %v2251_v7, 1  ;;  %v1679_v23 = vrot.slane %v2252_v11, 1  ;;  %v2098_v56 = vld [vmem:[%s2484_s11 + $0x74] sm:$0x1] }
  0x65   : > { %2433 = vst [vmem:[%s2523_s15 + $0x30] sm:$0xff] %v2334_v15   ;;  %v872_v24 = vmax.f32 %v711_v16, %v2220_v57  ;;  %v230_v25 = vunpack.c.l.bf16 %v1930_v13  ;;  %v231_v26 = vunpack.c.h.bf16 %v1930_v13  ;;  %v366_v27 = vunpack.c.l.bf16 %v318_v14 }
  0x66   : > { %v1159_v29 = vmax.f32 %v871_v20, %v1070_v10  ;;  %v1680_v30 = vsel %vm422_vm0, %v1678_v22, %v1679_v23  ;;  %v1681_v31 = vrot.slane %v1586_v21, 1  ;;  %v2191_v32 = vunpack.c.l.bf16 %v2400_v19  ;;  %v2408_v20 = vld [vmem:[%s2484_s11 + $0x2d0] sm:$0xff]  }
  0x67   : > { %v1160_v33 = vmax.f32 %v872_v24, %v1072_v17  ;;  %v262_v34 = vmax.f32 %v2251_v7, %v230_v25  ;;  %v263_v35 = vmax.f32 %v2252_v11, %v231_v26  ;;  %v466_v36 = vrot.slane %v366_v27, 1  ;;  %v2019_v25 = vld [vmem:[%s2484_s11 + $0x20c] sm:$0x1] }
  0x68   : > { %v1320_v38 = vmax.f32 %v1159_v29, %v2251_v7  ;;  %v1682_v39 = vsel %vm422_vm0, %v1679_v23, %v1681_v31  ;;  %v2192_v40 = vunpack.c.h.bf16 %v2400_v19  ;;  %v841_v41 = vunpack.c.l.bf16 %v1994_v28  ;;  %v1964_v7 = vld [vmem:[%s2484_s11 + $0x204] sm:$0xff]  }
  0x69   : > { %v1321_v43 = vmax.f32 %v1160_v33, %v2252_v11  ;;  %v467_v44 = vsel %vm422_vm0, %v1679_v23, %v466_v36  ;;  %v551_v45 = vmax.f32 %v262_v34, %v1680_v30  ;;  %v842_v46 = vunpack.c.h.bf16 %v1994_v28  ;;  %v2416_v34 = vld [vmem:[%s2484_s11 + $0x78] sm:$0xff]  }
  0x6a   : > { %v1481_v47 = vmax.f32 %v1320_v38, %v1449_v12  ;;  %v552_v48 = vmax.f32 %v263_v35, %v467_v44  ;;  %v977_v49 = vunpack.c.l.bf16 %v2018_v37  ;;  %v1073_v50 = vrot.slane %v2191_v32, 1  ;;  %v2099_v44 = vld [vmem:[%s2484_s11 + $0x80] sm:$0x1] }
  0x6b   : > { %v1482_v52 = vmax.f32 %v1321_v43, %v1450_v18  ;;  %v712_v53 = vmax.f32 %v551_v45, %v2191_v32  ;;  %v1074_v54 = vrot.slane %v2192_v40, 1  ;;  %v1290_v55 = vunpack.c.l.bf16 %v2042_v42 }
  0x6c   : > { %v1769_v57 = vmax.f32 %v1481_v47, %v1680_v30  ;;  %v713_v58 = vmax.f32 %v552_v48, %v2192_v40  ;;  %v1076_v59 = vrot.slane %v977_v49, 1  ;;  %v1291_v60 = vunpack.c.h.bf16 %v2042_v42 }
  0x6d   : > { %v1770_v61 = vmax.f32 %v1482_v52, %v1682_v39  ;;  %v873_v62 = vmax.f32 %v712_v53, %v841_v41  ;;  %v1075_v63 = vsel %vm422_vm0, %v1073_v50, %v1074_v54  ;;  %v2287_v0 = vunpack.c.l.bf16 %v2424_v51  ;;  %v2076_v39 = vld [vmem:[%s2484_s11 + $0x144] sm:$0xff]  }
  0x6e   : > { %v874_v2 = vmax.f32 %v713_v58, %v842_v46  ;;  %v1077_v3 = vsel %vm422_vm0, %v1074_v54, %v1076_v59  ;;  %v2288_v4 = vunpack.c.h.bf16 %v2424_v51  ;;  %v1587_v5 = vunpack.c.l.bf16 %v2098_v56  ;;  %v1934_v53 = vld [vmem:[%s2484_s11 + $0x144] sm:$0xff]   ;;  %v320_v54 = vld [vmem:[%s2484_s11 + $0x80] sm:$0x1]  ;;  %v2401_v59 = vld [vmem:[%s2484_s11 + $0x210] sm:$0xff]  }
  0x6f   : > { %v2339_v8 = vpack.c.bf16 %v1770_v61, %v1769_v57  ;;  %v1161_v9 = vmax.f32 %v873_v62, %v1075_v63  ;;  %v1683_v10 = vrot.slane %v1290_v55, 1  ;;  %v1684_v11 = vrot.slane %v1291_v60, 1 }
  0x70   : > { %v1162_v12 = vmax.f32 %v874_v2, %v1077_v3  ;;  %v1686_v13 = vrot.slane %v1587_v5, 1  ;;  %v200_v14 = vunpack.c.l.bf16 %v135_v1  ;;  %v201_v15 = vunpack.c.h.bf16 %v135_v1 }
  0x71   : > { %2434 = vst [vmem:[%s2523_s15 + $0x38] sm:$0xff] %v2339_v8   ;;  %v1322_v16 = vmax.f32 %v1161_v9, %v1290_v55  ;;  %v1685_v17 = vsel %vm422_vm0, %v1683_v10, %v1684_v11  ;;  %v367_v18 = vunpack.c.l.bf16 %v319_v6  ;;  %v682_v19 = vunpack.c.l.bf16 %v1964_v7  ;;  %v2020_v9 = vld [vmem:[%s2484_s11 + $0x218] sm:$0x1] }
  0x72   : > { %v1323_v21 = vmax.f32 %v1162_v12, %v1291_v60  ;;  %v1687_v22 = vsel %vm422_vm0, %v1684_v11, %v1686_v13  ;;  %v264_v23 = vmax.f32 %v200_v14, %v2287_v0  ;;  %v265_v24 = vmax.f32 %v201_v15, %v2288_v4 }
  0x73   : > { %v1483_v26 = vmax.f32 %v1322_v16, %v2287_v0  ;;  %v468_v27 = vrot.slane %v200_v14, 1  ;;  %v469_v28 = vrot.slane %v201_v15, 1  ;;  %v471_v29 = vrot.slane %v367_v18, 1  ;;  %v2046_v18 = vld [vmem:[%s2484_s11 + $0x84] sm:$0xff]  }
  0x74   : > { %v1484_v30 = vmax.f32 %v1323_v21, %v2288_v4  ;;  %v683_v31 = vunpack.c.h.bf16 %v1964_v7  ;;  %v2223_v32 = vunpack.c.l.bf16 %v2408_v20  ;;  %v2224_v33 = vunpack.c.h.bf16 %v2408_v20  ;;  %v1998_v4 = vld [vmem:[%s2484_s11 + $0x2dc] sm:$0xff]  }
  0x75   : > { %v1771_v35 = vmax.f32 %v1483_v26, %v1685_v17  ;;  %v470_v36 = vsel %vm422_vm0, %v468_v27, %v469_v28  ;;  %v472_v37 = vsel %vm422_vm0, %v469_v28, %v471_v29  ;;  %v978_v38 = vunpack.c.l.bf16 %v2019_v25  ;;  %v2425_v27 = vld [vmem:[%s2484_s11 + $0x150] sm:$0xff]  }
  0x76   : > { %v1772_v40 = vmax.f32 %v1484_v30, %v1687_v22  ;;  %v553_v41 = vmax.f32 %v264_v23, %v470_v36  ;;  %v554_v42 = vmax.f32 %v265_v24, %v472_v37  ;;  %v1078_v43 = vrot.slane %v682_v19, 1  ;;  %v139_v37 = vld [vmem:[%s2484_s11 + $0x84] sm:$0xff]  }
  0x77   : > { %v1079_v45 = vrot.slane %v683_v31, 1  ;;  %v1081_v46 = vrot.slane %v978_v38, 1  ;;  %v2255_v47 = vunpack.c.l.bf16 %v2416_v34  ;;  %v2256_v48 = vunpack.c.h.bf16 %v2416_v34 }
  0x78   : > { %v2344_v49 = vpack.c.bf16 %v1772_v40, %v1771_v35  ;;  %v714_v50 = vmax.f32 %v553_v41, %v682_v19  ;;  %v715_v51 = vmax.f32 %v554_v42, %v683_v31  ;;  %v1453_v52 = vunpack.c.l.bf16 %v2076_v39  ;;  %v321_v42 = vld [vmem:[%s2484_s11 + $0x8c] sm:$0x1] }
  0x79   : > { %v1080_v55 = vsel %vm422_vm0, %v1078_v43, %v1079_v45  ;;  %v1082_v56 = vsel %vm422_vm0, %v1079_v45, %v1081_v46  ;;  %v1454_v57 = vunpack.c.h.bf16 %v2076_v39  ;;  %v1588_v58 = vunpack.c.l.bf16 %v2099_v44 }
  0x7a   : > { %2435 = vst [vmem:[%s2523_s15 + $0x40] sm:$0xff] %v2344_v49   ;;  %v875_v60 = vmax.f32 %v714_v50, %v2223_v32  ;;  %v876_v61 = vmax.f32 %v715_v51, %v2224_v33  ;;  %v1688_v62 = vrot.slane %v2255_v47, 1  ;;  %v1689_v63 = vrot.slane %v2256_v48, 1  ;;  %v2100_v32 = vld [vmem:[%s2484_s11 + $0x8c] sm:$0x1] }
  0x7b   : > { %v1691_v0 = vrot.slane %v1588_v58, 1  ;;  %v234_v1 = vunpack.c.l.bf16 %v1934_v53  ;;  %v235_v2 = vunpack.c.h.bf16 %v1934_v53  ;;  %v368_v3 = vunpack.c.l.bf16 %v320_v54 }
  0x7c   : > { %v1163_v5 = vmax.f32 %v875_v60, %v1080_v55  ;;  %v1164_v6 = vmax.f32 %v876_v61, %v1082_v56  ;;  %v1690_v7 = vsel %vm422_vm0, %v1688_v62, %v1689_v63  ;;  %v2195_v8 = vunpack.c.l.bf16 %v2401_v59  ;;  %v1968_v55 = vld [vmem:[%s2484_s11 + $0x21c] sm:$0xff]   ;;  %v2409_v60 = vld [vmem:[%s2484_s11 + $0x2e8] sm:$0xff]  }
  0x7d   : > { %v1692_v10 = vsel %vm422_vm0, %v1689_v63, %v1691_v0  ;;  %v266_v11 = vmax.f32 %v2255_v47, %v234_v1  ;;  %v267_v12 = vmax.f32 %v2256_v48, %v235_v2  ;;  %v476_v13 = vrot.slane %v368_v3, 1  ;;  %v2021_v1 = vld [vmem:[%s2484_s11 + $0x224] sm:$0x1] }
  0x7e   : > { %v1324_v14 = vmax.f32 %v1163_v5, %v2255_v47  ;;  %v1325_v15 = vmax.f32 %v1164_v6, %v2256_v48  ;;  %v2196_v16 = vunpack.c.h.bf16 %v2401_v59  ;;  %v845_v17 = vunpack.c.l.bf16 %v1998_v4 }
  0x7f   : > { %v477_v19 = vsel %vm422_vm0, %v1689_v63, %v476_v13  ;;  %v555_v20 = vmax.f32 %v266_v11, %v1690_v7  ;;  %v846_v21 = vunpack.c.h.bf16 %v1998_v4  ;;  %v979_v22 = vunpack.c.l.bf16 %v2020_v9 }
  0x80   : > { %v1485_v23 = vmax.f32 %v1324_v14, %v1453_v52  ;;  %v1486_v24 = vmax.f32 %v1325_v15, %v1454_v57  ;;  %v556_v25 = vmax.f32 %v267_v12, %v477_v19  ;;  %v1083_v26 = vrot.slane %v2195_v8, 1  ;;  %v2080_v15 = vld [vmem:[%s2484_s11 + $0x15c] sm:$0xff]  }
  0x81   : > { %v716_v28 = vmax.f32 %v555_v20, %v2195_v8  ;;  %v1084_v29 = vrot.slane %v2196_v16, 1  ;;  %v1086_v30 = vrot.slane %v979_v22, 1  ;;  %v1294_v31 = vunpack.c.l.bf16 %v2046_v18  ;;  %v2101_v20 = vld [vmem:[%s2484_s11 + $0x98] sm:$0x1] }
  0x82   : > { %v1773_v33 = vmax.f32 %v1485_v23, %v1690_v7  ;;  %v1774_v34 = vmax.f32 %v1486_v24, %v1692_v10  ;;  %v717_v35 = vmax.f32 %v556_v25, %v2196_v16  ;;  %v1295_v36 = vunpack.c.h.bf16 %v2046_v18  ;;  %v2417_v10 = vld [vmem:[%s2484_s11 + $0x90] sm:$0xff]   ;;  %v1938_v25 = vld [vmem:[%s2484_s11 + $0x15c] sm:$0xff]  }
  0x83   : > { %v877_v38 = vmax.f32 %v716_v28, %v845_v17  ;;  %v1085_v39 = vsel %vm422_vm0, %v1083_v26, %v1084_v29  ;;  %v1087_v40 = vsel %vm422_vm0, %v1084_v29, %v1086_v30  ;;  %v2291_v41 = vunpack.c.l.bf16 %v2425_v27  ;;  %v322_v30 = vld [vmem:[%s2484_s11 + $0x98] sm:$0x1] }
  0x84   : > { %v2349_v43 = vpack.c.bf16 %v1774_v34, %v1773_v33  ;;  %v878_v44 = vmax.f32 %v717_v35, %v846_v21  ;;  %v2292_v45 = vunpack.c.h.bf16 %v2425_v27  ;;  %v1589_v46 = vunpack.c.l.bf16 %v2100_v32  ;;  %v2402_v35 = vld [vmem:[%s2484_s11 + $0x228] sm:$0xff]  }
  0x85   : > { %v1165_v47 = vmax.f32 %v877_v38, %v1085_v39  ;;  %v1693_v48 = vrot.slane %v1294_v31, 1  ;;  %v1694_v49 = vrot.slane %v1295_v36, 1  ;;  %v204_v50 = vunpack.c.l.bf16 %v139_v37 }
  0x86   : > { %2436 = vst [vmem:[%s2523_s15 + $0x48] sm:$0xff] %v2349_v43   ;;  %v1166_v51 = vmax.f32 %v878_v44, %v1087_v40  ;;  %v1696_v52 = vrot.slane %v1589_v46, 1  ;;  %v205_v53 = vunpack.c.h.bf16 %v139_v37  ;;  %v369_v54 = vunpack.c.l.bf16 %v321_v42  ;;  %v2002_v44 = vld [vmem:[%s2484_s11 + $0x2f4] sm:$0xff]  }
  0x87   : > { %v1326_v56 = vmax.f32 %v1165_v47, %v1294_v31  ;;  %v1695_v57 = vsel %vm422_vm0, %v1693_v48, %v1694_v49  ;;  %v268_v58 = vmax.f32 %v204_v50, %v2291_v41  ;;  %v478_v59 = vrot.slane %v204_v50, 1 }
  0x88   : > { %v1327_v61 = vmax.f32 %v1166_v51, %v1295_v36  ;;  %v1697_v62 = vsel %vm422_vm0, %v1694_v49, %v1696_v52  ;;  %v269_v63 = vmax.f32 %v205_v53, %v2292_v45  ;;  %v479_v0 = vrot.slane %v205_v53, 1  ;;  %v2022_v49 = vld [vmem:[%s2484_s11 + $0x230] sm:$0x1] }
  0x89   : > { %v1487_v2 = vmax.f32 %v1326_v56, %v2291_v41  ;;  %v481_v3 = vrot.slane %v369_v54, 1  ;;  %v686_v4 = vunpack.c.l.bf16 %v1968_v55  ;;  %v687_v5 = vunpack.c.h.bf16 %v1968_v55 }
  0x8a   : > { %v1488_v6 = vmax.f32 %v1327_v61, %v2292_v45  ;;  %v480_v7 = vsel %vm422_vm0, %v478_v59, %v479_v0  ;;  %v2227_v8 = vunpack.c.l.bf16 %v2409_v60  ;;  %v2228_v9 = vunpack.c.h.bf16 %v2409_v60 }
  0x8b   : > { %v1775_v11 = vmax.f32 %v1487_v2, %v1695_v57  ;;  %v482_v12 = vsel %vm422_vm0, %v479_v0, %v481_v3  ;;  %v557_v13 = vmax.f32 %v268_v58, %v480_v7  ;;  %v980_v14 = vunpack.c.l.bf16 %v2021_v1  ;;  %v2050_v58 = vld [vmem:[%s2484_s11 + $0x9c] sm:$0xff]   ;;  %v2426_v3 = vld [vmem:[%s2484_s11 + $0x168] sm:$0xff]  }
  0x8c   : > { %v1776_v16 = vmax.f32 %v1488_v6, %v1697_v62  ;;  %v558_v17 = vmax.f32 %v269_v63, %v482_v12  ;;  %v1088_v18 = vrot.slane %v686_v4, 1  ;;  %v1089_v19 = vrot.slane %v687_v5, 1 }
  0x8d   : > { %v718_v21 = vmax.f32 %v557_v13, %v686_v4  ;;  %v1091_v22 = vrot.slane %v980_v14, 1  ;;  %v2259_v23 = vunpack.c.l.bf16 %v2417_v10  ;;  %v2260_v24 = vunpack.c.h.bf16 %v2417_v10  ;;  %v143_v13 = vld [vmem:[%s2484_s11 + $0x9c] sm:$0xff]  }
  0x8e   : > { %v2354_v26 = vpack.c.bf16 %v1776_v16, %v1775_v11  ;;  %v719_v27 = vmax.f32 %v558_v17, %v687_v5  ;;  %v1090_v28 = vsel %vm422_vm0, %v1088_v18, %v1089_v19  ;;  %v1457_v29 = vunpack.c.l.bf16 %v2080_v15  ;;  %v323_v18 = vld [vmem:[%s2484_s11 + $0xa4] sm:$0x1] }
  0x8f   : > { %v879_v31 = vmax.f32 %v718_v21, %v2227_v8  ;;  %v1092_v32 = vsel %vm422_vm0, %v1089_v19, %v1091_v22  ;;  %v1458_v33 = vunpack.c.h.bf16 %v2080_v15  ;;  %v1590_v34 = vunpack.c.l.bf16 %v2101_v20  ;;  %v2102_v8 = vld [vmem:[%s2484_s11 + $0xa4] sm:$0x1] }
  0x90   : > { %2437 = vst [vmem:[%s2523_s15 + $0x50] sm:$0xff] %v2354_v26   ;;  %v880_v36 = vmax.f32 %v719_v27, %v2228_v9  ;;  %v1698_v37 = vrot.slane %v2259_v23, 1  ;;  %v1699_v38 = vrot.slane %v2260_v24, 1  ;;  %v238_v39 = vunpack.c.l.bf16 %v1938_v25 }
  0x91   : > { %v1167_v40 = vmax.f32 %v879_v31, %v1090_v28  ;;  %v1701_v41 = vrot.slane %v1590_v34, 1  ;;  %v239_v42 = vunpack.c.h.bf16 %v1938_v25  ;;  %v370_v43 = vunpack.c.l.bf16 %v322_v30  ;;  %v1972_v31 = vld [vmem:[%s2484_s11 + $0x234] sm:$0xff]  }
  0x92   : > { %v1168_v45 = vmax.f32 %v880_v36, %v1092_v32  ;;  %v1700_v46 = vsel %vm422_vm0, %v1698_v37, %v1699_v38  ;;  %v270_v47 = vmax.f32 %v2259_v23, %v238_v39  ;;  %v2199_v48 = vunpack.c.l.bf16 %v2402_v35  ;;  %v2410_v32 = vld [vmem:[%s2484_s11 + $0x300] sm:$0xff]  }
  0x93   : > { %v1328_v50 = vmax.f32 %v1167_v40, %v2259_v23  ;;  %v1702_v51 = vsel %vm422_vm0, %v1699_v38, %v1701_v41  ;;  %v271_v52 = vmax.f32 %v2260_v24, %v239_v42  ;;  %v486_v53 = vrot.slane %v370_v43, 1  ;;  %v2023_v41 = vld [vmem:[%s2484_s11 + $0x23c] sm:$0x1] }
  0x94   : > { %v1329_v54 = vmax.f32 %v1168_v45, %v2260_v24  ;;  %v559_v55 = vmax.f32 %v270_v47, %v1700_v46  ;;  %v2200_v56 = vunpack.c.h.bf16 %v2402_v35  ;;  %v849_v57 = vunpack.c.l.bf16 %v2002_v44 }
  0x95   : > { %v1489_v59 = vmax.f32 %v1328_v50, %v1457_v29  ;;  %v487_v60 = vsel %vm422_vm0, %v1699_v38, %v486_v53  ;;  %v850_v61 = vunpack.c.h.bf16 %v2002_v44  ;;  %v981_v62 = vunpack.c.l.bf16 %v2022_v49 }
  0x96   : > { %v1490_v63 = vmax.f32 %v1329_v54, %v1458_v33  ;;  %v560_v0 = vmax.f32 %v271_v52, %v487_v60  ;;  %v720_v1 = vmax.f32 %v559_v55, %v2199_v48  ;;  %v1093_v2 = vrot.slane %v2199_v48, 1  ;;  %v2103_v60 = vld [vmem:[%s2484_s11 + $0xb0] sm:$0x1] }
  0x97   : > { %v1777_v4 = vmax.f32 %v1489_v59, %v1700_v46  ;;  %v1094_v5 = vrot.slane %v2200_v56, 1  ;;  %v1096_v6 = vrot.slane %v981_v62, 1  ;;  %v1298_v7 = vunpack.c.l.bf16 %v2050_v58  ;;  %v2418_v46 = vld [vmem:[%s2484_s11 + $0xa8] sm:$0xff]  }
  0x98   : > { %v1778_v9 = vmax.f32 %v1490_v63, %v1702_v51  ;;  %v721_v10 = vmax.f32 %v560_v0, %v2200_v56  ;;  %v881_v11 = vmax.f32 %v720_v1, %v849_v57  ;;  %v1299_v12 = vunpack.c.h.bf16 %v2050_v58  ;;  %v2084_v51 = vld [vmem:[%s2484_s11 + $0x174] sm:$0xff]  }
  0x99   : > { %v1095_v14 = vsel %vm422_vm0, %v1093_v2, %v1094_v5  ;;  %v1097_v15 = vsel %vm422_vm0, %v1094_v5, %v1096_v6  ;;  %v2295_v16 = vunpack.c.l.bf16 %v2426_v3  ;;  %v2296_v17 = vunpack.c.h.bf16 %v2426_v3  ;;  %v1942_v1 = vld [vmem:[%s2484_s11 + $0x174] sm:$0xff]   ;;  %v324_v6 = vld [vmem:[%s2484_s11 + $0xb0] sm:$0x1] }
  0x9a   : > { %v2359_v19 = vpack.c.bf16 %v1778_v9, %v1777_v4  ;;  %v882_v20 = vmax.f32 %v721_v10, %v850_v61  ;;  %v1169_v21 = vmax.f32 %v881_v11, %v1095_v14  ;;  %v1591_v22 = vunpack.c.l.bf16 %v2102_v8 }
  0x9b   : > { %v1703_v23 = vrot.slane %v1298_v7, 1  ;;  %v1704_v24 = vrot.slane %v1299_v12, 1  ;;  %v208_v25 = vunpack.c.l.bf16 %v143_v13  ;;  %v209_v26 = vunpack.c.h.bf16 %v143_v13 }
  0x9c   : > { %2438 = vst [vmem:[%s2523_s15 + $0x58] sm:$0xff] %v2359_v19   ;;  %v1170_v27 = vmax.f32 %v882_v20, %v1097_v15  ;;  %v1330_v28 = vmax.f32 %v1169_v21, %v1298_v7  ;;  %v1706_v29 = vrot.slane %v1591_v22, 1  ;;  %v371_v30 = vunpack.c.l.bf16 %v323_v18  ;;  %v2403_v7 = vld [vmem:[%s2484_s11 + $0x240] sm:$0xff]   ;;  %v2006_v20 = vld [vmem:[%s2484_s11 + $0x30c] sm:$0xff]  }
  0x9d   : > { %v1705_v33 = vsel %vm422_vm0, %v1703_v23, %v1704_v24  ;;  %v272_v34 = vmax.f32 %v208_v25, %v2295_v16  ;;  %v273_v35 = vmax.f32 %v209_v26, %v2296_v17  ;;  %v488_v36 = vrot.slane %v208_v25, 1  ;;  %v2024_v25 = vld [vmem:[%s2484_s11 + $0x248] sm:$0x1] }
  0x9e   : > { %v1331_v37 = vmax.f32 %v1170_v27, %v1299_v12  ;;  %v1491_v38 = vmax.f32 %v1330_v28, %v2295_v16  ;;  %v1707_v39 = vsel %vm422_vm0, %v1704_v24, %v1706_v29  ;;  %v489_v40 = vrot.slane %v209_v26, 1 }
  0x9f   : > { %v491_v42 = vrot.slane %v371_v30, 1  ;;  %v690_v43 = vunpack.c.l.bf16 %v1972_v31  ;;  %v691_v44 = vunpack.c.h.bf16 %v1972_v31  ;;  %v2231_v45 = vunpack.c.l.bf16 %v2410_v32 }
  0xa0   : > { %v1492_v47 = vmax.f32 %v1331_v37, %v2296_v17  ;;  %v1779_v48 = vmax.f32 %v1491_v38, %v1705_v33  ;;  %v490_v49 = vsel %vm422_vm0, %v488_v36, %v489_v40  ;;  %v2232_v50 = vunpack.c.h.bf16 %v2410_v32 }
  0xa1   : > { %v492_v52 = vsel %vm422_vm0, %v489_v40, %v491_v42  ;;  %v561_v53 = vmax.f32 %v272_v34, %v490_v49  ;;  %v982_v54 = vunpack.c.l.bf16 %v2023_v41  ;;  %v1098_v55 = vrot.slane %v690_v43, 1  ;;  %v2054_v34 = vld [vmem:[%s2484_s11 + $0xb4] sm:$0xff]  }
  0xa2   : > { %v1780_v56 = vmax.f32 %v1492_v47, %v1707_v39  ;;  %v562_v57 = vmax.f32 %v273_v35, %v492_v52  ;;  %v1099_v58 = vrot.slane %v691_v44, 1  ;;  %v2263_v59 = vunpack.c.l.bf16 %v2418_v46 }
  0xa3   : > { %v722_v61 = vmax.f32 %v561_v53, %v690_v43  ;;  %v1101_v62 = vrot.slane %v982_v54, 1  ;;  %v2264_v63 = vunpack.c.h.bf16 %v2418_v46  ;;  %v1461_v0 = vunpack.c.l.bf16 %v2084_v51  ;;  %v2427_v43 = vld [vmem:[%s2484_s11 + $0x180] sm:$0xff]   ;;  %v147_v53 = vld [vmem:[%s2484_s11 + $0xb4] sm:$0xff]  }
  0xa4   : > { %v2364_v2 = vpack.c.bf16 %v1780_v56, %v1779_v48  ;;  %v723_v3 = vmax.f32 %v562_v57, %v691_v44  ;;  %v1100_v4 = vsel %vm422_vm0, %v1098_v55, %v1099_v58  ;;  %v1462_v5 = vunpack.c.h.bf16 %v2084_v51  ;;  %v2104_v44 = vld [vmem:[%s2484_s11 + $0xbc] sm:$0x1] }
  0xa5   : > { %v883_v8 = vmax.f32 %v722_v61, %v2231_v45  ;;  %v1102_v9 = vsel %vm422_vm0, %v1099_v58, %v1101_v62  ;;  %v1592_v10 = vunpack.c.l.bf16 %v2103_v60  ;;  %v1708_v11 = vrot.slane %v2263_v59, 1  ;;  %v325_v58 = vld [vmem:[%s2484_s11 + $0xbc] sm:$0x1] }
  0xa6   : > { %2439 = vst [vmem:[%s2523_s15 + $0x60] sm:$0xff] %v2364_v2   ;;  %v884_v12 = vmax.f32 %v723_v3, %v2232_v50  ;;  %v1709_v13 = vrot.slane %v2264_v63, 1  ;;  %v242_v14 = vunpack.c.l.bf16 %v1942_v1  ;;  %v243_v15 = vunpack.c.h.bf16 %v1942_v1 }
  0xa7   : > { %v1171_v16 = vmax.f32 %v883_v8, %v1100_v4  ;;  %v1711_v17 = vrot.slane %v1592_v10, 1  ;;  %v372_v18 = vunpack.c.l.bf16 %v324_v6  ;;  %v2203_v19 = vunpack.c.l.bf16 %v2403_v7  ;;  %v2411_v8 = vld [vmem:[%s2484_s11 + $0x318] sm:$0xff]  }
  0xa8   : > { %v1172_v21 = vmax.f32 %v884_v12, %v1102_v9  ;;  %v1710_v22 = vsel %vm422_vm0, %v1708_v11, %v1709_v13  ;;  %v274_v23 = vmax.f32 %v2263_v59, %v242_v14  ;;  %v275_v24 = vmax.f32 %v2264_v63, %v243_v15 }
  0xa9   : > { %v1332_v26 = vmax.f32 %v1171_v16, %v2263_v59  ;;  %v1712_v27 = vsel %vm422_vm0, %v1709_v13, %v1711_v17  ;;  %v496_v28 = vrot.slane %v372_v18, 1  ;;  %v2204_v29 = vunpack.c.h.bf16 %v2403_v7  ;;  %v1976_v59 = vld [vmem:[%s2484_s11 + $0x24c] sm:$0xff]  }
  0xaa   : > { %v1333_v30 = vmax.f32 %v1172_v21, %v2264_v63  ;;  %v563_v31 = vmax.f32 %v274_v23, %v1710_v22  ;;  %v853_v32 = vunpack.c.l.bf16 %v2006_v20  ;;  %v854_v33 = vunpack.c.h.bf16 %v2006_v20 }
  0xab   : > { %v1493_v35 = vmax.f32 %v1332_v26, %v1461_v0  ;;  %v497_v36 = vsel %vm422_vm0, %v1709_v13, %v496_v28  ;;  %v983_v37 = vunpack.c.l.bf16 %v2024_v25  ;;  %v1103_v38 = vrot.slane %v2203_v19, 1  ;;  %v2025_v13 = vld [vmem:[%s2484_s11 + $0x254] sm:$0x1] }
  0xac   : > { %v1494_v39 = vmax.f32 %v1333_v30, %v1462_v5  ;;  %v564_v40 = vmax.f32 %v275_v24, %v497_v36  ;;  %v724_v41 = vmax.f32 %v563_v31, %v2203_v19  ;;  %v1104_v42 = vrot.slane %v2204_v29, 1 }
  0xad   : > { %v1781_v45 = vmax.f32 %v1493_v35, %v1710_v22  ;;  %v1106_v46 = vrot.slane %v983_v37, 1  ;;  %v1302_v47 = vunpack.c.l.bf16 %v2054_v34  ;;  %v1303_v48 = vunpack.c.h.bf16 %v2054_v34  ;;  %v2419_v22 = vld [vmem:[%s2484_s11 + $0xc0] sm:$0xff]   ;;  %v2105_v35 = vld [vmem:[%s2484_s11 + $0xc8] sm:$0x1] }
  0xae   : > { %v1782_v49 = vmax.f32 %v1494_v39, %v1712_v27  ;;  %v725_v50 = vmax.f32 %v564_v40, %v2204_v29  ;;  %v885_v51 = vmax.f32 %v724_v41, %v853_v32  ;;  %v1105_v52 = vsel %vm422_vm0, %v1103_v38, %v1104_v42  ;;  %v2088_v41 = vld [vmem:[%s2484_s11 + $0x18c] sm:$0xff]  }
  0xaf   : > { %v1107_v54 = vsel %vm422_vm0, %v1104_v42, %v1106_v46  ;;  %v2299_v55 = vunpack.c.l.bf16 %v2427_v43  ;;  %v2300_v56 = vunpack.c.h.bf16 %v2427_v43  ;;  %v1593_v57 = vunpack.c.l.bf16 %v2104_v44 }
  0xb0   : > { %v2369_v60 = vpack.c.bf16 %v1782_v49, %v1781_v45  ;;  %v886_v61 = vmax.f32 %v725_v50, %v854_v33  ;;  %v1173_v62 = vmax.f32 %v885_v51, %v1105_v52  ;;  %v1713_v63 = vrot.slane %v1302_v47, 1 }
  0xb1   : > { %v1714_v0 = vrot.slane %v1303_v48, 1  ;;  %v1716_v1 = vrot.slane %v1593_v57, 1  ;;  %v212_v2 = vunpack.c.l.bf16 %v147_v53  ;;  %v213_v3 = vunpack.c.h.bf16 %v147_v53 }
  0xb2   : > { %2440 = vst [vmem:[%s2523_s15 + $0x68] sm:$0xff] %v2369_v60   ;;  %v1174_v4 = vmax.f32 %v886_v61, %v1107_v54  ;;  %v1334_v5 = vmax.f32 %v1173_v62, %v1302_v47  ;;  %v373_v6 = vunpack.c.l.bf16 %v325_v58  ;;  %v694_v7 = vunpack.c.l.bf16 %v1976_v59 }
  0xb3   : > { %v1715_v9 = vsel %vm422_vm0, %v1713_v63, %v1714_v0  ;;  %v1717_v10 = vsel %vm422_vm0, %v1714_v0, %v1716_v1  ;;  %v276_v11 = vmax.f32 %v212_v2, %v2299_v55  ;;  %v277_v12 = vmax.f32 %v213_v3, %v2300_v56 }
  0xb4   : > { %v1335_v14 = vmax.f32 %v1174_v4, %v1303_v48  ;;  %v1495_v15 = vmax.f32 %v1334_v5, %v2299_v55  ;;  %v498_v16 = vrot.slane %v212_v2, 1  ;;  %v499_v17 = vrot.slane %v213_v3, 1 }
  0xb5   : > { %v501_v18 = vrot.slane %v373_v6, 1  ;;  %v695_v19 = vunpack.c.h.bf16 %v1976_v59  ;;  %v2235_v20 = vunpack.c.l.bf16 %v2411_v8  ;;  %v2236_v21 = vunpack.c.h.bf16 %v2411_v8 }
  0xb6   : > { %v1496_v23 = vmax.f32 %v1335_v14, %v2300_v56  ;;  %v1783_v24 = vmax.f32 %v1495_v15, %v1715_v9  ;;  %v500_v25 = vsel %vm422_vm0, %v498_v16, %v499_v17  ;;  %v984_v26 = vunpack.c.l.bf16 %v2025_v13 }
  0xb7   : > { %v502_v27 = vsel %vm422_vm0, %v499_v17, %v501_v18  ;;  %v565_v28 = vmax.f32 %v276_v11, %v500_v25  ;;  %v1108_v29 = vrot.slane %v694_v7, 1  ;;  %v1109_v30 = vrot.slane %v695_v19, 1 }
  0xb8   : > { %v1784_v31 = vmax.f32 %v1496_v23, %v1717_v10  ;;  %v566_v32 = vmax.f32 %v277_v12, %v502_v27  ;;  %v1111_v33 = vrot.slane %v984_v26, 1  ;;  %v2267_v34 = vunpack.c.l.bf16 %v2419_v22 }
  0xb9   : > { %v726_v36 = vmax.f32 %v565_v28, %v694_v7  ;;  %v2268_v37 = vunpack.c.h.bf16 %v2419_v22  ;;  %v1110_v40 = vsel %vm422_vm0, %v1108_v29, %v1109_v30  ;;  %v1594_v44 = vunpack.c.l.bf16 %v2105_v35 }
  0xba   : > { %v2374_v38 = vpack.c.bf16 %v1784_v31, %v1783_v24  ;;  %v727_v39 = vmax.f32 %v566_v32, %v695_v19  ;;  %v1112_v43 = vsel %vm422_vm0, %v1109_v30, %v1111_v33  ;;  %v1718_v46 = vrot.slane %v2267_v34, 1 }
  0xbb   : > { %v887_v42 = vmax.f32 %v726_v36, %v2235_v20  ;;  %v1719_v47 = vrot.slane %v2268_v37, 1  ;;  %v1465_v49 = vunpack.c.l.bf16 %v2088_v41  ;;  %v1721_v50 = vrot.slane %v1594_v44, 1 }
  0xbc   : > { %2441 = vst [vmem:[%s2523_s15 + $0x70] sm:$0xff] %v2374_v38   ;;  %v888_v45 = vmax.f32 %v727_v39, %v2236_v21  ;;  %v1466_v52 = vunpack.c.h.bf16 %v2088_v41 }
  0xbd   : > { %v1175_v48 = vmax.f32 %v887_v42, %v1110_v40  ;;  %v1720_v55 = vsel %vm422_vm0, %v1718_v46, %v1719_v47  ;;  %v1722_v57 = vsel %vm422_vm0, %v1719_v47, %v1721_v50 }
  0xbe   : > { %v1176_v51 = vmax.f32 %v888_v45, %v1112_v43 }
  0xbf   : > { %v1336_v53 = vmax.f32 %v1175_v48, %v2267_v34 }
  0xc0   : > { %v1337_v54 = vmax.f32 %v1176_v51, %v2268_v37 }
  0xc1   : > { %v1497_v56 = vmax.f32 %v1336_v53, %v1465_v49 }
  0xc2   : > { %v1498_v58 = vmax.f32 %v1337_v54, %v1466_v52 }
  0xc3   : > { %v1785_v59 = vmax.f32 %v1497_v56, %v1720_v55 }
  0xc4   : > { %v1786_v60 = vmax.f32 %v1498_v58, %v1722_v57 }
  0xc6   : > { %v2379_v61 = vpack.c.bf16 %v1786_v60, %v1785_v59 }
  0xc8   : > { %2442 = vst [vmem:[%s2523_s15 + $0x78] sm:$0xff] %v2379_v61  }
  0xc9 PF: > { %s11_s6 = sadd.s32 1, %s2458_s6  }
  0xca   : > { %p8_p4 = scmp.ge.s32.totalorder %s11_s6, 4  }
  0xcc   :  { %10 = sbr.rel (!%p8_p4) target bundleno = 1 (0x1), region = 59 }

// kernel: encoder_cnn_forward.22
= control target key start
LH: loop header
LB: loop body
LE: loop exit
PB: predicated region body
PF: predicated region fallthrough
CT: control target
= control target key end

     0   :  { %s1435_s15 = smov 0   ;;  %s1437_s16 = smov 0   ;;  %s1682_s0 = inlined_call_operand.vmem [shape: bf16[2,256,256], index: 0, kind: input, shape index: {}]   ;;  %s1683_s1 = inlined_call_operand.vmem [shape: bf16[256,128], index: 1, kind: input, shape index: {}]   ;;  %s1684_s2 = inlined_call_operand.vmem [shape: f32[1,128], index: 2, kind: input, shape index: {}]   ;;  %s1685_s3 = inlined_call_operand.vmem [shape: f32[1,128], index: 3, kind: input, shape index: {}]   ;;  %s1686_s4 = inlined_call_operand.vmem [shape: bf16[2,256,128], index: 4, kind: output, shape index: {}]  }
   0x1   :  { %s1439_s17 = smov 0  }
   0x2 LB: > { %s26_s18 = sadd.s32 1, %s1404_s16  ;;  %p1000_p0 = scmp.ge.s32.totalorder %s1408_s17, 1  ;;  %s1408_s17 = sphi %s1439_s17, %s14_s17   ;;  %s1404_s16 = sphi %s1437_s16, %s1688_s16   ;;  %s1400_s15 = sphi %s1435_s15, %s1687_s15  }
   0x3   : > { %p28_p1 = scmp.ge.s32.totalorder %s26_s18, 2  ;;  %p184_p2 = scmp.lt.s32.totalorder %s1408_s17, 3 }
   0x5   : > { %s1690_s18 = smov (%p28_p1, %s26_s18), 0  ;;  %p185_p3 = pnand %p1000_p0, %p184_p2 }
   0x6   : > { %p220_p4 = scmp.lt.s32.totalorder (!%p185_p3), %s1400_s15, 1 }
   0x7   : > { %188 = sbr.rel (%p185_p3) target bundleno = 308 (0x134), region = 36 }
   0xc   : > { %v1240_v0 = vld [vmem:[%s1683_s1 + $0x38] sm:$0xff]  ;;  %v1239_v2 = vld [vmem:[%s1683_s1 + $0x30] sm:$0xff]  ;;  %v1238_v4 = vld [vmem:[%s1683_s1 + $0x28] sm:$0xff]  ;;  %s1692_s15 = smov (!%p220_p4, %s1400_s15), 1 }
   0xd   : > { %v1248_v1 = vld [vmem:[%s1683_s1 + $0x78] sm:$0xff]  ;;  %560 = vmatpush.bf16.msra.mxu0 %v1240_v0  ;;  %1344 = vmatpush.bf16.msra.mxu2 %v1240_v0  ;;  %v1247_v3 = vld [vmem:[%s1683_s1 + $0x70] sm:$0xff]  ;;  %v1246_v5 = vld [vmem:[%s1683_s1 + $0x68] sm:$0xff]  ;;  %s1199_s21 = sshll.u32 %s1692_s15, 8  ;;  %s1200_s11 = sshll.u32 %s1692_s15, 7 }
   0xe   : > { %649 = vmatpush.bf16.msra.mxu1 %v1248_v1  ;;  %1352 = vmatpush.bf16.msra.mxu3 %v1248_v1  ;;  %v1237_v6 = vld [vmem:[%s1683_s1 + $0x20] sm:$0xff]  ;;  %v1236_v8 = vld [vmem:[%s1683_s1 + $0x18] sm:$0xff]  ;;  %v1235_v10 = vld [vmem:[%s1683_s1 + $0x10] sm:$0xff]  ;;  %s1502_s26 = scalar_lea.vmem %s1682_s0, %s1199_s21  ;;  %s1596_s14 = scalar_lea.vmem %s1686_s4, %s1200_s11 }
   0xf   : > { %v1245_v7 = vld [vmem:[%s1683_s1 + $0x60] sm:$0xff]  ;;  %v1244_v9 = vld [vmem:[%s1683_s1 + $0x58] sm:$0xff]  ;;  %v1243_v11 = vld [vmem:[%s1683_s1 + $0x50] sm:$0xff] }
  0x10   : > { %v1234_v12 = vld [vmem:[%s1683_s1 + $0x8] sm:$0xff]  ;;  %v1233_v14 = vld [vmem:[%s1683_s1] sm:$0xff]  ;;  %v1015_v28 = vld [vmem:[%s1502_s26 + $0x10] sm:$0xf] }
  0x11   : > { %561 = vmatpush.bf16.msra.mxu0 %v1239_v2  ;;  %1345 = vmatpush.bf16.msra.mxu2 %v1239_v2  ;;  %v1242_v13 = vld [vmem:[%s1683_s1 + $0x48] sm:$0xff]  ;;  %v1241_v15 = vld [vmem:[%s1683_s1 + $0x40] sm:$0xff]  ;;  %v1204_v29 = vld [vmem:[%s1502_s26 + $0x14] sm:$0xf0] }
  0x12   : > { %650 = vmatpush.bf16.msra.mxu1 %v1247_v3  ;;  %1353 = vmatpush.bf16.msra.mxu3 %v1247_v3  ;;  %v1007_v16 = vld [vmem:[%s1502_s26] sm:$0xf]  ;;  %v1202_v17 = vld [vmem:[%s1502_s26 + $0x4] sm:$0xf0]  ;;  %v1201_v20 = vld [vmem:[%s1502_s26 + $0x4] sm:$0xf]  ;;  %v1016_v36 = vor.u32 %v1204_v29, %v1015_v28 }
  0x13   : > { %v1071_v18 = vld [vmem:[%s1502_s26 + $0x80] sm:$0xf]  ;;  %v1218_v19 = vld [vmem:[%s1502_s26 + $0x84] sm:$0xf0]  ;;  %v1009_v21 = vld [vmem:[%s1502_s26 + $0x8] sm:$0xf0]  ;;  %v1008_v24 = vor.u32 %v1202_v17, %v1007_v16 }
  0x14   : > { %v1217_v22 = vld [vmem:[%s1502_s26 + $0x84] sm:$0xf]  ;;  %v1073_v23 = vld [vmem:[%s1502_s26 + $0x88] sm:$0xf0]  ;;  %v1072_v25 = vor.u32 %v1218_v19, %v1071_v18  ;;  %v1012_v26 = vor.u32 %v1201_v20, %v1009_v21  ;;  %v1079_v30 = vld [vmem:[%s1502_s26 + $0x90] sm:$0xf] }
  0x15   : > { %562 = vmatpush.bf16.msra.mxu0 %v1238_v4  ;;  %1346 = vmatpush.bf16.msra.mxu2 %v1238_v4  ;;  %v1076_v27 = vor.u32 %v1217_v22, %v1073_v23  ;;  %v1220_v31 = vld [vmem:[%s1502_s26 + $0x94] sm:$0xf0]  ;;  %v1203_v32 = vld [vmem:[%s1502_s26 + $0x14] sm:$0xf]  ;;  %v1017_v33 = vld [vmem:[%s1502_s26 + $0x18] sm:$0xf0] }
  0x16   : > { %651 = vmatpush.bf16.msra.mxu1 %v1246_v5  ;;  %1354 = vmatpush.bf16.msra.mxu3 %v1246_v5  ;;  %v1219_v34 = vld [vmem:[%s1502_s26 + $0x94] sm:$0xf]  ;;  %v1081_v35 = vld [vmem:[%s1502_s26 + $0x98] sm:$0xf0]  ;;  %v1080_v37 = vor.u32 %v1220_v31, %v1079_v30  ;;  %v1020_v38 = vor.u32 %v1203_v32, %v1017_v33  ;;  %v1023_v40 = vld [vmem:[%s1502_s26 + $0x20] sm:$0xf] }
  0x17   : > { %v1084_v39 = vor.u32 %v1219_v34, %v1081_v35  ;;  %v1206_v41 = vld [vmem:[%s1502_s26 + $0x24] sm:$0xf0]  ;;  %v1087_v42 = vld [vmem:[%s1502_s26 + $0xa0] sm:$0xf]  ;;  %v1205_v44 = vld [vmem:[%s1502_s26 + $0x24] sm:$0xf] }
  0x18   : > { %v1222_v43 = vld [vmem:[%s1502_s26 + $0xa4] sm:$0xf0]  ;;  %v1025_v45 = vld [vmem:[%s1502_s26 + $0x28] sm:$0xf0]  ;;  %v1221_v46 = vld [vmem:[%s1502_s26 + $0xa4] sm:$0xf]  ;;  %v1024_v48 = vor.u32 %v1206_v41, %v1023_v40 }
  0x19   : > { %563 = vmatpush.bf16.msra.mxu0 %v1237_v6  ;;  %1347 = vmatpush.bf16.msra.mxu2 %v1237_v6  ;;  %v1089_v47 = vld [vmem:[%s1502_s26 + $0xa8] sm:$0xf0]  ;;  %v1088_v49 = vor.u32 %v1222_v43, %v1087_v42  ;;  %v1028_v50 = vor.u32 %v1205_v44, %v1025_v45  ;;  %v1031_v52 = vld [vmem:[%s1502_s26 + $0x30] sm:$0xf]  ;;  %v1208_v53 = vld [vmem:[%s1502_s26 + $0x34] sm:$0xf0] }
  0x1a   : > { %652 = vmatpush.bf16.msra.mxu1 %v1245_v7  ;;  %1355 = vmatpush.bf16.msra.mxu3 %v1245_v7  ;;  %v1092_v51 = vor.u32 %v1221_v46, %v1089_v47  ;;  %v1095_v54 = vld [vmem:[%s1502_s26 + $0xb0] sm:$0xf]  ;;  %v1224_v55 = vld [vmem:[%s1502_s26 + $0xb4] sm:$0xf0]  ;;  %v1207_v56 = vld [vmem:[%s1502_s26 + $0x34] sm:$0xf]  ;;  %v1032_v60 = vor.u32 %v1208_v53, %v1031_v52 }
  0x1b   : > { %v1033_v57 = vld [vmem:[%s1502_s26 + $0x38] sm:$0xf0]  ;;  %v1223_v58 = vld [vmem:[%s1502_s26 + $0xb4] sm:$0xf]  ;;  %v1096_v61 = vor.u32 %v1224_v55, %v1095_v54  ;;  %v1039_v0 = vld [vmem:[%s1502_s26 + $0x40] sm:$0xf] }
  0x1c   : > { %v1097_v59 = vld [vmem:[%s1502_s26 + $0xb8] sm:$0xf0]  ;;  %v1036_v62 = vor.u32 %v1207_v56, %v1033_v57  ;;  %v1210_v1 = vld [vmem:[%s1502_s26 + $0x44] sm:$0xf0]  ;;  %v1103_v2 = vld [vmem:[%s1502_s26 + $0xc0] sm:$0xf] }
  0x1d   : > { %564 = vmatpush.bf16.msra.mxu0 %v1236_v8  ;;  %1348 = vmatpush.bf16.msra.mxu2 %v1236_v8  ;;  %v1100_v63 = vor.u32 %v1223_v58, %v1097_v59  ;;  %v1226_v3 = vld [vmem:[%s1502_s26 + $0xc4] sm:$0xf0]  ;;  %v1209_v4 = vld [vmem:[%s1502_s26 + $0x44] sm:$0xf]  ;;  %v1041_v5 = vld [vmem:[%s1502_s26 + $0x48] sm:$0xf0]  ;;  %v1040_v8 = vor.u32 %v1210_v1, %v1039_v0 }
  0x1e   : > { %653 = vmatpush.bf16.msra.mxu1 %v1244_v9  ;;  %1356 = vmatpush.bf16.msra.mxu3 %v1244_v9  ;;  %v1225_v6 = vld [vmem:[%s1502_s26 + $0xc4] sm:$0xf]  ;;  %v1105_v7 = vld [vmem:[%s1502_s26 + $0xc8] sm:$0xf0]  ;;  %v1104_v9 = vor.u32 %v1226_v3, %v1103_v2  ;;  %v1211_v16 = vld [vmem:[%s1502_s26 + $0x54] sm:$0xf] }
  0x1f   : > { %v1049_v17 = vld [vmem:[%s1502_s26 + $0x58] sm:$0xf0]  ;;  %v1227_v18 = vld [vmem:[%s1502_s26 + $0xd4] sm:$0xf]  ;;  %v1213_v28 = vld [vmem:[%s1502_s26 + $0x64] sm:$0xf] }
  0x20   : > { %v1113_v19 = vld [vmem:[%s1502_s26 + $0xd8] sm:$0xf0]  ;;  %v1052_v22 = vor.u32 %v1211_v16, %v1049_v17  ;;  %v1057_v29 = vld [vmem:[%s1502_s26 + $0x68] sm:$0xf0]  ;;  %v1229_v30 = vld [vmem:[%s1502_s26 + $0xe4] sm:$0xf] }
  0x21   : > { %565 = vmatpush.bf16.msra.mxu0 %v1235_v10  ;;  %1349 = vmatpush.bf16.msra.mxu2 %v1235_v10  ;;  %v1044_v10 = vor.u32 %v1209_v4, %v1041_v5  ;;  %v1116_v23 = vor.u32 %v1227_v18, %v1113_v19  ;;  %v1121_v31 = vld [vmem:[%s1502_s26 + $0xe8] sm:$0xf0]  ;;  %v1060_v34 = vor.u32 %v1213_v28, %v1057_v29  ;;  %v1215_v40 = vld [vmem:[%s1502_s26 + $0x74] sm:$0xf]  ;;  %v1065_v41 = vld [vmem:[%s1502_s26 + $0x78] sm:$0xf0] }
  0x22   : > { %654 = vmatpush.bf16.msra.mxu1 %v1243_v11  ;;  %1357 = vmatpush.bf16.msra.mxu3 %v1243_v11  ;;  %v1108_v11 = vor.u32 %v1225_v6, %v1105_v7  ;;  %v1124_v35 = vor.u32 %v1229_v30, %v1121_v31  ;;  %v1231_v42 = vld [vmem:[%s1502_s26 + $0xf4] sm:$0xf]  ;;  %v1129_v43 = vld [vmem:[%s1502_s26 + $0xf8] sm:$0xf0]  ;;  %v1068_v46 = vor.u32 %v1215_v40, %v1065_v41  ;;  %v1586_v55 = vld [vmem:[%s1685_s3] ss:$0 sm:$0xff] }
  0x23   : > { %v1132_v47 = vor.u32 %v1231_v42, %v1129_v43 }
  0x25   : > { %566 = vmatpush.bf16.msra.mxu0 %v1234_v12  ;;  %1350 = vmatpush.bf16.msra.mxu2 %v1234_v12  ;;  %v1047_v12 = vld [vmem:[%s1502_s26 + $0x50] sm:$0xf] }
  0x26   : > { %655 = vmatpush.bf16.msra.mxu1 %v1242_v13  ;;  %1358 = vmatpush.bf16.msra.mxu3 %v1242_v13  ;;  %v1212_v13 = vld [vmem:[%s1502_s26 + $0x54] sm:$0xf0] }
  0x27   : > { %v1048_v20 = vor.u32 %v1212_v13, %v1047_v12 }
  0x29   : > { %567 = vmatpush.bf16.msra.mxu0 %v1233_v14  ;;  %1351 = vmatpush.bf16.msra.mxu2 %v1233_v14  ;;  %v1111_v14 = vld [vmem:[%s1502_s26 + $0xd0] sm:$0xf] }
  0x2a   : > { %656 = vmatpush.bf16.msra.mxu1 %v1241_v15  ;;  %1359 = vmatpush.bf16.msra.mxu3 %v1241_v15  ;;  %v1228_v15 = vld [vmem:[%s1502_s26 + $0xd4] sm:$0xf0] }
  0x2b   : > { %v1112_v21 = vor.u32 %v1228_v15, %v1111_v14 }
  0x2c   : > { %568 = vmatmul.bf16.vlgmr.msra.gmra.mxu0 %v1008_v24  ;;  %608 = vmatmul.bf16.vlgmr.msra.gmra.mxu2 %v1072_v25  ;;  %v1055_v24 = vld [vmem:[%s1502_s26 + $0x60] sm:$0xf]  ;;  %v1214_v25 = vld [vmem:[%s1502_s26 + $0x64] sm:$0xf0] }
  0x2d   : > { %657 = vmatmul.bf16.vlgmr.msra.gmra.mxu1 %v1012_v26  ;;  %697 = vmatmul.bf16.vlgmr.msra.gmra.mxu3 %v1076_v27  ;;  %v1119_v26 = vld [vmem:[%s1502_s26 + $0xe0] sm:$0xf]  ;;  %v1230_v27 = vld [vmem:[%s1502_s26 + $0xe4] sm:$0xf0]  ;;  %v1056_v32 = vor.u32 %v1214_v25, %v1055_v24 }
  0x2e   : > { %v1120_v33 = vor.u32 %v1230_v27, %v1119_v26 }
  0x3c   : > { %573 = vmatmul.bf16.gmra.mxu0 %v1016_v36  ;;  %613 = vmatmul.bf16.gmra.mxu2 %v1080_v37  ;;  %v1063_v36 = vld [vmem:[%s1502_s26 + $0x70] sm:$0xf]  ;;  %v1216_v37 = vld [vmem:[%s1502_s26 + $0x74] sm:$0xf0] }
  0x3d   : > { %662 = vmatmul.bf16.gmra.mxu1 %v1020_v38  ;;  %702 = vmatmul.bf16.gmra.mxu3 %v1084_v39  ;;  %v1127_v38 = vld [vmem:[%s1502_s26 + $0xf0] sm:$0xf]  ;;  %v1232_v39 = vld [vmem:[%s1502_s26 + $0xf4] sm:$0xf0]  ;;  %v1064_v44 = vor.u32 %v1216_v37, %v1063_v36 }
  0x3e   : > { %v1128_v45 = vor.u32 %v1232_v39, %v1127_v38 }
  0x4c   : > { %578 = vmatmul.bf16.gmra.mxu0 %v1024_v48  ;;  %618 = vmatmul.bf16.gmra.mxu2 %v1088_v49 }
  0x4d   : > { %667 = vmatmul.bf16.gmra.mxu1 %v1028_v50  ;;  %707 = vmatmul.bf16.gmra.mxu3 %v1092_v51  ;;  %v1580_v51 = vld [vmem:[%s1684_s2] ss:$0 sm:$0xff] }
  0x5c   : > { %583 = vmatmul.bf16.gmra.mxu0 %v1032_v60  ;;  %623 = vmatmul.bf16.gmra.mxu2 %v1096_v61 }
  0x5d   : > { %672 = vmatmul.bf16.gmra.mxu1 %v1036_v62  ;;  %712 = vmatmul.bf16.gmra.mxu3 %v1100_v63 }
  0x6c   : > { %588 = vmatmul.bf16.gmra.mxu0 %v1040_v8  ;;  %628 = vmatmul.bf16.gmra.mxu2 %v1104_v9 }
  0x6d   : > { %677 = vmatmul.bf16.gmra.mxu1 %v1044_v10  ;;  %717 = vmatmul.bf16.gmra.mxu3 %v1108_v11 }
  0x7c   : > { %593 = vmatmul.bf16.gmra.mxu0 %v1048_v20  ;;  %633 = vmatmul.bf16.gmra.mxu2 %v1112_v21 }
  0x7d   : > { %682 = vmatmul.bf16.gmra.mxu1 %v1052_v22  ;;  %722 = vmatmul.bf16.gmra.mxu3 %v1116_v23 }
  0x8c   : > { %598 = vmatmul.bf16.gmra.mxu0 %v1056_v32  ;;  %638 = vmatmul.bf16.gmra.mxu2 %v1120_v33 }
  0x8d   : > { %687 = vmatmul.bf16.gmra.mxu1 %v1060_v34  ;;  %727 = vmatmul.bf16.gmra.mxu3 %v1124_v35 }
  0x9c   : > { %603 = vmatmul.bf16.gmra.mxu0 %v1064_v44  ;;  %643 = vmatmul.bf16.gmra.mxu2 %v1128_v45 }
  0x9d   : > { %692 = vmatmul.bf16.gmra.mxu1 %v1068_v46  ;;  %732 = vmatmul.bf16.gmra.mxu3 %v1132_v47 }
  0xa9   : > { %v569_v48 = vpop.f32.mrf.mxu0 }
  0xaa   : > { %v658_v49 = vpop.f32.mrf.mxu1 }
  0xab   : > { %v659_v50 = vadd.f32 %v658_v49, %v569_v48 }
  0xad   : > { %v742_v54 = vmul.f32 %v1580_v51, %v659_v50 }
  0xaf   : > { %v609_v52 = vpop.f32.mrf.mxu2  ;;  %v778_v60 = vadd.f32 %v1586_v55, %v742_v54 }
  0xb0   : > { %v698_v53 = vpop.f32.mrf.mxu3 }
  0xb1   : > { %v571_v56 = vpop.f32.mrf.mxu0  ;;  %v699_v58 = vadd.f32 %v698_v53, %v609_v52  ;;  %v810_v2 = vmax.f32 %v778_v60, 0.0 }
  0xb2   : > { %v660_v57 = vpop.f32.mrf.mxu1 }
  0xb3   : > { %v661_v59 = vadd.f32 %v660_v57, %v571_v56  ;;  %v758_v62 = vmul.f32 %v1580_v51, %v699_v58 }
  0xb5   : > { %v743_v61 = vmul.f32 %v1580_v51, %v661_v59  ;;  %v794_v7 = vadd.f32 %v1586_v55, %v758_v62 }
  0xb7   : > { %v779_v63 = vadd.f32 %v1586_v55, %v743_v61  ;;  %v611_v0 = vpop.f32.mrf.mxu2  ;;  %v826_v12 = vmax.f32 %v794_v7, 0.0 }
  0xb8   : > { %v700_v1 = vpop.f32.mrf.mxu3 }
  0xb9   : > { %v811_v3 = vmax.f32 %v779_v63, 0.0  ;;  %v701_v4 = vadd.f32 %v700_v1, %v611_v0  ;;  %v574_v5 = vpop.f32.mrf.mxu0 }
  0xba   : > { %v663_v6 = vpop.f32.mrf.mxu1 }
  0xbb   : > { %v1252_v8 = vpack.c.bf16 %v811_v3, %v810_v2  ;;  %v759_v9 = vmul.f32 %v1580_v51, %v701_v4  ;;  %v664_v11 = vadd.f32 %v663_v6, %v574_v5 }
  0xbd   : > { %1253 = vst [vmem:[%s1596_s14] sm:$0xff] %v1252_v8   ;;  %v795_v10 = vadd.f32 %v1586_v55, %v759_v9  ;;  %v744_v17 = vmul.f32 %v1580_v51, %v664_v11 }
  0xbf   : > { %v827_v13 = vmax.f32 %v795_v10, 0.0  ;;  %v614_v14 = vpop.f32.mrf.mxu2  ;;  %v780_v22 = vadd.f32 %v1586_v55, %v744_v17 }
  0xc0   : > { %v703_v15 = vpop.f32.mrf.mxu3 }
  0xc1   : > { %v1292_v16 = vpack.c.bf16 %v827_v13, %v826_v12  ;;  %v576_v18 = vpop.f32.mrf.mxu0  ;;  %v704_v20 = vadd.f32 %v703_v15, %v614_v14  ;;  %v812_v28 = vmax.f32 %v780_v22, 0.0 }
  0xc2   : > { %v665_v19 = vpop.f32.mrf.mxu1 }
  0xc3   : > { %1336 = vst [vmem:[%s1596_s14 + $0x40] sm:$0xff] %v1292_v16   ;;  %v666_v21 = vadd.f32 %v665_v19, %v576_v18  ;;  %v760_v24 = vmul.f32 %v1580_v51, %v704_v20 }
  0xc5   : > { %v745_v23 = vmul.f32 %v1580_v51, %v666_v21  ;;  %v796_v33 = vadd.f32 %v1586_v55, %v760_v24 }
  0xc7   : > { %v781_v25 = vadd.f32 %v1586_v55, %v745_v23  ;;  %v616_v26 = vpop.f32.mrf.mxu2  ;;  %v828_v38 = vmax.f32 %v796_v33, 0.0 }
  0xc8   : > { %v705_v27 = vpop.f32.mrf.mxu3 }
  0xc9   : > { %v813_v29 = vmax.f32 %v781_v25, 0.0  ;;  %v706_v30 = vadd.f32 %v705_v27, %v616_v26  ;;  %v579_v31 = vpop.f32.mrf.mxu0 }
  0xca   : > { %v668_v32 = vpop.f32.mrf.mxu1 }
  0xcb   : > { %v1257_v34 = vpack.c.bf16 %v813_v29, %v812_v28  ;;  %v761_v35 = vmul.f32 %v1580_v51, %v706_v30  ;;  %v669_v37 = vadd.f32 %v668_v32, %v579_v31 }
  0xcd   : > { %1329 = vst [vmem:[%s1596_s14 + $0x8] sm:$0xff] %v1257_v34   ;;  %v797_v36 = vadd.f32 %v1586_v55, %v761_v35  ;;  %v746_v43 = vmul.f32 %v1580_v51, %v669_v37 }
  0xcf   : > { %v829_v39 = vmax.f32 %v797_v36, 0.0  ;;  %v619_v40 = vpop.f32.mrf.mxu2  ;;  %v782_v48 = vadd.f32 %v1586_v55, %v746_v43 }
  0xd0   : > { %v708_v41 = vpop.f32.mrf.mxu3 }
  0xd1   : > { %v1297_v42 = vpack.c.bf16 %v829_v39, %v828_v38  ;;  %v581_v44 = vpop.f32.mrf.mxu0  ;;  %v709_v46 = vadd.f32 %v708_v41, %v619_v40  ;;  %v814_v56 = vmax.f32 %v782_v48, 0.0 }
  0xd2   : > { %v670_v45 = vpop.f32.mrf.mxu1 }
  0xd3   : > { %1337 = vst [vmem:[%s1596_s14 + $0x48] sm:$0xff] %v1297_v42   ;;  %v671_v47 = vadd.f32 %v670_v45, %v581_v44  ;;  %v762_v50 = vmul.f32 %v1580_v51, %v709_v46 }
  0xd5   : > { %v747_v49 = vmul.f32 %v1580_v51, %v671_v47  ;;  %v798_v61 = vadd.f32 %v1586_v55, %v762_v50 }
  0xd7   : > { %v783_v52 = vadd.f32 %v1586_v55, %v747_v49  ;;  %v621_v53 = vpop.f32.mrf.mxu2  ;;  %v830_v2 = vmax.f32 %v798_v61, 0.0 }
  0xd8   : > { %v710_v54 = vpop.f32.mrf.mxu3 }
  0xd9   : > { %v815_v57 = vmax.f32 %v783_v52, 0.0  ;;  %v711_v58 = vadd.f32 %v710_v54, %v621_v53  ;;  %v584_v59 = vpop.f32.mrf.mxu0 }
  0xda   : > { %v673_v60 = vpop.f32.mrf.mxu1 }
  0xdb   : > { %v1262_v62 = vpack.c.bf16 %v815_v57, %v814_v56  ;;  %v763_v63 = vmul.f32 %v1580_v51, %v711_v58  ;;  %v674_v1 = vadd.f32 %v673_v60, %v584_v59 }
  0xdd   : > { %1330 = vst [vmem:[%s1596_s14 + $0x10] sm:$0xff] %v1262_v62   ;;  %v799_v0 = vadd.f32 %v1586_v55, %v763_v63  ;;  %v748_v7 = vmul.f32 %v1580_v51, %v674_v1 }
  0xdf   : > { %v831_v3 = vmax.f32 %v799_v0, 0.0  ;;  %v624_v4 = vpop.f32.mrf.mxu2  ;;  %v784_v12 = vadd.f32 %v1586_v55, %v748_v7 }
  0xe0   : > { %v713_v5 = vpop.f32.mrf.mxu3 }
  0xe1   : > { %v1302_v6 = vpack.c.bf16 %v831_v3, %v830_v2  ;;  %v586_v8 = vpop.f32.mrf.mxu0  ;;  %v714_v10 = vadd.f32 %v713_v5, %v624_v4  ;;  %v816_v18 = vmax.f32 %v784_v12, 0.0 }
  0xe2   : > { %v675_v9 = vpop.f32.mrf.mxu1 }
  0xe3   : > { %1338 = vst [vmem:[%s1596_s14 + $0x50] sm:$0xff] %v1302_v6   ;;  %v676_v11 = vadd.f32 %v675_v9, %v586_v8  ;;  %v764_v14 = vmul.f32 %v1580_v51, %v714_v10 }
  0xe5   : > { %v749_v13 = vmul.f32 %v1580_v51, %v676_v11  ;;  %v800_v23 = vadd.f32 %v1586_v55, %v764_v14 }
  0xe7   : > { %v785_v15 = vadd.f32 %v1586_v55, %v749_v13  ;;  %v626_v16 = vpop.f32.mrf.mxu2  ;;  %v832_v28 = vmax.f32 %v800_v23, 0.0 }
  0xe8   : > { %v715_v17 = vpop.f32.mrf.mxu3 }
  0xe9   : > { %v817_v19 = vmax.f32 %v785_v15, 0.0  ;;  %v716_v20 = vadd.f32 %v715_v17, %v626_v16  ;;  %v589_v21 = vpop.f32.mrf.mxu0 }
  0xea   : > { %v678_v22 = vpop.f32.mrf.mxu1 }
  0xeb   : > { %v1267_v24 = vpack.c.bf16 %v817_v19, %v816_v18  ;;  %v765_v25 = vmul.f32 %v1580_v51, %v716_v20  ;;  %v679_v27 = vadd.f32 %v678_v22, %v589_v21 }
  0xed   : > { %1331 = vst [vmem:[%s1596_s14 + $0x18] sm:$0xff] %v1267_v24   ;;  %v801_v26 = vadd.f32 %v1586_v55, %v765_v25  ;;  %v750_v33 = vmul.f32 %v1580_v51, %v679_v27 }
  0xef   : > { %v833_v29 = vmax.f32 %v801_v26, 0.0  ;;  %v629_v30 = vpop.f32.mrf.mxu2  ;;  %v786_v38 = vadd.f32 %v1586_v55, %v750_v33 }
  0xf0   : > { %v718_v31 = vpop.f32.mrf.mxu3 }
  0xf1   : > { %v1307_v32 = vpack.c.bf16 %v833_v29, %v832_v28  ;;  %v591_v34 = vpop.f32.mrf.mxu0  ;;  %v719_v36 = vadd.f32 %v718_v31, %v629_v30  ;;  %v818_v44 = vmax.f32 %v786_v38, 0.0 }
  0xf2   : > { %v680_v35 = vpop.f32.mrf.mxu1 }
  0xf3   : > { %1339 = vst [vmem:[%s1596_s14 + $0x58] sm:$0xff] %v1307_v32   ;;  %v681_v37 = vadd.f32 %v680_v35, %v591_v34  ;;  %v766_v40 = vmul.f32 %v1580_v51, %v719_v36 }
  0xf5   : > { %v751_v39 = vmul.f32 %v1580_v51, %v681_v37  ;;  %v802_v49 = vadd.f32 %v1586_v55, %v766_v40 }
  0xf7   : > { %v787_v41 = vadd.f32 %v1586_v55, %v751_v39  ;;  %v631_v42 = vpop.f32.mrf.mxu2  ;;  %v834_v56 = vmax.f32 %v802_v49, 0.0 }
  0xf8   : > { %v720_v43 = vpop.f32.mrf.mxu3 }
  0xf9   : > { %v819_v45 = vmax.f32 %v787_v41, 0.0  ;;  %v721_v46 = vadd.f32 %v720_v43, %v631_v42  ;;  %v594_v47 = vpop.f32.mrf.mxu0 }
  0xfa   : > { %v683_v48 = vpop.f32.mrf.mxu1 }
  0xfb   : > { %v1272_v50 = vpack.c.bf16 %v819_v45, %v818_v44  ;;  %v767_v52 = vmul.f32 %v1580_v51, %v721_v46  ;;  %v684_v54 = vadd.f32 %v683_v48, %v594_v47 }
  0xfd   : > { %1332 = vst [vmem:[%s1596_s14 + $0x20] sm:$0xff] %v1272_v50   ;;  %v803_v53 = vadd.f32 %v1586_v55, %v767_v52  ;;  %v752_v61 = vmul.f32 %v1580_v51, %v684_v54 }
  0xff   : > { %v835_v57 = vmax.f32 %v803_v53, 0.0  ;;  %v634_v58 = vpop.f32.mrf.mxu2  ;;  %v788_v2 = vadd.f32 %v1586_v55, %v752_v61 }
 0x100   : > { %v723_v59 = vpop.f32.mrf.mxu3 }
 0x101   : > { %v1312_v60 = vpack.c.bf16 %v835_v57, %v834_v56  ;;  %v596_v62 = vpop.f32.mrf.mxu0  ;;  %v724_v0 = vadd.f32 %v723_v59, %v634_v58  ;;  %v820_v8 = vmax.f32 %v788_v2, 0.0 }
 0x102   : > { %v685_v63 = vpop.f32.mrf.mxu1 }
 0x103   : > { %1340 = vst [vmem:[%s1596_s14 + $0x60] sm:$0xff] %v1312_v60   ;;  %v686_v1 = vadd.f32 %v685_v63, %v596_v62  ;;  %v768_v4 = vmul.f32 %v1580_v51, %v724_v0 }
 0x105   : > { %v753_v3 = vmul.f32 %v1580_v51, %v686_v1  ;;  %v804_v13 = vadd.f32 %v1586_v55, %v768_v4 }
 0x107   : > { %v789_v5 = vadd.f32 %v1586_v55, %v753_v3  ;;  %v636_v6 = vpop.f32.mrf.mxu2  ;;  %v836_v18 = vmax.f32 %v804_v13, 0.0 }
 0x108   : > { %v725_v7 = vpop.f32.mrf.mxu3 }
 0x109   : > { %v821_v9 = vmax.f32 %v789_v5, 0.0  ;;  %v726_v10 = vadd.f32 %v725_v7, %v636_v6  ;;  %v599_v11 = vpop.f32.mrf.mxu0 }
 0x10a   : > { %v688_v12 = vpop.f32.mrf.mxu1 }
 0x10b   : > { %v1277_v14 = vpack.c.bf16 %v821_v9, %v820_v8  ;;  %v769_v15 = vmul.f32 %v1580_v51, %v726_v10  ;;  %v689_v17 = vadd.f32 %v688_v12, %v599_v11 }
 0x10d   : > { %1333 = vst [vmem:[%s1596_s14 + $0x28] sm:$0xff] %v1277_v14   ;;  %v805_v16 = vadd.f32 %v1586_v55, %v769_v15  ;;  %v754_v23 = vmul.f32 %v1580_v51, %v689_v17 }
 0x10f   : > { %v837_v19 = vmax.f32 %v805_v16, 0.0  ;;  %v639_v20 = vpop.f32.mrf.mxu2  ;;  %v790_v28 = vadd.f32 %v1586_v55, %v754_v23 }
 0x110   : > { %v728_v21 = vpop.f32.mrf.mxu3 }
 0x111   : > { %v1317_v22 = vpack.c.bf16 %v837_v19, %v836_v18  ;;  %v601_v24 = vpop.f32.mrf.mxu0  ;;  %v729_v26 = vadd.f32 %v728_v21, %v639_v20  ;;  %v822_v34 = vmax.f32 %v790_v28, 0.0 }
 0x112   : > { %v690_v25 = vpop.f32.mrf.mxu1 }
 0x113   : > { %1341 = vst [vmem:[%s1596_s14 + $0x68] sm:$0xff] %v1317_v22   ;;  %v691_v27 = vadd.f32 %v690_v25, %v601_v24  ;;  %v770_v30 = vmul.f32 %v1580_v51, %v729_v26 }
 0x115   : > { %v755_v29 = vmul.f32 %v1580_v51, %v691_v27  ;;  %v806_v39 = vadd.f32 %v1586_v55, %v770_v30 }
 0x117   : > { %v791_v31 = vadd.f32 %v1586_v55, %v755_v29  ;;  %v641_v32 = vpop.f32.mrf.mxu2  ;;  %v838_v44 = vmax.f32 %v806_v39, 0.0 }
 0x118   : > { %v730_v33 = vpop.f32.mrf.mxu3 }
 0x119   : > { %v823_v35 = vmax.f32 %v791_v31, 0.0  ;;  %v731_v36 = vadd.f32 %v730_v33, %v641_v32  ;;  %v604_v37 = vpop.f32.mrf.mxu0 }
 0x11a   : > { %v693_v38 = vpop.f32.mrf.mxu1 }
 0x11b   : > { %v1282_v40 = vpack.c.bf16 %v823_v35, %v822_v34  ;;  %v771_v41 = vmul.f32 %v1580_v51, %v731_v36  ;;  %v694_v43 = vadd.f32 %v693_v38, %v604_v37 }
 0x11d   : > { %1334 = vst [vmem:[%s1596_s14 + $0x30] sm:$0xff] %v1282_v40   ;;  %v807_v42 = vadd.f32 %v1586_v55, %v771_v41  ;;  %v756_v49 = vmul.f32 %v1580_v51, %v694_v43 }
 0x11f   : > { %v839_v45 = vmax.f32 %v807_v42, 0.0  ;;  %v644_v46 = vpop.f32.mrf.mxu2  ;;  %v792_v56 = vadd.f32 %v1586_v55, %v756_v49 }
 0x120   : > { %v733_v47 = vpop.f32.mrf.mxu3 }
 0x121   : > { %v1322_v48 = vpack.c.bf16 %v839_v45, %v838_v44  ;;  %v606_v50 = vpop.f32.mrf.mxu0  ;;  %v734_v53 = vadd.f32 %v733_v47, %v644_v46  ;;  %v824_v62 = vmax.f32 %v792_v56, 0.0 }
 0x122   : > { %v695_v52 = vpop.f32.mrf.mxu1 }
 0x123   : > { %1342 = vst [vmem:[%s1596_s14 + $0x70] sm:$0xff] %v1322_v48   ;;  %v696_v54 = vadd.f32 %v695_v52, %v606_v50  ;;  %v772_v58 = vmul.f32 %v1580_v51, %v734_v53 }
 0x125   : > { %v757_v57 = vmul.f32 %v1580_v51, %v696_v54  ;;  %v808_v1 = vadd.f32 %v1586_v55, %v772_v58 }
 0x127   : > { %v793_v59 = vadd.f32 %v1586_v55, %v757_v57  ;;  %v646_v60 = vpop.f32.mrf.mxu2  ;;  %v840_v5 = vmax.f32 %v808_v1, 0.0 }
 0x128   : > { %v735_v61 = vpop.f32.mrf.mxu3 }
 0x129   : > { %v825_v63 = vmax.f32 %v793_v59, 0.0  ;;  %v736_v0 = vadd.f32 %v735_v61, %v646_v60 }
 0x12b   : > { %v1287_v2 = vpack.c.bf16 %v825_v63, %v824_v62  ;;  %v773_v3 = vmul.f32 %v1580_v51, %v736_v0 }
 0x12d   : > { %1335 = vst [vmem:[%s1596_s14 + $0x38] sm:$0xff] %v1287_v2   ;;  %v809_v4 = vadd.f32 %v1586_v55, %v773_v3 }
 0x12f   : > { %v841_v6 = vmax.f32 %v809_v4, 0.0 }
 0x131   : > { %v1327_v7 = vpack.c.bf16 %v841_v6, %v840_v5 }
 0x133   : > { %1343 = vst [vmem:[%s1596_s14 + $0x78] sm:$0xff] %v1327_v7  }
 0x134 PF: > { %s14_s17 = sadd.s32 1, %s1408_s17   ;;  %s1687_s15 = smov %s1404_s16 }
 0x135   : > { %p11_p5 = scmp.ge.s32.totalorder %s14_s17, 4   ;;  %s1688_s16 = smov %s1690_s18 }
 0x137   :  { %13 = sbr.rel (!%p11_p5) target bundleno = 2 (0x2), region = 66 }

// kernel: encoder_cnn_forward.23
= control target key start
LH: loop header
LB: loop body
LE: loop exit
PB: predicated region body
PF: predicated region fallthrough
CT: control target
= control target key end

     0   :  { %s1068_s15 = smov 0   ;;  %s1070_s16 = smov 0   ;;  %s1246_s0 = inlined_call_operand.vmem [shape: bf16[2,256,128], index: 0, kind: input, shape index: {}]   ;;  %s1247_s1 = inlined_call_operand.vmem [shape: bf16[128,128], index: 1, kind: input, shape index: {}]   ;;  %s1248_s2 = inlined_call_operand.vmem [shape: f32[1,128], index: 2, kind: input, shape index: {}]   ;;  %s1249_s3 = inlined_call_operand.vmem [shape: f32[1,128], index: 3, kind: input, shape index: {}]   ;;  %s1250_s4 = inlined_call_operand.vmem [shape: bf16[2,256,128], index: 4, kind: output, shape index: {}]  }
   0x1   :  { %s1072_s17 = smov 0  }
   0x2 LB: > { %s26_s18 = sadd.s32 1, %s1037_s16  ;;  %p745_p0 = scmp.ge.s32.totalorder %s1041_s17, 1  ;;  %s1041_s17 = sphi %s1072_s17, %s14_s17   ;;  %s1037_s16 = sphi %s1070_s16, %s1252_s16   ;;  %s1033_s15 = sphi %s1068_s15, %s1251_s15  }
   0x3   : > { %p28_p1 = scmp.ge.s32.totalorder %s26_s18, 2  ;;  %p183_p2 = scmp.lt.s32.totalorder %s1041_s17, 3 }
   0x5   : > { %s1254_s18 = smov (%p28_p1, %s26_s18), 0  ;;  %p184_p3 = pnand %p745_p0, %p183_p2 }
   0x6   : > { %p218_p4 = scmp.lt.s32.totalorder (!%p184_p3), %s1033_s15, 1 }
   0x7   : > { %187 = sbr.rel (%p184_p3) target bundleno = 241 (0xf1), region = 36 }
   0xc   : > { %v873_v0 = vld [vmem:[%s1247_s1 + $0x38] sm:$0xff]  ;;  %v872_v1 = vld [vmem:[%s1247_s1 + $0x30] sm:$0xff]  ;;  %v871_v2 = vld [vmem:[%s1247_s1 + $0x28] sm:$0xff]  ;;  %s1256_s15 = smov (!%p218_p4, %s1033_s15), 1 }
   0xd   : > { %429 = vmatpush.bf16.msra.mxu0 %v873_v0  ;;  %969 = vmatpush.bf16.msra.mxu1 %v873_v0  ;;  %v870_v3 = vld [vmem:[%s1247_s1 + $0x20] sm:$0xff]  ;;  %v869_v4 = vld [vmem:[%s1247_s1 + $0x18] sm:$0xff]  ;;  %v868_v5 = vld [vmem:[%s1247_s1 + $0x10] sm:$0xff]  ;;  %s848_s7 = sshll.u32 %s1256_s15, 7 }
   0xe   : > { %970 = vmatpush.bf16.msra.mxu2 %v873_v0  ;;  %971 = vmatpush.bf16.msra.mxu3 %v873_v0  ;;  %v867_v6 = vld [vmem:[%s1247_s1 + $0x8] sm:$0xff]  ;;  %v866_v7 = vld [vmem:[%s1247_s1] sm:$0xff]  ;;  %s1122_s12 = scalar_lea.vmem %s1246_s0, %s848_s7  ;;  %s1163_s23 = scalar_lea.vmem %s1250_s4, %s848_s7 }
   0xf   : > { %v850_v8 = vld [vmem:[%s1122_s12] sm:$0xff]  ;;  %v851_v12 = vld [vmem:[%s1122_s12 + $0x8] sm:$0xff]  ;;  %v852_v16 = vld [vmem:[%s1122_s12 + $0x10] sm:$0xff] }
  0x10   : > { %v854_v9 = vld [vmem:[%s1122_s12 + $0x20] sm:$0xff]  ;;  %v855_v13 = vld [vmem:[%s1122_s12 + $0x28] sm:$0xff]  ;;  %v856_v17 = vld [vmem:[%s1122_s12 + $0x30] sm:$0xff] }
  0x11   : > { %430 = vmatpush.bf16.msra.mxu0 %v872_v1  ;;  %972 = vmatpush.bf16.msra.mxu1 %v872_v1  ;;  %v858_v10 = vld [vmem:[%s1122_s12 + $0x40] sm:$0xff]  ;;  %v859_v14 = vld [vmem:[%s1122_s12 + $0x48] sm:$0xff]  ;;  %v860_v18 = vld [vmem:[%s1122_s12 + $0x50] sm:$0xff] }
  0x12   : > { %973 = vmatpush.bf16.msra.mxu2 %v872_v1  ;;  %974 = vmatpush.bf16.msra.mxu3 %v872_v1  ;;  %v862_v11 = vld [vmem:[%s1122_s12 + $0x60] sm:$0xff]  ;;  %v863_v15 = vld [vmem:[%s1122_s12 + $0x68] sm:$0xff]  ;;  %v864_v19 = vld [vmem:[%s1122_s12 + $0x70] sm:$0xff] }
  0x13   : > { %v853_v20 = vld [vmem:[%s1122_s12 + $0x18] sm:$0xff]  ;;  %v1143_v26 = vld [vmem:[%s1248_s2] ss:$0 sm:$0xff] }
  0x14   : > { %v857_v21 = vld [vmem:[%s1122_s12 + $0x38] sm:$0xff]  ;;  %v1149_v28 = vld [vmem:[%s1249_s3] ss:$0 sm:$0xff] }
  0x15   : > { %431 = vmatpush.bf16.msra.mxu0 %v871_v2  ;;  %975 = vmatpush.bf16.msra.mxu1 %v871_v2  ;;  %v861_v22 = vld [vmem:[%s1122_s12 + $0x58] sm:$0xff] }
  0x16   : > { %976 = vmatpush.bf16.msra.mxu2 %v871_v2  ;;  %977 = vmatpush.bf16.msra.mxu3 %v871_v2  ;;  %v865_v23 = vld [vmem:[%s1122_s12 + $0x78] sm:$0xff] }
  0x19   : > { %432 = vmatpush.bf16.msra.mxu0 %v870_v3  ;;  %978 = vmatpush.bf16.msra.mxu1 %v870_v3 }
  0x1a   : > { %979 = vmatpush.bf16.msra.mxu2 %v870_v3  ;;  %980 = vmatpush.bf16.msra.mxu3 %v870_v3 }
  0x1d   : > { %433 = vmatpush.bf16.msra.mxu0 %v869_v4  ;;  %981 = vmatpush.bf16.msra.mxu1 %v869_v4 }
  0x1e   : > { %982 = vmatpush.bf16.msra.mxu2 %v869_v4  ;;  %983 = vmatpush.bf16.msra.mxu3 %v869_v4 }
  0x21   : > { %434 = vmatpush.bf16.msra.mxu0 %v868_v5  ;;  %984 = vmatpush.bf16.msra.mxu1 %v868_v5 }
  0x22   : > { %985 = vmatpush.bf16.msra.mxu2 %v868_v5  ;;  %986 = vmatpush.bf16.msra.mxu3 %v868_v5 }
  0x25   : > { %435 = vmatpush.bf16.msra.mxu0 %v867_v6  ;;  %987 = vmatpush.bf16.msra.mxu1 %v867_v6 }
  0x26   : > { %988 = vmatpush.bf16.msra.mxu2 %v867_v6  ;;  %989 = vmatpush.bf16.msra.mxu3 %v867_v6 }
  0x29   : > { %436 = vmatpush.bf16.msra.mxu0 %v866_v7  ;;  %990 = vmatpush.bf16.msra.mxu1 %v866_v7 }
  0x2a   : > { %991 = vmatpush.bf16.msra.mxu2 %v866_v7  ;;  %992 = vmatpush.bf16.msra.mxu3 %v866_v7 }
  0x2c   : > { %437 = vmatmul.bf16.vlgmr.msra.gmra.mxu0 %v850_v8  ;;  %457 = vmatmul.bf16.vlgmr.msra.gmra.mxu1 %v854_v9 }
  0x2d   : > { %477 = vmatmul.bf16.vlgmr.msra.gmra.mxu2 %v858_v10  ;;  %497 = vmatmul.bf16.vlgmr.msra.gmra.mxu3 %v862_v11 }
  0x3c   : > { %442 = vmatmul.bf16.gmra.mxu0 %v851_v12  ;;  %462 = vmatmul.bf16.gmra.mxu1 %v855_v13 }
  0x3d   : > { %482 = vmatmul.bf16.gmra.mxu2 %v859_v14  ;;  %502 = vmatmul.bf16.gmra.mxu3 %v863_v15 }
  0x4c   : > { %447 = vmatmul.bf16.gmra.mxu0 %v852_v16  ;;  %467 = vmatmul.bf16.gmra.mxu1 %v856_v17 }
  0x4d   : > { %487 = vmatmul.bf16.gmra.mxu2 %v860_v18  ;;  %507 = vmatmul.bf16.gmra.mxu3 %v864_v19 }
  0x5c   : > { %452 = vmatmul.bf16.gmra.mxu0 %v853_v20  ;;  %472 = vmatmul.bf16.gmra.mxu1 %v857_v21 }
  0x5d   : > { %492 = vmatmul.bf16.gmra.mxu2 %v861_v22  ;;  %512 = vmatmul.bf16.gmra.mxu3 %v865_v23 }
  0xa9   : > { %v438_v24 = vpop.f32.mrf.mxu0  ;;  %v458_v25 = vpop.f32.mrf.mxu1 }
  0xaa   : > { %v522_v27 = vmul.f32 %v1143_v26, %v438_v24  ;;  %v530_v29 = vmul.f32 %v1143_v26, %v458_v25 }
  0xac   : > { %v558_v36 = vadd.f32 %v1149_v28, %v522_v27  ;;  %v566_v37 = vadd.f32 %v1149_v28, %v530_v29 }
  0xb0   : > { %v478_v30 = vpop.f32.mrf.mxu2  ;;  %v498_v31 = vpop.f32.mrf.mxu3 }
  0xb1   : > { %v440_v32 = vpop.f32.mrf.mxu0  ;;  %v460_v33 = vpop.f32.mrf.mxu1  ;;  %v538_v42 = vmul.f32 %v1143_v26, %v478_v30  ;;  %v546_v43 = vmul.f32 %v1143_v26, %v498_v31 }
  0xb2   : > { %v523_v34 = vmul.f32 %v1143_v26, %v440_v32  ;;  %v531_v35 = vmul.f32 %v1143_v26, %v460_v33 }
  0xb3   : > { %v574_v50 = vadd.f32 %v1149_v28, %v538_v42  ;;  %v582_v51 = vadd.f32 %v1149_v28, %v546_v43 }
  0xb4   : > { %v559_v38 = vadd.f32 %v1149_v28, %v523_v34  ;;  %v567_v39 = vadd.f32 %v1149_v28, %v531_v35 }
  0xb6   : > { %v877_v40 = vpack.c.bf16 %v559_v38, %v558_v36  ;;  %v897_v41 = vpack.c.bf16 %v567_v39, %v566_v37 }
  0xb8   : > { %878 = vst [vmem:[%s1163_s23] sm:$0xff] %v877_v40   ;;  %v480_v44 = vpop.f32.mrf.mxu2  ;;  %v500_v45 = vpop.f32.mrf.mxu3 }
  0xb9   : > { %957 = vst [vmem:[%s1163_s23 + $0x20] sm:$0xff] %v897_v41   ;;  %v539_v46 = vmul.f32 %v1143_v26, %v480_v44  ;;  %v547_v47 = vmul.f32 %v1143_v26, %v500_v45  ;;  %v443_v48 = vpop.f32.mrf.mxu0  ;;  %v463_v49 = vpop.f32.mrf.mxu1 }
  0xba   : > { %v524_v56 = vmul.f32 %v1143_v26, %v443_v48  ;;  %v532_v57 = vmul.f32 %v1143_v26, %v463_v49 }
  0xbb   : > { %v575_v52 = vadd.f32 %v1149_v28, %v539_v46  ;;  %v583_v53 = vadd.f32 %v1149_v28, %v547_v47 }
  0xbc   : > { %v560_v0 = vadd.f32 %v1149_v28, %v524_v56  ;;  %v568_v1 = vadd.f32 %v1149_v28, %v532_v57 }
  0xbd   : > { %v917_v54 = vpack.c.bf16 %v575_v52, %v574_v50  ;;  %v937_v55 = vpack.c.bf16 %v583_v53, %v582_v51 }
  0xbf   : > { %961 = vst [vmem:[%s1163_s23 + $0x40] sm:$0xff] %v917_v54  }
  0xc0   : > { %965 = vst [vmem:[%s1163_s23 + $0x60] sm:$0xff] %v937_v55   ;;  %v483_v58 = vpop.f32.mrf.mxu2  ;;  %v503_v59 = vpop.f32.mrf.mxu3 }
  0xc1   : > { %v445_v60 = vpop.f32.mrf.mxu0  ;;  %v465_v61 = vpop.f32.mrf.mxu1  ;;  %v540_v6 = vmul.f32 %v1143_v26, %v483_v58  ;;  %v548_v7 = vmul.f32 %v1143_v26, %v503_v59 }
  0xc2   : > { %v525_v62 = vmul.f32 %v1143_v26, %v445_v60  ;;  %v533_v63 = vmul.f32 %v1143_v26, %v465_v61 }
  0xc3   : > { %v576_v14 = vadd.f32 %v1149_v28, %v540_v6  ;;  %v584_v15 = vadd.f32 %v1149_v28, %v548_v7 }
  0xc4   : > { %v561_v2 = vadd.f32 %v1149_v28, %v525_v62  ;;  %v569_v3 = vadd.f32 %v1149_v28, %v533_v63 }
  0xc6   : > { %v882_v4 = vpack.c.bf16 %v561_v2, %v560_v0  ;;  %v902_v5 = vpack.c.bf16 %v569_v3, %v568_v1 }
  0xc8   : > { %954 = vst [vmem:[%s1163_s23 + $0x8] sm:$0xff] %v882_v4   ;;  %v485_v8 = vpop.f32.mrf.mxu2  ;;  %v505_v9 = vpop.f32.mrf.mxu3 }
  0xc9   : > { %958 = vst [vmem:[%s1163_s23 + $0x28] sm:$0xff] %v902_v5   ;;  %v541_v10 = vmul.f32 %v1143_v26, %v485_v8  ;;  %v549_v11 = vmul.f32 %v1143_v26, %v505_v9  ;;  %v448_v12 = vpop.f32.mrf.mxu0  ;;  %v468_v13 = vpop.f32.mrf.mxu1 }
  0xca   : > { %v526_v20 = vmul.f32 %v1143_v26, %v448_v12  ;;  %v534_v21 = vmul.f32 %v1143_v26, %v468_v13 }
  0xcb   : > { %v577_v16 = vadd.f32 %v1149_v28, %v541_v10  ;;  %v585_v17 = vadd.f32 %v1149_v28, %v549_v11 }
  0xcc   : > { %v562_v30 = vadd.f32 %v1149_v28, %v526_v20  ;;  %v570_v31 = vadd.f32 %v1149_v28, %v534_v21 }
  0xcd   : > { %v922_v18 = vpack.c.bf16 %v577_v16, %v576_v14  ;;  %v942_v19 = vpack.c.bf16 %v585_v17, %v584_v15 }
  0xcf   : > { %962 = vst [vmem:[%s1163_s23 + $0x48] sm:$0xff] %v922_v18  }
  0xd0   : > { %966 = vst [vmem:[%s1163_s23 + $0x68] sm:$0xff] %v942_v19   ;;  %v488_v22 = vpop.f32.mrf.mxu2  ;;  %v508_v23 = vpop.f32.mrf.mxu3 }
  0xd1   : > { %v450_v24 = vpop.f32.mrf.mxu0  ;;  %v470_v25 = vpop.f32.mrf.mxu1  ;;  %v542_v36 = vmul.f32 %v1143_v26, %v488_v22  ;;  %v550_v37 = vmul.f32 %v1143_v26, %v508_v23 }
  0xd2   : > { %v527_v27 = vmul.f32 %v1143_v26, %v450_v24  ;;  %v535_v29 = vmul.f32 %v1143_v26, %v470_v25 }
  0xd3   : > { %v578_v44 = vadd.f32 %v1149_v28, %v542_v36  ;;  %v586_v45 = vadd.f32 %v1149_v28, %v550_v37 }
  0xd4   : > { %v563_v32 = vadd.f32 %v1149_v28, %v527_v27  ;;  %v571_v33 = vadd.f32 %v1149_v28, %v535_v29 }
  0xd6   : > { %v887_v34 = vpack.c.bf16 %v563_v32, %v562_v30  ;;  %v907_v35 = vpack.c.bf16 %v571_v33, %v570_v31 }
  0xd8   : > { %955 = vst [vmem:[%s1163_s23 + $0x10] sm:$0xff] %v887_v34   ;;  %v490_v38 = vpop.f32.mrf.mxu2  ;;  %v510_v39 = vpop.f32.mrf.mxu3 }
  0xd9   : > { %959 = vst [vmem:[%s1163_s23 + $0x30] sm:$0xff] %v907_v35   ;;  %v543_v40 = vmul.f32 %v1143_v26, %v490_v38  ;;  %v551_v41 = vmul.f32 %v1143_v26, %v510_v39  ;;  %v453_v42 = vpop.f32.mrf.mxu0  ;;  %v473_v43 = vpop.f32.mrf.mxu1 }
  0xda   : > { %v528_v50 = vmul.f32 %v1143_v26, %v453_v42  ;;  %v536_v51 = vmul.f32 %v1143_v26, %v473_v43 }
  0xdb   : > { %v579_v46 = vadd.f32 %v1149_v28, %v543_v40  ;;  %v587_v47 = vadd.f32 %v1149_v28, %v551_v41 }
  0xdc   : > { %v564_v58 = vadd.f32 %v1149_v28, %v528_v50  ;;  %v572_v59 = vadd.f32 %v1149_v28, %v536_v51 }
  0xdd   : > { %v927_v48 = vpack.c.bf16 %v579_v46, %v578_v44  ;;  %v947_v49 = vpack.c.bf16 %v587_v47, %v586_v45 }
  0xdf   : > { %963 = vst [vmem:[%s1163_s23 + $0x50] sm:$0xff] %v927_v48  }
  0xe0   : > { %967 = vst [vmem:[%s1163_s23 + $0x70] sm:$0xff] %v947_v49   ;;  %v493_v52 = vpop.f32.mrf.mxu2  ;;  %v513_v53 = vpop.f32.mrf.mxu3 }
  0xe1   : > { %v455_v54 = vpop.f32.mrf.mxu0  ;;  %v475_v55 = vpop.f32.mrf.mxu1  ;;  %v544_v0 = vmul.f32 %v1143_v26, %v493_v52  ;;  %v552_v1 = vmul.f32 %v1143_v26, %v513_v53 }
  0xe2   : > { %v529_v56 = vmul.f32 %v1143_v26, %v455_v54  ;;  %v537_v57 = vmul.f32 %v1143_v26, %v475_v55 }
  0xe3   : > { %v580_v6 = vadd.f32 %v1149_v28, %v544_v0  ;;  %v588_v7 = vadd.f32 %v1149_v28, %v552_v1 }
  0xe4   : > { %v565_v60 = vadd.f32 %v1149_v28, %v529_v56  ;;  %v573_v61 = vadd.f32 %v1149_v28, %v537_v57 }
  0xe6   : > { %v892_v62 = vpack.c.bf16 %v565_v60, %v564_v58  ;;  %v912_v63 = vpack.c.bf16 %v573_v61, %v572_v59 }
  0xe8   : > { %956 = vst [vmem:[%s1163_s23 + $0x18] sm:$0xff] %v892_v62   ;;  %v495_v2 = vpop.f32.mrf.mxu2  ;;  %v515_v3 = vpop.f32.mrf.mxu3 }
  0xe9   : > { %960 = vst [vmem:[%s1163_s23 + $0x38] sm:$0xff] %v912_v63   ;;  %v545_v4 = vmul.f32 %v1143_v26, %v495_v2  ;;  %v553_v5 = vmul.f32 %v1143_v26, %v515_v3 }
  0xeb   : > { %v581_v8 = vadd.f32 %v1149_v28, %v545_v4  ;;  %v589_v9 = vadd.f32 %v1149_v28, %v553_v5 }
  0xed   : > { %v932_v10 = vpack.c.bf16 %v581_v8, %v580_v6  ;;  %v952_v11 = vpack.c.bf16 %v589_v9, %v588_v7 }
  0xef   : > { %964 = vst [vmem:[%s1163_s23 + $0x58] sm:$0xff] %v932_v10  }
  0xf0   : > { %968 = vst [vmem:[%s1163_s23 + $0x78] sm:$0xff] %v952_v11  }
  0xf1 PF: > { %s14_s17 = sadd.s32 1, %s1041_s17   ;;  %s1251_s15 = smov %s1037_s16 }
  0xf2   : > { %p11_p5 = scmp.ge.s32.totalorder %s14_s17, 4   ;;  %s1252_s16 = smov %s1254_s18 }
  0xf4   :  { %13 = sbr.rel (!%p11_p5) target bundleno = 2 (0x2), region = 66 }

// kernel: encoder_cnn_forward.24
= control target key start
LH: loop header
LB: loop body
LE: loop exit
PB: predicated region body
PF: predicated region fallthrough
CT: control target
= control target key end

     0   :  { %s1364_s18 = smov 0   ;;  %s1366_s19 = smov 0   ;;  %s1561_s0 = inlined_call_operand.vmem [shape: bf16[2,256,128], index: 0, kind: input, shape index: {}]   ;;  %s1562_s1 = inlined_call_operand.vmem [shape: bf16[128,128], index: 1, kind: input, shape index: {}]   ;;  %s1563_s2 = inlined_call_operand.vmem [shape: f32[1,128], index: 2, kind: input, shape index: {}]   ;;  %s1564_s3 = inlined_call_operand.vmem [shape: f32[1,128], index: 3, kind: input, shape index: {}]   ;;  %s1565_s4 = inlined_call_operand.vmem [shape: bf16[2,256,128], index: 4, kind: input, shape index: {}]   ;;  %s1566_s5 = inlined_call_operand.vmem [shape: bf16[2,256,128], index: 5, kind: output, shape index: {}]  }
   0x1   :  { %s1368_s20 = smov 0  }
   0x2 LB: > { %s27_s21 = sadd.s32 1, %s1328_s19  ;;  %p954_p0 = scmp.ge.s32.totalorder %s1332_s20, 1  ;;  %s1332_s20 = sphi %s1368_s20, %s15_s20   ;;  %s1328_s19 = sphi %s1366_s19, %s1568_s19   ;;  %s1324_s18 = sphi %s1364_s18, %s1567_s18  }
   0x3   : > { %p29_p1 = scmp.ge.s32.totalorder %s27_s21, 2  ;;  %p225_p2 = scmp.lt.s32.totalorder %s1332_s20, 3 }
   0x5   : > { %s1570_s21 = smov (%p29_p1, %s27_s21), 0  ;;  %p226_p3 = pnand %p954_p0, %p225_p2 }
   0x6   : > { %p271_p4 = scmp.lt.s32.totalorder (!%p226_p3), %s1324_s18, 1 }
   0x7   : > { %229 = sbr.rel (%p226_p3) target bundleno = 245 (0xf5), region = 40 }
   0xc   : > { %v1085_v0 = vld [vmem:[%s1562_s1 + $0x38] sm:$0xff]  ;;  %v1084_v1 = vld [vmem:[%s1562_s1 + $0x30] sm:$0xff]  ;;  %v1083_v2 = vld [vmem:[%s1562_s1 + $0x28] sm:$0xff]  ;;  %s1572_s18 = smov (!%p271_p4, %s1324_s18), 1 }
   0xd   : > { %492 = vmatpush.bf16.msra.mxu0 %v1085_v0  ;;  %1260 = vmatpush.bf16.msra.mxu1 %v1085_v0  ;;  %v1082_v3 = vld [vmem:[%s1562_s1 + $0x20] sm:$0xff]  ;;  %v1081_v4 = vld [vmem:[%s1562_s1 + $0x18] sm:$0xff]  ;;  %v1080_v5 = vld [vmem:[%s1562_s1 + $0x10] sm:$0xff]  ;;  %s1407_s11 = sshll.u32 %s1572_s18, 7 }
   0xe   : > { %1261 = vmatpush.bf16.msra.mxu2 %v1085_v0  ;;  %1262 = vmatpush.bf16.msra.mxu3 %v1085_v0  ;;  %v1079_v6 = vld [vmem:[%s1562_s1 + $0x8] sm:$0xff]  ;;  %v1078_v7 = vld [vmem:[%s1562_s1] sm:$0xff]  ;;  %s1416_s16 = scalar_lea.vmem %s1561_s0, %s1407_s11  ;;  %s1443_s24 = scalar_lea.vmem %s1565_s4, %s1407_s11 }
   0xf   : > { %v1062_v8 = vld [vmem:[%s1416_s16] sm:$0xff]  ;;  %v1063_v12 = vld [vmem:[%s1416_s16 + $0x8] sm:$0xff]  ;;  %v1064_v16 = vld [vmem:[%s1416_s16 + $0x10] sm:$0xff]  ;;  %s1470_s29 = scalar_lea.vmem %s1566_s5, %s1407_s11 }
  0x10   : > { %v1066_v9 = vld [vmem:[%s1416_s16 + $0x20] sm:$0xff]  ;;  %v1067_v13 = vld [vmem:[%s1416_s16 + $0x28] sm:$0xff]  ;;  %v1068_v17 = vld [vmem:[%s1416_s16 + $0x30] sm:$0xff] }
  0x11   : > { %493 = vmatpush.bf16.msra.mxu0 %v1084_v1  ;;  %1263 = vmatpush.bf16.msra.mxu1 %v1084_v1  ;;  %v1070_v10 = vld [vmem:[%s1416_s16 + $0x40] sm:$0xff]  ;;  %v1071_v14 = vld [vmem:[%s1416_s16 + $0x48] sm:$0xff]  ;;  %v1072_v18 = vld [vmem:[%s1416_s16 + $0x50] sm:$0xff] }
  0x12   : > { %1264 = vmatpush.bf16.msra.mxu2 %v1084_v1  ;;  %1265 = vmatpush.bf16.msra.mxu3 %v1084_v1  ;;  %v1074_v11 = vld [vmem:[%s1416_s16 + $0x60] sm:$0xff]  ;;  %v1075_v15 = vld [vmem:[%s1416_s16 + $0x68] sm:$0xff]  ;;  %v1076_v19 = vld [vmem:[%s1416_s16 + $0x70] sm:$0xff] }
  0x13   : > { %v1065_v20 = vld [vmem:[%s1416_s16 + $0x18] sm:$0xff]  ;;  %v1437_v24 = vld [vmem:[%s1563_s2] ss:$0 sm:$0xff] }
  0x14   : > { %v1069_v21 = vld [vmem:[%s1416_s16 + $0x38] sm:$0xff]  ;;  %v1449_v28 = vld [vmem:[%s1564_s3] ss:$0 sm:$0xff] }
  0x15   : > { %494 = vmatpush.bf16.msra.mxu0 %v1083_v2  ;;  %1266 = vmatpush.bf16.msra.mxu1 %v1083_v2  ;;  %v1073_v22 = vld [vmem:[%s1416_s16 + $0x58] sm:$0xff]  ;;  %v1087_v30 = vld [vmem:[%s1443_s24] sm:$0xff]  }
  0x16   : > { %1267 = vmatpush.bf16.msra.mxu2 %v1083_v2  ;;  %1268 = vmatpush.bf16.msra.mxu3 %v1083_v2  ;;  %v1077_v23 = vld [vmem:[%s1416_s16 + $0x78] sm:$0xff]  ;;  %v1233_v31 = vld [vmem:[%s1443_s24 + $0x20] sm:$0xff]   ;;  %v1088_v33 = vunpack.c.l.bf16 %v1087_v30  ;;  %v1089_v41 = vunpack.c.h.bf16 %v1087_v30 }
  0x17   : > { %v1104_v35 = vunpack.c.l.bf16 %v1233_v31  ;;  %v1105_v43 = vunpack.c.h.bf16 %v1233_v31  ;;  %v1237_v48 = vld [vmem:[%s1443_s24 + $0x40] sm:$0xff]  }
  0x18   : > { %v1241_v49 = vld [vmem:[%s1443_s24 + $0x60] sm:$0xff]   ;;  %v1120_v55 = vunpack.c.l.bf16 %v1237_v48  ;;  %v1121_v1 = vunpack.c.h.bf16 %v1237_v48 }
  0x19   : > { %495 = vmatpush.bf16.msra.mxu0 %v1082_v3  ;;  %1269 = vmatpush.bf16.msra.mxu1 %v1082_v3  ;;  %v1136_v57 = vunpack.c.l.bf16 %v1241_v49 }
  0x1a   : > { %1270 = vmatpush.bf16.msra.mxu2 %v1082_v3  ;;  %1271 = vmatpush.bf16.msra.mxu3 %v1082_v3  ;;  %v1137_v3 = vunpack.c.h.bf16 %v1241_v49 }
  0x1d   : > { %496 = vmatpush.bf16.msra.mxu0 %v1081_v4  ;;  %1272 = vmatpush.bf16.msra.mxu1 %v1081_v4 }
  0x1e   : > { %1273 = vmatpush.bf16.msra.mxu2 %v1081_v4  ;;  %1274 = vmatpush.bf16.msra.mxu3 %v1081_v4 }
  0x21   : > { %497 = vmatpush.bf16.msra.mxu0 %v1080_v5  ;;  %1275 = vmatpush.bf16.msra.mxu1 %v1080_v5 }
  0x22   : > { %1276 = vmatpush.bf16.msra.mxu2 %v1080_v5  ;;  %1277 = vmatpush.bf16.msra.mxu3 %v1080_v5 }
  0x25   : > { %498 = vmatpush.bf16.msra.mxu0 %v1079_v6  ;;  %1278 = vmatpush.bf16.msra.mxu1 %v1079_v6 }
  0x26   : > { %1279 = vmatpush.bf16.msra.mxu2 %v1079_v6  ;;  %1280 = vmatpush.bf16.msra.mxu3 %v1079_v6 }
  0x29   : > { %499 = vmatpush.bf16.msra.mxu0 %v1078_v7  ;;  %1281 = vmatpush.bf16.msra.mxu1 %v1078_v7 }
  0x2a   : > { %1282 = vmatpush.bf16.msra.mxu2 %v1078_v7  ;;  %1283 = vmatpush.bf16.msra.mxu3 %v1078_v7 }
  0x2c   : > { %500 = vmatmul.bf16.vlgmr.msra.gmra.mxu0 %v1062_v8  ;;  %520 = vmatmul.bf16.vlgmr.msra.gmra.mxu1 %v1066_v9 }
  0x2d   : > { %540 = vmatmul.bf16.vlgmr.msra.gmra.mxu2 %v1070_v10  ;;  %560 = vmatmul.bf16.vlgmr.msra.gmra.mxu3 %v1074_v11 }
  0x3c   : > { %505 = vmatmul.bf16.gmra.mxu0 %v1063_v12  ;;  %525 = vmatmul.bf16.gmra.mxu1 %v1067_v13 }
  0x3d   : > { %545 = vmatmul.bf16.gmra.mxu2 %v1071_v14  ;;  %565 = vmatmul.bf16.gmra.mxu3 %v1075_v15 }
  0x4c   : > { %510 = vmatmul.bf16.gmra.mxu0 %v1064_v16  ;;  %530 = vmatmul.bf16.gmra.mxu1 %v1068_v17  ;;  %v1230_v16 = vld [vmem:[%s1443_s24 + $0x8] sm:$0xff]  }
  0x4d   : > { %550 = vmatmul.bf16.gmra.mxu2 %v1072_v18  ;;  %570 = vmatmul.bf16.gmra.mxu3 %v1076_v19  ;;  %v1234_v17 = vld [vmem:[%s1443_s24 + $0x28] sm:$0xff]  }
  0x5c   : > { %515 = vmatmul.bf16.gmra.mxu0 %v1065_v20  ;;  %535 = vmatmul.bf16.gmra.mxu1 %v1069_v21 }
  0x5d   : > { %555 = vmatmul.bf16.gmra.mxu2 %v1073_v22  ;;  %575 = vmatmul.bf16.gmra.mxu3 %v1077_v23  ;;  %v1092_v23 = vunpack.c.l.bf16 %v1230_v16 }
  0xa9   : > { %v501_v25 = vpop.f32.mrf.mxu0  ;;  %v521_v26 = vpop.f32.mrf.mxu1 }
  0xaa   : > { %v585_v27 = vmul.f32 %v1437_v24, %v501_v25  ;;  %v593_v29 = vmul.f32 %v1437_v24, %v521_v26  ;;  %v1108_v26 = vunpack.c.l.bf16 %v1234_v17 }
  0xac   : > { %v621_v32 = vadd.f32 %v1449_v28, %v585_v27  ;;  %v629_v34 = vadd.f32 %v1449_v28, %v593_v29 }
  0xae   : > { %v717_v46 = vadd.f32 %v1088_v33, %v621_v32  ;;  %v725_v47 = vadd.f32 %v1104_v35, %v629_v34  ;;  %v1093_v35 = vunpack.c.h.bf16 %v1230_v16 }
  0xb0   : > { %v541_v36 = vpop.f32.mrf.mxu2  ;;  %v561_v37 = vpop.f32.mrf.mxu3  ;;  %v749_v58 = vmax.f32 %v717_v46, 0.0  ;;  %v757_v59 = vmax.f32 %v725_v47, 0.0 }
  0xb1   : > { %v503_v38 = vpop.f32.mrf.mxu0  ;;  %v523_v39 = vpop.f32.mrf.mxu1  ;;  %v601_v44 = vmul.f32 %v1437_v24, %v541_v36  ;;  %v609_v45 = vmul.f32 %v1437_v24, %v561_v37  ;;  %v1109_v37 = vunpack.c.h.bf16 %v1234_v17 }
  0xb2   : > { %v586_v40 = vmul.f32 %v1437_v24, %v503_v38  ;;  %v594_v42 = vmul.f32 %v1437_v24, %v523_v39 }
  0xb3   : > { %v637_v54 = vadd.f32 %v1449_v28, %v601_v44  ;;  %v645_v56 = vadd.f32 %v1449_v28, %v609_v45 }
  0xb4   : > { %v622_v50 = vadd.f32 %v1449_v28, %v586_v40  ;;  %v630_v51 = vadd.f32 %v1449_v28, %v594_v42  ;;  %v1238_v42 = vld [vmem:[%s1443_s24 + $0x48] sm:$0xff]  }
  0xb5   : > { %v733_v8 = vadd.f32 %v1120_v55, %v637_v54  ;;  %v741_v9 = vadd.f32 %v1136_v57, %v645_v56  ;;  %v1124_v49 = vunpack.c.l.bf16 %v1238_v42 }
  0xb6   : > { %v718_v52 = vadd.f32 %v1089_v41, %v622_v50  ;;  %v726_v53 = vadd.f32 %v1105_v43, %v630_v51  ;;  %v1242_v43 = vld [vmem:[%s1443_s24 + $0x68] sm:$0xff]  }
  0xb7   : > { %v765_v18 = vmax.f32 %v733_v8, 0.0  ;;  %v773_v19 = vmax.f32 %v741_v9, 0.0  ;;  %v1140_v51 = vunpack.c.l.bf16 %v1242_v43 }
  0xb8   : > { %v750_v60 = vmax.f32 %v718_v52, 0.0  ;;  %v758_v61 = vmax.f32 %v726_v53, 0.0  ;;  %v543_v62 = vpop.f32.mrf.mxu2  ;;  %v563_v63 = vpop.f32.mrf.mxu3 }
  0xb9   : > { %v602_v0 = vmul.f32 %v1437_v24, %v543_v62  ;;  %v610_v2 = vmul.f32 %v1437_v24, %v563_v63  ;;  %v506_v4 = vpop.f32.mrf.mxu0  ;;  %v526_v5 = vpop.f32.mrf.mxu1 }
  0xba   : > { %v1153_v6 = vpack.c.bf16 %v750_v60, %v749_v58  ;;  %v1173_v7 = vpack.c.bf16 %v758_v61, %v757_v59  ;;  %v587_v12 = vmul.f32 %v1437_v24, %v506_v4  ;;  %v595_v13 = vmul.f32 %v1437_v24, %v526_v5 }
  0xbb   : > { %v638_v10 = vadd.f32 %v1449_v28, %v602_v0  ;;  %v646_v11 = vadd.f32 %v1449_v28, %v610_v2  ;;  %v1125_v59 = vunpack.c.h.bf16 %v1238_v42  ;;  %v1141_v61 = vunpack.c.h.bf16 %v1242_v43 }
  0xbc   : > { %1154 = vst [vmem:[%s1470_s29] sm:$0xff] %v1153_v6   ;;  %v623_v22 = vadd.f32 %v1449_v28, %v587_v12  ;;  %v631_v25 = vadd.f32 %v1449_v28, %v595_v13 }
  0xbd   : > { %1248 = vst [vmem:[%s1470_s29 + $0x20] sm:$0xff] %v1173_v7   ;;  %v734_v14 = vadd.f32 %v1121_v1, %v638_v10  ;;  %v742_v15 = vadd.f32 %v1137_v3, %v646_v11  ;;  %v1231_v10 = vld [vmem:[%s1443_s24 + $0x10] sm:$0xff]  }
  0xbe   : > { %v719_v40 = vadd.f32 %v1092_v23, %v623_v22  ;;  %v727_v41 = vadd.f32 %v1108_v26, %v631_v25  ;;  %v1235_v11 = vld [vmem:[%s1443_s24 + $0x30] sm:$0xff]   ;;  %v1096_v17 = vunpack.c.l.bf16 %v1231_v10 }
  0xbf   : > { %v766_v20 = vmax.f32 %v734_v14, 0.0  ;;  %v774_v21 = vmax.f32 %v742_v15, 0.0 }
  0xc0   : > { %v546_v27 = vpop.f32.mrf.mxu2  ;;  %v566_v29 = vpop.f32.mrf.mxu3  ;;  %v751_v52 = vmax.f32 %v719_v40, 0.0  ;;  %v759_v53 = vmax.f32 %v727_v41, 0.0 }
  0xc1   : > { %v1193_v30 = vpack.c.bf16 %v766_v20, %v765_v18  ;;  %v1213_v31 = vpack.c.bf16 %v774_v21, %v773_v19  ;;  %v508_v32 = vpop.f32.mrf.mxu0  ;;  %v528_v33 = vpop.f32.mrf.mxu1  ;;  %v603_v38 = vmul.f32 %v1437_v24, %v546_v27  ;;  %v611_v39 = vmul.f32 %v1437_v24, %v566_v29 }
  0xc2   : > { %v588_v34 = vmul.f32 %v1437_v24, %v508_v32  ;;  %v596_v36 = vmul.f32 %v1437_v24, %v528_v33  ;;  %v1112_v19 = vunpack.c.l.bf16 %v1235_v11  ;;  %v1097_v29 = vunpack.c.h.bf16 %v1231_v10 }
  0xc3   : > { %1252 = vst [vmem:[%s1470_s29 + $0x40] sm:$0xff] %v1193_v30   ;;  %v639_v48 = vadd.f32 %v1449_v28, %v603_v38  ;;  %v647_v50 = vadd.f32 %v1449_v28, %v611_v39 }
  0xc4   : > { %1256 = vst [vmem:[%s1470_s29 + $0x60] sm:$0xff] %v1213_v31   ;;  %v624_v44 = vadd.f32 %v1449_v28, %v588_v34  ;;  %v632_v45 = vadd.f32 %v1449_v28, %v596_v36  ;;  %v1113_v31 = vunpack.c.h.bf16 %v1235_v11  ;;  %v1239_v36 = vld [vmem:[%s1443_s24 + $0x50] sm:$0xff]  }
  0xc5   : > { %v735_v2 = vadd.f32 %v1124_v49, %v639_v48  ;;  %v743_v3 = vadd.f32 %v1140_v51, %v647_v50  ;;  %v1128_v43 = vunpack.c.l.bf16 %v1239_v36 }
  0xc6   : > { %v720_v46 = vadd.f32 %v1093_v35, %v624_v44  ;;  %v728_v47 = vadd.f32 %v1109_v37, %v632_v45  ;;  %v1243_v37 = vld [vmem:[%s1443_s24 + $0x70] sm:$0xff]  }
  0xc7   : > { %v767_v12 = vmax.f32 %v735_v2, 0.0  ;;  %v775_v13 = vmax.f32 %v743_v3, 0.0  ;;  %v1144_v45 = vunpack.c.l.bf16 %v1243_v37 }
  0xc8   : > { %v752_v54 = vmax.f32 %v720_v46, 0.0  ;;  %v760_v55 = vmax.f32 %v728_v47, 0.0  ;;  %v548_v56 = vpop.f32.mrf.mxu2  ;;  %v568_v57 = vpop.f32.mrf.mxu3 }
  0xc9   : > { %v604_v58 = vmul.f32 %v1437_v24, %v548_v56  ;;  %v612_v60 = vmul.f32 %v1437_v24, %v568_v57  ;;  %v511_v62 = vpop.f32.mrf.mxu0  ;;  %v531_v63 = vpop.f32.mrf.mxu1 }
  0xca   : > { %v1158_v0 = vpack.c.bf16 %v752_v54, %v751_v52  ;;  %v1178_v1 = vpack.c.bf16 %v760_v55, %v759_v53  ;;  %v589_v6 = vmul.f32 %v1437_v24, %v511_v62  ;;  %v597_v7 = vmul.f32 %v1437_v24, %v531_v63 }
  0xcb   : > { %v640_v4 = vadd.f32 %v1449_v28, %v604_v58  ;;  %v648_v5 = vadd.f32 %v1449_v28, %v612_v60  ;;  %v1129_v53 = vunpack.c.h.bf16 %v1239_v36  ;;  %v1145_v55 = vunpack.c.h.bf16 %v1243_v37 }
  0xcc   : > { %1245 = vst [vmem:[%s1470_s29 + $0x8] sm:$0xff] %v1158_v0   ;;  %v625_v16 = vadd.f32 %v1449_v28, %v589_v6  ;;  %v633_v18 = vadd.f32 %v1449_v28, %v597_v7 }
  0xcd   : > { %1249 = vst [vmem:[%s1470_s29 + $0x28] sm:$0xff] %v1178_v1   ;;  %v736_v8 = vadd.f32 %v1125_v59, %v640_v4  ;;  %v744_v9 = vadd.f32 %v1141_v61, %v648_v5  ;;  %v1232_v4 = vld [vmem:[%s1443_s24 + $0x18] sm:$0xff]  }
  0xce   : > { %v721_v34 = vadd.f32 %v1096_v17, %v625_v16  ;;  %v729_v35 = vadd.f32 %v1112_v19, %v633_v18  ;;  %v1236_v5 = vld [vmem:[%s1443_s24 + $0x38] sm:$0xff]   ;;  %v1100_v11 = vunpack.c.l.bf16 %v1232_v4 }
  0xcf   : > { %v768_v14 = vmax.f32 %v736_v8, 0.0  ;;  %v776_v15 = vmax.f32 %v744_v9, 0.0 }
  0xd0   : > { %v551_v20 = vpop.f32.mrf.mxu2  ;;  %v571_v21 = vpop.f32.mrf.mxu3  ;;  %v753_v46 = vmax.f32 %v721_v34, 0.0  ;;  %v761_v47 = vmax.f32 %v729_v35, 0.0 }
  0xd1   : > { %v1198_v22 = vpack.c.bf16 %v768_v14, %v767_v12  ;;  %v1218_v23 = vpack.c.bf16 %v776_v15, %v775_v13  ;;  %v513_v25 = vpop.f32.mrf.mxu0  ;;  %v533_v26 = vpop.f32.mrf.mxu1  ;;  %v605_v32 = vmul.f32 %v1437_v24, %v551_v20  ;;  %v613_v33 = vmul.f32 %v1437_v24, %v571_v21 }
  0xd2   : > { %v590_v27 = vmul.f32 %v1437_v24, %v513_v25  ;;  %v598_v30 = vmul.f32 %v1437_v24, %v533_v26  ;;  %v1116_v13 = vunpack.c.l.bf16 %v1236_v5  ;;  %v1101_v21 = vunpack.c.h.bf16 %v1232_v4 }
  0xd3   : > { %1253 = vst [vmem:[%s1470_s29 + $0x48] sm:$0xff] %v1198_v22   ;;  %v641_v42 = vadd.f32 %v1449_v28, %v605_v32  ;;  %v649_v44 = vadd.f32 %v1449_v28, %v613_v33 }
  0xd4   : > { %1257 = vst [vmem:[%s1470_s29 + $0x68] sm:$0xff] %v1218_v23   ;;  %v626_v38 = vadd.f32 %v1449_v28, %v590_v27  ;;  %v634_v39 = vadd.f32 %v1449_v28, %v598_v30  ;;  %v1117_v23 = vunpack.c.h.bf16 %v1236_v5  ;;  %v1240_v30 = vld [vmem:[%s1443_s24 + $0x58] sm:$0xff]  }
  0xd5   : > { %v737_v60 = vadd.f32 %v1128_v43, %v641_v42  ;;  %v745_v61 = vadd.f32 %v1144_v45, %v649_v44  ;;  %v1132_v37 = vunpack.c.l.bf16 %v1240_v30 }
  0xd6   : > { %v722_v40 = vadd.f32 %v1097_v29, %v626_v38  ;;  %v730_v41 = vadd.f32 %v1113_v31, %v634_v39  ;;  %v1244_v31 = vld [vmem:[%s1443_s24 + $0x78] sm:$0xff]  }
  0xd7   : > { %v769_v6 = vmax.f32 %v737_v60, 0.0  ;;  %v777_v7 = vmax.f32 %v745_v61, 0.0  ;;  %v1148_v39 = vunpack.c.l.bf16 %v1244_v31 }
  0xd8   : > { %v754_v48 = vmax.f32 %v722_v40, 0.0  ;;  %v762_v49 = vmax.f32 %v730_v41, 0.0  ;;  %v553_v50 = vpop.f32.mrf.mxu2  ;;  %v573_v51 = vpop.f32.mrf.mxu3 }
  0xd9   : > { %v606_v52 = vmul.f32 %v1437_v24, %v553_v50  ;;  %v614_v54 = vmul.f32 %v1437_v24, %v573_v51  ;;  %v516_v56 = vpop.f32.mrf.mxu0  ;;  %v536_v57 = vpop.f32.mrf.mxu1 }
  0xda   : > { %v1163_v58 = vpack.c.bf16 %v754_v48, %v753_v46  ;;  %v1183_v59 = vpack.c.bf16 %v762_v49, %v761_v47  ;;  %v591_v0 = vmul.f32 %v1437_v24, %v516_v56  ;;  %v599_v1 = vmul.f32 %v1437_v24, %v536_v57 }
  0xdb   : > { %v642_v62 = vadd.f32 %v1449_v28, %v606_v52  ;;  %v650_v63 = vadd.f32 %v1449_v28, %v614_v54  ;;  %v1133_v47 = vunpack.c.h.bf16 %v1240_v30  ;;  %v1149_v49 = vunpack.c.h.bf16 %v1244_v31 }
  0xdc   : > { %1246 = vst [vmem:[%s1470_s29 + $0x10] sm:$0xff] %v1163_v58   ;;  %v627_v10 = vadd.f32 %v1449_v28, %v591_v0  ;;  %v635_v12 = vadd.f32 %v1449_v28, %v599_v1 }
  0xdd   : > { %1250 = vst [vmem:[%s1470_s29 + $0x30] sm:$0xff] %v1183_v59   ;;  %v738_v2 = vadd.f32 %v1129_v53, %v642_v62  ;;  %v746_v3 = vadd.f32 %v1145_v55, %v650_v63 }
  0xde   : > { %v723_v27 = vadd.f32 %v1100_v11, %v627_v10  ;;  %v731_v29 = vadd.f32 %v1116_v13, %v635_v12 }
  0xdf   : > { %v770_v8 = vmax.f32 %v738_v2, 0.0  ;;  %v778_v9 = vmax.f32 %v746_v3, 0.0 }
  0xe0   : > { %v556_v14 = vpop.f32.mrf.mxu2  ;;  %v576_v15 = vpop.f32.mrf.mxu3  ;;  %v755_v40 = vmax.f32 %v723_v27, 0.0  ;;  %v763_v41 = vmax.f32 %v731_v29, 0.0 }
  0xe1   : > { %v1203_v16 = vpack.c.bf16 %v770_v8, %v769_v6  ;;  %v1223_v17 = vpack.c.bf16 %v778_v9, %v777_v7  ;;  %v518_v18 = vpop.f32.mrf.mxu0  ;;  %v538_v19 = vpop.f32.mrf.mxu1  ;;  %v607_v25 = vmul.f32 %v1437_v24, %v556_v14  ;;  %v615_v26 = vmul.f32 %v1437_v24, %v576_v15 }
  0xe2   : > { %v592_v20 = vmul.f32 %v1437_v24, %v518_v18  ;;  %v600_v22 = vmul.f32 %v1437_v24, %v538_v19 }
  0xe3   : > { %1254 = vst [vmem:[%s1470_s29 + $0x50] sm:$0xff] %v1203_v16   ;;  %v643_v36 = vadd.f32 %v1449_v28, %v607_v25  ;;  %v651_v38 = vadd.f32 %v1449_v28, %v615_v26 }
  0xe4   : > { %1258 = vst [vmem:[%s1470_s29 + $0x70] sm:$0xff] %v1223_v17   ;;  %v628_v32 = vadd.f32 %v1449_v28, %v592_v20  ;;  %v636_v33 = vadd.f32 %v1449_v28, %v600_v22 }
  0xe5   : > { %v739_v52 = vadd.f32 %v1132_v37, %v643_v36  ;;  %v747_v53 = vadd.f32 %v1148_v39, %v651_v38 }
  0xe6   : > { %v724_v34 = vadd.f32 %v1101_v21, %v628_v32  ;;  %v732_v35 = vadd.f32 %v1117_v23, %v636_v33 }
  0xe7   : > { %v771_v58 = vmax.f32 %v739_v52, 0.0  ;;  %v779_v59 = vmax.f32 %v747_v53, 0.0 }
  0xe8   : > { %v756_v42 = vmax.f32 %v724_v34, 0.0  ;;  %v764_v43 = vmax.f32 %v732_v35, 0.0  ;;  %v558_v44 = vpop.f32.mrf.mxu2  ;;  %v578_v45 = vpop.f32.mrf.mxu3 }
  0xe9   : > { %v608_v46 = vmul.f32 %v1437_v24, %v558_v44  ;;  %v616_v48 = vmul.f32 %v1437_v24, %v578_v45 }
  0xea   : > { %v1168_v50 = vpack.c.bf16 %v756_v42, %v755_v40  ;;  %v1188_v51 = vpack.c.bf16 %v764_v43, %v763_v41 }
  0xeb   : > { %v644_v54 = vadd.f32 %v1449_v28, %v608_v46  ;;  %v652_v55 = vadd.f32 %v1449_v28, %v616_v48 }
  0xec   : > { %1247 = vst [vmem:[%s1470_s29 + $0x18] sm:$0xff] %v1168_v50  }
  0xed   : > { %1251 = vst [vmem:[%s1470_s29 + $0x38] sm:$0xff] %v1188_v51   ;;  %v740_v56 = vadd.f32 %v1133_v47, %v644_v54  ;;  %v748_v57 = vadd.f32 %v1149_v49, %v652_v55 }
  0xef   : > { %v772_v60 = vmax.f32 %v740_v56, 0.0  ;;  %v780_v61 = vmax.f32 %v748_v57, 0.0 }
  0xf1   : > { %v1208_v24 = vpack.c.bf16 %v772_v60, %v771_v58  ;;  %v1228_v62 = vpack.c.bf16 %v780_v61, %v779_v59 }
  0xf3   : > { %1255 = vst [vmem:[%s1470_s29 + $0x58] sm:$0xff] %v1208_v24  }
  0xf4   : > { %1259 = vst [vmem:[%s1470_s29 + $0x78] sm:$0xff] %v1228_v62  }
  0xf5 PF: > { %s15_s20 = sadd.s32 1, %s1332_s20   ;;  %s1567_s18 = smov %s1328_s19 }
  0xf6   : > { %p12_p5 = scmp.ge.s32.totalorder %s15_s20, 4   ;;  %s1568_s19 = smov %s1570_s21 }
  0xf8   :  { %14 = sbr.rel (!%p12_p5) target bundleno = 2 (0x2), region = 73 }

// kernel: encoder_cnn_forward.27
= control target key start
LH: loop header
LB: loop body
LE: loop exit
PB: predicated region body
PF: predicated region fallthrough
CT: control target
= control target key end

     0   :  { %s684_s15 = smov 0   ;;  %s686_s16 = smov 0   ;;  %s758_s0 = inlined_call_operand.vmem [shape: bf16[2,64,128], index: 0, kind: input, shape index: {}]   ;;  %s759_s1 = inlined_call_operand.vmem [shape: bf16[128,128], index: 1, kind: input, shape index: {}]   ;;  %s760_s2 = inlined_call_operand.vmem [shape: f32[1,128], index: 2, kind: input, shape index: {}]   ;;  %s761_s3 = inlined_call_operand.vmem [shape: f32[1,128], index: 3, kind: input, shape index: {}]   ;;  %s762_s4 = inlined_call_operand.vmem [shape: bf16[2,64,128], index: 4, kind: output, shape index: {}]  }
   0x1   :  { %s688_s17 = smov 0  }
   0x2 LB: > { %s26_s18 = sadd.s32 1, %s653_s16  ;;  %p493_p0 = scmp.ge.s32.totalorder %s657_s17, 1  ;;  %s657_s17 = sphi %s688_s17, %s14_s17   ;;  %s653_s16 = sphi %s686_s16, %s764_s16   ;;  %s649_s15 = sphi %s684_s15, %s763_s15  }
   0x3   : > { %p28_p1 = scmp.ge.s32.totalorder %s26_s18, 2  ;;  %p183_p2 = scmp.lt.s32.totalorder %s657_s17, 3 }
   0x5   : > { %s766_s18 = smov (%p28_p1, %s26_s18), 0  ;;  %p184_p3 = pnand %p493_p0, %p183_p2 }
   0x6   : > { %p218_p4 = scmp.lt.s32.totalorder (!%p184_p3), %s649_s15, 1 }
   0x7   : > { %187 = sbr.rel (%p184_p3) target bundleno = 193 (0xc1), region = 36 }
   0xc   : > { %v561_v0 = vld [vmem:[%s759_s1 + $0x38] sm:$0xff]  ;;  %v560_v1 = vld [vmem:[%s759_s1 + $0x30] sm:$0xff]  ;;  %v559_v2 = vld [vmem:[%s759_s1 + $0x28] sm:$0xff]  ;;  %s768_s15 = smov (!%p218_p4, %s649_s15), 1 }
   0xd   : > { %333 = vmatpush.bf16.msra.mxu0 %v561_v0  ;;  %585 = vmatpush.bf16.msra.mxu1 %v561_v0  ;;  %v558_v3 = vld [vmem:[%s759_s1 + $0x20] sm:$0xff]  ;;  %v557_v4 = vld [vmem:[%s759_s1 + $0x18] sm:$0xff]  ;;  %v556_v5 = vld [vmem:[%s759_s1 + $0x10] sm:$0xff]  ;;  %s548_s7 = sshll.u32 %s768_s15, 5 }
   0xe   : > { %586 = vmatpush.bf16.msra.mxu2 %v561_v0  ;;  %587 = vmatpush.bf16.msra.mxu3 %v561_v0  ;;  %v555_v6 = vld [vmem:[%s759_s1 + $0x8] sm:$0xff]  ;;  %v554_v7 = vld [vmem:[%s759_s1] sm:$0xff]  ;;  %s225_s12 = scalar_lea.vmem %s758_s0, %s548_s7  ;;  %s235_s23 = scalar_lea.vmem %s762_s4, %s548_s7 }
   0xf   : > { %v550_v8 = vld [vmem:[%s225_s12] sm:$0xff]  ;;  %v551_v9 = vld [vmem:[%s225_s12 + $0x8] sm:$0xff]  ;;  %v552_v10 = vld [vmem:[%s225_s12 + $0x10] sm:$0xff] }
  0x10   : > { %v553_v11 = vld [vmem:[%s225_s12 + $0x18] sm:$0xff]  ;;  %v633_v14 = vld [vmem:[%s760_s2] ss:$0 sm:$0xff] }
  0x11   : > { %334 = vmatpush.bf16.msra.mxu0 %v560_v1  ;;  %588 = vmatpush.bf16.msra.mxu1 %v560_v1  ;;  %v634_v16 = vld [vmem:[%s761_s3] ss:$0 sm:$0xff] }
  0x12   : > { %589 = vmatpush.bf16.msra.mxu2 %v560_v1  ;;  %590 = vmatpush.bf16.msra.mxu3 %v560_v1 }
  0x15   : > { %335 = vmatpush.bf16.msra.mxu0 %v559_v2  ;;  %591 = vmatpush.bf16.msra.mxu1 %v559_v2 }
  0x16   : > { %592 = vmatpush.bf16.msra.mxu2 %v559_v2  ;;  %593 = vmatpush.bf16.msra.mxu3 %v559_v2 }
  0x19   : > { %336 = vmatpush.bf16.msra.mxu0 %v558_v3  ;;  %594 = vmatpush.bf16.msra.mxu1 %v558_v3 }
  0x1a   : > { %595 = vmatpush.bf16.msra.mxu2 %v558_v3  ;;  %596 = vmatpush.bf16.msra.mxu3 %v558_v3 }
  0x1d   : > { %337 = vmatpush.bf16.msra.mxu0 %v557_v4  ;;  %597 = vmatpush.bf16.msra.mxu1 %v557_v4 }
  0x1e   : > { %598 = vmatpush.bf16.msra.mxu2 %v557_v4  ;;  %599 = vmatpush.bf16.msra.mxu3 %v557_v4 }
  0x21   : > { %338 = vmatpush.bf16.msra.mxu0 %v556_v5  ;;  %600 = vmatpush.bf16.msra.mxu1 %v556_v5 }
  0x22   : > { %601 = vmatpush.bf16.msra.mxu2 %v556_v5  ;;  %602 = vmatpush.bf16.msra.mxu3 %v556_v5 }
  0x25   : > { %339 = vmatpush.bf16.msra.mxu0 %v555_v6  ;;  %603 = vmatpush.bf16.msra.mxu1 %v555_v6 }
  0x26   : > { %604 = vmatpush.bf16.msra.mxu2 %v555_v6  ;;  %605 = vmatpush.bf16.msra.mxu3 %v555_v6 }
  0x29   : > { %340 = vmatpush.bf16.msra.mxu0 %v554_v7  ;;  %606 = vmatpush.bf16.msra.mxu1 %v554_v7 }
  0x2a   : > { %607 = vmatpush.bf16.msra.mxu2 %v554_v7  ;;  %608 = vmatpush.bf16.msra.mxu3 %v554_v7 }
  0x2c   : > { %341 = vmatmul.bf16.vlgmr.msra.gmra.mxu0 %v550_v8  ;;  %346 = vmatmul.bf16.vlgmr.msra.gmra.mxu1 %v551_v9 }
  0x2d   : > { %351 = vmatmul.bf16.vlgmr.msra.gmra.mxu2 %v552_v10  ;;  %356 = vmatmul.bf16.vlgmr.msra.gmra.mxu3 %v553_v11 }
  0xa9   : > { %v342_v12 = vpop.f32.mrf.mxu0  ;;  %v347_v13 = vpop.f32.mrf.mxu1 }
  0xaa   : > { %v366_v15 = vmul.f32 %v633_v14, %v342_v12  ;;  %v368_v17 = vmul.f32 %v633_v14, %v347_v13 }
  0xac   : > { %v378_v24 = vadd.f32 %v634_v16, %v366_v15  ;;  %v380_v25 = vadd.f32 %v634_v16, %v368_v17 }
  0xb0   : > { %v352_v18 = vpop.f32.mrf.mxu2  ;;  %v357_v19 = vpop.f32.mrf.mxu3 }
  0xb1   : > { %v344_v20 = vpop.f32.mrf.mxu0  ;;  %v349_v21 = vpop.f32.mrf.mxu1  ;;  %v370_v30 = vmul.f32 %v633_v14, %v352_v18  ;;  %v372_v31 = vmul.f32 %v633_v14, %v357_v19 }
  0xb2   : > { %v367_v22 = vmul.f32 %v633_v14, %v344_v20  ;;  %v369_v23 = vmul.f32 %v633_v14, %v349_v21 }
  0xb3   : > { %v382_v36 = vadd.f32 %v634_v16, %v370_v30  ;;  %v384_v37 = vadd.f32 %v634_v16, %v372_v31 }
  0xb4   : > { %v379_v26 = vadd.f32 %v634_v16, %v367_v22  ;;  %v381_v27 = vadd.f32 %v634_v16, %v369_v23 }
  0xb6   : > { %v565_v28 = vpack.c.bf16 %v379_v26, %v378_v24  ;;  %v570_v29 = vpack.c.bf16 %v381_v27, %v380_v25 }
  0xb8   : > { %566 = vst [vmem:[%s235_s23] sm:$0xff] %v565_v28   ;;  %v354_v32 = vpop.f32.mrf.mxu2  ;;  %v359_v33 = vpop.f32.mrf.mxu3 }
  0xb9   : > { %582 = vst [vmem:[%s235_s23 + $0x8] sm:$0xff] %v570_v29   ;;  %v371_v34 = vmul.f32 %v633_v14, %v354_v32  ;;  %v373_v35 = vmul.f32 %v633_v14, %v359_v33 }
  0xbb   : > { %v383_v38 = vadd.f32 %v634_v16, %v371_v34  ;;  %v385_v39 = vadd.f32 %v634_v16, %v373_v35 }
  0xbd   : > { %v575_v40 = vpack.c.bf16 %v383_v38, %v382_v36  ;;  %v580_v41 = vpack.c.bf16 %v385_v39, %v384_v37 }
  0xbf   : > { %583 = vst [vmem:[%s235_s23 + $0x10] sm:$0xff] %v575_v40  }
  0xc0   : > { %584 = vst [vmem:[%s235_s23 + $0x18] sm:$0xff] %v580_v41  }
  0xc1 PF: > { %s14_s17 = sadd.s32 1, %s657_s17   ;;  %s763_s15 = smov %s653_s16 }
  0xc2   : > { %p11_p5 = scmp.ge.s32.totalorder %s14_s17, 4   ;;  %s764_s16 = smov %s766_s18 }
  0xc4   :  { %13 = sbr.rel (!%p11_p5) target bundleno = 2 (0x2), region = 66 }

// kernel: encoder_cnn_forward.29
= control target key start
LH: loop header
LB: loop body
LE: loop exit
PB: predicated region body
PF: predicated region fallthrough
CT: control target
= control target key end

     0   :  { %s692_s15 = smov 0   ;;  %s694_s16 = smov 0   ;;  %s766_s0 = inlined_call_operand.vmem [shape: bf16[2,64,128], index: 0, kind: input, shape index: {}]   ;;  %s767_s1 = inlined_call_operand.vmem [shape: bf16[128,128], index: 1, kind: input, shape index: {}]   ;;  %s768_s2 = inlined_call_operand.vmem [shape: f32[1,128], index: 2, kind: input, shape index: {}]   ;;  %s769_s3 = inlined_call_operand.vmem [shape: f32[1,128], index: 3, kind: input, shape index: {}]   ;;  %s770_s4 = inlined_call_operand.vmem [shape: bf16[2,64,128], index: 4, kind: output, shape index: {}]  }
   0x1   :  { %s696_s17 = smov 0  }
   0x2 LB: > { %s26_s18 = sadd.s32 1, %s661_s16  ;;  %p501_p0 = scmp.ge.s32.totalorder %s665_s17, 1  ;;  %s665_s17 = sphi %s696_s17, %s14_s17   ;;  %s661_s16 = sphi %s694_s16, %s772_s16   ;;  %s657_s15 = sphi %s692_s15, %s771_s15  }
   0x3   : > { %p28_p1 = scmp.ge.s32.totalorder %s26_s18, 2  ;;  %p183_p2 = scmp.lt.s32.totalorder %s665_s17, 3 }
   0x5   : > { %s774_s18 = smov (%p28_p1, %s26_s18), 0  ;;  %p184_p3 = pnand %p501_p0, %p183_p2 }
   0x6   : > { %p218_p4 = scmp.lt.s32.totalorder (!%p184_p3), %s657_s15, 1 }
   0x7   : > { %187 = sbr.rel (%p184_p3) target bundleno = 195 (0xc3), region = 36 }
   0xc   : > { %v569_v0 = vld [vmem:[%s767_s1 + $0x38] sm:$0xff]  ;;  %v568_v1 = vld [vmem:[%s767_s1 + $0x30] sm:$0xff]  ;;  %v567_v2 = vld [vmem:[%s767_s1 + $0x28] sm:$0xff]  ;;  %s776_s15 = smov (!%p218_p4, %s657_s15), 1 }
   0xd   : > { %333 = vmatpush.bf16.msra.mxu0 %v569_v0  ;;  %593 = vmatpush.bf16.msra.mxu1 %v569_v0  ;;  %v566_v3 = vld [vmem:[%s767_s1 + $0x20] sm:$0xff]  ;;  %v565_v4 = vld [vmem:[%s767_s1 + $0x18] sm:$0xff]  ;;  %v564_v5 = vld [vmem:[%s767_s1 + $0x10] sm:$0xff]  ;;  %s556_s7 = sshll.u32 %s776_s15, 5 }
   0xe   : > { %594 = vmatpush.bf16.msra.mxu2 %v569_v0  ;;  %595 = vmatpush.bf16.msra.mxu3 %v569_v0  ;;  %v563_v6 = vld [vmem:[%s767_s1 + $0x8] sm:$0xff]  ;;  %v562_v7 = vld [vmem:[%s767_s1] sm:$0xff]  ;;  %s225_s12 = scalar_lea.vmem %s766_s0, %s556_s7  ;;  %s235_s23 = scalar_lea.vmem %s770_s4, %s556_s7 }
   0xf   : > { %v558_v8 = vld [vmem:[%s225_s12] sm:$0xff]  ;;  %v559_v9 = vld [vmem:[%s225_s12 + $0x8] sm:$0xff]  ;;  %v560_v10 = vld [vmem:[%s225_s12 + $0x10] sm:$0xff] }
  0x10   : > { %v561_v11 = vld [vmem:[%s225_s12 + $0x18] sm:$0xff]  ;;  %v641_v14 = vld [vmem:[%s768_s2] ss:$0 sm:$0xff] }
  0x11   : > { %334 = vmatpush.bf16.msra.mxu0 %v568_v1  ;;  %596 = vmatpush.bf16.msra.mxu1 %v568_v1  ;;  %v642_v16 = vld [vmem:[%s769_s3] ss:$0 sm:$0xff] }
  0x12   : > { %597 = vmatpush.bf16.msra.mxu2 %v568_v1  ;;  %598 = vmatpush.bf16.msra.mxu3 %v568_v1 }
  0x15   : > { %335 = vmatpush.bf16.msra.mxu0 %v567_v2  ;;  %599 = vmatpush.bf16.msra.mxu1 %v567_v2 }
  0x16   : > { %600 = vmatpush.bf16.msra.mxu2 %v567_v2  ;;  %601 = vmatpush.bf16.msra.mxu3 %v567_v2 }
  0x19   : > { %336 = vmatpush.bf16.msra.mxu0 %v566_v3  ;;  %602 = vmatpush.bf16.msra.mxu1 %v566_v3 }
  0x1a   : > { %603 = vmatpush.bf16.msra.mxu2 %v566_v3  ;;  %604 = vmatpush.bf16.msra.mxu3 %v566_v3 }
  0x1d   : > { %337 = vmatpush.bf16.msra.mxu0 %v565_v4  ;;  %605 = vmatpush.bf16.msra.mxu1 %v565_v4 }
  0x1e   : > { %606 = vmatpush.bf16.msra.mxu2 %v565_v4  ;;  %607 = vmatpush.bf16.msra.mxu3 %v565_v4 }
  0x21   : > { %338 = vmatpush.bf16.msra.mxu0 %v564_v5  ;;  %608 = vmatpush.bf16.msra.mxu1 %v564_v5 }
  0x22   : > { %609 = vmatpush.bf16.msra.mxu2 %v564_v5  ;;  %610 = vmatpush.bf16.msra.mxu3 %v564_v5 }
  0x25   : > { %339 = vmatpush.bf16.msra.mxu0 %v563_v6  ;;  %611 = vmatpush.bf16.msra.mxu1 %v563_v6 }
  0x26   : > { %612 = vmatpush.bf16.msra.mxu2 %v563_v6  ;;  %613 = vmatpush.bf16.msra.mxu3 %v563_v6 }
  0x29   : > { %340 = vmatpush.bf16.msra.mxu0 %v562_v7  ;;  %614 = vmatpush.bf16.msra.mxu1 %v562_v7 }
  0x2a   : > { %615 = vmatpush.bf16.msra.mxu2 %v562_v7  ;;  %616 = vmatpush.bf16.msra.mxu3 %v562_v7 }
  0x2c   : > { %341 = vmatmul.bf16.vlgmr.msra.gmra.mxu0 %v558_v8  ;;  %346 = vmatmul.bf16.vlgmr.msra.gmra.mxu1 %v559_v9 }
  0x2d   : > { %351 = vmatmul.bf16.vlgmr.msra.gmra.mxu2 %v560_v10  ;;  %356 = vmatmul.bf16.vlgmr.msra.gmra.mxu3 %v561_v11 }
  0xa9   : > { %v342_v12 = vpop.f32.mrf.mxu0  ;;  %v347_v13 = vpop.f32.mrf.mxu1 }
  0xaa   : > { %v366_v15 = vmul.f32 %v641_v14, %v342_v12  ;;  %v368_v17 = vmul.f32 %v641_v14, %v347_v13 }
  0xac   : > { %v378_v22 = vadd.f32 %v642_v16, %v366_v15  ;;  %v380_v23 = vadd.f32 %v642_v16, %v368_v17 }
  0xae   : > { %v386_v30 = vmax.f32 %v378_v22, 0.0  ;;  %v388_v31 = vmax.f32 %v380_v23, 0.0 }
  0xb0   : > { %v352_v18 = vpop.f32.mrf.mxu2  ;;  %v357_v19 = vpop.f32.mrf.mxu3 }
  0xb1   : > { %v344_v20 = vpop.f32.mrf.mxu0  ;;  %v349_v21 = vpop.f32.mrf.mxu1  ;;  %v370_v28 = vmul.f32 %v641_v14, %v352_v18  ;;  %v372_v29 = vmul.f32 %v641_v14, %v357_v19 }
  0xb2   : > { %v367_v24 = vmul.f32 %v641_v14, %v344_v20  ;;  %v369_v25 = vmul.f32 %v641_v14, %v349_v21 }
  0xb3   : > { %v382_v38 = vadd.f32 %v642_v16, %v370_v28  ;;  %v384_v39 = vadd.f32 %v642_v16, %v372_v29 }
  0xb4   : > { %v379_v26 = vadd.f32 %v642_v16, %v367_v24  ;;  %v381_v27 = vadd.f32 %v642_v16, %v369_v25 }
  0xb5   : > { %v390_v44 = vmax.f32 %v382_v38, 0.0  ;;  %v392_v45 = vmax.f32 %v384_v39, 0.0 }
  0xb6   : > { %v387_v32 = vmax.f32 %v379_v26, 0.0  ;;  %v389_v33 = vmax.f32 %v381_v27, 0.0 }
  0xb8   : > { %v573_v34 = vpack.c.bf16 %v387_v32, %v386_v30  ;;  %v578_v35 = vpack.c.bf16 %v389_v33, %v388_v31  ;;  %v354_v36 = vpop.f32.mrf.mxu2  ;;  %v359_v37 = vpop.f32.mrf.mxu3 }
  0xb9   : > { %v371_v40 = vmul.f32 %v641_v14, %v354_v36  ;;  %v373_v41 = vmul.f32 %v641_v14, %v359_v37 }
  0xba   : > { %574 = vst [vmem:[%s235_s23] sm:$0xff] %v573_v34  }
  0xbb   : > { %590 = vst [vmem:[%s235_s23 + $0x8] sm:$0xff] %v578_v35   ;;  %v383_v42 = vadd.f32 %v642_v16, %v371_v40  ;;  %v385_v43 = vadd.f32 %v642_v16, %v373_v41 }
  0xbd   : > { %v391_v46 = vmax.f32 %v383_v42, 0.0  ;;  %v393_v47 = vmax.f32 %v385_v43, 0.0 }
  0xbf   : > { %v583_v48 = vpack.c.bf16 %v391_v46, %v390_v44  ;;  %v588_v49 = vpack.c.bf16 %v393_v47, %v392_v45 }
  0xc1   : > { %591 = vst [vmem:[%s235_s23 + $0x10] sm:$0xff] %v583_v48  }
  0xc2   : > { %592 = vst [vmem:[%s235_s23 + $0x18] sm:$0xff] %v588_v49  }
  0xc3 PF: > { %s14_s17 = sadd.s32 1, %s665_s17   ;;  %s771_s15 = smov %s661_s16 }
  0xc4   : > { %p11_p5 = scmp.ge.s32.totalorder %s14_s17, 4   ;;  %s772_s16 = smov %s774_s18 }
  0xc6   :  { %13 = sbr.rel (!%p11_p5) target bundleno = 2 (0x2), region = 66 }

// kernel: encoder_cnn_forward.26
= control target key start
LH: loop header
LB: loop body
LE: loop exit
PB: predicated region body
PF: predicated region fallthrough
CT: control target
= control target key end

     0   :  { %s1040_s15 = smov 0   ;;  %s1159_s0 = inlined_call_operand.vmem [shape: bf16[2,144,128], index: 0, kind: input, shape index: {}]   ;;  %s1160_s1 = inlined_call_operand.vmem [shape: bf16[3,128,128], index: 1, kind: input, shape index: {}]   ;;  %s1161_s2 = inlined_call_operand.vmem [shape: f32[1,128], index: 2, kind: input, shape index: {}]   ;;  %s1162_s3 = inlined_call_operand.vmem [shape: f32[1,128], index: 3, kind: input, shape index: {}]   ;;  %s1163_s4 = inlined_call_operand.vmem [shape: bf16[2,64,128], index: 4, kind: output, shape index: {}]  }
   0x1 LB: > { %s742_s16 = sadd.s32 4294967295, %s1013_s15   ;;  %p746_p0 = scmp.ge.s32.totalorder %s1013_s15, 1  ;;  %s1013_s15 = sphi %s1040_s15, %s14_s15  }
   0x2   : > { %p162_p1 = scmp.lt.s32.totalorder %s1013_s15, 3 }
   0x4   : > { %p163_p2 = pnand %p746_p0, %p162_p1 }
   0x5   : > { %p188_p3 = scmp.lt.s32.totalorder (!%p163_p2), %s742_s16, 1 }
   0x6   : > { %166 = sbr.rel (%p163_p2) target bundleno = 244 (0xf4), region = 36 }
   0xb   : > { %v940_v0 = vld [vmem:[%s1160_s1 + $0x38] sm:$0xff]  ;;  %v939_v3 = vld [vmem:[%s1160_s1 + $0x30] sm:$0xff]  ;;  %v938_v6 = vld [vmem:[%s1160_s1 + $0x28] sm:$0xff]  ;;  %s1165_s16 = smov (!%p188_p3, %s742_s16), 1 }
   0xc   : > { %v952_v1 = vld [vmem:[%s1160_s1 + $0x78] sm:$0xff]  ;;  %294 = vmatpush.bf16.msra.mxu0 %v940_v0  ;;  %v951_v4 = vld [vmem:[%s1160_s1 + $0x70] sm:$0xff]  ;;  %988 = vmatpush.bf16.msra.mxu3 %v940_v0  ;;  %v950_v7 = vld [vmem:[%s1160_s1 + $0x68] sm:$0xff]  ;;  %s996_s7 = smul.u32 72, %s1165_s16  ;;  %s928_s25 = sshll.u32 %s1165_s16, 5 }
   0xd   : > { %v964_v2 = vld [vmem:[%s1160_s1 + $0xb8] sm:$0xff]  ;;  %428 = vmatpush.bf16.msra.mxu1 %v952_v1  ;;  %v963_v5 = vld [vmem:[%s1160_s1 + $0xb0] sm:$0xff]  ;;  %v962_v8 = vld [vmem:[%s1160_s1 + $0xa8] sm:$0xff]  ;;  %s1144_s28 = scalar_lea.vmem %s1163_s4, %s928_s25 }
   0xe   : > { %578 = vmatpush.bf16.msra.mxu2 %v964_v2  ;;  %v937_v9 = vld [vmem:[%s1160_s1 + $0x20] sm:$0xff]  ;;  %v936_v12 = vld [vmem:[%s1160_s1 + $0x18] sm:$0xff]  ;;  %v935_v15 = vld [vmem:[%s1160_s1 + $0x10] sm:$0xff]  ;;  %s192_s18 = scalar_lea.vmem %s1159_s0, %s996_s7 }
   0xf   : > { %v949_v10 = vld [vmem:[%s1160_s1 + $0x60] sm:$0xff]  ;;  %v948_v13 = vld [vmem:[%s1160_s1 + $0x58] sm:$0xff]  ;;  %v947_v16 = vld [vmem:[%s1160_s1 + $0x50] sm:$0xff] }
  0x10   : > { %295 = vmatpush.bf16.msra.mxu0 %v939_v3  ;;  %989 = vmatpush.bf16.msra.mxu3 %v939_v3  ;;  %v961_v11 = vld [vmem:[%s1160_s1 + $0xa0] sm:$0xff]  ;;  %v960_v14 = vld [vmem:[%s1160_s1 + $0x98] sm:$0xff]  ;;  %v959_v17 = vld [vmem:[%s1160_s1 + $0x90] sm:$0xff] }
  0x11   : > { %429 = vmatpush.bf16.msra.mxu1 %v951_v4  ;;  %v934_v18 = vld [vmem:[%s1160_s1 + $0x8] sm:$0xff]  ;;  %v933_v21 = vld [vmem:[%s1160_s1] sm:$0xff]  ;;  %v931_v30 = vld [vmem:[%s192_s18 + $0x10] sm:$0xff] }
  0x12   : > { %579 = vmatpush.bf16.msra.mxu2 %v963_v5  ;;  %v946_v19 = vld [vmem:[%s1160_s1 + $0x48] sm:$0xff]  ;;  %v945_v22 = vld [vmem:[%s1160_s1 + $0x40] sm:$0xff]  ;;  %v943_v31 = vld [vmem:[%s192_s18 + $0x34] sm:$0xff] }
  0x13   : > { %v958_v20 = vld [vmem:[%s1160_s1 + $0x88] sm:$0xff]  ;;  %v957_v23 = vld [vmem:[%s1160_s1 + $0x80] sm:$0xff]  ;;  %v955_v32 = vld [vmem:[%s192_s18 + $0x14] sm:$0xff] }
  0x14   : > { %296 = vmatpush.bf16.msra.mxu0 %v938_v6  ;;  %990 = vmatpush.bf16.msra.mxu3 %v938_v6  ;;  %v929_v24 = vld [vmem:[%s192_s18] sm:$0xff]  ;;  %v930_v27 = vld [vmem:[%s192_s18 + $0x8] sm:$0xff]  ;;  %v932_v33 = vld [vmem:[%s192_s18 + $0x18] sm:$0xff] }
  0x15   : > { %430 = vmatpush.bf16.msra.mxu1 %v950_v7  ;;  %v941_v25 = vld [vmem:[%s192_s18 + $0x24] sm:$0xff]  ;;  %v942_v28 = vld [vmem:[%s192_s18 + $0x2c] sm:$0xff]  ;;  %v944_v34 = vld [vmem:[%s192_s18 + $0x3c] sm:$0xff] }
  0x16   : > { %580 = vmatpush.bf16.msra.mxu2 %v962_v8  ;;  %v953_v26 = vld [vmem:[%s192_s18 + $0x4] sm:$0xff]  ;;  %v954_v29 = vld [vmem:[%s192_s18 + $0xc] sm:$0xff]  ;;  %v956_v35 = vld [vmem:[%s192_s18 + $0x1c] sm:$0xff] }
  0x17   : > { %v1133_v42 = vld [vmem:[%s1161_s2] ss:$0 sm:$0xff] }
  0x18   : > { %297 = vmatpush.bf16.msra.mxu0 %v937_v9  ;;  %991 = vmatpush.bf16.msra.mxu3 %v937_v9  ;;  %v1006_v46 = vld [vmem:[%s1162_s3] ss:$0 sm:$0xff] }
  0x19   : > { %431 = vmatpush.bf16.msra.mxu1 %v949_v10 }
  0x1a   : > { %581 = vmatpush.bf16.msra.mxu2 %v961_v11 }
  0x1c   : > { %298 = vmatpush.bf16.msra.mxu0 %v936_v12  ;;  %992 = vmatpush.bf16.msra.mxu3 %v936_v12 }
  0x1d   : > { %432 = vmatpush.bf16.msra.mxu1 %v948_v13 }
  0x1e   : > { %582 = vmatpush.bf16.msra.mxu2 %v960_v14 }
  0x20   : > { %299 = vmatpush.bf16.msra.mxu0 %v935_v15  ;;  %993 = vmatpush.bf16.msra.mxu3 %v935_v15 }
  0x21   : > { %433 = vmatpush.bf16.msra.mxu1 %v947_v16 }
  0x22   : > { %583 = vmatpush.bf16.msra.mxu2 %v959_v17 }
  0x24   : > { %300 = vmatpush.bf16.msra.mxu0 %v934_v18  ;;  %994 = vmatpush.bf16.msra.mxu3 %v934_v18 }
  0x25   : > { %434 = vmatpush.bf16.msra.mxu1 %v946_v19 }
  0x26   : > { %584 = vmatpush.bf16.msra.mxu2 %v958_v20 }
  0x28   : > { %301 = vmatpush.bf16.msra.mxu0 %v933_v21  ;;  %995 = vmatpush.bf16.msra.mxu3 %v933_v21 }
  0x29   : > { %435 = vmatpush.bf16.msra.mxu1 %v945_v22 }
  0x2a   : > { %585 = vmatpush.bf16.msra.mxu2 %v957_v23 }
  0x2b   : > { %302 = vmatmul.bf16.vlgmr.msra.gmra.mxu0 %v929_v24  ;;  %307 = vmatmul.bf16.vlgmr.msra.gmra.mxu3 %v930_v27 }
  0x2c   : > { %436 = vmatmul.bf16.vlgmr.msra.gmra.mxu1 %v941_v25 }
  0x2d   : > { %586 = vmatmul.bf16.vlgmr.msra.gmra.mxu2 %v953_v26 }
  0x3b   : > { %312 = vmatmul.bf16.gmra.mxu3 %v931_v30 }
  0x3c   : > { %441 = vmatmul.bf16.gmra.mxu1 %v942_v28 }
  0x3d   : > { %591 = vmatmul.bf16.gmra.mxu2 %v954_v29 }
  0x4b   : > { %317 = vmatmul.bf16.gmra.mxu3 %v932_v33 }
  0x4c   : > { %446 = vmatmul.bf16.gmra.mxu1 %v943_v31 }
  0x4d   : > { %596 = vmatmul.bf16.gmra.mxu2 %v955_v32 }
  0x5c   : > { %451 = vmatmul.bf16.gmra.mxu1 %v944_v34 }
  0x5d   : > { %601 = vmatmul.bf16.gmra.mxu2 %v956_v35 }
  0xa8   : > { %v303_v37 = vpop.f32.mrf.mxu0 }
  0xa9   : > { %v437_v36 = vpop.f32.mrf.mxu1 }
  0xaa   : > { %v465_v38 = vadd.f32 %v437_v36, %v303_v37 }
  0xae   : > { %v308_v44 = vpop.f32.mrf.mxu3 }
  0xb0   : > { %v587_v39 = vpop.f32.mrf.mxu2  ;;  %v305_v43 = vpop.f32.mrf.mxu0 }
  0xb1   : > { %v439_v40 = vpop.f32.mrf.mxu1  ;;  %v615_v41 = vadd.f32 %v587_v39, %v465_v38 }
  0xb2   : > { %v466_v47 = vadd.f32 %v439_v40, %v305_v43 }
  0xb3   : > { %v643_v45 = vmul.f32 %v1133_v42, %v615_v41 }
  0xb5   : > { %v655_v51 = vadd.f32 %v1006_v46, %v643_v45 }
  0xb6   : > { %v310_v54 = vpop.f32.mrf.mxu3 }
  0xb7   : > { %v663_v55 = vmax.f32 %v655_v51, 0.0 }
  0xb8   : > { %v589_v48 = vpop.f32.mrf.mxu2 }
  0xb9   : > { %v616_v49 = vadd.f32 %v589_v48, %v466_v47  ;;  %v442_v50 = vpop.f32.mrf.mxu1 }
  0xba   : > { %v467_v57 = vadd.f32 %v442_v50, %v308_v44 }
  0xbb   : > { %v644_v52 = vmul.f32 %v1133_v42, %v616_v49 }
  0xbd   : > { %v656_v53 = vadd.f32 %v1006_v46, %v644_v52 }
  0xbe   : > { %v313_v0 = vpop.f32.mrf.mxu3 }
  0xbf   : > { %v664_v56 = vmax.f32 %v656_v53, 0.0 }
  0xc0   : > { %v592_v58 = vpop.f32.mrf.mxu2 }
  0xc1   : > { %v968_v59 = vpack.c.bf16 %v664_v56, %v663_v55  ;;  %v444_v60 = vpop.f32.mrf.mxu1  ;;  %v617_v61 = vadd.f32 %v592_v58, %v467_v57 }
  0xc2   : > { %v468_v63 = vadd.f32 %v444_v60, %v310_v54 }
  0xc3   : > { %969 = vst [vmem:[%s1144_s28] sm:$0xff] %v968_v59   ;;  %v645_v62 = vmul.f32 %v1133_v42, %v617_v61 }
  0xc5   : > { %v657_v4 = vadd.f32 %v1006_v46, %v645_v62 }
  0xc6   : > { %v315_v13 = vpop.f32.mrf.mxu3 }
  0xc7   : > { %v665_v7 = vmax.f32 %v657_v4, 0.0 }
  0xc8   : > { %v594_v1 = vpop.f32.mrf.mxu2 }
  0xc9   : > { %v618_v2 = vadd.f32 %v594_v1, %v468_v63  ;;  %v447_v3 = vpop.f32.mrf.mxu1 }
  0xca   : > { %v469_v9 = vadd.f32 %v447_v3, %v313_v0 }
  0xcb   : > { %v646_v5 = vmul.f32 %v1133_v42, %v618_v2 }
  0xcd   : > { %v658_v6 = vadd.f32 %v1006_v46, %v646_v5 }
  0xce   : > { %v318_v22 = vpop.f32.mrf.mxu3 }
  0xcf   : > { %v666_v8 = vmax.f32 %v658_v6, 0.0 }
  0xd0   : > { %v597_v10 = vpop.f32.mrf.mxu2 }
  0xd1   : > { %v973_v11 = vpack.c.bf16 %v666_v8, %v665_v7  ;;  %v449_v12 = vpop.f32.mrf.mxu1  ;;  %v619_v14 = vadd.f32 %v597_v10, %v469_v9 }
  0xd2   : > { %v470_v16 = vadd.f32 %v449_v12, %v315_v13 }
  0xd3   : > { %985 = vst [vmem:[%s1144_s28 + $0x8] sm:$0xff] %v973_v11   ;;  %v647_v15 = vmul.f32 %v1133_v42, %v619_v14 }
  0xd5   : > { %v659_v20 = vadd.f32 %v1006_v46, %v647_v15 }
  0xd6   : > { %v320_v31 = vpop.f32.mrf.mxu3 }
  0xd7   : > { %v667_v24 = vmax.f32 %v659_v20, 0.0 }
  0xd8   : > { %v599_v17 = vpop.f32.mrf.mxu2 }
  0xd9   : > { %v620_v18 = vadd.f32 %v599_v17, %v470_v16  ;;  %v452_v19 = vpop.f32.mrf.mxu1 }
  0xda   : > { %v471_v26 = vadd.f32 %v452_v19, %v318_v22 }
  0xdb   : > { %v648_v21 = vmul.f32 %v1133_v42, %v620_v18 }
  0xdd   : > { %v660_v23 = vadd.f32 %v1006_v46, %v648_v21 }
  0xdf   : > { %v668_v25 = vmax.f32 %v660_v23, 0.0 }
  0xe0   : > { %v602_v27 = vpop.f32.mrf.mxu2 }
  0xe1   : > { %v978_v28 = vpack.c.bf16 %v668_v25, %v667_v24  ;;  %v621_v29 = vadd.f32 %v602_v27, %v471_v26  ;;  %v454_v30 = vpop.f32.mrf.mxu1 }
  0xe2   : > { %v472_v33 = vadd.f32 %v454_v30, %v320_v31 }
  0xe3   : > { %986 = vst [vmem:[%s1144_s28 + $0x10] sm:$0xff] %v978_v28   ;;  %v649_v32 = vmul.f32 %v1133_v42, %v621_v29 }
  0xe5   : > { %v661_v36 = vadd.f32 %v1006_v46, %v649_v32 }
  0xe7   : > { %v669_v39 = vmax.f32 %v661_v36, 0.0 }
  0xe8   : > { %v604_v34 = vpop.f32.mrf.mxu2 }
  0xe9   : > { %v622_v35 = vadd.f32 %v604_v34, %v472_v33 }
  0xeb   : > { %v650_v37 = vmul.f32 %v1133_v42, %v622_v35 }
  0xed   : > { %v662_v38 = vadd.f32 %v1006_v46, %v650_v37 }
  0xef   : > { %v670_v40 = vmax.f32 %v662_v38, 0.0 }
  0xf1   : > { %v983_v41 = vpack.c.bf16 %v670_v40, %v669_v39 }
  0xf3   : > { %987 = vst [vmem:[%s1144_s28 + $0x18] sm:$0xff] %v983_v41  }
  0xf4 PF: > { %s14_s15 = sadd.s32 1, %s1013_s15  }
  0xf5   : > { %p11_p4 = scmp.ge.s32.totalorder %s14_s15, 4  }
  0xf7   :  { %13 = sbr.rel (!%p11_p4) target bundleno = 1 (0x1), region = 68 }

// kernel: encoder_cnn_forward.28
= control target key start
LH: loop header
LB: loop body
LE: loop exit
PB: predicated region body
PF: predicated region fallthrough
CT: control target
= control target key end

     0   :  { %s824_s18 = smov 0   ;;  %s826_s19 = smov 0   ;;  %s899_s0 = inlined_call_operand.vmem [shape: bf16[2,64,128], index: 0, kind: input, shape index: {}]   ;;  %s900_s1 = inlined_call_operand.vmem [shape: bf16[128,128], index: 1, kind: input, shape index: {}]   ;;  %s901_s2 = inlined_call_operand.vmem [shape: f32[1,128], index: 2, kind: input, shape index: {}]   ;;  %s902_s3 = inlined_call_operand.vmem [shape: f32[1,128], index: 3, kind: input, shape index: {}]   ;;  %s903_s4 = inlined_call_operand.vmem [shape: bf16[2,64,128], index: 4, kind: input, shape index: {}]   ;;  %s904_s5 = inlined_call_operand.vmem [shape: bf16[2,64,128], index: 5, kind: output, shape index: {}]  }
   0x1   :  { %s828_s20 = smov 0  }
   0x2 LB: > { %s27_s21 = sadd.s32 1, %s788_s19  ;;  %p606_p0 = scmp.ge.s32.totalorder %s792_s20, 1  ;;  %s792_s20 = sphi %s828_s20, %s15_s20   ;;  %s788_s19 = sphi %s826_s19, %s906_s19   ;;  %s784_s18 = sphi %s824_s18, %s905_s18  }
   0x3   : > { %p29_p1 = scmp.ge.s32.totalorder %s27_s21, 2  ;;  %p225_p2 = scmp.lt.s32.totalorder %s792_s20, 3 }
   0x5   : > { %s908_s21 = smov (%p29_p1, %s27_s21), 0  ;;  %p226_p3 = pnand %p606_p0, %p225_p2 }
   0x6   : > { %p271_p4 = scmp.lt.s32.totalorder (!%p226_p3), %s784_s18, 1 }
   0x7   : > { %229 = sbr.rel (%p226_p3) target bundleno = 197 (0xc5), region = 40 }
   0xc   : > { %v677_v0 = vld [vmem:[%s900_s1 + $0x38] sm:$0xff]  ;;  %v676_v1 = vld [vmem:[%s900_s1 + $0x30] sm:$0xff]  ;;  %v675_v2 = vld [vmem:[%s900_s1 + $0x28] sm:$0xff]  ;;  %s910_s18 = smov (!%p271_p4, %s784_s18), 1 }
   0xd   : > { %396 = vmatpush.bf16.msra.mxu0 %v677_v0  ;;  %720 = vmatpush.bf16.msra.mxu1 %v677_v0  ;;  %v674_v3 = vld [vmem:[%s900_s1 + $0x20] sm:$0xff]  ;;  %v673_v4 = vld [vmem:[%s900_s1 + $0x18] sm:$0xff]  ;;  %v672_v5 = vld [vmem:[%s900_s1 + $0x10] sm:$0xff]  ;;  %s867_s11 = sshll.u32 %s910_s18, 5 }
   0xe   : > { %721 = vmatpush.bf16.msra.mxu2 %v677_v0  ;;  %722 = vmatpush.bf16.msra.mxu3 %v677_v0  ;;  %v671_v6 = vld [vmem:[%s900_s1 + $0x8] sm:$0xff]  ;;  %v670_v7 = vld [vmem:[%s900_s1] sm:$0xff]  ;;  %s278_s16 = scalar_lea.vmem %s899_s0, %s867_s11  ;;  %s288_s24 = scalar_lea.vmem %s903_s4, %s867_s11 }
   0xf   : > { %v666_v8 = vld [vmem:[%s278_s16] sm:$0xff]  ;;  %v667_v9 = vld [vmem:[%s278_s16 + $0x8] sm:$0xff]  ;;  %v668_v10 = vld [vmem:[%s278_s16 + $0x10] sm:$0xff]  ;;  %s298_s29 = scalar_lea.vmem %s904_s5, %s867_s11 }
  0x10   : > { %v669_v11 = vld [vmem:[%s278_s16 + $0x18] sm:$0xff]  ;;  %v768_v12 = vld [vmem:[%s901_s2] ss:$0 sm:$0xff]  ;;  %v714_v19 = vld [vmem:[%s288_s24 + $0x8] sm:$0xff]  }
  0x11   : > { %397 = vmatpush.bf16.msra.mxu0 %v676_v1  ;;  %723 = vmatpush.bf16.msra.mxu1 %v676_v1  ;;  %v769_v16 = vld [vmem:[%s902_s3] ss:$0 sm:$0xff]  ;;  %v684_v23 = vunpack.c.l.bf16 %v714_v19  ;;  %v685_v31 = vunpack.c.h.bf16 %v714_v19  ;;  %v715_v36 = vld [vmem:[%s288_s24 + $0x10] sm:$0xff]   ;;  %v716_v37 = vld [vmem:[%s288_s24 + $0x18] sm:$0xff]  }
  0x12   : > { %724 = vmatpush.bf16.msra.mxu2 %v676_v1  ;;  %725 = vmatpush.bf16.msra.mxu3 %v676_v1  ;;  %v679_v18 = vld [vmem:[%s288_s24] sm:$0xff]   ;;  %v688_v43 = vunpack.c.l.bf16 %v715_v36  ;;  %v692_v45 = vunpack.c.l.bf16 %v716_v37  ;;  %v689_v53 = vunpack.c.h.bf16 %v715_v36  ;;  %v693_v55 = vunpack.c.h.bf16 %v716_v37 }
  0x13   : > { %v680_v21 = vunpack.c.l.bf16 %v679_v18  ;;  %v681_v29 = vunpack.c.h.bf16 %v679_v18 }
  0x15   : > { %398 = vmatpush.bf16.msra.mxu0 %v675_v2  ;;  %726 = vmatpush.bf16.msra.mxu1 %v675_v2 }
  0x16   : > { %727 = vmatpush.bf16.msra.mxu2 %v675_v2  ;;  %728 = vmatpush.bf16.msra.mxu3 %v675_v2 }
  0x19   : > { %399 = vmatpush.bf16.msra.mxu0 %v674_v3  ;;  %729 = vmatpush.bf16.msra.mxu1 %v674_v3 }
  0x1a   : > { %730 = vmatpush.bf16.msra.mxu2 %v674_v3  ;;  %731 = vmatpush.bf16.msra.mxu3 %v674_v3 }
  0x1d   : > { %400 = vmatpush.bf16.msra.mxu0 %v673_v4  ;;  %732 = vmatpush.bf16.msra.mxu1 %v673_v4 }
  0x1e   : > { %733 = vmatpush.bf16.msra.mxu2 %v673_v4  ;;  %734 = vmatpush.bf16.msra.mxu3 %v673_v4 }
  0x21   : > { %401 = vmatpush.bf16.msra.mxu0 %v672_v5  ;;  %735 = vmatpush.bf16.msra.mxu1 %v672_v5 }
  0x22   : > { %736 = vmatpush.bf16.msra.mxu2 %v672_v5  ;;  %737 = vmatpush.bf16.msra.mxu3 %v672_v5 }
  0x25   : > { %402 = vmatpush.bf16.msra.mxu0 %v671_v6  ;;  %738 = vmatpush.bf16.msra.mxu1 %v671_v6 }
  0x26   : > { %739 = vmatpush.bf16.msra.mxu2 %v671_v6  ;;  %740 = vmatpush.bf16.msra.mxu3 %v671_v6 }
  0x29   : > { %403 = vmatpush.bf16.msra.mxu0 %v670_v7  ;;  %741 = vmatpush.bf16.msra.mxu1 %v670_v7 }
  0x2a   : > { %742 = vmatpush.bf16.msra.mxu2 %v670_v7  ;;  %743 = vmatpush.bf16.msra.mxu3 %v670_v7 }
  0x2c   : > { %404 = vmatmul.bf16.vlgmr.msra.gmra.mxu0 %v666_v8  ;;  %409 = vmatmul.bf16.vlgmr.msra.gmra.mxu1 %v667_v9 }
  0x2d   : > { %414 = vmatmul.bf16.vlgmr.msra.gmra.mxu2 %v668_v10  ;;  %419 = vmatmul.bf16.vlgmr.msra.gmra.mxu3 %v669_v11 }
  0xa9   : > { %v405_v13 = vpop.f32.mrf.mxu0  ;;  %v410_v14 = vpop.f32.mrf.mxu1 }
  0xaa   : > { %v429_v15 = vmul.f32 %v768_v12, %v405_v13  ;;  %v431_v17 = vmul.f32 %v768_v12, %v410_v14 }
  0xac   : > { %v441_v20 = vadd.f32 %v769_v16, %v429_v15  ;;  %v443_v22 = vadd.f32 %v769_v16, %v431_v17 }
  0xae   : > { %v465_v34 = vadd.f32 %v680_v21, %v441_v20  ;;  %v467_v35 = vadd.f32 %v684_v23, %v443_v22 }
  0xb0   : > { %v415_v24 = vpop.f32.mrf.mxu2  ;;  %v420_v25 = vpop.f32.mrf.mxu3  ;;  %v473_v46 = vmax.f32 %v465_v34, 0.0  ;;  %v475_v47 = vmax.f32 %v467_v35, 0.0 }
  0xb1   : > { %v407_v26 = vpop.f32.mrf.mxu0  ;;  %v412_v27 = vpop.f32.mrf.mxu1  ;;  %v433_v32 = vmul.f32 %v768_v12, %v415_v24  ;;  %v435_v33 = vmul.f32 %v768_v12, %v420_v25 }
  0xb2   : > { %v430_v28 = vmul.f32 %v768_v12, %v407_v26  ;;  %v432_v30 = vmul.f32 %v768_v12, %v412_v27 }
  0xb3   : > { %v445_v42 = vadd.f32 %v769_v16, %v433_v32  ;;  %v447_v44 = vadd.f32 %v769_v16, %v435_v33 }
  0xb4   : > { %v442_v38 = vadd.f32 %v769_v16, %v430_v28  ;;  %v444_v39 = vadd.f32 %v769_v16, %v432_v30 }
  0xb5   : > { %v469_v58 = vadd.f32 %v688_v43, %v445_v42  ;;  %v471_v59 = vadd.f32 %v692_v45, %v447_v44 }
  0xb6   : > { %v466_v40 = vadd.f32 %v681_v29, %v442_v38  ;;  %v468_v41 = vadd.f32 %v685_v31, %v444_v39 }
  0xb7   : > { %v477_v0 = vmax.f32 %v469_v58, 0.0  ;;  %v479_v1 = vmax.f32 %v471_v59, 0.0 }
  0xb8   : > { %v474_v48 = vmax.f32 %v466_v40, 0.0  ;;  %v476_v49 = vmax.f32 %v468_v41, 0.0  ;;  %v417_v50 = vpop.f32.mrf.mxu2  ;;  %v422_v51 = vpop.f32.mrf.mxu3 }
  0xb9   : > { %v434_v52 = vmul.f32 %v768_v12, %v417_v50  ;;  %v436_v54 = vmul.f32 %v768_v12, %v422_v51 }
  0xba   : > { %v697_v56 = vpack.c.bf16 %v474_v48, %v473_v46  ;;  %v702_v57 = vpack.c.bf16 %v476_v49, %v475_v47 }
  0xbb   : > { %v446_v60 = vadd.f32 %v769_v16, %v434_v52  ;;  %v448_v61 = vadd.f32 %v769_v16, %v436_v54 }
  0xbc   : > { %698 = vst [vmem:[%s298_s29] sm:$0xff] %v697_v56  }
  0xbd   : > { %717 = vst [vmem:[%s298_s29 + $0x8] sm:$0xff] %v702_v57   ;;  %v470_v62 = vadd.f32 %v689_v53, %v446_v60  ;;  %v472_v63 = vadd.f32 %v693_v55, %v448_v61 }
  0xbf   : > { %v478_v2 = vmax.f32 %v470_v62, 0.0  ;;  %v480_v3 = vmax.f32 %v472_v63, 0.0 }
  0xc1   : > { %v707_v4 = vpack.c.bf16 %v478_v2, %v477_v0  ;;  %v712_v5 = vpack.c.bf16 %v480_v3, %v479_v1 }
  0xc3   : > { %718 = vst [vmem:[%s298_s29 + $0x10] sm:$0xff] %v707_v4  }
  0xc4   : > { %719 = vst [vmem:[%s298_s29 + $0x18] sm:$0xff] %v712_v5  }
  0xc5 PF: > { %s15_s20 = sadd.s32 1, %s792_s20   ;;  %s905_s18 = smov %s788_s19 }
  0xc6   : > { %p12_p5 = scmp.ge.s32.totalorder %s15_s20, 4   ;;  %s906_s19 = smov %s908_s21 }
  0xc8   :  { %14 = sbr.rel (!%p12_p5) target bundleno = 2 (0x2), region = 73 }

// kernel: encoder_cnn_forward.32
= control target key start
LH: loop header
LB: loop body
LE: loop exit
PB: predicated region body
PF: predicated region fallthrough
CT: control target
= control target key end

     0   :  { %s768_s18 = smov 0   ;;  %s770_s19 = smov 0   ;;  %s914_s0 = inlined_call_operand.vmem [shape: bf16[2,16,128], index: 0, kind: input, shape index: {}]   ;;  %s915_s1 = inlined_call_operand.vmem [shape: bf16[128,256], index: 1, kind: input, shape index: {}]   ;;  %s916_s2 = inlined_call_operand.vmem [shape: f32[1,256], index: 2, kind: input, shape index: {}]   ;;  %s917_s3 = inlined_call_operand.vmem [shape: f32[1,256], index: 3, kind: input, shape index: {}]   ;;  %s918_s4 = inlined_call_operand.vmem [shape: bf16[2,16,256], index: 4, kind: input, shape index: {}]   ;;  %s919_s5 = inlined_call_operand.vmem [shape: bf16[2,16,256], index: 5, kind: output, shape index: {}]  }
   0x1   :  { %s772_s20 = smov 0  }
   0x2 LB: > { %s27_s21 = sadd.s32 1, %s732_s19  ;;  %p593_p0 = scmp.ge.s32.totalorder %s736_s20, 1  ;;  %s736_s20 = sphi %s772_s20, %s15_s20   ;;  %s732_s19 = sphi %s770_s19, %s921_s19   ;;  %s728_s18 = sphi %s768_s18, %s920_s18  }
   0x3   : > { %p29_p1 = scmp.ge.s32.totalorder %s27_s21, 2  ;;  %p226_p2 = scmp.lt.s32.totalorder %s736_s20, 3 }
   0x5   : > { %s923_s21 = smov (%p29_p1, %s27_s21), 0  ;;  %p227_p3 = pnand %p593_p0, %p226_p2 }
   0x6   : > { %p274_p4 = scmp.lt.s32.totalorder (!%p227_p3), %s728_s18, 1 }
   0x7   : > { %230 = sbr.rel (%p227_p3) target bundleno = 192 (0xc0), region = 40 }
   0xc   : > { %v662_v0 = vld [vmem:[%s915_s1 + $0x70] sm:$0xf]  ;;  %v689_v1 = vld [vmem:[%s915_s1 + $0x74] sm:$0xf0]  ;;  %v688_v2 = vld [vmem:[%s915_s1 + $0x74] sm:$0xf] }
   0xd   : > { %v663_v3 = vor.u32 %v689_v1, %v662_v0  ;;  %v664_v4 = vld [vmem:[%s915_s1 + $0x78] sm:$0xf0]  ;;  %v654_v5 = vld [vmem:[%s915_s1 + $0x60] sm:$0xf]  ;;  %v687_v6 = vld [vmem:[%s915_s1 + $0x64] sm:$0xf0] }
   0xe   : > { %v667_v7 = vor.u32 %v688_v2, %v664_v4  ;;  %v686_v8 = vld [vmem:[%s915_s1 + $0x64] sm:$0xf]  ;;  %v656_v9 = vld [vmem:[%s915_s1 + $0x68] sm:$0xf0]  ;;  %v655_v10 = vor.u32 %v687_v6, %v654_v5  ;;  %v646_v12 = vld [vmem:[%s915_s1 + $0x50] sm:$0xf] }
   0xf   : > { %409 = vmatpush.bf16.msra.mxu0 %v663_v3  ;;  %v659_v11 = vor.u32 %v686_v8, %v656_v9  ;;  %v685_v13 = vld [vmem:[%s915_s1 + $0x54] sm:$0xf0]  ;;  %v684_v14 = vld [vmem:[%s915_s1 + $0x54] sm:$0xf]  ;;  %v648_v15 = vld [vmem:[%s915_s1 + $0x58] sm:$0xf0] }
  0x10   : > { %423 = vmatpush.bf16.msra.mxu1 %v667_v7  ;;  %v647_v16 = vor.u32 %v685_v13, %v646_v12  ;;  %v651_v17 = vor.u32 %v684_v14, %v648_v15  ;;  %v638_v18 = vld [vmem:[%s915_s1 + $0x40] sm:$0xf]  ;;  %v683_v19 = vld [vmem:[%s915_s1 + $0x44] sm:$0xf0]  ;;  %v682_v20 = vld [vmem:[%s915_s1 + $0x44] sm:$0xf] }
  0x11   : > { %v640_v21 = vld [vmem:[%s915_s1 + $0x48] sm:$0xf0]  ;;  %v639_v22 = vor.u32 %v683_v19, %v638_v18  ;;  %v630_v24 = vld [vmem:[%s915_s1 + $0x30] sm:$0xf]  ;;  %v681_v25 = vld [vmem:[%s915_s1 + $0x34] sm:$0xf0] }
  0x12   : > { %v643_v23 = vor.u32 %v682_v20, %v640_v21  ;;  %v680_v26 = vld [vmem:[%s915_s1 + $0x34] sm:$0xf]  ;;  %v632_v27 = vld [vmem:[%s915_s1 + $0x38] sm:$0xf0]  ;;  %v631_v28 = vor.u32 %v681_v25, %v630_v24  ;;  %v622_v30 = vld [vmem:[%s915_s1 + $0x20] sm:$0xf] }
  0x13   : > { %410 = vmatpush.bf16.msra.mxu0 %v655_v10  ;;  %v635_v29 = vor.u32 %v680_v26, %v632_v27  ;;  %v679_v31 = vld [vmem:[%s915_s1 + $0x24] sm:$0xf0]  ;;  %v678_v32 = vld [vmem:[%s915_s1 + $0x24] sm:$0xf]  ;;  %v624_v33 = vld [vmem:[%s915_s1 + $0x28] sm:$0xf0] }
  0x14   : > { %424 = vmatpush.bf16.msra.mxu1 %v659_v11  ;;  %v623_v34 = vor.u32 %v679_v31, %v622_v30  ;;  %v627_v35 = vor.u32 %v678_v32, %v624_v33  ;;  %v614_v36 = vld [vmem:[%s915_s1 + $0x10] sm:$0xf]  ;;  %v677_v37 = vld [vmem:[%s915_s1 + $0x14] sm:$0xf0]  ;;  %s925_s18 = smov (!%p274_p4, %s728_s18), 1 }
  0x15   : > { %v676_v38 = vld [vmem:[%s915_s1 + $0x14] sm:$0xf]  ;;  %v616_v39 = vld [vmem:[%s915_s1 + $0x18] sm:$0xf0]  ;;  %v615_v40 = vor.u32 %v677_v37, %v614_v36  ;;  %v606_v42 = vld [vmem:[%s915_s1] sm:$0xf] }
  0x16   : > { %v619_v41 = vor.u32 %v676_v38, %v616_v39  ;;  %v675_v43 = vld [vmem:[%s915_s1 + $0x4] sm:$0xf0]  ;;  %s670_s15 = sshll.u32 %s925_s18, 3  ;;  %v674_v44 = vld [vmem:[%s915_s1 + $0x4] sm:$0xf]  ;;  %s671_s27 = sshll.u32 %s925_s18, 4 }
  0x17   : > { %411 = vmatpush.bf16.msra.mxu0 %v647_v16  ;;  %v608_v45 = vld [vmem:[%s915_s1 + $0x8] sm:$0xf0]  ;;  %v607_v46 = vor.u32 %v675_v43, %v606_v42  ;;  %s281_s26 = scalar_lea.vmem %s914_s0, %s670_s15  ;;  %v437_v49 = vld [vmem:[%s916_s2] sm:$0x3]  ;;  %s292_s7 = scalar_lea.vmem %s918_s4, %s671_s27 }
  0x18   : > { %425 = vmatpush.bf16.msra.mxu1 %v651_v17  ;;  %v611_v47 = vor.u32 %v674_v44, %v608_v45  ;;  %v673_v48 = vld [vmem:[%s281_s26] sm:$0xff]  ;;  %v439_v51 = vperm.slane %v437_v49, 0  ;;  %v440_v53 = vperm.slane %v437_v49, 1  ;;  %v458_v2 = vld [vmem:[%s292_s7 + $0x8] sm:$0xff]  ;;  %s303_s11 = scalar_lea.vmem %s919_s5, %s671_s27 }
  0x19   : > { %v447_v50 = vld [vmem:[%s917_s3] sm:$0x3]  ;;  %v461_v7 = vunpack.c.l.bf16 %v458_v2  ;;  %v462_v11 = vunpack.c.h.bf16 %v458_v2 }
  0x1a   : > { %v457_v52 = vld [vmem:[%s292_s7] sm:$0xff]  ;;  %v449_v54 = vperm.slane %v447_v50, 0  ;;  %v450_v56 = vperm.slane %v447_v50, 1 }
  0x1b   : > { %412 = vmatpush.bf16.msra.mxu0 %v639_v22  ;;  %v459_v58 = vunpack.c.l.bf16 %v457_v52  ;;  %v460_v61 = vunpack.c.h.bf16 %v457_v52 }
  0x1c   : > { %426 = vmatpush.bf16.msra.mxu1 %v643_v23 }
  0x1f   : > { %413 = vmatpush.bf16.msra.mxu0 %v631_v28 }
  0x20   : > { %427 = vmatpush.bf16.msra.mxu1 %v635_v29 }
  0x23   : > { %414 = vmatpush.bf16.msra.mxu0 %v623_v34 }
  0x24   : > { %428 = vmatpush.bf16.msra.mxu1 %v627_v35 }
  0x27   : > { %415 = vmatpush.bf16.msra.mxu0 %v615_v40 }
  0x28   : > { %429 = vmatpush.bf16.msra.mxu1 %v619_v41 }
  0x2b   : > { %416 = vmatpush.bf16.msra.mxu0 %v607_v46 }
  0x2c   : > { %430 = vmatpush.bf16.msra.mxu1 %v611_v47 }
  0x2e   : > { %417 = vmatmul.bf16.vlgmr.msra.gmra.mxu0 %v673_v48 }
  0x2f   : > { %431 = vmatmul.bf16.vlgmr.msra.gmra.mxu1 %v673_v48 }
  0xab   : > { %v418_v55 = vpop.f32.mrf.mxu0 }
  0xac   : > { %v443_v57 = vmul.f32 %v439_v51, %v418_v55  ;;  %v432_v59 = vpop.f32.mrf.mxu1 }
  0xad   : > { %v444_v60 = vmul.f32 %v440_v53, %v432_v59 }
  0xae   : > { %v453_v62 = vadd.f32 %v449_v54, %v443_v57 }
  0xaf   : > { %v454_v63 = vadd.f32 %v450_v56, %v444_v60 }
  0xb0   : > { %v463_v0 = vadd.f32 %v459_v58, %v453_v62 }
  0xb1   : > { %v464_v1 = vadd.f32 %v460_v61, %v454_v63 }
  0xb2   : > { %v467_v3 = vmax.f32 %v463_v0, 0.0 }
  0xb3   : > { %v468_v4 = vmax.f32 %v464_v1, 0.0  ;;  %v420_v5 = vpop.f32.mrf.mxu0 }
  0xb4   : > { %v445_v6 = vmul.f32 %v439_v51, %v420_v5  ;;  %v434_v8 = vpop.f32.mrf.mxu1 }
  0xb5   : > { %v471_v9 = vpack.c.bf16 %v468_v4, %v467_v3  ;;  %v446_v10 = vmul.f32 %v440_v53, %v434_v8 }
  0xb6   : > { %v455_v12 = vadd.f32 %v449_v54, %v445_v6 }
  0xb7   : > { %473 = vst [vmem:[%s303_s11] sm:$0xff] %v471_v9  ;;  %v456_v13 = vadd.f32 %v450_v56, %v446_v10 }
  0xb8   : > { %v465_v14 = vadd.f32 %v461_v7, %v455_v12 }
  0xb9   : > { %v466_v15 = vadd.f32 %v462_v11, %v456_v13 }
  0xba   : > { %v469_v16 = vmax.f32 %v465_v14, 0.0 }
  0xbb   : > { %v470_v17 = vmax.f32 %v466_v15, 0.0 }
  0xbd   : > { %v472_v18 = vpack.c.bf16 %v470_v17, %v469_v16 }
  0xbf   : > { %474 = vst [vmem:[%s303_s11 + $0x8] sm:$0xff] %v472_v18 }
  0xc0 PF: > { %s15_s20 = sadd.s32 1, %s736_s20   ;;  %s920_s18 = smov %s732_s19 }
  0xc1   : > { %p12_p5 = scmp.ge.s32.totalorder %s15_s20, 4   ;;  %s921_s19 = smov %s923_s21 }
  0xc3   :  { %14 = sbr.rel (!%p12_p5) target bundleno = 2 (0x2), region = 73 }

// kernel: encoder_cnn_forward.30
= control target key start
LH: loop header
LB: loop body
LE: loop exit
PB: predicated region body
PF: predicated region fallthrough
CT: control target
= control target key end

     0   :  { %s1087_s15 = smov 0   ;;  %s1089_s16 = smov 0   ;;  %s1266_s0 = inlined_call_operand.vmem [shape: bf16[2,16,640], index: 0, kind: input, shape index: {}]   ;;  %s1267_s1 = inlined_call_operand.vmem [shape: bf16[640,128], index: 1, kind: input, shape index: {}]   ;;  %s1268_s2 = inlined_call_operand.vmem [shape: f32[1,128], index: 2, kind: input, shape index: {}]   ;;  %s1269_s3 = inlined_call_operand.vmem [shape: f32[1,128], index: 3, kind: input, shape index: {}]   ;;  %s1270_s4 = inlined_call_operand.vmem [shape: bf16[2,16,128], index: 4, kind: output, shape index: {}]  }
   0x1   :  { %s1091_s17 = smov 0  }
   0x2 LB: > { %s26_s18 = sadd.s32 1, %s1056_s16  ;;  %p774_p0 = scmp.ge.s32.totalorder %s1060_s17, 1  ;;  %s1060_s17 = sphi %s1091_s17, %s14_s17   ;;  %s1056_s16 = sphi %s1089_s16, %s1272_s16   ;;  %s1052_s15 = sphi %s1087_s15, %s1271_s15  }
   0x3   : > { %p28_p1 = scmp.ge.s32.totalorder %s26_s18, 2  ;;  %p184_p2 = scmp.lt.s32.totalorder %s1060_s17, 3 }
   0x5   : > { %s1274_s18 = smov (%p28_p1, %s26_s18), 0  ;;  %p185_p3 = pnand %p774_p0, %p184_p2 }
   0x6   : > { %p220_p4 = scmp.lt.s32.totalorder (!%p185_p3), %s1052_s15, 1 }
   0x7   : > { %188 = sbr.rel (%p185_p3) target bundleno = 221 (0xdd), region = 36 }
   0xc   : > { %v973_v0 = vld [vmem:[%s1267_s1 + $0x38] sm:$0xff]  ;;  %v972_v4 = vld [vmem:[%s1267_s1 + $0x30] sm:$0xff]  ;;  %v971_v8 = vld [vmem:[%s1267_s1 + $0x28] sm:$0xff]  ;;  %s1276_s15 = smov (!%p220_p4, %s1052_s15), 1 }
   0xd   : > { %v989_v1 = vld [vmem:[%s1267_s1 + $0xb8] sm:$0xff]  ;;  %592 = vmatpush.bf16.msra.mxu0 %v973_v0  ;;  %v988_v5 = vld [vmem:[%s1267_s1 + $0xb0] sm:$0xff]  ;;  %v987_v9 = vld [vmem:[%s1267_s1 + $0xa8] sm:$0xff]  ;;  %s1011_s19 = smul.u32 40, %s1276_s15 }
   0xe   : > { %v997_v2 = vld [vmem:[%s1267_s1 + $0xf8] sm:$0xff]  ;;  %620 = vmatpush.bf16.msra.mxu2 %v989_v1  ;;  %v996_v6 = vld [vmem:[%s1267_s1 + $0xf0] sm:$0xff]  ;;  %v995_v10 = vld [vmem:[%s1267_s1 + $0xe8] sm:$0xff] }
   0xf   : > { %v981_v3 = vld [vmem:[%s1267_s1 + $0x78] sm:$0xff]  ;;  %634 = vmatpush.bf16.msra.mxu3 %v997_v2  ;;  %v980_v7 = vld [vmem:[%s1267_s1 + $0x70] sm:$0xff]  ;;  %v979_v11 = vld [vmem:[%s1267_s1 + $0x68] sm:$0xff]  ;;  %s1193_s30 = scalar_lea.vmem %s1266_s0, %s1011_s19  ;;  %s960_s19 = sshll.u32 %s1276_s15, 3 }
  0x10   : > { %606 = vmatpush.bf16.msra.mxu1 %v981_v3  ;;  %v970_v12 = vld [vmem:[%s1267_s1 + $0x20] sm:$0xff]  ;;  %v969_v16 = vld [vmem:[%s1267_s1 + $0x18] sm:$0xff]  ;;  %v968_v20 = vld [vmem:[%s1267_s1 + $0x10] sm:$0xff]  ;;  %s238_s22 = scalar_lea.vmem %s1270_s4, %s960_s19 }
  0x11   : > { %593 = vmatpush.bf16.msra.mxu0 %v972_v4  ;;  %v986_v13 = vld [vmem:[%s1267_s1 + $0xa0] sm:$0xff]  ;;  %v985_v17 = vld [vmem:[%s1267_s1 + $0x98] sm:$0xff]  ;;  %v984_v21 = vld [vmem:[%s1267_s1 + $0x90] sm:$0xff] }
  0x12   : > { %621 = vmatpush.bf16.msra.mxu2 %v988_v5  ;;  %v994_v14 = vld [vmem:[%s1267_s1 + $0xe0] sm:$0xff]  ;;  %v993_v18 = vld [vmem:[%s1267_s1 + $0xd8] sm:$0xff]  ;;  %v992_v22 = vld [vmem:[%s1267_s1 + $0xd0] sm:$0xff] }
  0x13   : > { %635 = vmatpush.bf16.msra.mxu3 %v996_v6  ;;  %v978_v15 = vld [vmem:[%s1267_s1 + $0x60] sm:$0xff]  ;;  %v977_v19 = vld [vmem:[%s1267_s1 + $0x58] sm:$0xff]  ;;  %v976_v23 = vld [vmem:[%s1267_s1 + $0x50] sm:$0xff] }
  0x14   : > { %607 = vmatpush.bf16.msra.mxu1 %v980_v7  ;;  %v967_v24 = vld [vmem:[%s1267_s1 + $0x8] sm:$0xff]  ;;  %v966_v28 = vld [vmem:[%s1267_s1] sm:$0xff]  ;;  %v1005_v30 = vld [vmem:[%s1267_s1 + $0x138] sm:$0xff] }
  0x15   : > { %594 = vmatpush.bf16.msra.mxu0 %v971_v8  ;;  %v983_v25 = vld [vmem:[%s1267_s1 + $0x88] sm:$0xff]  ;;  %v982_v29 = vld [vmem:[%s1267_s1 + $0x80] sm:$0xff]  ;;  %v964_v32 = vld [vmem:[%s1193_s30 + $0x18] sm:$0xf0] }
  0x16   : > { %622 = vmatpush.bf16.msra.mxu2 %v987_v9  ;;  %v991_v26 = vld [vmem:[%s1267_s1 + $0xc8] sm:$0xff]  ;;  %v780_v33 = vld [vmem:[%s1193_s30] sm:$0xf]  ;;  %v963_v34 = vld [vmem:[%s1193_s30 + $0x10] sm:$0xf0] }
  0x17   : > { %636 = vmatpush.bf16.msra.mxu3 %v995_v10  ;;  %v975_v27 = vld [vmem:[%s1267_s1 + $0x48] sm:$0xff]  ;;  %v990_v35 = vld [vmem:[%s1267_s1 + $0xc0] sm:$0xff]  ;;  %v782_v40 = vld [vmem:[%s1193_s30 + $0x14] sm:$0xf0]  ;;  %v781_v42 = vor.u32 %v963_v34, %v780_v33 }
  0x18   : > { %608 = vmatpush.bf16.msra.mxu1 %v979_v11  ;;  %v788_v31 = vld [vmem:[%s1193_s30 + $0x8] sm:$0xf]  ;;  %v962_v36 = vld [vmem:[%s1193_s30 + $0xc] sm:$0xf]  ;;  %v790_v37 = vld [vmem:[%s1193_s30 + $0x1c] sm:$0xf0] }
  0x19   : > { %595 = vmatpush.bf16.msra.mxu0 %v970_v12  ;;  %v974_v38 = vld [vmem:[%s1267_s1 + $0x40] sm:$0xff]  ;;  %v789_v41 = vor.u32 %v964_v32, %v788_v31  ;;  %v793_v43 = vor.u32 %v962_v36, %v790_v37  ;;  %v1004_v44 = vld [vmem:[%s1267_s1 + $0x130] sm:$0xff]  ;;  %v1003_v46 = vld [vmem:[%s1267_s1 + $0x128] sm:$0xff] }
  0x1a   : > { %623 = vmatpush.bf16.msra.mxu2 %v986_v13  ;;  %v961_v39 = vld [vmem:[%s1193_s30 + $0x4] sm:$0xf]  ;;  %v1001_v48 = vld [vmem:[%s1267_s1 + $0x118] sm:$0xff]  ;;  %v1000_v49 = vld [vmem:[%s1267_s1 + $0x110] sm:$0xff] }
  0x1b   : > { %637 = vmatpush.bf16.msra.mxu3 %v994_v14  ;;  %v785_v45 = vor.u32 %v961_v39, %v782_v40  ;;  %v1002_v47 = vld [vmem:[%s1267_s1 + $0x120] sm:$0xff]  ;;  %v999_v50 = vld [vmem:[%s1267_s1 + $0x108] sm:$0xff]  ;;  %v796_v52 = vld [vmem:[%s1193_s30 + $0x10] sm:$0xf] }
  0x1c   : > { %609 = vmatpush.bf16.msra.mxu1 %v978_v15  ;;  %v998_v51 = vld [vmem:[%s1267_s1 + $0x100] sm:$0xff] }
  0x1d   : > { %596 = vmatpush.bf16.msra.mxu0 %v969_v16  ;;  %v965_v53 = vld [vmem:[%s1193_s30 + $0x20] sm:$0xf0]  ;;  %v1036_v5 = vld [vmem:[%s1268_s2] ss:$0 sm:$0xff] }
  0x1e   : > { %624 = vmatpush.bf16.msra.mxu2 %v985_v17  ;;  %v797_v54 = vor.u32 %v965_v53, %v796_v52  ;;  %v1037_v9 = vld [vmem:[%s1269_s3] ss:$0 sm:$0xff] }
  0x1f   : > { %638 = vmatpush.bf16.msra.mxu3 %v993_v18 }
  0x20   : > { %610 = vmatpush.bf16.msra.mxu1 %v977_v19 }
  0x21   : > { %597 = vmatpush.bf16.msra.mxu0 %v968_v20 }
  0x22   : > { %625 = vmatpush.bf16.msra.mxu2 %v984_v21 }
  0x23   : > { %639 = vmatpush.bf16.msra.mxu3 %v992_v22 }
  0x24   : > { %611 = vmatpush.bf16.msra.mxu1 %v976_v23 }
  0x25   : > { %598 = vmatpush.bf16.msra.mxu0 %v967_v24 }
  0x26   : > { %626 = vmatpush.bf16.msra.mxu2 %v983_v25 }
  0x27   : > { %640 = vmatpush.bf16.msra.mxu3 %v991_v26 }
  0x28   : > { %612 = vmatpush.bf16.msra.mxu1 %v975_v27 }
  0x29   : > { %599 = vmatpush.bf16.msra.mxu0 %v966_v28 }
  0x2a   : > { %627 = vmatpush.bf16.msra.mxu2 %v982_v29 }
  0x2b   : > { %641 = vmatpush.bf16.msra.mxu3 %v990_v35 }
  0x2c   : > { %613 = vmatpush.bf16.msra.mxu1 %v974_v38  ;;  %600 = vmatmul.bf16.vlgmr.msra.gmra.mxu0 %v781_v42 }
  0x2d   : > { %648 = vmatpush.bf16.msrb.mxu0 %v1005_v30  ;;  %628 = vmatmul.bf16.vlgmr.msra.gmra.mxu2 %v789_v41 }
  0x2e   : > { %642 = vmatmul.bf16.vlgmr.msra.gmra.mxu3 %v793_v43 }
  0x2f   : > { %614 = vmatmul.bf16.vlgmr.msra.gmra.mxu1 %v785_v45 }
  0x31   : > { %649 = vmatpush.bf16.msrb.mxu0 %v1004_v44 }
  0x35   : > { %650 = vmatpush.bf16.msrb.mxu0 %v1003_v46 }
  0x39   : > { %651 = vmatpush.bf16.msrb.mxu0 %v1002_v47 }
  0x3d   : > { %652 = vmatpush.bf16.msrb.mxu0 %v1001_v48 }
  0x41   : > { %653 = vmatpush.bf16.msrb.mxu0 %v1000_v49 }
  0x45   : > { %654 = vmatpush.bf16.msrb.mxu0 %v999_v50 }
  0x49   : > { %655 = vmatpush.bf16.msrb.mxu0 %v998_v51 }
  0x4c   : > { %656 = vmatmul.bf16.vlgmr.msrb.gmra.mxu0 %v797_v54 }
  0xa9   : > { %v601_v55 = vpop.f32.mrf.mxu0 }
  0xac   : > { %v615_v56 = vpop.f32.mrf.mxu1 }
  0xad   : > { %v616_v59 = vadd.f32 %v615_v56, %v601_v55 }
  0xb0   : > { %v629_v57 = vpop.f32.mrf.mxu2 }
  0xb1   : > { %v603_v58 = vpop.f32.mrf.mxu0  ;;  %v643_v60 = vpop.f32.mrf.mxu3  ;;  %v630_v62 = vadd.f32 %v629_v57, %v616_v59 }
  0xb3   : > { %v644_v2 = vadd.f32 %v643_v60, %v630_v62 }
  0xb4   : > { %v617_v61 = vpop.f32.mrf.mxu1 }
  0xb5   : > { %v618_v63 = vadd.f32 %v617_v61, %v603_v58 }
  0xb8   : > { %v631_v0 = vpop.f32.mrf.mxu2 }
  0xb9   : > { %v632_v3 = vadd.f32 %v631_v0, %v618_v63  ;;  %v645_v6 = vpop.f32.mrf.mxu3 }
  0xbb   : > { %v646_v7 = vadd.f32 %v645_v6, %v632_v3 }
  0xc9   : > { %v657_v1 = vpop.f32.mrf.mxu0 }
  0xca   : > { %v658_v4 = vadd.f32 %v657_v1, %v644_v2 }
  0xcc   : > { %v666_v8 = vmul.f32 %v1036_v5, %v658_v4 }
  0xce   : > { %v672_v12 = vadd.f32 %v1037_v9, %v666_v8 }
  0xd0   : > { %v674_v15 = vmax.f32 %v672_v12, 0.0 }
  0xd1   : > { %v659_v10 = vpop.f32.mrf.mxu0 }
  0xd2   : > { %v660_v11 = vadd.f32 %v659_v10, %v646_v7 }
  0xd4   : > { %v667_v13 = vmul.f32 %v1036_v5, %v660_v11 }
  0xd6   : > { %v673_v14 = vadd.f32 %v1037_v9, %v667_v13 }
  0xd8   : > { %v675_v16 = vmax.f32 %v673_v14, 0.0 }
  0xda   : > { %v1009_v17 = vpack.c.bf16 %v675_v16, %v674_v15 }
  0xdc   : > { %1010 = vst [vmem:[%s238_s22] sm:$0xff] %v1009_v17  }
  0xdd PF: > { %s14_s17 = sadd.s32 1, %s1060_s17   ;;  %s1271_s15 = smov %s1056_s16 }
  0xde   : > { %p11_p5 = scmp.ge.s32.totalorder %s14_s17, 4   ;;  %s1272_s16 = smov %s1274_s18 }
  0xe0   :  { %13 = sbr.rel (!%p11_p5) target bundleno = 2 (0x2), region = 66 }

// kernel: encoder_cnn_forward.33
= control target key start
LH: loop header
LB: loop body
LE: loop exit
PB: predicated region body
PF: predicated region fallthrough
CT: control target
= control target key end

     0   :  { %s699_s15 = smov 0   ;;  %s701_s16 = smov 0   ;;  %s790_s0 = inlined_call_operand.vmem [shape: bf16[2,16,256], index: 0, kind: input, shape index: {}]   ;;  %s791_s1 = inlined_call_operand.vmem [shape: bf16[256,128], index: 1, kind: input, shape index: {}]   ;;  %s792_s2 = inlined_call_operand.vmem [shape: f32[1,128], index: 2, kind: input, shape index: {}]   ;;  %s793_s3 = inlined_call_operand.vmem [shape: f32[1,128], index: 3, kind: input, shape index: {}]   ;;  %s794_s4 = inlined_call_operand.vmem [shape: bf16[2,16,128], index: 4, kind: output, shape index: {}]  }
   0x1   :  { %s703_s17 = smov 0  }
   0x2 LB: > { %s26_s18 = sadd.s32 1, %s668_s16  ;;  %p520_p0 = scmp.ge.s32.totalorder %s672_s17, 1  ;;  %s672_s17 = sphi %s703_s17, %s14_s17   ;;  %s668_s16 = sphi %s701_s16, %s796_s16   ;;  %s664_s15 = sphi %s699_s15, %s795_s15  }
   0x3   : > { %p28_p1 = scmp.ge.s32.totalorder %s26_s18, 2  ;;  %p184_p2 = scmp.lt.s32.totalorder %s672_s17, 3 }
   0x5   : > { %s798_s18 = smov (%p28_p1, %s26_s18), 0  ;;  %p185_p3 = pnand %p520_p0, %p184_p2 }
   0x6   : > { %p220_p4 = scmp.lt.s32.totalorder (!%p185_p3), %s664_s15, 1 }
   0x7   : > { %188 = sbr.rel (%p185_p3) target bundleno = 190 (0xbe), region = 36 }
   0xc   : > { %v610_v0 = vld [vmem:[%s791_s1 + $0x38] sm:$0xff]  ;;  %v609_v2 = vld [vmem:[%s791_s1 + $0x30] sm:$0xff]  ;;  %v608_v4 = vld [vmem:[%s791_s1 + $0x28] sm:$0xff]  ;;  %s800_s15 = smov (!%p220_p4, %s664_s15), 1 }
   0xd   : > { %v618_v1 = vld [vmem:[%s791_s1 + $0x78] sm:$0xff]  ;;  %380 = vmatpush.bf16.msra.mxu0 %v610_v0  ;;  %v617_v3 = vld [vmem:[%s791_s1 + $0x70] sm:$0xff]  ;;  %v616_v5 = vld [vmem:[%s791_s1 + $0x68] sm:$0xff]  ;;  %s599_s21 = sshll.u32 %s800_s15, 4  ;;  %s600_s11 = sshll.u32 %s800_s15, 3 }
   0xe   : > { %394 = vmatpush.bf16.msra.mxu1 %v618_v1  ;;  %v607_v6 = vld [vmem:[%s791_s1 + $0x20] sm:$0xff]  ;;  %v606_v8 = vld [vmem:[%s791_s1 + $0x18] sm:$0xff]  ;;  %v605_v10 = vld [vmem:[%s791_s1 + $0x10] sm:$0xff]  ;;  %s228_s28 = scalar_lea.vmem %s790_s0, %s599_s21  ;;  %s238_s14 = scalar_lea.vmem %s794_s4, %s600_s11 }
   0xf   : > { %v615_v7 = vld [vmem:[%s791_s1 + $0x60] sm:$0xff]  ;;  %v614_v9 = vld [vmem:[%s791_s1 + $0x58] sm:$0xff]  ;;  %v613_v11 = vld [vmem:[%s791_s1 + $0x50] sm:$0xff] }
  0x10   : > { %v604_v12 = vld [vmem:[%s791_s1 + $0x8] sm:$0xff]  ;;  %v603_v14 = vld [vmem:[%s791_s1] sm:$0xff] }
  0x11   : > { %381 = vmatpush.bf16.msra.mxu0 %v609_v2  ;;  %v612_v13 = vld [vmem:[%s791_s1 + $0x48] sm:$0xff]  ;;  %v611_v15 = vld [vmem:[%s791_s1 + $0x40] sm:$0xff] }
  0x12   : > { %395 = vmatpush.bf16.msra.mxu1 %v617_v3  ;;  %v527_v16 = vld [vmem:[%s228_s28] sm:$0xf]  ;;  %v602_v17 = vld [vmem:[%s228_s28 + $0x4] sm:$0xf0]  ;;  %v601_v18 = vld [vmem:[%s228_s28 + $0x4] sm:$0xf] }
  0x13   : > { %v529_v19 = vld [vmem:[%s228_s28 + $0x8] sm:$0xf0]  ;;  %v528_v20 = vor.u32 %v602_v17, %v527_v16  ;;  %v648_v25 = vld [vmem:[%s792_s2] ss:$0 sm:$0xff] }
  0x14   : > { %v532_v21 = vor.u32 %v601_v18, %v529_v19  ;;  %v649_v27 = vld [vmem:[%s793_s3] ss:$0 sm:$0xff] }
  0x15   : > { %382 = vmatpush.bf16.msra.mxu0 %v608_v4 }
  0x16   : > { %396 = vmatpush.bf16.msra.mxu1 %v616_v5 }
  0x19   : > { %383 = vmatpush.bf16.msra.mxu0 %v607_v6 }
  0x1a   : > { %397 = vmatpush.bf16.msra.mxu1 %v615_v7 }
  0x1d   : > { %384 = vmatpush.bf16.msra.mxu0 %v606_v8 }
  0x1e   : > { %398 = vmatpush.bf16.msra.mxu1 %v614_v9 }
  0x21   : > { %385 = vmatpush.bf16.msra.mxu0 %v605_v10 }
  0x22   : > { %399 = vmatpush.bf16.msra.mxu1 %v613_v11 }
  0x25   : > { %386 = vmatpush.bf16.msra.mxu0 %v604_v12 }
  0x26   : > { %400 = vmatpush.bf16.msra.mxu1 %v612_v13 }
  0x29   : > { %387 = vmatpush.bf16.msra.mxu0 %v603_v14 }
  0x2a   : > { %401 = vmatpush.bf16.msra.mxu1 %v611_v15 }
  0x2c   : > { %388 = vmatmul.bf16.vlgmr.msra.gmra.mxu0 %v528_v20 }
  0x2d   : > { %402 = vmatmul.bf16.vlgmr.msra.gmra.mxu1 %v532_v21 }
  0xa9   : > { %v389_v22 = vpop.f32.mrf.mxu0 }
  0xaa   : > { %v403_v23 = vpop.f32.mrf.mxu1 }
  0xab   : > { %v404_v24 = vadd.f32 %v403_v23, %v389_v22 }
  0xad   : > { %v412_v26 = vmul.f32 %v648_v25, %v404_v24 }
  0xaf   : > { %v418_v31 = vadd.f32 %v649_v27, %v412_v26 }
  0xb1   : > { %v391_v28 = vpop.f32.mrf.mxu0  ;;  %v420_v34 = vmax.f32 %v418_v31, 0.0 }
  0xb2   : > { %v405_v29 = vpop.f32.mrf.mxu1 }
  0xb3   : > { %v406_v30 = vadd.f32 %v405_v29, %v391_v28 }
  0xb5   : > { %v413_v32 = vmul.f32 %v648_v25, %v406_v30 }
  0xb7   : > { %v419_v33 = vadd.f32 %v649_v27, %v413_v32 }
  0xb9   : > { %v421_v35 = vmax.f32 %v419_v33, 0.0 }
  0xbb   : > { %v622_v36 = vpack.c.bf16 %v421_v35, %v420_v34 }
  0xbd   : > { %623 = vst [vmem:[%s238_s14] sm:$0xff] %v622_v36  }
  0xbe PF: > { %s14_s17 = sadd.s32 1, %s672_s17   ;;  %s795_s15 = smov %s668_s16 }
  0xbf   : > { %p11_p5 = scmp.ge.s32.totalorder %s14_s17, 4   ;;  %s796_s16 = smov %s798_s18 }
  0xc1   :  { %13 = sbr.rel (!%p11_p5) target bundleno = 2 (0x2), region = 66 }

// kernel: encoder_cnn_forward.31
= control target key start
LH: loop header
LB: loop body
LE: loop exit
PB: predicated region body
PF: predicated region fallthrough
CT: control target
= control target key end

     0   :  { %s659_s15 = smov 0   ;;  %s661_s16 = smov 0   ;;  %s802_s0 = inlined_call_operand.vmem [shape: bf16[2,16,128], index: 0, kind: input, shape index: {}]   ;;  %s803_s1 = inlined_call_operand.vmem [shape: bf16[128,256], index: 1, kind: input, shape index: {}]   ;;  %s804_s2 = inlined_call_operand.vmem [shape: f32[1,256], index: 2, kind: input, shape index: {}]   ;;  %s805_s3 = inlined_call_operand.vmem [shape: f32[1,256], index: 3, kind: input, shape index: {}]   ;;  %s806_s4 = inlined_call_operand.vmem [shape: bf16[2,16,256], index: 4, kind: output, shape index: {}]  }
   0x1   :  { %s663_s17 = smov 0  }
   0x2 LB: > { %s26_s18 = sadd.s32 1, %s628_s16  ;;  %p492_p0 = scmp.ge.s32.totalorder %s632_s17, 1  ;;  %s632_s17 = sphi %s663_s17, %s14_s17   ;;  %s628_s16 = sphi %s661_s16, %s808_s16   ;;  %s624_s15 = sphi %s659_s15, %s807_s15  }
   0x3   : > { %p28_p1 = scmp.ge.s32.totalorder %s26_s18, 2  ;;  %p183_p2 = scmp.lt.s32.totalorder %s632_s17, 3 }
   0x5   : > { %s810_s18 = smov (%p28_p1, %s26_s18), 0  ;;  %p184_p3 = pnand %p492_p0, %p183_p2 }
   0x6   : > { %p219_p4 = scmp.lt.s32.totalorder (!%p184_p3), %s624_s15, 1 }
   0x7   : > { %187 = sbr.rel (%p184_p3) target bundleno = 188 (0xbc), region = 36 }
   0xc   : > { %v559_v0 = vld [vmem:[%s803_s1 + $0x70] sm:$0xf]  ;;  %v585_v1 = vld [vmem:[%s803_s1 + $0x74] sm:$0xf0]  ;;  %v584_v2 = vld [vmem:[%s803_s1 + $0x74] sm:$0xf] }
   0xd   : > { %v560_v3 = vor.u32 %v585_v1, %v559_v0  ;;  %v561_v4 = vld [vmem:[%s803_s1 + $0x78] sm:$0xf0]  ;;  %v551_v5 = vld [vmem:[%s803_s1 + $0x60] sm:$0xf]  ;;  %v583_v6 = vld [vmem:[%s803_s1 + $0x64] sm:$0xf0] }
   0xe   : > { %v564_v7 = vor.u32 %v584_v2, %v561_v4  ;;  %v582_v8 = vld [vmem:[%s803_s1 + $0x64] sm:$0xf]  ;;  %v553_v9 = vld [vmem:[%s803_s1 + $0x68] sm:$0xf0]  ;;  %v552_v10 = vor.u32 %v583_v6, %v551_v5  ;;  %v543_v12 = vld [vmem:[%s803_s1 + $0x50] sm:$0xf] }
   0xf   : > { %343 = vmatpush.bf16.msra.mxu0 %v560_v3  ;;  %v556_v11 = vor.u32 %v582_v8, %v553_v9  ;;  %v581_v13 = vld [vmem:[%s803_s1 + $0x54] sm:$0xf0]  ;;  %v580_v14 = vld [vmem:[%s803_s1 + $0x54] sm:$0xf]  ;;  %v545_v15 = vld [vmem:[%s803_s1 + $0x58] sm:$0xf0] }
  0x10   : > { %357 = vmatpush.bf16.msra.mxu1 %v564_v7  ;;  %v544_v16 = vor.u32 %v581_v13, %v543_v12  ;;  %v548_v17 = vor.u32 %v580_v14, %v545_v15  ;;  %v535_v18 = vld [vmem:[%s803_s1 + $0x40] sm:$0xf]  ;;  %v579_v19 = vld [vmem:[%s803_s1 + $0x44] sm:$0xf0]  ;;  %v578_v20 = vld [vmem:[%s803_s1 + $0x44] sm:$0xf] }
  0x11   : > { %v537_v21 = vld [vmem:[%s803_s1 + $0x48] sm:$0xf0]  ;;  %v536_v22 = vor.u32 %v579_v19, %v535_v18  ;;  %v527_v24 = vld [vmem:[%s803_s1 + $0x30] sm:$0xf]  ;;  %v577_v25 = vld [vmem:[%s803_s1 + $0x34] sm:$0xf0] }
  0x12   : > { %v540_v23 = vor.u32 %v578_v20, %v537_v21  ;;  %v576_v26 = vld [vmem:[%s803_s1 + $0x34] sm:$0xf]  ;;  %v529_v27 = vld [vmem:[%s803_s1 + $0x38] sm:$0xf0]  ;;  %v528_v28 = vor.u32 %v577_v25, %v527_v24  ;;  %v519_v30 = vld [vmem:[%s803_s1 + $0x20] sm:$0xf] }
  0x13   : > { %344 = vmatpush.bf16.msra.mxu0 %v552_v10  ;;  %v532_v29 = vor.u32 %v576_v26, %v529_v27  ;;  %v575_v31 = vld [vmem:[%s803_s1 + $0x24] sm:$0xf0]  ;;  %v574_v32 = vld [vmem:[%s803_s1 + $0x24] sm:$0xf]  ;;  %v521_v33 = vld [vmem:[%s803_s1 + $0x28] sm:$0xf0] }
  0x14   : > { %358 = vmatpush.bf16.msra.mxu1 %v556_v11  ;;  %v520_v34 = vor.u32 %v575_v31, %v519_v30  ;;  %v524_v35 = vor.u32 %v574_v32, %v521_v33  ;;  %v511_v36 = vld [vmem:[%s803_s1 + $0x10] sm:$0xf]  ;;  %v573_v37 = vld [vmem:[%s803_s1 + $0x14] sm:$0xf0]  ;;  %s812_s15 = smov (!%p219_p4, %s624_s15), 1 }
  0x15   : > { %v572_v38 = vld [vmem:[%s803_s1 + $0x14] sm:$0xf]  ;;  %v513_v39 = vld [vmem:[%s803_s1 + $0x18] sm:$0xf0]  ;;  %v512_v40 = vor.u32 %v573_v37, %v511_v36  ;;  %v503_v42 = vld [vmem:[%s803_s1] sm:$0xf] }
  0x16   : > { %v516_v41 = vor.u32 %v572_v38, %v513_v39  ;;  %v571_v43 = vld [vmem:[%s803_s1 + $0x4] sm:$0xf0]  ;;  %s567_s9 = sshll.u32 %s812_s15, 3  ;;  %v570_v44 = vld [vmem:[%s803_s1 + $0x4] sm:$0xf]  ;;  %s568_s25 = sshll.u32 %s812_s15, 4 }
  0x17   : > { %345 = vmatpush.bf16.msra.mxu0 %v544_v16  ;;  %v505_v45 = vld [vmem:[%s803_s1 + $0x8] sm:$0xf0]  ;;  %v504_v46 = vor.u32 %v571_v43, %v503_v42  ;;  %s226_s20 = scalar_lea.vmem %s802_s0, %s567_s9  ;;  %v371_v49 = vld [vmem:[%s804_s2] sm:$0x3]  ;;  %s237_s28 = scalar_lea.vmem %s806_s4, %s568_s25 }
  0x18   : > { %359 = vmatpush.bf16.msra.mxu1 %v548_v17  ;;  %v508_v47 = vor.u32 %v570_v44, %v505_v45  ;;  %v569_v48 = vld [vmem:[%s226_s20] sm:$0xff]  ;;  %v373_v51 = vperm.slane %v371_v49, 0  ;;  %v374_v52 = vperm.slane %v371_v49, 1 }
  0x19   : > { %v381_v50 = vld [vmem:[%s805_s3] sm:$0x3] }
  0x1a   : > { %v383_v53 = vperm.slane %v381_v50, 0  ;;  %v384_v55 = vperm.slane %v381_v50, 1 }
  0x1b   : > { %346 = vmatpush.bf16.msra.mxu0 %v536_v22 }
  0x1c   : > { %360 = vmatpush.bf16.msra.mxu1 %v540_v23 }
  0x1f   : > { %347 = vmatpush.bf16.msra.mxu0 %v528_v28 }
  0x20   : > { %361 = vmatpush.bf16.msra.mxu1 %v532_v29 }
  0x23   : > { %348 = vmatpush.bf16.msra.mxu0 %v520_v34 }
  0x24   : > { %362 = vmatpush.bf16.msra.mxu1 %v524_v35 }
  0x27   : > { %349 = vmatpush.bf16.msra.mxu0 %v512_v40 }
  0x28   : > { %363 = vmatpush.bf16.msra.mxu1 %v516_v41 }
  0x2b   : > { %350 = vmatpush.bf16.msra.mxu0 %v504_v46 }
  0x2c   : > { %364 = vmatpush.bf16.msra.mxu1 %v508_v47 }
  0x2e   : > { %351 = vmatmul.bf16.vlgmr.msra.gmra.mxu0 %v569_v48 }
  0x2f   : > { %365 = vmatmul.bf16.vlgmr.msra.gmra.mxu1 %v569_v48 }
  0xab   : > { %v352_v54 = vpop.f32.mrf.mxu0 }
  0xac   : > { %v377_v56 = vmul.f32 %v373_v51, %v352_v54  ;;  %v366_v57 = vpop.f32.mrf.mxu1 }
  0xad   : > { %v378_v58 = vmul.f32 %v374_v52, %v366_v57 }
  0xae   : > { %v387_v59 = vadd.f32 %v383_v53, %v377_v56 }
  0xaf   : > { %v388_v60 = vadd.f32 %v384_v55, %v378_v58 }
  0xb1   : > { %v391_v61 = vpack.c.bf16 %v388_v60, %v387_v59 }
  0xb3   : > { %393 = vst [vmem:[%s237_s28] sm:$0xff] %v391_v61  ;;  %v354_v62 = vpop.f32.mrf.mxu0 }
  0xb4   : > { %v379_v63 = vmul.f32 %v373_v51, %v354_v62  ;;  %v368_v0 = vpop.f32.mrf.mxu1 }
  0xb5   : > { %v380_v1 = vmul.f32 %v374_v52, %v368_v0 }
  0xb6   : > { %v389_v2 = vadd.f32 %v383_v53, %v379_v63 }
  0xb7   : > { %v390_v3 = vadd.f32 %v384_v55, %v380_v1 }
  0xb9   : > { %v392_v4 = vpack.c.bf16 %v390_v3, %v389_v2 }
  0xbb   : > { %394 = vst [vmem:[%s237_s28 + $0x8] sm:$0xff] %v392_v4 }
  0xbc PF: > { %s14_s17 = sadd.s32 1, %s632_s17   ;;  %s807_s15 = smov %s628_s16 }
  0xbd   : > { %p11_p5 = scmp.ge.s32.totalorder %s14_s17, 4   ;;  %s808_s16 = smov %s810_s18 }
  0xbf   :  { %13 = sbr.rel (!%p11_p5) target bundleno = 2 (0x2), region = 66 }

// kernel: encoder_cnn_forward.36
= control target key start
LH: loop header
LB: loop body
LE: loop exit
PB: predicated region body
PF: predicated region fallthrough
CT: control target
= control target key end

     0   :  { %s964_s18 = smov 0   ;;  %s966_s19 = smov 0   ;;  %s1210_s0 = inlined_call_operand.vmem [shape: bf16[2,4,128], index: 0, kind: input, shape index: {}]   ;;  %s1211_s1 = inlined_call_operand.vmem [shape: bf16[128,512], index: 1, kind: input, shape index: {}]   ;;  %s1212_s2 = inlined_call_operand.vmem [shape: f32[1,512], index: 2, kind: input, shape index: {}]   ;;  %s1213_s3 = inlined_call_operand.vmem [shape: f32[1,512], index: 3, kind: input, shape index: {}]   ;;  %s1214_s4 = inlined_call_operand.vmem [shape: bf16[2,4,512], index: 4, kind: input, shape index: {}]   ;;  %s1215_s5 = inlined_call_operand.vmem [shape: bf16[2,4,512], index: 5, kind: output, shape index: {}]  }
   0x1   :  { %s968_s20 = smov 0  }
   0x2 LB: > { %s27_s21 = sadd.s32 1, %s928_s19  ;;  %p716_p0 = scmp.ge.s32.totalorder %s932_s20, 1  ;;  %s932_s20 = sphi %s968_s20, %s15_s20   ;;  %s928_s19 = sphi %s966_s19, %s1217_s19   ;;  %s924_s18 = sphi %s964_s18, %s1216_s18  }
   0x3   : > { %p29_p1 = scmp.ge.s32.totalorder %s27_s21, 2  ;;  %p221_p2 = scmp.lt.s32.totalorder %s932_s20, 3 }
   0x5   : > { %s1219_s21 = smov (%p29_p1, %s27_s21), 0  ;;  %p222_p3 = pnand %p716_p0, %p221_p2 }
   0x6   : > { %p264_p4 = scmp.lt.s32.totalorder (!%p222_p3), %s924_s18, 1 }
   0x7   : > { %225 = sbr.rel (%p222_p3) target bundleno = 195 (0xc3), region = 40 }
   0xc   : > { %v836_v0 = vld [vmem:[%s1211_s1 + $0xe0] sm:$0xf]  ;;  %v884_v1 = vld [vmem:[%s1211_s1 + $0xec] sm:$0xf0]  ;;  %v882_v2 = vld [vmem:[%s1211_s1 + $0xe4] sm:$0xf] }
   0xd   : > { %v837_v3 = vor.u32 %v884_v1, %v836_v0  ;;  %v838_v4 = vld [vmem:[%s1211_s1 + $0xf0] sm:$0xf0]  ;;  %v844_v5 = vld [vmem:[%s1211_s1 + $0xe8] sm:$0xf]  ;;  %v885_v6 = vld [vmem:[%s1211_s1 + $0xf4] sm:$0xf0] }
   0xe   : > { %v841_v7 = vor.u32 %v882_v2, %v838_v4  ;;  %v845_v8 = vor.u32 %v885_v6, %v844_v5  ;;  %v883_v9 = vld [vmem:[%s1211_s1 + $0xec] sm:$0xf]  ;;  %v846_v10 = vld [vmem:[%s1211_s1 + $0xf8] sm:$0xf0]  ;;  %v820_v11 = vld [vmem:[%s1211_s1 + $0xc0] sm:$0xf] }
   0xf   : > { %482 = vmatpush.bf16.msra.mxu0 %v837_v3  ;;  %v849_v12 = vor.u32 %v883_v9, %v846_v10  ;;  %v880_v13 = vld [vmem:[%s1211_s1 + $0xcc] sm:$0xf0]  ;;  %v878_v14 = vld [vmem:[%s1211_s1 + $0xc4] sm:$0xf]  ;;  %v822_v15 = vld [vmem:[%s1211_s1 + $0xd0] sm:$0xf0] }
  0x10   : > { %495 = vmatpush.bf16.msra.mxu1 %v841_v7  ;;  %508 = vmatpush.bf16.msra.mxu2 %v845_v8  ;;  %v821_v16 = vor.u32 %v880_v13, %v820_v11  ;;  %v825_v17 = vor.u32 %v878_v14, %v822_v15  ;;  %v828_v18 = vld [vmem:[%s1211_s1 + $0xc8] sm:$0xf]  ;;  %v881_v19 = vld [vmem:[%s1211_s1 + $0xd4] sm:$0xf0]  ;;  %v879_v20 = vld [vmem:[%s1211_s1 + $0xcc] sm:$0xf] }
  0x11   : > { %521 = vmatpush.bf16.msra.mxu3 %v849_v12  ;;  %v829_v21 = vor.u32 %v881_v19, %v828_v18  ;;  %v830_v22 = vld [vmem:[%s1211_s1 + $0xd8] sm:$0xf0]  ;;  %v804_v23 = vld [vmem:[%s1211_s1 + $0xa0] sm:$0xf]  ;;  %v876_v24 = vld [vmem:[%s1211_s1 + $0xac] sm:$0xf0] }
  0x12   : > { %v833_v25 = vor.u32 %v879_v20, %v830_v22  ;;  %v874_v26 = vld [vmem:[%s1211_s1 + $0xa4] sm:$0xf]  ;;  %v806_v27 = vld [vmem:[%s1211_s1 + $0xb0] sm:$0xf0]  ;;  %v812_v28 = vld [vmem:[%s1211_s1 + $0xa8] sm:$0xf]  ;;  %v805_v29 = vor.u32 %v876_v24, %v804_v23 }
  0x13   : > { %483 = vmatpush.bf16.msra.mxu0 %v821_v16  ;;  %v877_v30 = vld [vmem:[%s1211_s1 + $0xb4] sm:$0xf0]  ;;  %v875_v31 = vld [vmem:[%s1211_s1 + $0xac] sm:$0xf]  ;;  %v814_v32 = vld [vmem:[%s1211_s1 + $0xb8] sm:$0xf0]  ;;  %v809_v33 = vor.u32 %v874_v26, %v806_v27 }
  0x14   : > { %496 = vmatpush.bf16.msra.mxu1 %v825_v17  ;;  %509 = vmatpush.bf16.msra.mxu2 %v829_v21  ;;  %v813_v34 = vor.u32 %v877_v30, %v812_v28  ;;  %v788_v35 = vld [vmem:[%s1211_s1 + $0x80] sm:$0xf]  ;;  %v872_v36 = vld [vmem:[%s1211_s1 + $0x8c] sm:$0xf0]  ;;  %v870_v37 = vld [vmem:[%s1211_s1 + $0x84] sm:$0xf]  ;;  %v817_v38 = vor.u32 %v875_v31, %v814_v32 }
  0x15   : > { %522 = vmatpush.bf16.msra.mxu3 %v833_v25  ;;  %v790_v39 = vld [vmem:[%s1211_s1 + $0x90] sm:$0xf0]  ;;  %v796_v40 = vld [vmem:[%s1211_s1 + $0x88] sm:$0xf]  ;;  %v873_v41 = vld [vmem:[%s1211_s1 + $0x94] sm:$0xf0]  ;;  %v789_v44 = vor.u32 %v872_v36, %v788_v35 }
  0x16   : > { %v871_v42 = vld [vmem:[%s1211_s1 + $0x8c] sm:$0xf]  ;;  %v798_v43 = vld [vmem:[%s1211_s1 + $0x98] sm:$0xf0]  ;;  %v793_v45 = vor.u32 %v870_v37, %v790_v39  ;;  %v797_v46 = vor.u32 %v873_v41, %v796_v40  ;;  %v772_v47 = vld [vmem:[%s1211_s1 + $0x60] sm:$0xf] }
  0x17   : > { %484 = vmatpush.bf16.msra.mxu0 %v805_v29  ;;  %v868_v48 = vld [vmem:[%s1211_s1 + $0x6c] sm:$0xf0]  ;;  %v866_v49 = vld [vmem:[%s1211_s1 + $0x64] sm:$0xf]  ;;  %v801_v50 = vor.u32 %v871_v42, %v798_v43  ;;  %v774_v51 = vld [vmem:[%s1211_s1 + $0x70] sm:$0xf0] }
  0x18   : > { %497 = vmatpush.bf16.msra.mxu1 %v809_v33  ;;  %510 = vmatpush.bf16.msra.mxu2 %v813_v34  ;;  %v780_v52 = vld [vmem:[%s1211_s1 + $0x68] sm:$0xf]  ;;  %v869_v53 = vld [vmem:[%s1211_s1 + $0x74] sm:$0xf0]  ;;  %v867_v54 = vld [vmem:[%s1211_s1 + $0x6c] sm:$0xf]  ;;  %v773_v56 = vor.u32 %v868_v48, %v772_v47  ;;  %v777_v57 = vor.u32 %v866_v49, %v774_v51 }
  0x19   : > { %523 = vmatpush.bf16.msra.mxu3 %v817_v38  ;;  %v782_v55 = vld [vmem:[%s1211_s1 + $0x78] sm:$0xf0]  ;;  %v781_v58 = vor.u32 %v869_v53, %v780_v52  ;;  %v756_v59 = vld [vmem:[%s1211_s1 + $0x40] sm:$0xf]  ;;  %v864_v60 = vld [vmem:[%s1211_s1 + $0x4c] sm:$0xf0] }
  0x1a   : > { %v862_v61 = vld [vmem:[%s1211_s1 + $0x44] sm:$0xf]  ;;  %v785_v62 = vor.u32 %v867_v54, %v782_v55  ;;  %v758_v63 = vld [vmem:[%s1211_s1 + $0x50] sm:$0xf0]  ;;  %v764_v0 = vld [vmem:[%s1211_s1 + $0x48] sm:$0xf]  ;;  %v757_v4 = vor.u32 %v864_v60, %v756_v59 }
  0x1b   : > { %485 = vmatpush.bf16.msra.mxu0 %v789_v44  ;;  %v865_v1 = vld [vmem:[%s1211_s1 + $0x54] sm:$0xf0]  ;;  %v863_v2 = vld [vmem:[%s1211_s1 + $0x4c] sm:$0xf]  ;;  %v766_v3 = vld [vmem:[%s1211_s1 + $0x58] sm:$0xf0]  ;;  %v761_v6 = vor.u32 %v862_v61, %v758_v63 }
  0x1c   : > { %498 = vmatpush.bf16.msra.mxu1 %v793_v45  ;;  %511 = vmatpush.bf16.msra.mxu2 %v797_v46  ;;  %v740_v5 = vld [vmem:[%s1211_s1 + $0x20] sm:$0xf]  ;;  %v765_v7 = vor.u32 %v865_v1, %v764_v0  ;;  %v860_v8 = vld [vmem:[%s1211_s1 + $0x2c] sm:$0xf0]  ;;  %v858_v9 = vld [vmem:[%s1211_s1 + $0x24] sm:$0xf]  ;;  %v769_v11 = vor.u32 %v863_v2, %v766_v3 }
  0x1d   : > { %524 = vmatpush.bf16.msra.mxu3 %v801_v50  ;;  %v742_v10 = vld [vmem:[%s1211_s1 + $0x30] sm:$0xf0]  ;;  %v748_v12 = vld [vmem:[%s1211_s1 + $0x28] sm:$0xf]  ;;  %v861_v13 = vld [vmem:[%s1211_s1 + $0x34] sm:$0xf0]  ;;  %v741_v16 = vor.u32 %v860_v8, %v740_v5 }
  0x1e   : > { %v859_v14 = vld [vmem:[%s1211_s1 + $0x2c] sm:$0xf]  ;;  %v750_v15 = vld [vmem:[%s1211_s1 + $0x38] sm:$0xf0]  ;;  %v724_v17 = vld [vmem:[%s1211_s1] sm:$0xf]  ;;  %v745_v18 = vor.u32 %v858_v9, %v742_v10  ;;  %v749_v19 = vor.u32 %v861_v13, %v748_v12 }
  0x1f   : > { %486 = vmatpush.bf16.msra.mxu0 %v773_v56  ;;  %s1221_s18 = smov (!%p264_p4, %s924_s18), 1  ;;  %v856_v20 = vld [vmem:[%s1211_s1 + $0xc] sm:$0xf0]  ;;  %v854_v21 = vld [vmem:[%s1211_s1 + $0x4] sm:$0xf]  ;;  %v753_v23 = vor.u32 %v859_v14, %v750_v15  ;;  %vm593_vm0 = vcmask 1041408  }
  0x20   : > { %499 = vmatpush.bf16.msra.mxu1 %v777_v57  ;;  %512 = vmatpush.bf16.msra.mxu2 %v781_v58  ;;  %v726_v22 = vld [vmem:[%s1211_s1 + $0x10] sm:$0xf0]  ;;  %v732_v24 = vld [vmem:[%s1211_s1 + $0x8] sm:$0xf]  ;;  %v857_v25 = vld [vmem:[%s1211_s1 + $0x14] sm:$0xf0]  ;;  %v725_v28 = vor.u32 %v856_v20, %v724_v17 }
  0x21   : > { %525 = vmatpush.bf16.msra.mxu3 %v785_v62  ;;  %s717_s16 = sshll.u32 %s1221_s18, 1  ;;  %s852_s17 = sshll.u32 %s1221_s18, 3  ;;  %v855_v26 = vld [vmem:[%s1211_s1 + $0xc] sm:$0xf]  ;;  %v734_v27 = vld [vmem:[%s1211_s1 + $0x18] sm:$0xf0]  ;;  %v729_v30 = vor.u32 %v854_v21, %v726_v22  ;;  %v733_v31 = vor.u32 %v857_v25, %v732_v24 }
  0x22   : > { %s279_s28 = scalar_lea.vmem %s1214_s4, %s852_s17  ;;  %s270_s6 = scalar_lea.vmem %s1210_s0, %s717_s16  ;;  %v737_v34 = vor.u32 %v855_v26, %v734_v27  ;;  %v534_v36 = vld [vmem:[%s1212_s2] sm:$0xf]  ;;  %vm597_vm1 = vcmask 1045508   ;;  %vm601_vm2 = vcmask 1043456  }
  0x23   : > { %487 = vmatpush.bf16.msra.mxu0 %v757_v4  ;;  %v562_v29 = vld [vmem:[%s279_s28] sm:$0xff]  ;;  %v536_v38 = vperm.slane %v534_v36, 0  ;;  %v537_v39 = vperm.slane %v534_v36, 1  ;;  %v538_v50 = vperm.slane %v534_v36, 2  ;;  %v539_v52 = vperm.slane %v534_v36, 3  ;;  %s288_s13 = scalar_lea.vmem %s1215_s5, %s852_s17 }
  0x24   : > { %500 = vmatpush.bf16.msra.mxu1 %v761_v6  ;;  %513 = vmatpush.bf16.msra.mxu2 %v765_v7  ;;  %v563_v32 = vunpack.c.l.bf16 %v562_v29  ;;  %v564_v33 = vunpack.c.h.bf16 %v562_v29  ;;  %v289_v35 = vld [vmem:[%s270_s6] sm:$0x3] }
  0x25   : > { %526 = vmatpush.bf16.msra.mxu3 %v769_v11  ;;  %v548_v37 = vld [vmem:[%s1213_s3] sm:$0xf] }
  0x26   : > { %567 = vst [vmem:[#allocation1] ss:$2 sm:$0xff] %v563_v32  ;;  %v550_v40 = vperm.slane %v548_v37, 0  ;;  %v551_v42 = vperm.slane %v548_v37, 1  ;;  %v552_v54 = vperm.slane %v548_v37, 2  ;;  %v553_v56 = vperm.slane %v548_v37, 3 }
  0x27   : > { %488 = vmatpush.bf16.msra.mxu0 %v741_v16  ;;  %569 = vst [vmem:[#allocation1 + $0x10] ss:$2 sm:$0xff] %v564_v33 }
  0x28   : > { %501 = vmatpush.bf16.msra.mxu1 %v745_v18  ;;  %514 = vmatpush.bf16.msra.mxu2 %v749_v19 }
  0x29   : > { %527 = vmatpush.bf16.msra.mxu3 %v753_v23 }
  0x2b   : > { %489 = vmatpush.bf16.msra.mxu0 %v725_v28 }
  0x2c   : > { %502 = vmatpush.bf16.msra.mxu1 %v729_v30  ;;  %515 = vmatpush.bf16.msra.mxu2 %v733_v31 }
  0x2d   : > { %528 = vmatpush.bf16.msra.mxu3 %v737_v34  ;;  %v570_v45 = vld.sshfl [vmem:[#allocation1] sm:$0xff pattern:$0x75316420]  ;;  %v571_v48 = vld.sshfl [vmem:[#allocation1 + $0x8] sm:$0xff pattern:$0x75316420] }
  0x2e   : > { %490 = vmatmul.bf16.vlgmr.msra.gmra.mxu0 %v289_v35  ;;  %v572_v62 = vld.sshfl [vmem:[#allocation1 + $0x10] sm:$0xff pattern:$0x75316420]  ;;  %v573_v2 = vld.sshfl [vmem:[#allocation1 + $0x18] sm:$0xff pattern:$0x75316420] }
  0x2f   : > { %503 = vmatmul.bf16.vlgmr.msra.gmra.mxu1 %v289_v35  ;;  %516 = vmatmul.bf16.vlgmr.msra.gmra.mxu2 %v289_v35 }
  0x30   : > { %529 = vmatmul.bf16.vlgmr.msra.gmra.mxu3 %v289_v35 }
  0xab   : > { %v491_v41 = vpop.f32.mrf.mxu0 }
  0xac   : > { %v544_v43 = vmul.f32 %v536_v38, %v491_v41  ;;  %v504_v44 = vpop.f32.mrf.mxu1 }
  0xad   : > { %v545_v46 = vmul.f32 %v537_v39, %v504_v44 }
  0xae   : > { %v558_v47 = vadd.f32 %v550_v40, %v544_v43 }
  0xaf   : > { %v559_v49 = vadd.f32 %v551_v42, %v545_v46 }
  0xb0   : > { %v578_v51 = vadd.f32 %v570_v45, %v558_v47 }
  0xb1   : > { %v579_v53 = vadd.f32 %v571_v48, %v559_v49 }
  0xb2   : > { %v517_v55 = vpop.f32.mrf.mxu2  ;;  %v582_v60 = vmax.f32 %v578_v51, 0.0 }
  0xb3   : > { %v546_v57 = vmul.f32 %v538_v50, %v517_v55  ;;  %v530_v58 = vpop.f32.mrf.mxu3  ;;  %v493_v59 = vpop.f32.mrf.mxu0  ;;  %v583_v61 = vmax.f32 %v579_v53, 0.0 }
  0xb4   : > { %v547_v63 = vmul.f32 %v539_v52, %v530_v58  ;;  %v506_v0 = vpop.f32.mrf.mxu1 }
  0xb5   : > { %v560_v1 = vadd.f32 %v552_v54, %v546_v57  ;;  %v586_v5 = vpack.c.bf16 %v583_v61, %v582_v60 }
  0xb6   : > { %v561_v3 = vadd.f32 %v553_v56, %v547_v63 }
  0xb7   : > { %v580_v4 = vadd.f32 %v572_v62, %v560_v1  ;;  %v590_v11 = vrot.slane %v586_v5, 2 }
  0xb8   : > { %v581_v6 = vadd.f32 %v573_v2, %v561_v3 }
  0xb9   : > { %v584_v7 = vmax.f32 %v580_v4, 0.0  ;;  %v596_v15 = vsel %vm593_vm0, %v586_v5, %v590_v11 }
  0xba   : > { %v585_v8 = vmax.f32 %v581_v6, 0.0  ;;  %v519_v9 = vpop.f32.mrf.mxu2 }
  0xbb   : > { %v532_v10 = vpop.f32.mrf.mxu3 }
  0xbc   : > { %v587_v12 = vpack.c.bf16 %v585_v8, %v584_v7 }
  0xbe   : > { %v591_v13 = vrot.slane %v587_v12, 4  ;;  %v592_v14 = vrot.slane %v587_v12, 6 }
  0xc0   : > { %v600_v16 = vsel %vm597_vm1, %v591_v13, %v592_v14 }
  0xc1   : > { %v602_v17 = vsel %vm601_vm2, %v596_v15, %v600_v16 }
  0xc2   : > { %604 = vst [vmem:[%s288_s13] sm:$0xff] %v602_v17 }
  0xc3 PF: > { %s15_s20 = sadd.s32 1, %s932_s20   ;;  %s1216_s18 = smov %s928_s19 }
  0xc4   : > { %p12_p5 = scmp.ge.s32.totalorder %s15_s20, 4   ;;  %s1217_s19 = smov %s1219_s21 }
  0xc6   :  { %14 = sbr.rel (!%p12_p5) target bundleno = 2 (0x2), region = 74 }

// kernel: encoder_cnn_forward.37
= control target key start
LH: loop header
LB: loop body
LE: loop exit
PB: predicated region body
PF: predicated region fallthrough
CT: control target
= control target key end

     0   :  { %s284_s6 = smov 0   ;;  %s305_s0 = inlined_call_operand.vmem [shape: bf16[2,4,512], index: 0, kind: input, shape index: {}]   ;;  %s306_s1 = inlined_call_operand.vmem [shape: f32[2,1,512], index: 1, kind: output, shape index: {}]  }
   0x1 LB: > { %s243_s7 = sadd.s32 4294967295, %s271_s6   ;;  %p247_p0 = scmp.ge.s32.totalorder %s271_s6, 1  ;;  %s271_s6 = sphi %s284_s6, %s11_s6  }
   0x2   : > { %p87_p1 = scmp.lt.s32.totalorder %s271_s6, 3 }
   0x4   : > { %p88_p2 = pnand %p247_p0, %p87_p1 }
   0x5   : > { %p106_p3 = scmp.lt.s32.totalorder (!%p88_p2), %s243_s7, 1 }
   0x6   : > { %91 = sbr.rel (%p88_p2) target bundleno = 46 (0x2e), region = 24 }
   0xb   : > { %s308_s7 = smov (!%p106_p3, %s243_s7), 1  ;;  %v273_v0 = vmov 4.0   ;;  %vm131_vm0 = vcmask 1043456   ;;  %v185_v42 = vlaneseq  ;;  %vm178_vm2 = vcmask 1040384  }
   0xc   : > { %263 = vrcp.f32 %v273_v0  ;;  %s253_s8 = sshll.u32 %s308_s7, 3  ;;  %s250_s12 = sshll.u32 %s308_s7, 2  ;;  %vm180_vm3 = vcmask 1042434   ;;  %vm182_vm4 = vcmask 1041408  }
   0xd   : > { %s110_s11 = scalar_lea.vmem %s305_s0, %s253_s8  ;;  %s114_s15 = scalar_lea.vmem %s306_s1, %s250_s12  ;;  %vm187_vm5 = vcmp.lt.s32.totalorder %v185_v42, 512 }
   0xe   : > { %v115_v1 = vld [vmem:[%s110_s11] sm:$0xff] }
   0xf   : > { %v116_v2 = vunpack.c.l.bf16 %v115_v1  ;;  %v117_v3 = vunpack.c.h.bf16 %v115_v1 }
  0x11   : > { %120 = vst [vmem:[#allocation1] ss:$2 sm:$0xff] %v116_v2 }
  0x12   : > { %v264_v4 = vpop.eup %263  ;;  %122 = vst [vmem:[#allocation1 + $0x10] ss:$2 sm:$0xff] %v117_v3 }
  0x13   : > { %v161_v5 = vmul.f32 4.0, %v264_v4  ;;  %vm165_vm1 = vweird.f32 %v264_v4 }
  0x15   : > { %v162_v6 = vsub.f32 1.0, %v161_v5 }
  0x17   : > { %v163_v19 = vmul.f32 %v264_v4, %v162_v6 }
  0x18   : > { %v123_v7 = vld.sshfl [vmem:[#allocation1] sm:$0xff pattern:$0x75316420]  ;;  %v124_v8 = vld.sshfl [vmem:[#allocation1 + $0x8] sm:$0xff pattern:$0x75316420] }
  0x19   : > { %v125_v9 = vld.sshfl [vmem:[#allocation1 + $0x10] sm:$0xff pattern:$0x75316420]  ;;  %v126_v10 = vld.sshfl [vmem:[#allocation1 + $0x18] sm:$0xff pattern:$0x75316420]  ;;  %v164_v28 = vadd.f32 %v264_v4, %v163_v19 }
  0x1a   : > { %v132_v11 = vsel %vm131_vm0, %v123_v7, 0.0  ;;  %v139_v12 = vsel %vm131_vm0, %v124_v8, 0.0  ;;  %v146_v13 = vsel %vm131_vm0, %v125_v9, 0.0  ;;  %v153_v14 = vsel %vm131_vm0, %v126_v10, 0.0 }
  0x1b   : > { %v133_v15 = vrot.slane %v132_v11, 4  ;;  %v140_v16 = vrot.slane %v139_v12, 4  ;;  %v147_v17 = vrot.slane %v146_v13, 4  ;;  %v154_v18 = vrot.slane %v153_v14, 4 }
  0x1c   : > { %v166_v37 = vsel %vm165_vm1, %v264_v4, %v164_v28 }
  0x1d   : > { %v134_v20 = vadd.f32 %v133_v15, %v132_v11  ;;  %v141_v21 = vadd.f32 %v140_v16, %v139_v12  ;;  %v148_v22 = vadd.f32 %v147_v17, %v146_v13  ;;  %v155_v23 = vadd.f32 %v154_v18, %v153_v14 }
  0x1f   : > { %v135_v24 = vrot.slane %v134_v20, 2  ;;  %v142_v25 = vrot.slane %v141_v21, 2  ;;  %v149_v26 = vrot.slane %v148_v22, 2  ;;  %v156_v27 = vrot.slane %v155_v23, 2 }
  0x21   : > { %v136_v29 = vadd.f32 %v135_v24, %v134_v20  ;;  %v143_v30 = vadd.f32 %v142_v25, %v141_v21  ;;  %v150_v31 = vadd.f32 %v149_v26, %v148_v22  ;;  %v157_v32 = vadd.f32 %v156_v27, %v155_v23 }
  0x23   : > { %v137_v33 = vrot.slane %v136_v29, 1  ;;  %v144_v34 = vrot.slane %v143_v30, 1  ;;  %v151_v35 = vrot.slane %v150_v31, 1  ;;  %v158_v36 = vrot.slane %v157_v32, 1 }
  0x25   : > { %v138_v38 = vadd.f32 %v137_v33, %v136_v29  ;;  %v145_v39 = vadd.f32 %v144_v34, %v143_v30  ;;  %v152_v40 = vadd.f32 %v151_v35, %v150_v31  ;;  %v159_v41 = vadd.f32 %v158_v36, %v157_v32 }
  0x27   : > { %v168_v43 = vmul.f32 %v166_v37, %v145_v39  ;;  %v169_v44 = vmul.f32 %v166_v37, %v152_v40  ;;  %v170_v45 = vmul.f32 %v166_v37, %v159_v41  ;;  %v167_v46 = vmul.f32 %v166_v37, %v138_v38 }
  0x29   : > { %v175_v47 = vrot.slane %v168_v43, 7  ;;  %v176_v48 = vrot.slane %v169_v44, 6  ;;  %v177_v49 = vrot.slane %v170_v45, 5 }
  0x2b   : > { %v179_v50 = vsel %vm178_vm2, %v167_v46, %v175_v47  ;;  %v181_v51 = vsel %vm180_vm3, %v176_v48, %v177_v49 }
  0x2c   : > { %v183_v52 = vsel %vm182_vm4, %v179_v50, %v181_v51 }
  0x2d   : > { %189 = vst.msk [vmem:[%s114_s15] sm:$0xf] %vm187_vm5, %v183_v52 }
  0x2e PF: > { %s11_s6 = sadd.s32 1, %s271_s6  }
  0x2f   : > { %p8_p4 = scmp.ge.s32.totalorder %s11_s6, 4  }
  0x31   :  { %10 = sbr.rel (!%p8_p4) target bundleno = 1 (0x1), region = 55 }

// kernel: encoder_cnn_forward.35
= control target key start
LH: loop header
LB: loop body
LE: loop exit
PB: predicated region body
PF: predicated region fallthrough
CT: control target
= control target key end

     0   :  { %s1274_s15 = smov 0   ;;  %s1276_s16 = smov 0   ;;  %s1717_s0 = inlined_call_operand.vmem [shape: bf16[2,4,256], index: 0, kind: input, shape index: {}]   ;;  %s1718_s1 = inlined_call_operand.vmem [shape: bf16[256,512], index: 1, kind: input, shape index: {}]   ;;  %s1719_s2 = inlined_call_operand.vmem [shape: f32[1,512], index: 2, kind: input, shape index: {}]   ;;  %s1720_s3 = inlined_call_operand.vmem [shape: f32[1,512], index: 3, kind: input, shape index: {}]   ;;  %s1721_s4 = inlined_call_operand.vmem [shape: bf16[2,4,512], index: 4, kind: output, shape index: {}]  }
   0x1   :  { %s1278_s17 = smov 0  }
   0x2 LB: > { %s26_s18 = sadd.s32 1, %s1243_s16  ;;  %p872_p0 = scmp.ge.s32.totalorder %s1247_s17, 1  ;;  %s1247_s17 = sphi %s1278_s17, %s14_s17   ;;  %s1243_s16 = sphi %s1276_s16, %s1723_s16   ;;  %s1239_s15 = sphi %s1274_s15, %s1722_s15  }
   0x3   : > { %p28_p1 = scmp.ge.s32.totalorder %s26_s18, 2  ;;  %p182_p2 = scmp.lt.s32.totalorder %s1247_s17, 3 }
   0x5   : > { %s1725_s18 = smov (%p28_p1, %s26_s18), 0  ;;  %p183_p3 = pnand %p872_p0, %p182_p2 }
   0x6   : > { %p216_p4 = scmp.lt.s32.totalorder (!%p183_p3), %s1239_s15, 1 }
   0x7   : > { %186 = sbr.rel (%p183_p3) target bundleno = 225 (0xe1), region = 36 }
   0xc   : > { %v991_v0 = vld [vmem:[%s1718_s1 + $0xe0] sm:$0xf]  ;;  %v1167_v1 = vld [vmem:[%s1718_s1 + $0xec] sm:$0xf0]  ;;  %v1165_v5 = vld [vmem:[%s1718_s1 + $0xe4] sm:$0xf] }
   0xd   : > { %v1119_v2 = vld [vmem:[%s1718_s1 + $0x1e0] sm:$0xf]  ;;  %v992_v3 = vor.u32 %v1167_v1, %v991_v0  ;;  %v1199_v4 = vld [vmem:[%s1718_s1 + $0x1ec] sm:$0xf0]  ;;  %v993_v6 = vld [vmem:[%s1718_s1 + $0xf0] sm:$0xf0] }
   0xe   : > { %v1120_v7 = vor.u32 %v1199_v4, %v1119_v2  ;;  %v996_v8 = vor.u32 %v1165_v5, %v993_v6  ;;  %v1197_v9 = vld [vmem:[%s1718_s1 + $0x1e4] sm:$0xf]  ;;  %v1121_v10 = vld [vmem:[%s1718_s1 + $0x1f0] sm:$0xf0]  ;;  %v975_v11 = vld [vmem:[%s1718_s1 + $0xc0] sm:$0xf] }
   0xf   : > { %625 = vmatpush.bf16.msra.mxu0 %v992_v3  ;;  %v1124_v12 = vor.u32 %v1197_v9, %v1121_v10  ;;  %v1163_v13 = vld [vmem:[%s1718_s1 + $0xcc] sm:$0xf0]  ;;  %v1103_v14 = vld [vmem:[%s1718_s1 + $0x1c0] sm:$0xf]  ;;  %v1161_v18 = vld [vmem:[%s1718_s1 + $0xc4] sm:$0xf] }
  0x10   : > { %v1195_v15 = vld [vmem:[%s1718_s1 + $0x1cc] sm:$0xf0]  ;;  %638 = vmatpush.bf16.msra.mxu1 %v1120_v7  ;;  %651 = vmatpush.bf16.msra.mxu2 %v996_v8  ;;  %v976_v16 = vor.u32 %v1163_v13, %v975_v11  ;;  %v977_v19 = vld [vmem:[%s1718_s1 + $0xd0] sm:$0xf0]  ;;  %v1193_v20 = vld [vmem:[%s1718_s1 + $0x1c4] sm:$0xf] }
  0x11   : > { %v1104_v17 = vor.u32 %v1195_v15, %v1103_v14  ;;  %664 = vmatpush.bf16.msra.mxu3 %v1124_v12  ;;  %v980_v21 = vor.u32 %v1161_v18, %v977_v19  ;;  %v1105_v22 = vld [vmem:[%s1718_s1 + $0x1d0] sm:$0xf0]  ;;  %v959_v23 = vld [vmem:[%s1718_s1 + $0xa0] sm:$0xf]  ;;  %v1159_v24 = vld [vmem:[%s1718_s1 + $0xac] sm:$0xf0] }
  0x12   : > { %v1108_v25 = vor.u32 %v1193_v20, %v1105_v22  ;;  %v1087_v26 = vld [vmem:[%s1718_s1 + $0x1a0] sm:$0xf]  ;;  %v1191_v27 = vld [vmem:[%s1718_s1 + $0x1ac] sm:$0xf0]  ;;  %v1157_v28 = vld [vmem:[%s1718_s1 + $0xa4] sm:$0xf]  ;;  %v960_v29 = vor.u32 %v1159_v24, %v959_v23 }
  0x13   : > { %626 = vmatpush.bf16.msra.mxu0 %v976_v16  ;;  %v961_v30 = vld [vmem:[%s1718_s1 + $0xb0] sm:$0xf0]  ;;  %v1189_v31 = vld [vmem:[%s1718_s1 + $0x1a4] sm:$0xf]  ;;  %v1088_v33 = vor.u32 %v1191_v27, %v1087_v26  ;;  %v943_v35 = vld [vmem:[%s1718_s1 + $0x80] sm:$0xf] }
  0x14   : > { %v1089_v32 = vld [vmem:[%s1718_s1 + $0x1b0] sm:$0xf0]  ;;  %639 = vmatpush.bf16.msra.mxu1 %v1104_v17  ;;  %652 = vmatpush.bf16.msra.mxu2 %v980_v21  ;;  %v964_v34 = vor.u32 %v1157_v28, %v961_v30  ;;  %v1155_v36 = vld [vmem:[%s1718_s1 + $0x8c] sm:$0xf0]  ;;  %v1071_v37 = vld [vmem:[%s1718_s1 + $0x180] sm:$0xf] }
  0x15   : > { %665 = vmatpush.bf16.msra.mxu3 %v1108_v25  ;;  %v1092_v38 = vor.u32 %v1189_v31, %v1089_v32  ;;  %v1187_v39 = vld [vmem:[%s1718_s1 + $0x18c] sm:$0xf0]  ;;  %v1153_v40 = vld [vmem:[%s1718_s1 + $0x84] sm:$0xf]  ;;  %v945_v41 = vld [vmem:[%s1718_s1 + $0x90] sm:$0xf0]  ;;  %v944_v44 = vor.u32 %v1155_v36, %v943_v35 }
  0x16   : > { %v1185_v42 = vld [vmem:[%s1718_s1 + $0x184] sm:$0xf]  ;;  %v1073_v43 = vld [vmem:[%s1718_s1 + $0x190] sm:$0xf0]  ;;  %v1072_v45 = vor.u32 %v1187_v39, %v1071_v37  ;;  %v948_v46 = vor.u32 %v1153_v40, %v945_v41  ;;  %v927_v47 = vld [vmem:[%s1718_s1 + $0x60] sm:$0xf] }
  0x17   : > { %627 = vmatpush.bf16.msra.mxu0 %v960_v29  ;;  %v1151_v48 = vld [vmem:[%s1718_s1 + $0x6c] sm:$0xf0]  ;;  %v1055_v49 = vld [vmem:[%s1718_s1 + $0x160] sm:$0xf]  ;;  %v1076_v50 = vor.u32 %v1185_v42, %v1073_v43  ;;  %v1149_v52 = vld [vmem:[%s1718_s1 + $0x64] sm:$0xf] }
  0x18   : > { %640 = vmatpush.bf16.msra.mxu1 %v1088_v33  ;;  %653 = vmatpush.bf16.msra.mxu2 %v964_v34  ;;  %v1183_v51 = vld [vmem:[%s1718_s1 + $0x16c] sm:$0xf0]  ;;  %v929_v53 = vld [vmem:[%s1718_s1 + $0x70] sm:$0xf0]  ;;  %v1181_v54 = vld [vmem:[%s1718_s1 + $0x164] sm:$0xf]  ;;  %v928_v56 = vor.u32 %v1151_v48, %v927_v47 }
  0x19   : > { %666 = vmatpush.bf16.msra.mxu3 %v1092_v38  ;;  %v1057_v55 = vld [vmem:[%s1718_s1 + $0x170] sm:$0xf0]  ;;  %v1056_v57 = vor.u32 %v1183_v51, %v1055_v49  ;;  %v932_v58 = vor.u32 %v1149_v52, %v929_v53  ;;  %v911_v59 = vld [vmem:[%s1718_s1 + $0x40] sm:$0xf]  ;;  %v1147_v60 = vld [vmem:[%s1718_s1 + $0x4c] sm:$0xf0] }
  0x1a   : > { %v1039_v61 = vld [vmem:[%s1718_s1 + $0x140] sm:$0xf]  ;;  %v1060_v62 = vor.u32 %v1181_v54, %v1057_v55  ;;  %v1179_v63 = vld [vmem:[%s1718_s1 + $0x14c] sm:$0xf0]  ;;  %v1145_v0 = vld [vmem:[%s1718_s1 + $0x44] sm:$0xf]  ;;  %v912_v4 = vor.u32 %v1147_v60, %v911_v59 }
  0x1b   : > { %628 = vmatpush.bf16.msra.mxu0 %v944_v44  ;;  %v913_v1 = vld [vmem:[%s1718_s1 + $0x50] sm:$0xf0]  ;;  %v1177_v2 = vld [vmem:[%s1718_s1 + $0x144] sm:$0xf]  ;;  %v1040_v5 = vor.u32 %v1179_v63, %v1039_v61  ;;  %v895_v7 = vld [vmem:[%s1718_s1 + $0x20] sm:$0xf] }
  0x1c   : > { %641 = vmatpush.bf16.msra.mxu1 %v1072_v45  ;;  %654 = vmatpush.bf16.msra.mxu2 %v948_v46  ;;  %v1041_v3 = vld [vmem:[%s1718_s1 + $0x150] sm:$0xf0]  ;;  %v916_v6 = vor.u32 %v1145_v0, %v913_v1  ;;  %v1143_v8 = vld [vmem:[%s1718_s1 + $0x2c] sm:$0xf0]  ;;  %v1023_v9 = vld [vmem:[%s1718_s1 + $0x120] sm:$0xf] }
  0x1d   : > { %667 = vmatpush.bf16.msra.mxu3 %v1076_v50  ;;  %v1044_v10 = vor.u32 %v1177_v2, %v1041_v3  ;;  %v1175_v11 = vld [vmem:[%s1718_s1 + $0x12c] sm:$0xf0]  ;;  %v1141_v12 = vld [vmem:[%s1718_s1 + $0x24] sm:$0xf]  ;;  %v897_v13 = vld [vmem:[%s1718_s1 + $0x30] sm:$0xf0]  ;;  %v896_v16 = vor.u32 %v1143_v8, %v895_v7 }
  0x1e   : > { %v1173_v14 = vld [vmem:[%s1718_s1 + $0x124] sm:$0xf]  ;;  %v1025_v15 = vld [vmem:[%s1718_s1 + $0x130] sm:$0xf0]  ;;  %v879_v17 = vld [vmem:[%s1718_s1] sm:$0xf]  ;;  %v1024_v20 = vor.u32 %v1175_v11, %v1023_v9  ;;  %v900_v21 = vor.u32 %v1141_v12, %v897_v13 }
  0x1f   : > { %629 = vmatpush.bf16.msra.mxu0 %v928_v56  ;;  %v1139_v18 = vld [vmem:[%s1718_s1 + $0xc] sm:$0xf0]  ;;  %v1007_v19 = vld [vmem:[%s1718_s1 + $0x100] sm:$0xf]  ;;  %v1137_v23 = vld [vmem:[%s1718_s1 + $0x4] sm:$0xf]  ;;  %v1028_v25 = vor.u32 %v1173_v14, %v1025_v15 }
  0x20   : > { %642 = vmatpush.bf16.msra.mxu1 %v1056_v57  ;;  %655 = vmatpush.bf16.msra.mxu2 %v932_v58  ;;  %v1171_v22 = vld [vmem:[%s1718_s1 + $0x10c] sm:$0xf0]  ;;  %v881_v24 = vld [vmem:[%s1718_s1 + $0x10] sm:$0xf0]  ;;  %v1169_v26 = vld [vmem:[%s1718_s1 + $0x104] sm:$0xf]  ;;  %v880_v31 = vor.u32 %v1139_v18, %v879_v17 }
  0x21   : > { %668 = vmatpush.bf16.msra.mxu3 %v1060_v62  ;;  %v1009_v27 = vld [vmem:[%s1718_s1 + $0x110] sm:$0xf0]  ;;  %v999_v28 = vld [vmem:[%s1718_s1 + $0xe8] sm:$0xf]  ;;  %v1168_v29 = vld [vmem:[%s1718_s1 + $0xf4] sm:$0xf0]  ;;  %v1008_v35 = vor.u32 %v1171_v22, %v1007_v19  ;;  %v884_v36 = vor.u32 %v1137_v23, %v881_v24 }
  0x22   : > { %v1127_v30 = vld [vmem:[%s1718_s1 + $0x1e8] sm:$0xf]  ;;  %v1200_v32 = vld [vmem:[%s1718_s1 + $0x1f4] sm:$0xf0]  ;;  %v1166_v33 = vld [vmem:[%s1718_s1 + $0xec] sm:$0xf]  ;;  %v1012_v39 = vor.u32 %v1169_v26, %v1009_v27  ;;  %v1000_v40 = vor.u32 %v1168_v29, %v999_v28 }
  0x23   : > { %630 = vmatpush.bf16.msra.mxu0 %v912_v4  ;;  %v1001_v34 = vld [vmem:[%s1718_s1 + $0xf8] sm:$0xf0]  ;;  %v1198_v37 = vld [vmem:[%s1718_s1 + $0x1ec] sm:$0xf]  ;;  %s1727_s15 = smov (!%p216_p4, %s1239_s15), 1  ;;  %v1128_v42 = vor.u32 %v1200_v32, %v1127_v30  ;;  %vm764_vm0 = vcmask 1041408  }
  0x24   : > { %643 = vmatpush.bf16.msra.mxu1 %v1040_v5  ;;  %656 = vmatpush.bf16.msra.mxu2 %v916_v6  ;;  %v1129_v38 = vld [vmem:[%s1718_s1 + $0x1f8] sm:$0xf0]  ;;  %v983_v41 = vld [vmem:[%s1718_s1 + $0xc8] sm:$0xf]  ;;  %v1004_v43 = vor.u32 %v1166_v33, %v1001_v34  ;;  %v1164_v44 = vld [vmem:[%s1718_s1 + $0xd4] sm:$0xf0] }
  0x25   : > { %669 = vmatpush.bf16.msra.mxu3 %v1044_v10  ;;  %v1111_v45 = vld [vmem:[%s1718_s1 + $0x1c8] sm:$0xf]  ;;  %s1135_s11 = sshll.u32 %s1727_s15, 2  ;;  %v1132_v46 = vor.u32 %v1198_v37, %v1129_v38  ;;  %v1196_v47 = vld [vmem:[%s1718_s1 + $0x1d4] sm:$0xf0]  ;;  %v984_v53 = vor.u32 %v1164_v44, %v983_v41  ;;  %s1136_s19 = sshll.u32 %s1727_s15, 3 }
  0x26   : > { %v1162_v48 = vld [vmem:[%s1718_s1 + $0xcc] sm:$0xf]  ;;  %v985_v49 = vld [vmem:[%s1718_s1 + $0xd8] sm:$0xf0]  ;;  %s224_s24 = scalar_lea.vmem %s1717_s0, %s1135_s11  ;;  %v1112_v54 = vor.u32 %v1196_v47, %v1111_v45  ;;  %v967_v56 = vld [vmem:[%s1718_s1 + $0xa8] sm:$0xf]  ;;  %s233_s22 = scalar_lea.vmem %s1721_s4, %s1136_s19 }
  0x27   : > { %631 = vmatpush.bf16.msra.mxu0 %v896_v16  ;;  %v1194_v50 = vld [vmem:[%s1718_s1 + $0x1cc] sm:$0xf]  ;;  %v1113_v51 = vld [vmem:[%s1718_s1 + $0x1d8] sm:$0xf0]  ;;  %v234_v52 = vld [vmem:[%s224_s24] sm:$0xf]  ;;  %v988_v55 = vor.u32 %v1162_v48, %v985_v49 }
  0x28   : > { %644 = vmatpush.bf16.msra.mxu1 %v1024_v20  ;;  %657 = vmatpush.bf16.msra.mxu2 %v900_v21  ;;  %300 = vst [vmem:[#allocation1] ss:$4 sm:$0xff] %v234_v52  ;;  %v1160_v57 = vld [vmem:[%s1718_s1 + $0xb4] sm:$0xf0]  ;;  %v1116_v58 = vor.u32 %v1194_v50, %v1113_v51  ;;  %v1095_v59 = vld [vmem:[%s1718_s1 + $0x1a8] sm:$0xf] }
  0x29   : > { %670 = vmatpush.bf16.msra.mxu3 %v1028_v25  ;;  %v1192_v60 = vld [vmem:[%s1718_s1 + $0x1b4] sm:$0xf0]  ;;  %v1158_v61 = vld [vmem:[%s1718_s1 + $0xac] sm:$0xf]  ;;  %v969_v62 = vld [vmem:[%s1718_s1 + $0xb8] sm:$0xf0]  ;;  %v968_v3 = vor.u32 %v1160_v57, %v967_v56 }
  0x2a   : > { %v1190_v63 = vld [vmem:[%s1718_s1 + $0x1ac] sm:$0xf]  ;;  %v1097_v0 = vld [vmem:[%s1718_s1 + $0x1b8] sm:$0xf0]  ;;  %v951_v1 = vld [vmem:[%s1718_s1 + $0x88] sm:$0xf]  ;;  %v1096_v4 = vor.u32 %v1192_v60, %v1095_v59  ;;  %v972_v8 = vor.u32 %v1158_v61, %v969_v62 }
  0x2b   : > { %632 = vmatpush.bf16.msra.mxu0 %v880_v31  ;;  %v1156_v2 = vld [vmem:[%s1718_s1 + $0x94] sm:$0xf0]  ;;  %v1079_v5 = vld [vmem:[%s1718_s1 + $0x188] sm:$0xf]  ;;  %v1154_v7 = vld [vmem:[%s1718_s1 + $0x8c] sm:$0xf]  ;;  %v1100_v9 = vor.u32 %v1190_v63, %v1097_v0 }
  0x2c   : > { %645 = vmatpush.bf16.msra.mxu1 %v1008_v35  ;;  %658 = vmatpush.bf16.msra.mxu2 %v884_v36  ;;  %v1188_v6 = vld [vmem:[%s1718_s1 + $0x194] sm:$0xf0]  ;;  %v953_v10 = vld [vmem:[%s1718_s1 + $0x98] sm:$0xf0]  ;;  %v1186_v11 = vld [vmem:[%s1718_s1 + $0x18c] sm:$0xf]  ;;  %v952_v15 = vor.u32 %v1156_v2, %v951_v1 }
  0x2d   : > { %671 = vmatpush.bf16.msra.mxu3 %v1012_v39  ;;  %v1081_v12 = vld [vmem:[%s1718_s1 + $0x198] sm:$0xf0]  ;;  %v1080_v16 = vor.u32 %v1188_v6, %v1079_v5  ;;  %v935_v17 = vld [vmem:[%s1718_s1 + $0x68] sm:$0xf]  ;;  %v1152_v18 = vld [vmem:[%s1718_s1 + $0x74] sm:$0xf0]  ;;  %v956_v19 = vor.u32 %v1154_v7, %v953_v10 }
  0x2e   : > { %v1084_v20 = vor.u32 %v1186_v11, %v1081_v12  ;;  %v1063_v21 = vld [vmem:[%s1718_s1 + $0x168] sm:$0xf]  ;;  %v1184_v22 = vld [vmem:[%s1718_s1 + $0x174] sm:$0xf0]  ;;  %v1150_v23 = vld [vmem:[%s1718_s1 + $0x6c] sm:$0xf]  ;;  %v936_v27 = vor.u32 %v1152_v18, %v935_v17 }
  0x2f   : > { %677 = vmatpush.bf16.msrb.mxu0 %v1000_v40  ;;  %v1590_v13 = vld.sshfl [vmem:[#allocation1] sm:$0xff pattern:$0x73625140]  ;;  %v1592_v14 = vld.sshfl [vmem:[#allocation1 + $0x8] sm:$0xff pattern:$0x73625140]  ;;  %v1064_v28 = vor.u32 %v1184_v22, %v1063_v21 }
  0x30   : > { %690 = vmatpush.bf16.msrb.mxu1 %v1128_v42  ;;  %703 = vmatpush.bf16.msrb.mxu2 %v1004_v43  ;;  %v937_v24 = vld [vmem:[%s1718_s1 + $0x78] sm:$0xf0]  ;;  %v1182_v25 = vld [vmem:[%s1718_s1 + $0x16c] sm:$0xf]  ;;  %v919_v29 = vld [vmem:[%s1718_s1 + $0x48] sm:$0xf] }
  0x31   : > { %716 = vmatpush.bf16.msrb.mxu3 %v1132_v46  ;;  %659 = vmatmul.bf16.vlgmr.msra.gmra.mxu2 %v1590_v13  ;;  %v1065_v26 = vld [vmem:[%s1718_s1 + $0x178] sm:$0xf0]  ;;  %v1148_v30 = vld [vmem:[%s1718_s1 + $0x54] sm:$0xf0]  ;;  %v940_v31 = vor.u32 %v1150_v23, %v937_v24  ;;  %v1047_v33 = vld [vmem:[%s1718_s1 + $0x148] sm:$0xf] }
  0x32   : > { %672 = vmatmul.bf16.vlgmr.msra.gmra.mxu3 %v1592_v14  ;;  %633 = vmatmul.bf16.vlgmr.msra.gmra.mxu0 %v1590_v13  ;;  %v1068_v32 = vor.u32 %v1182_v25, %v1065_v26  ;;  %v1180_v34 = vld [vmem:[%s1718_s1 + $0x154] sm:$0xf0]  ;;  %v1146_v35 = vld [vmem:[%s1718_s1 + $0x4c] sm:$0xf]  ;;  %v921_v36 = vld [vmem:[%s1718_s1 + $0x58] sm:$0xf0]  ;;  %v920_v39 = vor.u32 %v1148_v30, %v919_v29 }
  0x33   : > { %678 = vmatpush.bf16.msrb.mxu0 %v984_v53  ;;  %646 = vmatmul.bf16.vlgmr.msra.gmra.mxu1 %v1592_v14  ;;  %v1178_v37 = vld [vmem:[%s1718_s1 + $0x14c] sm:$0xf]  ;;  %v1049_v38 = vld [vmem:[%s1718_s1 + $0x158] sm:$0xf0]  ;;  %v1048_v40 = vor.u32 %v1180_v34, %v1047_v33  ;;  %v903_v41 = vld [vmem:[%s1718_s1 + $0x28] sm:$0xf]  ;;  %v924_v43 = vor.u32 %v1146_v35, %v921_v36 }
  0x34   : > { %691 = vmatpush.bf16.msrb.mxu1 %v1112_v54  ;;  %704 = vmatpush.bf16.msrb.mxu2 %v988_v55  ;;  %v1144_v42 = vld [vmem:[%s1718_s1 + $0x34] sm:$0xf0]  ;;  %v1052_v44 = vor.u32 %v1178_v37, %v1049_v38  ;;  %v1031_v45 = vld [vmem:[%s1718_s1 + $0x128] sm:$0xf]  ;;  %v1142_v47 = vld [vmem:[%s1718_s1 + $0x2c] sm:$0xf] }
  0x35   : > { %717 = vmatpush.bf16.msrb.mxu3 %v1116_v58  ;;  %v1176_v46 = vld [vmem:[%s1718_s1 + $0x134] sm:$0xf0]  ;;  %v905_v48 = vld [vmem:[%s1718_s1 + $0x38] sm:$0xf0]  ;;  %v1174_v49 = vld [vmem:[%s1718_s1 + $0x12c] sm:$0xf]  ;;  %v904_v51 = vor.u32 %v1144_v42, %v903_v41 }
  0x36   : > { %v1033_v50 = vld [vmem:[%s1718_s1 + $0x138] sm:$0xf0]  ;;  %v1032_v52 = vor.u32 %v1176_v46, %v1031_v45  ;;  %v887_v53 = vld [vmem:[%s1718_s1 + $0x8] sm:$0xf]  ;;  %v1140_v54 = vld [vmem:[%s1718_s1 + $0x14] sm:$0xf0]  ;;  %v908_v55 = vor.u32 %v1142_v47, %v905_v48 }
  0x37   : > { %679 = vmatpush.bf16.msrb.mxu0 %v968_v3  ;;  %v1036_v56 = vor.u32 %v1174_v49, %v1033_v50  ;;  %v1015_v57 = vld [vmem:[%s1718_s1 + $0x108] sm:$0xf]  ;;  %v1172_v58 = vld [vmem:[%s1718_s1 + $0x114] sm:$0xf0]  ;;  %v1138_v59 = vld [vmem:[%s1718_s1 + $0xc] sm:$0xf]  ;;  %v888_v63 = vor.u32 %v1140_v54, %v887_v53 }
  0x38   : > { %692 = vmatpush.bf16.msrb.mxu1 %v1096_v4  ;;  %705 = vmatpush.bf16.msrb.mxu2 %v972_v8  ;;  %v889_v60 = vld [vmem:[%s1718_s1 + $0x18] sm:$0xf0]  ;;  %v1170_v61 = vld [vmem:[%s1718_s1 + $0x10c] sm:$0xf]  ;;  %v1016_v0 = vor.u32 %v1172_v58, %v1015_v57  ;;  %v729_v11 = vld [vmem:[%s1719_s2] sm:$0xf] }
  0x39   : > { %718 = vmatpush.bf16.msrb.mxu3 %v1100_v9  ;;  %v1017_v62 = vld [vmem:[%s1718_s1 + $0x118] sm:$0xf0]  ;;  %v892_v1 = vor.u32 %v1138_v59, %v889_v60  ;;  %v733_v24 = vperm.slane %v729_v11, 2  ;;  %v734_v29 = vperm.slane %v729_v11, 3  ;;  %vm768_vm1 = vcmask 1045508  }
  0x3a   : > { %v1020_v2 = vor.u32 %v1170_v61, %v1017_v62  ;;  %vm772_vm2 = vcmask 1043456  }
  0x3b   : > { %680 = vmatpush.bf16.msrb.mxu0 %v952_v15  ;;  %v731_v15 = vperm.slane %v729_v11, 0 }
  0x3c   : > { %693 = vmatpush.bf16.msrb.mxu1 %v1080_v16  ;;  %706 = vmatpush.bf16.msrb.mxu2 %v956_v19 }
  0x3d   : > { %719 = vmatpush.bf16.msrb.mxu3 %v1084_v20 }
  0x3f   : > { %681 = vmatpush.bf16.msrb.mxu0 %v936_v27 }
  0x40   : > { %694 = vmatpush.bf16.msrb.mxu1 %v1064_v28  ;;  %707 = vmatpush.bf16.msrb.mxu2 %v940_v31 }
  0x41   : > { %720 = vmatpush.bf16.msrb.mxu3 %v1068_v32 }
  0x43   : > { %682 = vmatpush.bf16.msrb.mxu0 %v920_v39 }
  0x44   : > { %695 = vmatpush.bf16.msrb.mxu1 %v1048_v40  ;;  %708 = vmatpush.bf16.msrb.mxu2 %v924_v43 }
  0x45   : > { %721 = vmatpush.bf16.msrb.mxu3 %v1052_v44 }
  0x47   : > { %683 = vmatpush.bf16.msrb.mxu0 %v904_v51 }
  0x48   : > { %696 = vmatpush.bf16.msrb.mxu1 %v1032_v52  ;;  %709 = vmatpush.bf16.msrb.mxu2 %v908_v55 }
  0x49   : > { %722 = vmatpush.bf16.msrb.mxu3 %v1036_v56 }
  0x4b   : > { %684 = vmatpush.bf16.msrb.mxu0 %v888_v63 }
  0x4c   : > { %697 = vmatpush.bf16.msrb.mxu1 %v1016_v0  ;;  %710 = vmatpush.bf16.msrb.mxu2 %v892_v1 }
  0x4d   : > { %723 = vmatpush.bf16.msrb.mxu3 %v1020_v2 }
  0x4e   : > { %685 = vmatmul.bf16.vlgmr.msrb.gmra.mxu0 %v1590_v13 }
  0x4f   : > { %698 = vmatmul.bf16.vlgmr.msrb.gmra.mxu1 %v1592_v14  ;;  %711 = vmatmul.bf16.vlgmr.msrb.gmra.mxu2 %v1590_v13  ;;  %v743_v13 = vld [vmem:[%s1720_s3] sm:$0xf] }
  0x50   : > { %724 = vmatmul.bf16.vlgmr.msrb.gmra.mxu3 %v1592_v14  ;;  %v732_v14 = vperm.slane %v729_v11, 1  ;;  %v745_v19 = vperm.slane %v743_v13, 0  ;;  %v746_v20 = vperm.slane %v743_v13, 1  ;;  %v747_v25 = vperm.slane %v743_v13, 2 }
  0x51   : > { %v748_v33 = vperm.slane %v743_v13, 3 }
  0xaf   : > { %v634_v3 = vpop.f32.mrf.mxu0 }
  0xb0   : > { %v647_v4 = vpop.f32.mrf.mxu1 }
  0xb1   : > { %v648_v12 = vadd.f32 %v647_v4, %v634_v3 }
  0xb3   : > { %v739_v21 = vmul.f32 %v731_v15, %v648_v12 }
  0xb4   : > { %v660_v5 = vpop.f32.mrf.mxu2 }
  0xb5   : > { %v673_v6 = vpop.f32.mrf.mxu3  ;;  %v753_v26 = vadd.f32 %v745_v19, %v739_v21 }
  0xb6   : > { %v674_v16 = vadd.f32 %v673_v6, %v660_v5 }
  0xb7   : > { %v636_v7 = vpop.f32.mrf.mxu0 }
  0xb8   : > { %v649_v8 = vpop.f32.mrf.mxu1  ;;  %v740_v22 = vmul.f32 %v732_v14, %v674_v16 }
  0xba   : > { %v754_v27 = vadd.f32 %v746_v20, %v740_v22 }
  0xbc   : > { %v662_v9 = vpop.f32.mrf.mxu2  ;;  %v757_v36 = vpack.c.bf16 %v754_v27, %v753_v26 }
  0xbd   : > { %v675_v10 = vpop.f32.mrf.mxu3 }
  0xbe   : > { %v761_v40 = vrot.slane %v757_v36, 2 }
  0xc0   : > { %v767_v46 = vsel %vm764_vm0, %v757_v36, %v761_v40 }
  0xcb   : > { %v686_v17 = vpop.f32.mrf.mxu0 }
  0xcc   : > { %v699_v18 = vpop.f32.mrf.mxu1 }
  0xcd   : > { %v700_v23 = vadd.f32 %v699_v18, %v686_v17 }
  0xcf   : > { %v741_v28 = vmul.f32 %v733_v24, %v700_v23 }
  0xd1   : > { %v755_v37 = vadd.f32 %v747_v25, %v741_v28 }
  0xd2   : > { %v712_v30 = vpop.f32.mrf.mxu2 }
  0xd3   : > { %v725_v31 = vpop.f32.mrf.mxu3  ;;  %v688_v34 = vpop.f32.mrf.mxu0 }
  0xd4   : > { %v726_v32 = vadd.f32 %v725_v31, %v712_v30  ;;  %v701_v35 = vpop.f32.mrf.mxu1 }
  0xd6   : > { %v742_v38 = vmul.f32 %v734_v29, %v726_v32 }
  0xd8   : > { %v756_v39 = vadd.f32 %v748_v33, %v742_v38 }
  0xda   : > { %v758_v41 = vpack.c.bf16 %v756_v39, %v755_v37  ;;  %v714_v42 = vpop.f32.mrf.mxu2 }
  0xdb   : > { %v727_v43 = vpop.f32.mrf.mxu3 }
  0xdc   : > { %v762_v44 = vrot.slane %v758_v41, 4  ;;  %v763_v45 = vrot.slane %v758_v41, 6 }
  0xde   : > { %v771_v47 = vsel %vm768_vm1, %v762_v44, %v763_v45 }
  0xdf   : > { %v773_v48 = vsel %vm772_vm2, %v767_v46, %v771_v47 }
  0xe0   : > { %775 = vst [vmem:[%s233_s22] sm:$0xff] %v773_v48 }
  0xe1 PF: > { %s14_s17 = sadd.s32 1, %s1247_s17   ;;  %s1722_s15 = smov %s1243_s16 }
  0xe2   : > { %p11_p5 = scmp.ge.s32.totalorder %s14_s17, 4   ;;  %s1723_s16 = smov %s1725_s18 }
  0xe4   :  { %13 = sbr.rel (!%p11_p5) target bundleno = 2 (0x2), region = 66 }

// kernel: encoder_cnn_forward.34
= control target key start
LH: loop header
LB: loop body
LE: loop exit
PB: predicated region body
PF: predicated region fallthrough
CT: control target
= control target key end

     0   :  { %s1489_s15 = smov 0   ;;  %s1491_s16 = smov 0   ;;  %s1748_s0 = inlined_call_operand.vmem [shape: bf16[2,4,1152], index: 0, kind: input, shape index: {}]   ;;  %s1749_s1 = inlined_call_operand.vmem [shape: bf16[1152,128], index: 1, kind: input, shape index: {}]   ;;  %s1750_s2 = inlined_call_operand.vmem [shape: f32[1,128], index: 2, kind: input, shape index: {}]   ;;  %s1751_s3 = inlined_call_operand.vmem [shape: f32[1,128], index: 3, kind: input, shape index: {}]   ;;  %s1752_s4 = inlined_call_operand.vmem [shape: bf16[2,4,128], index: 4, kind: output, shape index: {}]  }
   0x1   :  { %s1493_s17 = smov 0  }
   0x2 LB: > { %s26_s18 = sadd.s32 1, %s1458_s16  ;;  %p1048_p0 = scmp.ge.s32.totalorder %s1462_s17, 1  ;;  %s1462_s17 = sphi %s1493_s17, %s14_s17   ;;  %s1458_s16 = sphi %s1491_s16, %s1754_s16   ;;  %s1454_s15 = sphi %s1489_s15, %s1753_s15  }
   0x3   : > { %p28_p1 = scmp.ge.s32.totalorder %s26_s18, 2  ;;  %p182_p2 = scmp.lt.s32.totalorder %s1462_s17, 3 }
   0x5   : > { %s1756_s18 = smov (%p28_p1, %s26_s18), 0  ;;  %p183_p3 = pnand %p1048_p0, %p182_p2 }
   0x6   : > { %p214_p4 = scmp.lt.s32.totalorder (!%p183_p3), %s1454_s15, 1 }
   0x7   : > { %186 = sbr.rel (%p183_p3) target bundleno = 245 (0xf5), region = 36 }
   0xc   : > { %v1348_v0 = vld [vmem:[%s1749_s1 + $0x38] sm:$0xff]  ;;  %v1347_v4 = vld [vmem:[%s1749_s1 + $0x30] sm:$0xff]  ;;  %s1758_s15 = smov (!%p214_p4, %s1454_s15), 1  ;;  %v1346_v8 = vld [vmem:[%s1749_s1 + $0x28] sm:$0xff] }
   0xd   : > { %v1364_v1 = vld [vmem:[%s1749_s1 + $0xb8] sm:$0xff]  ;;  %834 = vmatpush.bf16.msra.mxu0 %v1348_v0  ;;  %v1363_v5 = vld [vmem:[%s1749_s1 + $0xb0] sm:$0xff]  ;;  %v1362_v9 = vld [vmem:[%s1749_s1 + $0xa8] sm:$0xff]  ;;  %s1413_s21 = smul.u32 18, %s1758_s15 }
   0xe   : > { %v1372_v2 = vld [vmem:[%s1749_s1 + $0xf8] sm:$0xff]  ;;  %860 = vmatpush.bf16.msra.mxu2 %v1364_v1  ;;  %v1371_v6 = vld [vmem:[%s1749_s1 + $0xf0] sm:$0xff]  ;;  %v1370_v10 = vld [vmem:[%s1749_s1 + $0xe8] sm:$0xff] }
   0xf   : > { %v1356_v3 = vld [vmem:[%s1749_s1 + $0x78] sm:$0xff]  ;;  %873 = vmatpush.bf16.msra.mxu3 %v1372_v2  ;;  %v1355_v7 = vld [vmem:[%s1749_s1 + $0x70] sm:$0xff]  ;;  %v1354_v11 = vld [vmem:[%s1749_s1 + $0x68] sm:$0xff]  ;;  %s222_s6 = scalar_lea.vmem %s1748_s0, %s1413_s21 }
  0x10   : > { %847 = vmatpush.bf16.msra.mxu1 %v1356_v3  ;;  %v1345_v12 = vld [vmem:[%s1749_s1 + $0x20] sm:$0xff]  ;;  %v1344_v16 = vld [vmem:[%s1749_s1 + $0x18] sm:$0xff]  ;;  %v1343_v21 = vld [vmem:[%s1749_s1 + $0x10] sm:$0xff] }
  0x11   : > { %835 = vmatpush.bf16.msra.mxu0 %v1347_v4  ;;  %v1361_v13 = vld [vmem:[%s1749_s1 + $0xa0] sm:$0xff]  ;;  %v1360_v17 = vld [vmem:[%s1749_s1 + $0x98] sm:$0xff]  ;;  %v1359_v22 = vld [vmem:[%s1749_s1 + $0x90] sm:$0xff] }
  0x12   : > { %861 = vmatpush.bf16.msra.mxu2 %v1363_v5  ;;  %v1369_v14 = vld [vmem:[%s1749_s1 + $0xe0] sm:$0xff]  ;;  %v1368_v18 = vld [vmem:[%s1749_s1 + $0xd8] sm:$0xff]  ;;  %v1367_v23 = vld [vmem:[%s1749_s1 + $0xd0] sm:$0xff] }
  0x13   : > { %874 = vmatpush.bf16.msra.mxu3 %v1371_v6  ;;  %v1353_v15 = vld [vmem:[%s1749_s1 + $0x60] sm:$0xff]  ;;  %v1352_v19 = vld [vmem:[%s1749_s1 + $0x58] sm:$0xff]  ;;  %v1351_v24 = vld [vmem:[%s1749_s1 + $0x50] sm:$0xff] }
  0x14   : > { %848 = vmatpush.bf16.msra.mxu1 %v1355_v7  ;;  %v230_v20 = vld [vmem:[%s222_s6] sm:$0xff]  ;;  %v1342_v25 = vld [vmem:[%s1749_s1 + $0x8] sm:$0xff]  ;;  %v232_v29 = vld [vmem:[%s222_s6 + $0x10] sm:$0x3] }
  0x15   : > { %836 = vmatpush.bf16.msra.mxu0 %v1346_v8  ;;  %378 = vst [vmem:[#allocation1] ss:$4 sm:$0xff] %v230_v20  ;;  %v1358_v26 = vld [vmem:[%s1749_s1 + $0x88] sm:$0xff]  ;;  %v1341_v35 = vld [vmem:[%s1749_s1] sm:$0xff]  ;;  %v1380_v37 = vld [vmem:[%s1749_s1 + $0x138] sm:$0xff] }
  0x16   : > { %862 = vmatpush.bf16.msra.mxu2 %v1362_v9  ;;  %v1366_v27 = vld [vmem:[%s1749_s1 + $0xc8] sm:$0xff]  ;;  %v1357_v36 = vld [vmem:[%s1749_s1 + $0x80] sm:$0xff]  ;;  %v1396_v38 = vld [vmem:[%s1749_s1 + $0x1b8] sm:$0xff] }
  0x17   : > { %875 = vmatpush.bf16.msra.mxu3 %v1370_v10  ;;  %v1350_v28 = vld [vmem:[%s1749_s1 + $0x48] sm:$0xff]  ;;  %v1365_v39 = vld [vmem:[%s1749_s1 + $0xc0] sm:$0xff]  ;;  %v1404_v41 = vld [vmem:[%s1749_s1 + $0x1f8] sm:$0xff] }
  0x18   : > { %849 = vmatpush.bf16.msra.mxu1 %v1354_v11  ;;  %v231_v30 = vld [vmem:[%s222_s6 + $0x8] sm:$0xff]  ;;  %v1349_v40 = vld [vmem:[%s1749_s1 + $0x40] sm:$0xff]  ;;  %v1388_v42 = vld [vmem:[%s1749_s1 + $0x178] sm:$0xff]  ;;  %s1050_s6 = sshll.u32 %s1758_s15, 1 }
  0x19   : > { %837 = vmatpush.bf16.msra.mxu0 %v1345_v12  ;;  %381 = vst [vmem:[#allocation1 + $0x20] ss:$4 sm:$0xff] %v231_v30  ;;  %v1379_v43 = vld [vmem:[%s1749_s1 + $0x130] sm:$0xff]  ;;  %v1378_v47 = vld [vmem:[%s1749_s1 + $0x128] sm:$0xff]  ;;  %v1377_v51 = vld [vmem:[%s1749_s1 + $0x120] sm:$0xff]  ;;  %s229_s20 = scalar_lea.vmem %s1752_s4, %s1050_s6 }
  0x1a   : > { %863 = vmatpush.bf16.msra.mxu2 %v1361_v13  ;;  %v1395_v44 = vld [vmem:[%s1749_s1 + $0x1b0] sm:$0xff]  ;;  %v1394_v48 = vld [vmem:[%s1749_s1 + $0x1a8] sm:$0xff]  ;;  %v1393_v52 = vld [vmem:[%s1749_s1 + $0x1a0] sm:$0xff] }
  0x1b   : > { %876 = vmatpush.bf16.msra.mxu3 %v1369_v14  ;;  %v1403_v45 = vld [vmem:[%s1749_s1 + $0x1f0] sm:$0xff]  ;;  %v1402_v49 = vld [vmem:[%s1749_s1 + $0x1e8] sm:$0xff]  ;;  %v1401_v53 = vld [vmem:[%s1749_s1 + $0x1e0] sm:$0xff] }
  0x1c   : > { %850 = vmatpush.bf16.msra.mxu1 %v1353_v15  ;;  %v384_v31 = vld.sshfl [vmem:[#allocation1 + $0x10] sm:$0xff pattern:$0x73625140]  ;;  %v382_v32 = vld.sshfl [vmem:[#allocation1] sm:$0xff pattern:$0x73625140] }
  0x1d   : > { %838 = vmatpush.bf16.msra.mxu0 %v1344_v16  ;;  %v385_v33 = vld.sshfl [vmem:[#allocation1 + $0x18] sm:$0xff pattern:$0x73625140]  ;;  %v383_v34 = vld.sshfl [vmem:[#allocation1 + $0x8] sm:$0xff pattern:$0x73625140] }
  0x1e   : > { %864 = vmatpush.bf16.msra.mxu2 %v1360_v17  ;;  %391 = vst [vmem:[#allocation1] ss:$4 sm:$0xff] %v232_v29  ;;  %v1387_v46 = vld [vmem:[%s1749_s1 + $0x170] sm:$0xff]  ;;  %v1386_v50 = vld [vmem:[%s1749_s1 + $0x168] sm:$0xff]  ;;  %v1385_v54 = vld [vmem:[%s1749_s1 + $0x160] sm:$0xff] }
  0x1f   : > { %877 = vmatpush.bf16.msra.mxu3 %v1368_v18  ;;  %v1376_v55 = vld [vmem:[%s1749_s1 + $0x118] sm:$0xff]  ;;  %v1375_v59 = vld [vmem:[%s1749_s1 + $0x110] sm:$0xff]  ;;  %v1374_v63 = vld [vmem:[%s1749_s1 + $0x108] sm:$0xff] }
  0x20   : > { %851 = vmatpush.bf16.msra.mxu1 %v1352_v19  ;;  %v1392_v56 = vld [vmem:[%s1749_s1 + $0x198] sm:$0xff]  ;;  %v1391_v60 = vld [vmem:[%s1749_s1 + $0x190] sm:$0xff]  ;;  %v1390_v0 = vld [vmem:[%s1749_s1 + $0x188] sm:$0xff] }
  0x21   : > { %839 = vmatpush.bf16.msra.mxu0 %v1343_v21  ;;  %v1400_v57 = vld [vmem:[%s1749_s1 + $0x1d8] sm:$0xff]  ;;  %v1399_v61 = vld [vmem:[%s1749_s1 + $0x1d0] sm:$0xff]  ;;  %v1398_v1 = vld [vmem:[%s1749_s1 + $0x1c8] sm:$0xff] }
  0x22   : > { %865 = vmatpush.bf16.msra.mxu2 %v1359_v22  ;;  %v1384_v58 = vld [vmem:[%s1749_s1 + $0x158] sm:$0xff]  ;;  %v1383_v62 = vld [vmem:[%s1749_s1 + $0x150] sm:$0xff]  ;;  %v1382_v2 = vld [vmem:[%s1749_s1 + $0x148] sm:$0xff] }
  0x23   : > { %878 = vmatpush.bf16.msra.mxu3 %v1367_v23  ;;  %v1373_v3 = vld [vmem:[%s1749_s1 + $0x100] sm:$0xff]  ;;  %v1412_v5 = vld [vmem:[%s1749_s1 + $0x238] sm:$0xff]  ;;  %v388_v8 = vld.sshfl [vmem:[#allocation1 + $0x30] sm:$0xff pattern:$0x73625140] }
  0x24   : > { %852 = vmatpush.bf16.msra.mxu1 %v1351_v24  ;;  %v1389_v4 = vld [vmem:[%s1749_s1 + $0x180] sm:$0xff]  ;;  %v1411_v10 = vld [vmem:[%s1749_s1 + $0x230] sm:$0xff]  ;;  %v389_v11 = vld.sshfl [vmem:[#allocation1 + $0x38] sm:$0xff pattern:$0x73625140] }
  0x25   : > { %840 = vmatpush.bf16.msra.mxu0 %v1342_v25  ;;  %v1397_v6 = vld [vmem:[%s1749_s1 + $0x1c0] sm:$0xff]  ;;  %v387_v12 = vld.sshfl [vmem:[#allocation1 + $0x28] sm:$0xff pattern:$0x73625140]  ;;  %v1408_v15 = vld [vmem:[%s1749_s1 + $0x218] sm:$0xff] }
  0x26   : > { %866 = vmatpush.bf16.msra.mxu2 %v1358_v26  ;;  %v1381_v7 = vld [vmem:[%s1749_s1 + $0x140] sm:$0xff]  ;;  %v1410_v13 = vld [vmem:[%s1749_s1 + $0x228] sm:$0xff]  ;;  %v1407_v16 = vld [vmem:[%s1749_s1 + $0x210] sm:$0xff] }
  0x27   : > { %879 = vmatpush.bf16.msra.mxu3 %v1366_v27  ;;  %v386_v9 = vld.sshfl [vmem:[#allocation1 + $0x20] sm:$0xff pattern:$0x73625140]  ;;  %v1406_v17 = vld [vmem:[%s1749_s1 + $0x208] sm:$0xff] }
  0x28   : > { %853 = vmatpush.bf16.msra.mxu1 %v1350_v28  ;;  %v1409_v14 = vld [vmem:[%s1749_s1 + $0x220] sm:$0xff] }
  0x29   : > { %841 = vmatpush.bf16.msra.mxu0 %v1341_v35  ;;  %v1405_v18 = vld [vmem:[%s1749_s1 + $0x200] sm:$0xff] }
  0x2a   : > { %867 = vmatpush.bf16.msra.mxu2 %v1357_v36  ;;  %v392_v19 = vld.sshfl [vmem:[#allocation1] sm:$0xff pattern:$0x73625140] }
  0x2b   : > { %880 = vmatpush.bf16.msra.mxu3 %v1365_v39 }
  0x2c   : > { %854 = vmatpush.bf16.msra.mxu1 %v1349_v40  ;;  %842 = vmatmul.bf16.vlgmr.msra.gmra.mxu0 %v382_v32 }
  0x2d   : > { %886 = vmatpush.bf16.msrb.mxu0 %v1380_v37  ;;  %868 = vmatmul.bf16.vlgmr.msra.gmra.mxu2 %v384_v31 }
  0x2e   : > { %912 = vmatpush.bf16.msrb.mxu2 %v1396_v38  ;;  %881 = vmatmul.bf16.vlgmr.msra.gmra.mxu3 %v385_v33 }
  0x2f   : > { %925 = vmatpush.bf16.msrb.mxu3 %v1404_v41  ;;  %855 = vmatmul.bf16.vlgmr.msra.gmra.mxu1 %v383_v34 }
  0x30   : > { %899 = vmatpush.bf16.msrb.mxu1 %v1388_v42 }
  0x31   : > { %887 = vmatpush.bf16.msrb.mxu0 %v1379_v43  ;;  %v1438_v43 = vld [vmem:[%s1750_s2] ss:$0 sm:$0xff] }
  0x32   : > { %913 = vmatpush.bf16.msrb.mxu2 %v1395_v44 }
  0x33   : > { %926 = vmatpush.bf16.msrb.mxu3 %v1403_v45 }
  0x34   : > { %900 = vmatpush.bf16.msrb.mxu1 %v1387_v46  ;;  %v1439_v46 = vld [vmem:[%s1751_s3] ss:$0 sm:$0xff] }
  0x35   : > { %888 = vmatpush.bf16.msrb.mxu0 %v1378_v47 }
  0x36   : > { %914 = vmatpush.bf16.msrb.mxu2 %v1394_v48 }
  0x37   : > { %927 = vmatpush.bf16.msrb.mxu3 %v1402_v49 }
  0x38   : > { %901 = vmatpush.bf16.msrb.mxu1 %v1386_v50 }
  0x39   : > { %889 = vmatpush.bf16.msrb.mxu0 %v1377_v51 }
  0x3a   : > { %915 = vmatpush.bf16.msrb.mxu2 %v1393_v52 }
  0x3b   : > { %928 = vmatpush.bf16.msrb.mxu3 %v1401_v53 }
  0x3c   : > { %902 = vmatpush.bf16.msrb.mxu1 %v1385_v54 }
  0x3d   : > { %890 = vmatpush.bf16.msrb.mxu0 %v1376_v55 }
  0x3e   : > { %916 = vmatpush.bf16.msrb.mxu2 %v1392_v56 }
  0x3f   : > { %929 = vmatpush.bf16.msrb.mxu3 %v1400_v57 }
  0x40   : > { %903 = vmatpush.bf16.msrb.mxu1 %v1384_v58 }
  0x41   : > { %891 = vmatpush.bf16.msrb.mxu0 %v1375_v59 }
  0x42   : > { %917 = vmatpush.bf16.msrb.mxu2 %v1391_v60 }
  0x43   : > { %930 = vmatpush.bf16.msrb.mxu3 %v1399_v61 }
  0x44   : > { %904 = vmatpush.bf16.msrb.mxu1 %v1383_v62 }
  0x45   : > { %892 = vmatpush.bf16.msrb.mxu0 %v1374_v63 }
  0x46   : > { %918 = vmatpush.bf16.msrb.mxu2 %v1390_v0 }
  0x47   : > { %931 = vmatpush.bf16.msrb.mxu3 %v1398_v1 }
  0x48   : > { %905 = vmatpush.bf16.msrb.mxu1 %v1382_v2 }
  0x49   : > { %893 = vmatpush.bf16.msrb.mxu0 %v1373_v3 }
  0x4a   : > { %919 = vmatpush.bf16.msrb.mxu2 %v1389_v4 }
  0x4b   : > { %932 = vmatpush.bf16.msrb.mxu3 %v1397_v6 }
  0x4c   : > { %906 = vmatpush.bf16.msrb.mxu1 %v1381_v7  ;;  %894 = vmatmul.bf16.vlgmr.msrb.gmra.mxu0 %v386_v9 }
  0x4d   : > { %938 = vmatpush.bf16.msra.mxu0 %v1412_v5  ;;  %920 = vmatmul.bf16.vlgmr.msrb.gmra.mxu2 %v388_v8 }
  0x4e   : > { %933 = vmatmul.bf16.vlgmr.msrb.gmra.mxu3 %v389_v11 }
  0x4f   : > { %907 = vmatmul.bf16.vlgmr.msrb.gmra.mxu1 %v387_v12 }
  0x51   : > { %939 = vmatpush.bf16.msra.mxu0 %v1411_v10 }
  0x55   : > { %940 = vmatpush.bf16.msra.mxu0 %v1410_v13 }
  0x59   : > { %941 = vmatpush.bf16.msra.mxu0 %v1409_v14 }
  0x5d   : > { %942 = vmatpush.bf16.msra.mxu0 %v1408_v15 }
  0x61   : > { %943 = vmatpush.bf16.msra.mxu0 %v1407_v16 }
  0x65   : > { %944 = vmatpush.bf16.msra.mxu0 %v1406_v17 }
  0x69   : > { %945 = vmatpush.bf16.msra.mxu0 %v1405_v18 }
  0x6c   : > { %946 = vmatmul.bf16.vlgmr.msra.gmra.mxu0 %v392_v19 }
  0xa9   : > { %v843_v20 = vpop.f32.mrf.mxu0 }
  0xac   : > { %v856_v21 = vpop.f32.mrf.mxu1 }
  0xad   : > { %v857_v30 = vadd.f32 %v856_v21, %v843_v20 }
  0xb0   : > { %v869_v22 = vpop.f32.mrf.mxu2 }
  0xb1   : > { %v882_v23 = vpop.f32.mrf.mxu3  ;;  %v845_v24 = vpop.f32.mrf.mxu0  ;;  %v870_v32 = vadd.f32 %v869_v22, %v857_v30 }
  0xb3   : > { %v883_v36 = vadd.f32 %v882_v23, %v870_v32 }
  0xb4   : > { %v858_v25 = vpop.f32.mrf.mxu1 }
  0xb8   : > { %v871_v26 = vpop.f32.mrf.mxu2 }
  0xb9   : > { %v884_v27 = vpop.f32.mrf.mxu3 }
  0xc9   : > { %v895_v28 = vpop.f32.mrf.mxu0 }
  0xca   : > { %v896_v38 = vadd.f32 %v895_v28, %v883_v36 }
  0xcc   : > { %v908_v29 = vpop.f32.mrf.mxu1 }
  0xcd   : > { %v909_v40 = vadd.f32 %v908_v29, %v896_v38 }
  0xd0   : > { %v921_v31 = vpop.f32.mrf.mxu2 }
  0xd1   : > { %v934_v33 = vpop.f32.mrf.mxu3  ;;  %v897_v34 = vpop.f32.mrf.mxu0  ;;  %v922_v41 = vadd.f32 %v921_v31, %v909_v40 }
  0xd3   : > { %v935_v42 = vadd.f32 %v934_v33, %v922_v41 }
  0xd4   : > { %v910_v35 = vpop.f32.mrf.mxu1 }
  0xd8   : > { %v923_v37 = vpop.f32.mrf.mxu2 }
  0xd9   : > { %v936_v39 = vpop.f32.mrf.mxu3 }
  0xe9   : > { %v947_v44 = vpop.f32.mrf.mxu0 }
  0xea   : > { %v948_v45 = vadd.f32 %v947_v44, %v935_v42 }
  0xec   : > { %v955_v47 = vmul.f32 %v1438_v43, %v948_v45 }
  0xee   : > { %v960_v48 = vadd.f32 %v1439_v46, %v955_v47 }
  0xf0   : > { %v961_v49 = vmax.f32 %v960_v48, 0.0 }
  0xf1   : > { %v949_v50 = vpop.f32.mrf.mxu0 }
  0xf2   : > { %v962_v51 = vpack.c.bf16 %v961_v49, %v961_v49 }
  0xf4   : > { %963 = vst [vmem:[%s229_s20] sm:$0x3] %v962_v51 }
  0xf5 PF: > { %s14_s17 = sadd.s32 1, %s1462_s17   ;;  %s1753_s15 = smov %s1458_s16 }
  0xf6   : > { %p11_p5 = scmp.ge.s32.totalorder %s14_s17, 4   ;;  %s1754_s16 = smov %s1756_s18 }
  0xf8   :  { %13 = sbr.rel (!%p11_p5) target bundleno = 2 (0x2), region = 67 }

</bundles_post_ra>
